<compile_context>
chip_gen: v5e
topology: v5e:2x2
jax: 0.10.0
libtpu: 0.0.40
codegen_flags: <defaults>
</compile_context>

<pallas_src>
import functools

import jax
import jax.numpy as jnp
from jax import lax
from jax.experimental import pallas as pl
from jax.experimental.pallas import tpu as pltpu

EPS = 1e-5
MiB = 1024 * 1024


def _vmem_budget():
    """Per-pass scoped-VMEM budget, re-derived per chip (v7x: 64 MiB VMEM)."""
    try:
        cap = pltpu.get_tpu_info().vmem_capacity_bytes
    except Exception:                      # fall back to a budget safe on v7x
        cap = 64 * MiB
    return max(32 * MiB, min(96 * MiB, (cap * 3) // 4))


def _compiler_params(vmem_bytes):
    # Batch axis is independent -> "parallel" (2-TC sharding on v7x; keep the
    # grid extent >= 2 and even per chip there).
    return pltpu.CompilerParams(dimension_semantics=("parallel",),
                                vmem_limit_bytes=int(vmem_bytes))


def _channel_stats(y):
    """Per-channel [sum, sum_sq] of a (C, M) f32 tile -> (C, 2)."""
    s = jnp.sum(y, axis=1, keepdims=True)
    ss = jnp.sum(y * y, axis=1, keepdims=True)
    return jnp.concatenate([s, ss], axis=1)


def _zero_halo(pad_ref, c, h, w, dtype):
    """Zero the 1-pixel halo of a (c, h+2, w+2) staging scratch.

    Re-done every grid step (megacore-safe: scratch is per-core and the
    parallel grid axis may be split across cores on v7x).
    """
    hp, wp = h + 2, w + 2
    zrow = jnp.zeros((c, 1, wp), dtype)
    zcol = jnp.zeros((c, h, 1), dtype)
    pad_ref[:, 0:1, :] = zrow
    pad_ref[:, hp - 1:hp, :] = zrow
    pad_ref[:, 1:1 + h, 0:1] = zcol
    pad_ref[:, 1:1 + h, wp - 1:wp] = zcol


# ------------------- pass A: conv1 (+ 1x1 downsample conv) -------------------

def _make_conv1_kernel(H, W, Ho, Wo, Cin, Cout, stride, has_downsample):
    M = Ho * Wo

    if stride == 1:
        def kernel(x_ref, w1_ref, *rest):
            if has_downsample:
                wds_ref, c1_ref, s1_ref, cd_ref, sd_ref, pad_ref = rest
            else:
                c1_ref, s1_ref, pad_ref = rest

            # Stage the unpadded bf16 image into a zero-halo VMEM scratch.
            _zero_halo(pad_ref, Cin, H, W, jnp.bfloat16)
            pad_ref[:, 1:1 + H, 1:1 + W] = x_ref[0]

            # im2col^T (9*Cin, M), built directly in bf16 from 9 plain slices.
            colT = jnp.concatenate(
                [pad_ref[:, dy:dy + Ho, dx:dx + Wo].reshape(Cin, M)
                 for dy in range(3) for dx in range(3)], axis=0)
            y = jnp.dot(w1_ref[...], colT, preferred_element_type=jnp.float32)
            c1_ref[0] = y.astype(jnp.bfloat16)
            s1_ref[0] = _channel_stats(y)

            if has_downsample:
                yd = jnp.dot(wds_ref[...], x_ref[0].reshape(Cin, M),
                             preferred_element_type=jnp.float32)
                cd_ref[0] = yd.astype(jnp.bfloat16)
                sd_ref[0] = _channel_stats(yd)
        return kernel

    s = stride

    def kernel(xq_ref, w1_ref, *rest):
        # xq_ref holds the s*s phase-decimated padded image: phase p = py*s+px
        # occupies channels [p*Cin, (p+1)*Cin) and contains
        # xpad[:, py::s, px::s] (zero-padded to a common (Hq, Wq)).
        if has_downsample:
            wds_ref, c1_ref, s1_ref, cd_ref, sd_ref = rest
        else:
            c1_ref, s1_ref = rest

        taps = []
        for dy in range(3):
            for dx in range(3):
                p = (dy % s) * s + (dx % s)
                oy, ox = dy // s, dx // s
                taps.append(xq_ref[0, p * Cin:(p + 1) * Cin,
                                   oy:oy + Ho, ox:ox + Wo].reshape(Cin, M))
        colT = jnp.concatenate(taps, axis=0)
        y = jnp.dot(w1_ref[...], colT, preferred_element_type=jnp.float32)
        c1_ref[0] = y.astype(jnp.bfloat16)
        s1_ref[0] = _channel_stats(y)

        if has_downsample:
            # 1x1 conv at stride s reads xpad[:, 1+i*s, 1+j*s] -> phase (1,1).
            p = (1 % s) * s + (1 % s)
            xs = xq_ref[0, p * Cin:(p + 1) * Cin, 0:Ho, 0:Wo].reshape(Cin, M)
            yd = jnp.dot(wds_ref[...], xs, preferred_element_type=jnp.float32)
            cd_ref[0] = yd.astype(jnp.bfloat16)
            sd_ref[0] = _channel_stats(yd)
    return kernel


# ------------------- pass B: BN1 + ReLU + conv2 ------------------------------

def _make_conv2_kernel(Ho, Wo, Cout):
    M = Ho * Wo

    def kernel(c1_ref, sc1_ref, sh1_ref, w2_ref, c2_ref, s2_ref, pad_ref):
        # BN1 + ReLU in f32, restaged into the bf16 conv2 window scratch.
        y1 = jnp.maximum(c1_ref[0].astype(jnp.float32) * sc1_ref[...]
                         + sh1_ref[...], 0.0)
        _zero_halo(pad_ref, Cout, Ho, Wo, jnp.bfloat16)
        pad_ref[:, 1:1 + Ho, 1:1 + Wo] = (
            y1.astype(jnp.bfloat16).reshape(Cout, Ho, Wo))

        colT = jnp.concatenate(
            [pad_ref[:, dy:dy + Ho, dx:dx + Wo].reshape(Cout, M)
             for dy in range(3) for dx in range(3)], axis=0)
        y2 = jnp.dot(w2_ref[...], colT, preferred_element_type=jnp.float32)
        c2_ref[0] = y2.astype(jnp.bfloat16)
        s2_ref[0] = _channel_stats(y2)
    return kernel


# ------------------- pass C: BN2 + shortcut + ReLU ---------------------------

def _make_epilogue_kernel(has_downsample):
    def kernel(c2_ref, sc2_ref, sh2_ref, *rest):
        if has_downsample:
            cd_ref, scd_ref, shd_ref, out_ref = rest
        else:
            x_ref, out_ref = rest
        y2 = c2_ref[0].astype(jnp.float32) * sc2_ref[...] + sh2_ref[...]
        if has_downsample:
            shortcut = (cd_ref[0].astype(jnp.float32) * scd_ref[...]
                        + shd_ref[...])
        else:
            shortcut = x_ref[0]           # identity (Cin == Cout, stride == 1)
        out_ref[0] = jnp.maximum(y2 + shortcut, 0.0)
    return kernel


# ------------------- wrapper --------------------------------------------------

def _bn_scale_shift(stats, gamma, beta, m_total):
    """Fold per-image (sum, sum_sq) partials into train-mode BN scale/shift."""
    tot = jnp.sum(stats, axis=0)                  # (C, 2)
    mean = tot[:, 0] / m_total
    var = tot[:, 1] / m_total - mean * mean       # biased batch variance
    scale = gamma * lax.rsqrt(var + EPS)
    shift = beta - mean * scale
    return (scale.reshape(-1, 1).astype(jnp.float32),
            shift.reshape(-1, 1).astype(jnp.float32))


def basic_block(x_nchw, params, *, stride=1):
    """BasicBlock forward (train-mode BN).  x_nchw: (N, Cin, H, W) float32.

    params = (w1, g1, b1, w2, g2, b2, wds, gds, bds):
      w1: (3, 3, Cin, Cout) HWIO, w2: (3, 3, Cout, Cout) HWIO,
      wds: (Cin, Cout) or None (1x1 downsample conv), g*/b*: (Cout,).
    """
    w1, g1, b1, w2, g2, b2, wds, gds, bds = params
    N, Cin, H, W = x_nchw.shape
    Cout = w1.shape[-1]
    Ho = (H - 1) // stride + 1
    Wo = (W - 1) // stride + 1
    M = Ho * Wo
    Mtot = N * M
    has_ds = wds is not None
    if not has_ds:
        assert Cin == Cout and stride == 1, "identity shortcut needs matching shapes"
    assert stride in (1, 2), "ResNet BasicBlock uses stride 1 or 2"

    x_bf = x_nchw.astype(jnp.bfloat16)
    # Transposed weights so the matmul is W^T @ col^T (lane dim = M).
    w1t = jnp.transpose(w1, (3, 0, 1, 2)).reshape(Cout, 9 * Cin).astype(jnp.bfloat16)
    w2t = jnp.transpose(w2, (3, 0, 1, 2)).reshape(Cout, 9 * Cout).astype(jnp.bfloat16)

    vmem_big = _vmem_budget()
    cp_big = _compiler_params(vmem_big)
    cp_small = _compiler_params(min(vmem_big, 32 * MiB))

    act = jax.ShapeDtypeStruct((N, Cout, M), jnp.bfloat16)
    stat = jax.ShapeDtypeStruct((N, Cout, 2), jnp.float32)
    act_spec = pl.BlockSpec((1, Cout, M), lambda n: (n, 0, 0))
    stat_spec = pl.BlockSpec((1, Cout, 2), lambda n: (n, 0, 0))
    vec_spec = pl.BlockSpec((Cout, 1), lambda n: (0, 0))

    # ---- pass A: conv1 (+ downsample conv) + BN partial stats ----------------
    # TODO(synk): for very large H*W*Cin on v7x, add a second grid axis that
    # tiles Ho into row bands (1-row halo) to shrink the per-step block.
    if stride == 1:
        x_in = x_bf                                       # no HBM pad copy
        x_spec = pl.BlockSpec((1, Cin, H, W), lambda n: (n, 0, 0, 0))
        scratch_a = [pltpu.VMEM((Cin, H + 2, W + 2), jnp.bfloat16)]
    else:
        # Phase-decimate the bf16 padded input once (cheap XLA strided slices)
        # so the kernel never needs strided gathers.
        s = stride
        Hq = -(-(H + 2) // s)
        Wq = -(-(W + 2) // s)
        xpad = jnp.pad(x_bf, ((0, 0), (0, 0), (1, 1), (1, 1)))
        phases = []
        for py in range(s):
            for px in range(s):
                ph = xpad[:, :, py::s, px::s]
                ph = jnp.pad(ph, ((0, 0), (0, 0),
                                  (0, Hq - ph.shape[2]), (0, Wq - ph.shape[3])))
                phases.append(ph)
        x_in = jnp.concatenate(phases, axis=1)            # (N, s*s*Cin, Hq, Wq)
        x_spec = pl.BlockSpec((1, s * s * Cin, Hq, Wq), lambda n: (n, 0, 0, 0))
        scratch_a = []

    a_in_specs = [x_spec, pl.BlockSpec((Cout, 9 * Cin), lambda n: (0, 0))]
    a_inputs = [x_in, w1t]
    a_out_shape = [act, stat]
    a_out_specs = [act_spec, stat_spec]
    flops_a = 2 * Mtot * 9 * Cin * Cout
    bytes_a = x_in.size * 2 + w1t.size * 2 + Mtot * Cout * 2 + N * Cout * 8
    if has_ds:
        a_in_specs.append(pl.BlockSpec((Cout, Cin), lambda n: (0, 0)))
        a_inputs.append(jnp.transpose(wds).astype(jnp.bfloat16))
        a_out_shape += [act, stat]
        a_out_specs += [act_spec, stat_spec]
        flops_a += 2 * Mtot * Cin * Cout
        bytes_a += Cin * Cout * 2 + Mtot * Cout * 2 + N * Cout * 8

    outs_a = pl.pallas_call(
        _make_conv1_kernel(H, W, Ho, Wo, Cin, Cout, stride, has_ds),
        grid=(N,),
        in_specs=a_in_specs,
        out_specs=tuple(a_out_specs),
        out_shape=tuple(a_out_shape),
        scratch_shapes=scratch_a,
        compiler_params=cp_big,
        cost_estimate=pl.CostEstimate(flops=flops_a, transcendentals=0,
                                      bytes_accessed=bytes_a),
    )(*a_inputs)
    if has_ds:
        c1, s1, cd, sd = outs_a
    else:
        c1, s1 = outs_a

    scale1, shift1 = _bn_scale_shift(s1, g1, b1, Mtot)

    # ---- pass B: BN1 + ReLU + conv2 + BN2 partial stats ----------------------
    c2, s2 = pl.pallas_call(
        _make_conv2_kernel(Ho, Wo, Cout),
        grid=(N,),
        in_specs=[act_spec, vec_spec, vec_spec,
                  pl.BlockSpec((Cout, 9 * Cout), lambda n: (0, 0))],
        out_specs=(act_spec, stat_spec),
        out_shape=(act, stat),
        scratch_shapes=[pltpu.VMEM((Cout, Ho + 2, Wo + 2), jnp.bfloat16)],
        compiler_params=cp_big,
        cost_estimate=pl.CostEstimate(
            flops=2 * Mtot * 9 * Cout * Cout, transcendentals=0,
            bytes_accessed=2 * Mtot * Cout * 2 + w2t.size * 2 + N * Cout * 8),
    )(c1, scale1, shift1, w2t)

    scale2, shift2 = _bn_scale_shift(s2, g2, b2, Mtot)

    # ---- pass C: BN2 + shortcut add + ReLU -----------------------------------
    c_inputs = [c2, scale2, shift2]
    c_in_specs = [act_spec, vec_spec, vec_spec]
    if has_ds:
        scale_d, shift_d = _bn_scale_shift(sd, gds, bds, Mtot)
        c_inputs += [cd, scale_d, shift_d]
        c_in_specs += [act_spec, vec_spec, vec_spec]
    else:
        # Identity shortcut: flatten spatial (free in XLA), keep f32.
        c_inputs.append(x_nchw.astype(jnp.float32).reshape(N, Cin, H * W))
        c_in_specs.append(pl.BlockSpec((1, Cin, H * W), lambda n: (n, 0, 0)))

    out_flat = pl.pallas_call(
        _make_epilogue_kernel(has_ds),
        grid=(N,),
        in_specs=c_in_specs,
        out_specs=act_spec,
        out_shape=jax.ShapeDtypeStruct((N, Cout, M), jnp.float32),
        compiler_params=cp_small,
        cost_estimate=pl.CostEstimate(flops=4 * Mtot * Cout, transcendentals=0,
                                      bytes_accessed=8 * Mtot * Cout),
    )(*c_inputs)

    return out_flat.reshape(N, Cout, Ho, Wo)               # NCHW


# ------------------- pure-JAX reference (matched mixed precision) -------------

def _ref_bn(x, gamma, beta):
    mean = x.mean(axis=(0, 2, 3), keepdims=True)
    var = ((x - mean) ** 2).mean(axis=(0, 2, 3), keepdims=True)
    return ((x - mean) * lax.rsqrt(var + EPS) * gamma.reshape(1, -1, 1, 1)
            + beta.reshape(1, -1, 1, 1))


def _ref_conv(x, w_hwio, stride, pad):
    return lax.conv_general_dilated(
        x.astype(jnp.bfloat16), w_hwio.astype(jnp.bfloat16),
        (stride, stride), ((pad, pad), (pad, pad)),
        dimension_numbers=("NCHW", "HWIO", "NCHW"),
        preferred_element_type=jnp.float32)


def basic_block_ref(x_nchw, params, *, stride=1):
    w1, g1, b1, w2, g2, b2, wds, gds, bds = params
    x = x_nchw.astype(jnp.float32)
    y = jnp.maximum(_ref_bn(_ref_conv(x, w1, stride, 1), g1, b1), 0.0)
    y = _ref_bn(_ref_conv(y, w2, 1, 1), g2, b2)
    if wds is not None:
        cin, cout = wds.shape
        s = _ref_bn(_ref_conv(x, wds.reshape(1, 1, cin, cout), stride, 0),
                    gds, bds)
    else:
        s = x
    return jnp.maximum(y + s, 0.0)


# --------------------------------- main ---------------------------------------

if __name__ == "__main__":
    def run_case(N, Cin, H, W, Cout, stride, has_ds, key):
        ks = jax.random.split(key, 8)
        w1 = jax.random.normal(ks[0], (3, 3, Cin, Cout), jnp.float32) * 0.1
        w2 = jax.random.normal(ks[1], (3, 3, Cout, Cout), jnp.float32) * 0.1
        g1 = 1.0 + 0.1 * jax.random.normal(ks[2], (Cout,), jnp.float32)
        b1 = 0.1 * jax.random.normal(ks[3], (Cout,), jnp.float32)
        g2 = 1.0 + 0.1 * jax.random.normal(ks[4], (Cout,), jnp.float32)
        b2 = 0.1 * jax.random.normal(ks[5], (Cout,), jnp.float32)
        if has_ds:
            wds = jax.random.normal(ks[6], (Cin, Cout), jnp.float32) * 0.1
            gds = 1.0 + 0.1 * jax.random.normal(ks[7], (Cout,), jnp.float32)
            bds = jnp.zeros((Cout,), jnp.float32)
        else:
            wds = gds = bds = None
        params = (w1, g1, b1, w2, g2, b2, wds, gds, bds)
        x = jax.random.normal(jax.random.fold_in(key, 99),
                              (N, Cin, H, W), jnp.float32)

        fwd = jax.jit(functools.partial(basic_block, stride=stride))
        out = jax.block_until_ready(fwd(x, params))
        ref = basic_block_ref(x, params, stride=stride)
        assert out.shape == ref.shape
        err = float(jnp.max(jnp.abs(out - ref)))
        assert bool(jnp.allclose(out, ref, atol=3e-2, rtol=3e-2)), \
            f"mismatch: max abs err = {err}"

    key = jax.random.PRNGKey(0)
    k1, k2, k3 = jax.random.split(key, 3)
    # downsample path: channel expansion -> 1x1 conv + BN on the shortcut
    run_case(N=2, Cin=4, H=16, W=16, Cout=8, stride=1, has_ds=True, key=k1)
    # identity path: Cin == Cout, stride 1
    run_case(N=2, Cin=8, H=16, W=16, Cout=8, stride=1, has_ds=False, key=k2)
    # strided downsample path (stride 2, phase-decimated input)
    run_case(N=2, Cin=4, H=16, W=16, Cout=8, stride=2, has_ds=True, key=k3)

    print("KERNEL_OK")
</pallas_src>

<mosaic_0001>
module attributes {stable_mosaic.version = 11 : i64} {
  func.func @kernel(%arg0: i32, %arg1: memref<1x4x16x16xbf16, #tpu.memory_space<vmem>>, %arg2: memref<8x36xbf16, #tpu.memory_space<vmem>>, %arg3: memref<8x4xbf16, #tpu.memory_space<vmem>>, %arg4: memref<1x8x256xbf16, #tpu.memory_space<vmem>>, %arg5: memref<1x8x2xf32, #tpu.memory_space<vmem>>, %arg6: memref<1x8x256xbf16, #tpu.memory_space<vmem>>, %arg7: memref<1x8x2xf32, #tpu.memory_space<vmem>>, %arg8: memref<4x18x18xbf16, #tpu.memory_space<vmem>>) attributes {dimension_semantics = [#tpu.dimension_semantics<parallel>], iteration_bounds = array<i64: 2>, scalar_prefetch = 0 : i64, scratch_operands = 1 : i64, tpu.core_type = #tpu.core_type<tc>, window_params = [{transform_indices = @transform_0, window_bounds = array<i64: 1, 4, 16, 16>}, {pipeline_mode = #tpu.pipeline_mode<synchronous>, transform_indices = @transform_1, window_bounds = array<i64: 8, 36>}, {pipeline_mode = #tpu.pipeline_mode<synchronous>, transform_indices = @transform_2, window_bounds = array<i64: 8, 4>}, {transform_indices = @transform_3, window_bounds = array<i64: 1, 8, 256>}, {transform_indices = @transform_4, window_bounds = array<i64: 1, 8, 2>}, {transform_indices = @transform_5, window_bounds = array<i64: 1, 8, 256>}, {transform_indices = @transform_6, window_bounds = array<i64: 1, 8, 2>}]} {
    %cst = arith.constant 0.000000e+00 : bf16
    %0 = vector.broadcast %cst : bf16 to vector<4x1x18xbf16>
    %cst_0 = arith.constant 0.000000e+00 : bf16
    %1 = vector.broadcast %cst_0 : bf16 to vector<4x16x1xbf16>
    %c0 = arith.constant 0 : index
    %c0_1 = arith.constant 0 : index
    %c0_2 = arith.constant 0 : index
    %2 = vector.load %arg8[%c0, %c0_1, %c0_2] : memref<4x18x18xbf16, #tpu.memory_space<vmem>>, vector<4x1x18xbf16>
    tpu.vector_store %arg8[%c0, %c0_1, %c0_2], %0 {strides = array<i32>} : memref<4x18x18xbf16, #tpu.memory_space<vmem>>, vector<4x1x18xbf16>,
    %c0_3 = arith.constant 0 : index
    %c17 = arith.constant 17 : index
    %c0_4 = arith.constant 0 : index
    %3 = vector.load %arg8[%c0_3, %c17, %c0_4] : memref<4x18x18xbf16, #tpu.memory_space<vmem>>, vector<4x1x18xbf16>
    tpu.vector_store %arg8[%c0_3, %c17, %c0_4], %0 {strides = array<i32>} : memref<4x18x18xbf16, #tpu.memory_space<vmem>>, vector<4x1x18xbf16>,
    %c0_5 = arith.constant 0 : index
    %c1 = arith.constant 1 : index
    %c0_6 = arith.constant 0 : index
    %4 = vector.load %arg8[%c0_5, %c1, %c0_6] : memref<4x18x18xbf16, #tpu.memory_space<vmem>>, vector<4x16x1xbf16>
    tpu.vector_store %arg8[%c0_5, %c1, %c0_6], %1 {strides = array<i32>} : memref<4x18x18xbf16, #tpu.memory_space<vmem>>, vector<4x16x1xbf16>,
    %c0_7 = arith.constant 0 : index
    %c1_8 = arith.constant 1 : index
    %c17_9 = arith.constant 17 : index
    %5 = vector.load %arg8[%c0_7, %c1_8, %c17_9] : memref<4x18x18xbf16, #tpu.memory_space<vmem>>, vector<4x16x1xbf16>
    tpu.vector_store %arg8[%c0_7, %c1_8, %c17_9], %1 {strides = array<i32>} : memref<4x18x18xbf16, #tpu.memory_space<vmem>>, vector<4x16x1xbf16>,
    %c0_10 = arith.constant 0 : index
    %c0_11 = arith.constant 0 : index
    %c0_12 = arith.constant 0 : index
    %c0_13 = arith.constant 0 : index
    %6 = vector.load %arg1[%c0_10, %c0_11, %c0_12, %c0_13] : memref<1x4x16x16xbf16, #tpu.memory_space<vmem>>, vector<1x4x16x16xbf16>
    %7 = vector.shape_cast %6 : vector<1x4x16x16xbf16> to vector<4x16x16xbf16>
    %c0_14 = arith.constant 0 : index
    %c1_15 = arith.constant 1 : index
    %c1_16 = arith.constant 1 : index
    %8 = vector.load %arg8[%c0_14, %c1_15, %c1_16] : memref<4x18x18xbf16, #tpu.memory_space<vmem>>, vector<4x16x16xbf16>
    tpu.vector_store %arg8[%c0_14, %c1_15, %c1_16], %7 {strides = array<i32>} : memref<4x18x18xbf16, #tpu.memory_space<vmem>>, vector<4x16x16xbf16>,
    %c0_17 = arith.constant 0 : index
    %c0_18 = arith.constant 0 : index
    %c0_19 = arith.constant 0 : index
    %9 = vector.load %arg8[%c0_17, %c0_18, %c0_19] : memref<4x18x18xbf16, #tpu.memory_space<vmem>>, vector<4x16x16xbf16>
    %10 = vector.shape_cast %9 : vector<4x16x16xbf16> to vector<4x256xbf16>
    %c0_20 = arith.constant 0 : index
    %c0_21 = arith.constant 0 : index
    %c1_22 = arith.constant 1 : index
    %11 = vector.load %arg8[%c0_20, %c0_21, %c1_22] : memref<4x18x18xbf16, #tpu.memory_space<vmem>>, vector<4x16x16xbf16>
    %12 = vector.shape_cast %11 : vector<4x16x16xbf16> to vector<4x256xbf16>
    %c0_23 = arith.constant 0 : index
    %c0_24 = arith.constant 0 : index
    %c2 = arith.constant 2 : index
    %13 = vector.load %arg8[%c0_23, %c0_24, %c2] : memref<4x18x18xbf16, #tpu.memory_space<vmem>>, vector<4x16x16xbf16>
    %14 = vector.shape_cast %13 : vector<4x16x16xbf16> to vector<4x256xbf16>
    %c0_25 = arith.constant 0 : index
    %c1_26 = arith.constant 1 : index
    %c0_27 = arith.constant 0 : index
    %15 = vector.load %arg8[%c0_25, %c1_26, %c0_27] : memref<4x18x18xbf16, #tpu.memory_space<vmem>>, vector<4x16x16xbf16>
    %16 = vector.shape_cast %15 : vector<4x16x16xbf16> to vector<4x256xbf16>
    %c0_28 = arith.constant 0 : index
    %c1_29 = arith.constant 1 : index
    %c1_30 = arith.constant 1 : index
    %17 = vector.load %arg8[%c0_28, %c1_29, %c1_30] : memref<4x18x18xbf16, #tpu.memory_space<vmem>>, vector<4x16x16xbf16>
    %18 = vector.shape_cast %17 : vector<4x16x16xbf16> to vector<4x256xbf16>
    %c0_31 = arith.constant 0 : index
    %c1_32 = arith.constant 1 : index
    %c2_33 = arith.constant 2 : index
    %19 = vector.load %arg8[%c0_31, %c1_32, %c2_33] : memref<4x18x18xbf16, #tpu.memory_space<vmem>>, vector<4x16x16xbf16>
    %20 = vector.shape_cast %19 : vector<4x16x16xbf16> to vector<4x256xbf16>
    %c0_34 = arith.constant 0 : index
    %c2_35 = arith.constant 2 : index
    %c0_36 = arith.constant 0 : index
    %21 = vector.load %arg8[%c0_34, %c2_35, %c0_36] : memref<4x18x18xbf16, #tpu.memory_space<vmem>>, vector<4x16x16xbf16>
    %22 = vector.shape_cast %21 : vector<4x16x16xbf16> to vector<4x256xbf16>
    %c0_37 = arith.constant 0 : index
    %c2_38 = arith.constant 2 : index
    %c1_39 = arith.constant 1 : index
    %23 = vector.load %arg8[%c0_37, %c2_38, %c1_39] : memref<4x18x18xbf16, #tpu.memory_space<vmem>>, vector<4x16x16xbf16>
    %24 = vector.shape_cast %23 : vector<4x16x16xbf16> to vector<4x256xbf16>
    %c0_40 = arith.constant 0 : index
    %c2_41 = arith.constant 2 : index
    %c2_42 = arith.constant 2 : index
    %25 = vector.load %arg8[%c0_40, %c2_41, %c2_42] : memref<4x18x18xbf16, #tpu.memory_space<vmem>>, vector<4x16x16xbf16>
    %26 = vector.shape_cast %25 : vector<4x16x16xbf16> to vector<4x256xbf16>
    %27 = tpu.concatenate %10, %12, %14, %16, %18, %20, %22, %24, %26 in 0 : vector<4x256xbf16>, vector<4x256xbf16>, vector<4x256xbf16>, vector<4x256xbf16>, vector<4x256xbf16>, vector<4x256xbf16>, vector<4x256xbf16>, vector<4x256xbf16>, vector<4x256xbf16> -> vector<36x256xbf16>
    %c0_43 = arith.constant 0 : index
    %c0_44 = arith.constant 0 : index
    %28 = vector.load %arg2[%c0_43, %c0_44] : memref<8x36xbf16, #tpu.memory_space<vmem>>, vector<8x36xbf16>
    %cst_45 = arith.constant dense<0.000000e+00> : vector<8x256xf32>
    %29 = tpu.matmul %28, %27, %cst_45 {dimension_numbers = #tpu.dot_dimension_numbers<[1], [0], [0], [1], [0, 0, 1, 1], [], []>} : vector<8x36xbf16>, vector<36x256xbf16>, vector<8x256xf32> -> vector<8x256xf32>
    %30 = arith.truncf %29 : vector<8x256xf32> to vector<8x256xbf16>
    %c0_46 = arith.constant 0 : index
    %c0_47 = arith.constant 0 : index
    %c0_48 = arith.constant 0 : index
    %31 = vector.load %arg4[%c0_46, %c0_47, %c0_48] : memref<1x8x256xbf16, #tpu.memory_space<vmem>>, vector<1x8x256xbf16>
    %32 = vector.shape_cast %31 : vector<1x8x256xbf16> to vector<8x256xbf16>
    %33 = vector.shape_cast %30 : vector<8x256xbf16> to vector<1x8x256xbf16>
    tpu.vector_store %arg4[%c0_46, %c0_47, %c0_48], %33 {strides = array<i32>} : memref<1x8x256xbf16, #tpu.memory_space<vmem>>, vector<1x8x256xbf16>,
    %cst_49 = arith.constant dense<0.000000e+00> : vector<8xf32>
    %34 = vector.multi_reduction <add>, %29, %cst_49 [1] : vector<8x256xf32> to vector<8xf32>
    %35 = vector.shape_cast %34 : vector<8xf32> to vector<8x1xf32>
    %36 = arith.mulf %29, %29 : vector<8x256xf32>
    %cst_50 = arith.constant dense<0.000000e+00> : vector<8xf32>
    %37 = vector.multi_reduction <add>, %36, %cst_50 [1] : vector<8x256xf32> to vector<8xf32>
    %38 = vector.shape_cast %37 : vector<8xf32> to vector<8x1xf32>
    %39 = tpu.concatenate %35, %38 in 1 : vector<8x1xf32>, vector<8x1xf32> -> vector<8x2xf32>
    %c0_51 = arith.constant 0 : index
    %c0_52 = arith.constant 0 : index
    %c0_53 = arith.constant 0 : index
    %40 = vector.load %arg5[%c0_51, %c0_52, %c0_53] : memref<1x8x2xf32, #tpu.memory_space<vmem>>, vector<1x8x2xf32>
    %41 = vector.shape_cast %40 : vector<1x8x2xf32> to vector<8x2xf32>
    %42 = vector.shape_cast %39 : vector<8x2xf32> to vector<1x8x2xf32>
    tpu.vector_store %arg5[%c0_51, %c0_52, %c0_53], %42 {strides = array<i32>} : memref<1x8x2xf32, #tpu.memory_space<vmem>>, vector<1x8x2xf32>,
    %c0_54 = arith.constant 0 : index
    %c0_55 = arith.constant 0 : index
    %43 = vector.load %arg3[%c0_54, %c0_55] : memref<8x4xbf16, #tpu.memory_space<vmem>>, vector<8x4xbf16>
    %c0_56 = arith.constant 0 : index
    %c0_57 = arith.constant 0 : index
    %c0_58 = arith.constant 0 : index
    %c0_59 = arith.constant 0 : index
    %44 = vector.load %arg1[%c0_56, %c0_57, %c0_58, %c0_59] : memref<1x4x16x16xbf16, #tpu.memory_space<vmem>>, vector<1x4x16x16xbf16>
    %45 = vector.shape_cast %44 : vector<1x4x16x16xbf16> to vector<4x16x16xbf16>
    %46 = vector.shape_cast %45 : vector<4x16x16xbf16> to vector<4x256xbf16>
    %cst_60 = arith.constant dense<0.000000e+00> : vector<8x256xf32>
    %47 = tpu.matmul %43, %46, %cst_60 {dimension_numbers = #tpu.dot_dimension_numbers<[1], [0], [0], [1], [0, 0, 1, 1], [], []>} : vector<8x4xbf16>, vector<4x256xbf16>, vector<8x256xf32> -> vector<8x256xf32>
    %48 = arith.truncf %47 : vector<8x256xf32> to vector<8x256xbf16>
    %c0_61 = arith.constant 0 : index
    %c0_62 = arith.constant 0 : index
    %c0_63 = arith.constant 0 : index
    %49 = vector.load %arg6[%c0_61, %c0_62, %c0_63] : memref<1x8x256xbf16, #tpu.memory_space<vmem>>, vector<1x8x256xbf16>
    %50 = vector.shape_cast %49 : vector<1x8x256xbf16> to vector<8x256xbf16>
    %51 = vector.shape_cast %48 : vector<8x256xbf16> to vector<1x8x256xbf16>
    tpu.vector_store %arg6[%c0_61, %c0_62, %c0_63], %51 {strides = array<i32>} : memref<1x8x256xbf16, #tpu.memory_space<vmem>>, vector<1x8x256xbf16>,
    %cst_64 = arith.constant dense<0.000000e+00> : vector<8xf32>
    %52 = vector.multi_reduction <add>, %47, %cst_64 [1] : vector<8x256xf32> to vector<8xf32>
    %53 = vector.shape_cast %52 : vector<8xf32> to vector<8x1xf32>
    %54 = arith.mulf %47, %47 : vector<8x256xf32>
    %cst_65 = arith.constant dense<0.000000e+00> : vector<8xf32>
    %55 = vector.multi_reduction <add>, %54, %cst_65 [1] : vector<8x256xf32> to vector<8xf32>
    %56 = vector.shape_cast %55 : vector<8xf32> to vector<8x1xf32>
    %57 = tpu.concatenate %53, %56 in 1 : vector<8x1xf32>, vector<8x1xf32> -> vector<8x2xf32>
    %c0_66 = arith.constant 0 : index
    %c0_67 = arith.constant 0 : index
    %c0_68 = arith.constant 0 : index
    %58 = vector.load %arg7[%c0_66, %c0_67, %c0_68] : memref<1x8x2xf32, #tpu.memory_space<vmem>>, vector<1x8x2xf32>
    %59 = vector.shape_cast %58 : vector<1x8x2xf32> to vector<8x2xf32>
    %60 = vector.shape_cast %57 : vector<8x2xf32> to vector<1x8x2xf32>
    tpu.vector_store %arg7[%c0_66, %c0_67, %c0_68], %60 {strides = array<i32>} : memref<1x8x2xf32, #tpu.memory_space<vmem>>, vector<1x8x2xf32>,
    return
  }
  func.func @transform_0(%arg0: i32) -> (i32, i32, i32, i32) {
    %c0_i32 = arith.constant 0 : i32
    %c0_i32_0 = arith.constant 0 : i32
    %c0_i32_1 = arith.constant 0 : i32
    %c0_i32_2 = arith.constant 0 : i32
    return %arg0, %c0_i32, %c0_i32_0, %c0_i32_1 : i32, i32, i32, i32
  }
  func.func @transform_1(%arg0: i32) -> (i32, i32) {
    %c0_i32 = arith.constant 0 : i32
    %c0_i32_0 = arith.constant 0 : i32
    %c0_i32_1 = arith.constant 0 : i32
    return %c0_i32, %c0_i32_0 : i32, i32
  }
  func.func @transform_2(%arg0: i32) -> (i32, i32) {
    %c0_i32 = arith.constant 0 : i32
    %c0_i32_0 = arith.constant 0 : i32
    %c0_i32_1 = arith.constant 0 : i32
    return %c0_i32, %c0_i32_0 : i32, i32
  }
  func.func @transform_3(%arg0: i32) -> (i32, i32, i32) {
    %c0_i32 = arith.constant 0 : i32
    %c0_i32_0 = arith.constant 0 : i32
    %c0_i32_1 = arith.constant 0 : i32
    return %arg0, %c0_i32, %c0_i32_0 : i32, i32, i32
  }
  func.func @transform_4(%arg0: i32) -> (i32, i32, i32) {
    %c0_i32 = arith.constant 0 : i32
    %c0_i32_0 = arith.constant 0 : i32
    %c0_i32_1 = arith.constant 0 : i32
    return %arg0, %c0_i32, %c0_i32_0 : i32, i32, i32
  }
  func.func @transform_5(%arg0: i32) -> (i32, i32, i32) {
    %c0_i32 = arith.constant 0 : i32
    %c0_i32_0 = arith.constant 0 : i32
    %c0_i32_1 = arith.constant 0 : i32
    return %arg0, %c0_i32, %c0_i32_0 : i32, i32, i32
  }
  func.func @transform_6(%arg0: i32) -> (i32, i32, i32) {
    %c0_i32 = arith.constant 0 : i32
    %c0_i32_0 = arith.constant 0 : i32
    %c0_i32_1 = arith.constant 0 : i32
    return %arg0, %c0_i32, %c0_i32_0 : i32, i32, i32
  }
}

module attributes {stable_mosaic.version = 11 : i64} {
  func.func @kernel(%arg0: i32, %arg1: memref<1x8x256xbf16, #tpu.memory_space<vmem>>, %arg2: memref<8x1xf32, #tpu.memory_space<vmem>>, %arg3: memref<8x1xf32, #tpu.memory_space<vmem>>, %arg4: memref<1x8x256xbf16, #tpu.memory_space<vmem>>, %arg5: memref<8x1xf32, #tpu.memory_space<vmem>>, %arg6: memref<8x1xf32, #tpu.memory_space<vmem>>, %arg7: memref<1x8x256xf32, #tpu.memory_space<vmem>>) attributes {dimension_semantics = [#tpu.dimension_semantics<parallel>], iteration_bounds = array<i64: 2>, scalar_prefetch = 0 : i64, scratch_operands = 0 : i64, tpu.core_type = #tpu.core_type<tc>, window_params = [{transform_indices = @transform_0, window_bounds = array<i64: 1, 8, 256>}, {pipeline_mode = #tpu.pipeline_mode<synchronous>, transform_indices = @transform_1, window_bounds = array<i64: 8, 1>}, {pipeline_mode = #tpu.pipeline_mode<synchronous>, transform_indices = @transform_2, window_bounds = array<i64: 8, 1>}, {transform_indices = @transform_3, window_bounds = array<i64: 1, 8, 256>}, {pipeline_mode = #tpu.pipeline_mode<synchronous>, transform_indices = @transform_4, window_bounds = array<i64: 8, 1>}, {pipeline_mode = #tpu.pipeline_mode<synchronous>, transform_indices = @transform_5, window_bounds = array<i64: 8, 1>}, {transform_indices = @transform_6, window_bounds = array<i64: 1, 8, 256>}]} {
    %c0 = arith.constant 0 : index
    %c0_0 = arith.constant 0 : index
    %c0_1 = arith.constant 0 : index
    %0 = vector.load %arg1[%c0, %c0_0, %c0_1] : memref<1x8x256xbf16, #tpu.memory_space<vmem>>, vector<1x8x256xbf16>
    %1 = vector.shape_cast %0 : vector<1x8x256xbf16> to vector<8x256xbf16>
    %2 = arith.extf %1 : vector<8x256xbf16> to vector<8x256xf32>
    %c0_2 = arith.constant 0 : index
    %c0_3 = arith.constant 0 : index
    %3 = vector.load %arg2[%c0_2, %c0_3] : memref<8x1xf32, #tpu.memory_space<vmem>>, vector<8x1xf32>
    %4 = vector.broadcast %3 : vector<8x1xf32> to vector<8x256xf32>
    %5 = arith.mulf %2, %4 : vector<8x256xf32>
    %c0_4 = arith.constant 0 : index
    %c0_5 = arith.constant 0 : index
    %6 = vector.load %arg3[%c0_4, %c0_5] : memref<8x1xf32, #tpu.memory_space<vmem>>, vector<8x1xf32>
    %7 = vector.broadcast %6 : vector<8x1xf32> to vector<8x256xf32>
    %8 = arith.addf %5, %7 : vector<8x256xf32>
    %c0_6 = arith.constant 0 : index
    %c0_7 = arith.constant 0 : index
    %c0_8 = arith.constant 0 : index
    %9 = vector.load %arg4[%c0_6, %c0_7, %c0_8] : memref<1x8x256xbf16, #tpu.memory_space<vmem>>, vector<1x8x256xbf16>
    %10 = vector.shape_cast %9 : vector<1x8x256xbf16> to vector<8x256xbf16>
    %11 = arith.extf %10 : vector<8x256xbf16> to vector<8x256xf32>
    %c0_9 = arith.constant 0 : index
    %c0_10 = arith.constant 0 : index
    %12 = vector.load %arg5[%c0_9, %c0_10] : memref<8x1xf32, #tpu.memory_space<vmem>>, vector<8x1xf32>
    %13 = vector.broadcast %12 : vector<8x1xf32> to vector<8x256xf32>
    %14 = arith.mulf %11, %13 : vector<8x256xf32>
    %c0_11 = arith.constant 0 : index
    %c0_12 = arith.constant 0 : index
    %15 = vector.load %arg6[%c0_11, %c0_12] : memref<8x1xf32, #tpu.memory_space<vmem>>, vector<8x1xf32>
    %16 = vector.broadcast %15 : vector<8x1xf32> to vector<8x256xf32>
    %17 = arith.addf %14, %16 : vector<8x256xf32>
    %18 = arith.addf %8, %17 : vector<8x256xf32>
    %cst = arith.constant 0.000000e+00 : f32
    %19 = vector.broadcast %cst : f32 to vector<8x256xf32>
    %20 = arith.maximumf %18, %19 : vector<8x256xf32>
    %c0_13 = arith.constant 0 : index
    %c0_14 = arith.constant 0 : index
    %c0_15 = arith.constant 0 : index
    %21 = vector.load %arg7[%c0_13, %c0_14, %c0_15] : memref<1x8x256xf32, #tpu.memory_space<vmem>>, vector<1x8x256xf32>
    %22 = vector.shape_cast %21 : vector<1x8x256xf32> to vector<8x256xf32>
    %23 = vector.shape_cast %20 : vector<8x256xf32> to vector<1x8x256xf32>
    tpu.vector_store %arg7[%c0_13, %c0_14, %c0_15], %23 {strides = array<i32>} : memref<1x8x256xf32, #tpu.memory_space<vmem>>, vector<1x8x256xf32>,
    return
  }
  func.func @transform_0(%arg0: i32) -> (i32, i32, i32) {
    %c0_i32 = arith.constant 0 : i32
    %c0_i32_0 = arith.constant 0 : i32
    %c0_i32_1 = arith.constant 0 : i32
    return %arg0, %c0_i32, %c0_i32_0 : i32, i32, i32
  }
  func.func @transform_1(%arg0: i32) -> (i32, i32) {
    %c0_i32 = arith.constant 0 : i32
    %c0_i32_0 = arith.constant 0 : i32
    %c0_i32_1 = arith.constant 0 : i32
    return %c0_i32, %c0_i32_0 : i32, i32
  }
  func.func @transform_2(%arg0: i32) -> (i32, i32) {
    %c0_i32 = arith.constant 0 : i32
    %c0_i32_0 = arith.constant 0 : i32
    %c0_i32_1 = arith.constant 0 : i32
    return %c0_i32, %c0_i32_0 : i32, i32
  }
  func.func @transform_3(%arg0: i32) -> (i32, i32, i32) {
    %c0_i32 = arith.constant 0 : i32
    %c0_i32_0 = arith.constant 0 : i32
    %c0_i32_1 = arith.constant 0 : i32
    return %arg0, %c0_i32, %c0_i32_0 : i32, i32, i32
  }
  func.func @transform_4(%arg0: i32) -> (i32, i32) {
    %c0_i32 = arith.constant 0 : i32
    %c0_i32_0 = arith.constant 0 : i32
    %c0_i32_1 = arith.constant 0 : i32
    return %c0_i32, %c0_i32_0 : i32, i32
  }
  func.func @transform_5(%arg0: i32) -> (i32, i32) {
    %c0_i32 = arith.constant 0 : i32
    %c0_i32_0 = arith.constant 0 : i32
    %c0_i32_1 = arith.constant 0 : i32
    return %c0_i32, %c0_i32_0 : i32, i32
  }
  func.func @transform_6(%arg0: i32) -> (i32, i32, i32) {
    %c0_i32 = arith.constant 0 : i32
    %c0_i32_0 = arith.constant 0 : i32
    %c0_i32_1 = arith.constant 0 : i32
    return %arg0, %c0_i32, %c0_i32_0 : i32, i32, i32
  }
}

module attributes {stable_mosaic.version = 11 : i64} {
  func.func @kernel(%arg0: i32, %arg1: memref<1x8x256xbf16, #tpu.memory_space<vmem>>, %arg2: memref<8x1xf32, #tpu.memory_space<vmem>>, %arg3: memref<8x1xf32, #tpu.memory_space<vmem>>, %arg4: memref<8x72xbf16, #tpu.memory_space<vmem>>, %arg5: memref<1x8x256xbf16, #tpu.memory_space<vmem>>, %arg6: memref<1x8x2xf32, #tpu.memory_space<vmem>>, %arg7: memref<8x18x18xbf16, #tpu.memory_space<vmem>>) attributes {dimension_semantics = [#tpu.dimension_semantics<parallel>], iteration_bounds = array<i64: 2>, scalar_prefetch = 0 : i64, scratch_operands = 1 : i64, tpu.core_type = #tpu.core_type<tc>, window_params = [{transform_indices = @transform_0, window_bounds = array<i64: 1, 8, 256>}, {pipeline_mode = #tpu.pipeline_mode<synchronous>, transform_indices = @transform_1, window_bounds = array<i64: 8, 1>}, {pipeline_mode = #tpu.pipeline_mode<synchronous>, transform_indices = @transform_2, window_bounds = array<i64: 8, 1>}, {pipeline_mode = #tpu.pipeline_mode<synchronous>, transform_indices = @transform_3, window_bounds = array<i64: 8, 72>}, {transform_indices = @transform_4, window_bounds = array<i64: 1, 8, 256>}, {transform_indices = @transform_5, window_bounds = array<i64: 1, 8, 2>}]} {
    %c0 = arith.constant 0 : index
    %c0_0 = arith.constant 0 : index
    %c0_1 = arith.constant 0 : index
    %0 = vector.load %arg1[%c0, %c0_0, %c0_1] : memref<1x8x256xbf16, #tpu.memory_space<vmem>>, vector<1x8x256xbf16>
    %1 = vector.shape_cast %0 : vector<1x8x256xbf16> to vector<8x256xbf16>
    %2 = arith.extf %1 : vector<8x256xbf16> to vector<8x256xf32>
    %c0_2 = arith.constant 0 : index
    %c0_3 = arith.constant 0 : index
    %3 = vector.load %arg2[%c0_2, %c0_3] : memref<8x1xf32, #tpu.memory_space<vmem>>, vector<8x1xf32>
    %4 = vector.broadcast %3 : vector<8x1xf32> to vector<8x256xf32>
    %5 = arith.mulf %2, %4 : vector<8x256xf32>
    %c0_4 = arith.constant 0 : index
    %c0_5 = arith.constant 0 : index
    %6 = vector.load %arg3[%c0_4, %c0_5] : memref<8x1xf32, #tpu.memory_space<vmem>>, vector<8x1xf32>
    %7 = vector.broadcast %6 : vector<8x1xf32> to vector<8x256xf32>
    %8 = arith.addf %5, %7 : vector<8x256xf32>
    %cst = arith.constant 0.000000e+00 : f32
    %9 = vector.broadcast %cst : f32 to vector<8x256xf32>
    %10 = arith.maximumf %8, %9 : vector<8x256xf32>
    %cst_6 = arith.constant 0.000000e+00 : bf16
    %11 = vector.broadcast %cst_6 : bf16 to vector<8x1x18xbf16>
    %cst_7 = arith.constant 0.000000e+00 : bf16
    %12 = vector.broadcast %cst_7 : bf16 to vector<8x16x1xbf16>
    %c0_8 = arith.constant 0 : index
    %c0_9 = arith.constant 0 : index
    %c0_10 = arith.constant 0 : index
    %13 = vector.load %arg7[%c0_8, %c0_9, %c0_10] : memref<8x18x18xbf16, #tpu.memory_space<vmem>>, vector<8x1x18xbf16>
    tpu.vector_store %arg7[%c0_8, %c0_9, %c0_10], %11 {strides = array<i32>} : memref<8x18x18xbf16, #tpu.memory_space<vmem>>, vector<8x1x18xbf16>,
    %c0_11 = arith.constant 0 : index
    %c17 = arith.constant 17 : index
    %c0_12 = arith.constant 0 : index
    %14 = vector.load %arg7[%c0_11, %c17, %c0_12] : memref<8x18x18xbf16, #tpu.memory_space<vmem>>, vector<8x1x18xbf16>
    tpu.vector_store %arg7[%c0_11, %c17, %c0_12], %11 {strides = array<i32>} : memref<8x18x18xbf16, #tpu.memory_space<vmem>>, vector<8x1x18xbf16>,
    %c0_13 = arith.constant 0 : index
    %c1 = arith.constant 1 : index
    %c0_14 = arith.constant 0 : index
    %15 = vector.load %arg7[%c0_13, %c1, %c0_14] : memref<8x18x18xbf16, #tpu.memory_space<vmem>>, vector<8x16x1xbf16>
    tpu.vector_store %arg7[%c0_13, %c1, %c0_14], %12 {strides = array<i32>} : memref<8x18x18xbf16, #tpu.memory_space<vmem>>, vector<8x16x1xbf16>,
    %c0_15 = arith.constant 0 : index
    %c1_16 = arith.constant 1 : index
    %c17_17 = arith.constant 17 : index
    %16 = vector.load %arg7[%c0_15, %c1_16, %c17_17] : memref<8x18x18xbf16, #tpu.memory_space<vmem>>, vector<8x16x1xbf16>
    tpu.vector_store %arg7[%c0_15, %c1_16, %c17_17], %12 {strides = array<i32>} : memref<8x18x18xbf16, #tpu.memory_space<vmem>>, vector<8x16x1xbf16>,
    %17 = arith.truncf %10 : vector<8x256xf32> to vector<8x256xbf16>
    %18 = vector.shape_cast %17 : vector<8x256xbf16> to vector<8x16x16xbf16>
    %c0_18 = arith.constant 0 : index
    %c1_19 = arith.constant 1 : index
    %c1_20 = arith.constant 1 : index
    %19 = vector.load %arg7[%c0_18, %c1_19, %c1_20] : memref<8x18x18xbf16, #tpu.memory_space<vmem>>, vector<8x16x16xbf16>
    tpu.vector_store %arg7[%c0_18, %c1_19, %c1_20], %18 {strides = array<i32>} : memref<8x18x18xbf16, #tpu.memory_space<vmem>>, vector<8x16x16xbf16>,
    %c0_21 = arith.constant 0 : index
    %c0_22 = arith.constant 0 : index
    %c0_23 = arith.constant 0 : index
    %20 = vector.load %arg7[%c0_21, %c0_22, %c0_23] : memref<8x18x18xbf16, #tpu.memory_space<vmem>>, vector<8x16x16xbf16>
    %21 = vector.shape_cast %20 : vector<8x16x16xbf16> to vector<8x256xbf16>
    %c0_24 = arith.constant 0 : index
    %c0_25 = arith.constant 0 : index
    %c1_26 = arith.constant 1 : index
    %22 = vector.load %arg7[%c0_24, %c0_25, %c1_26] : memref<8x18x18xbf16, #tpu.memory_space<vmem>>, vector<8x16x16xbf16>
    %23 = vector.shape_cast %22 : vector<8x16x16xbf16> to vector<8x256xbf16>
    %c0_27 = arith.constant 0 : index
    %c0_28 = arith.constant 0 : index
    %c2 = arith.constant 2 : index
    %24 = vector.load %arg7[%c0_27, %c0_28, %c2] : memref<8x18x18xbf16, #tpu.memory_space<vmem>>, vector<8x16x16xbf16>
    %25 = vector.shape_cast %24 : vector<8x16x16xbf16> to vector<8x256xbf16>
    %c0_29 = arith.constant 0 : index
    %c1_30 = arith.constant 1 : index
    %c0_31 = arith.constant 0 : index
    %26 = vector.load %arg7[%c0_29, %c1_30, %c0_31] : memref<8x18x18xbf16, #tpu.memory_space<vmem>>, vector<8x16x16xbf16>
    %27 = vector.shape_cast %26 : vector<8x16x16xbf16> to vector<8x256xbf16>
    %c0_32 = arith.constant 0 : index
    %c1_33 = arith.constant 1 : index
    %c1_34 = arith.constant 1 : index
    %28 = vector.load %arg7[%c0_32, %c1_33, %c1_34] : memref<8x18x18xbf16, #tpu.memory_space<vmem>>, vector<8x16x16xbf16>
    %29 = vector.shape_cast %28 : vector<8x16x16xbf16> to vector<8x256xbf16>
    %c0_35 = arith.constant 0 : index
    %c1_36 = arith.constant 1 : index
    %c2_37 = arith.constant 2 : index
    %30 = vector.load %arg7[%c0_35, %c1_36, %c2_37] : memref<8x18x18xbf16, #tpu.memory_space<vmem>>, vector<8x16x16xbf16>
    %31 = vector.shape_cast %30 : vector<8x16x16xbf16> to vector<8x256xbf16>
    %c0_38 = arith.constant 0 : index
    %c2_39 = arith.constant 2 : index
    %c0_40 = arith.constant 0 : index
    %32 = vector.load %arg7[%c0_38, %c2_39, %c0_40] : memref<8x18x18xbf16, #tpu.memory_space<vmem>>, vector<8x16x16xbf16>
    %33 = vector.shape_cast %32 : vector<8x16x16xbf16> to vector<8x256xbf16>
    %c0_41 = arith.constant 0 : index
    %c2_42 = arith.constant 2 : index
    %c1_43 = arith.constant 1 : index
    %34 = vector.load %arg7[%c0_41, %c2_42, %c1_43] : memref<8x18x18xbf16, #tpu.memory_space<vmem>>, vector<8x16x16xbf16>
    %35 = vector.shape_cast %34 : vector<8x16x16xbf16> to vector<8x256xbf16>
    %c0_44 = arith.constant 0 : index
    %c2_45 = arith.constant 2 : index
    %c2_46 = arith.constant 2 : index
    %36 = vector.load %arg7[%c0_44, %c2_45, %c2_46] : memref<8x18x18xbf16, #tpu.memory_space<vmem>>, vector<8x16x16xbf16>
    %37 = vector.shape_cast %36 : vector<8x16x16xbf16> to vector<8x256xbf16>
    %38 = tpu.concatenate %21, %23, %25, %27, %29, %31, %33, %35, %37 in 0 : vector<8x256xbf16>, vector<8x256xbf16>, vector<8x256xbf16>, vector<8x256xbf16>, vector<8x256xbf16>, vector<8x256xbf16>, vector<8x256xbf16>, vector<8x256xbf16>, vector<8x256xbf16> -> vector<72x256xbf16>
    %c0_47 = arith.constant 0 : index
    %c0_48 = arith.constant 0 : index
    %39 = vector.load %arg4[%c0_47, %c0_48] : memref<8x72xbf16, #tpu.memory_space<vmem>>, vector<8x72xbf16>
    %cst_49 = arith.constant dense<0.000000e+00> : vector<8x256xf32>
    %40 = tpu.matmul %39, %38, %cst_49 {dimension_numbers = #tpu.dot_dimension_numbers<[1], [0], [0], [1], [0, 0, 1, 1], [], []>} : vector<8x72xbf16>, vector<72x256xbf16>, vector<8x256xf32> -> vector<8x256xf32>
    %41 = arith.truncf %40 : vector<8x256xf32> to vector<8x256xbf16>
    %c0_50 = arith.constant 0 : index
    %c0_51 = arith.constant 0 : index
    %c0_52 = arith.constant 0 : index
    %42 = vector.load %arg5[%c0_50, %c0_51, %c0_52] : memref<1x8x256xbf16, #tpu.memory_space<vmem>>, vector<1x8x256xbf16>
    %43 = vector.shape_cast %42 : vector<1x8x256xbf16> to vector<8x256xbf16>
    %44 = vector.shape_cast %41 : vector<8x256xbf16> to vector<1x8x256xbf16>
    tpu.vector_store %arg5[%c0_50, %c0_51, %c0_52], %44 {strides = array<i32>} : memref<1x8x256xbf16, #tpu.memory_space<vmem>>, vector<1x8x256xbf16>,
    %cst_53 = arith.constant dense<0.000000e+00> : vector<8xf32>
    %45 = vector.multi_reduction <add>, %40, %cst_53 [1] : vector<8x256xf32> to vector<8xf32>
    %46 = vector.shape_cast %45 : vector<8xf32> to vector<8x1xf32>
    %47 = arith.mulf %40, %40 : vector<8x256xf32>
    %cst_54 = arith.constant dense<0.000000e+00> : vector<8xf32>
    %48 = vector.multi_reduction <add>, %47, %cst_54 [1] : vector<8x256xf32> to vector<8xf32>
    %49 = vector.shape_cast %48 : vector<8xf32> to vector<8x1xf32>
    %50 = tpu.concatenate %46, %49 in 1 : vector<8x1xf32>, vector<8x1xf32> -> vector<8x2xf32>
    %c0_55 = arith.constant 0 : index
    %c0_56 = arith.constant 0 : index
    %c0_57 = arith.constant 0 : index
    %51 = vector.load %arg6[%c0_55, %c0_56, %c0_57] : memref<1x8x2xf32, #tpu.memory_space<vmem>>, vector<1x8x2xf32>
    %52 = vector.shape_cast %51 : vector<1x8x2xf32> to vector<8x2xf32>
    %53 = vector.shape_cast %50 : vector<8x2xf32> to vector<1x8x2xf32>
    tpu.vector_store %arg6[%c0_55, %c0_56, %c0_57], %53 {strides = array<i32>} : memref<1x8x2xf32, #tpu.memory_space<vmem>>, vector<1x8x2xf32>,
    return
  }
  func.func @transform_0(%arg0: i32) -> (i32, i32, i32) {
    %c0_i32 = arith.constant 0 : i32
    %c0_i32_0 = arith.constant 0 : i32
    %c0_i32_1 = arith.constant 0 : i32
    return %arg0, %c0_i32, %c0_i32_0 : i32, i32, i32
  }
  func.func @transform_1(%arg0: i32) -> (i32, i32) {
    %c0_i32 = arith.constant 0 : i32
    %c0_i32_0 = arith.constant 0 : i32
    %c0_i32_1 = arith.constant 0 : i32
    return %c0_i32, %c0_i32_0 : i32, i32
  }
  func.func @transform_2(%arg0: i32) -> (i32, i32) {
    %c0_i32 = arith.constant 0 : i32
    %c0_i32_0 = arith.constant 0 : i32
    %c0_i32_1 = arith.constant 0 : i32
    return %c0_i32, %c0_i32_0 : i32, i32
  }
  func.func @transform_3(%arg0: i32) -> (i32, i32) {
    %c0_i32 = arith.constant 0 : i32
    %c0_i32_0 = arith.constant 0 : i32
    %c0_i32_1 = arith.constant 0 : i32
    return %c0_i32, %c0_i32_0 : i32, i32
  }
  func.func @transform_4(%arg0: i32) -> (i32, i32, i32) {
    %c0_i32 = arith.constant 0 : i32
    %c0_i32_0 = arith.constant 0 : i32
    %c0_i32_1 = arith.constant 0 : i32
    return %arg0, %c0_i32, %c0_i32_0 : i32, i32, i32
  }
  func.func @transform_5(%arg0: i32) -> (i32, i32, i32) {
    %c0_i32 = arith.constant 0 : i32
    %c0_i32_0 = arith.constant 0 : i32
    %c0_i32_1 = arith.constant 0 : i32
    return %arg0, %c0_i32, %c0_i32_0 : i32, i32, i32
  }
}

</mosaic_0001>

<bundles_post_ra>
// kernel: basic_block.5
= control target key start
LH: loop header
LB: loop body
LE: loop exit
PB: predicated region body
PF: predicated region fallthrough
CT: control target
= control target key end

     0   :  { %s454_s21 = smov 0   ;;  %s486_s0 = inlined_call_operand.vmem [shape: bf16[2,8,256], index: 0, kind: input, shape index: {}]   ;;  %s487_s1 = inlined_call_operand.vmem [shape: f32[8,1], index: 1, kind: input, shape index: {}]   ;;  %s488_s2 = inlined_call_operand.vmem [shape: f32[8,1], index: 2, kind: input, shape index: {}]   ;;  %s489_s3 = inlined_call_operand.vmem [shape: bf16[2,8,256], index: 3, kind: input, shape index: {}]   ;;  %s490_s4 = inlined_call_operand.vmem [shape: f32[8,1], index: 4, kind: input, shape index: {}]   ;;  %s491_s5 = inlined_call_operand.vmem [shape: f32[8,1], index: 5, kind: input, shape index: {}]   ;;  %s492_s6 = inlined_call_operand.vmem [shape: f32[2,8,256], index: 6, kind: output, shape index: {}]  }
   0x1 LB: > { %s383_s22 = sadd.s32 4294967295, %s416_s21   ;;  %p387_p0 = scmp.ge.s32.totalorder %s416_s21, 1  ;;  %s416_s21 = sphi %s454_s21, %s16_s21  }
   0x2   : > { %p222_p1 = scmp.lt.s32.totalorder %s416_s21, 3 }
   0x4   : > { %p223_p2 = pnand %p387_p0, %p222_p1 }
   0x5   : > { %p257_p3 = scmp.lt.s32.totalorder (!%p223_p2), %s383_s22, 1 }
   0x6   : > { %226 = sbr.rel (%p223_p2) target bundleno = 146 (0x92), region = 44 }
   0xb   : > { %v283_v0 = vld [vmem:[%s488_s2] sm:$0xff]  ;;  %v418_v2 = vmov 0   ;;  %s494_s22 = smov (!%p257_p3, %s383_s22), 1 }
   0xc   : > { %v275_v1 = vld [vmem:[%s487_s1] sm:$0xff]  ;;  %409 = vset.pattern.permute.xlu1 %v418_v2  ;;  %408 = vset.pattern.permute.xlu0 %v418_v2  ;;  %s396_s7 = sshll.u32 %s494_s22, 3  ;;  %s398_s14 = sshll.u32 %s494_s22, 4 }
   0xd   : > { %286 = vperm.xlu1 %409, %v283_v0   ;;  %278 = vperm.xlu0 %408, %v275_v1   ;;  %v302_v3 = vld [vmem:[%s491_s5] sm:$0xff]  ;;  %s261_s10 = scalar_lea.vmem %s486_s0, %s396_s7  ;;  %s266_s13 = scalar_lea.vmem %s489_s3, %s396_s7 }
   0xe   : > { %v294_v4 = vld [vmem:[%s490_s4] sm:$0xff]  ;;  %s271_s17 = scalar_lea.vmem %s492_s6, %s398_s14 }
   0xf   : > { %v272_v7 = vld [vmem:[%s261_s10] sm:$0xff] }
  0x10   : > { %v291_v8 = vld [vmem:[%s266_s13] sm:$0xff]  ;;  %v273_v9 = vunpack.c.l.bf16 %v272_v7  ;;  %v274_v10 = vunpack.c.h.bf16 %v272_v7 }
  0x11   : > { %v292_v11 = vunpack.c.l.bf16 %v291_v8  ;;  %v293_v12 = vunpack.c.h.bf16 %v291_v8 }
  0x15   : > { %305 = vperm.xlu1 %409, %v302_v3   ;;  %297 = vperm.xlu0 %408, %v294_v4  }
  0x7f   : > { %v287_v5 = vpop.permute.xlu1 %286  ;;  %v279_v6 = vpop.permute.xlu0 %278 }
  0x80   : > { %v281_v13 = vmul.f32 %v279_v6, %v273_v9  ;;  %v282_v14 = vmul.f32 %v279_v6, %v274_v10 }
  0x82   : > { %v289_v19 = vadd.f32 %v287_v5, %v281_v13  ;;  %v290_v20 = vadd.f32 %v287_v5, %v282_v14 }
  0x87   : > { %v298_v15 = vpop.permute.xlu0 %297  ;;  %v306_v18 = vpop.permute.xlu1 %305 }
  0x88   : > { %v300_v16 = vmul.f32 %v298_v15, %v292_v11  ;;  %v301_v17 = vmul.f32 %v298_v15, %v293_v12 }
  0x8a   : > { %v308_v21 = vadd.f32 %v306_v18, %v300_v16  ;;  %v309_v22 = vadd.f32 %v306_v18, %v301_v17 }
  0x8c   : > { %v310_v23 = vadd.f32 %v308_v21, %v289_v19  ;;  %v311_v24 = vadd.f32 %v309_v22, %v290_v20 }
  0x8e   : > { %v312_v25 = vmax.f32 %v310_v23, 0.0  ;;  %v313_v26 = vmax.f32 %v311_v24, 0.0 }
  0x90   : > { %314 = vst [vmem:[%s271_s17] sm:$0xff] %v312_v25 }
  0x91   : > { %315 = vst [vmem:[%s271_s17 + $0x8] sm:$0xff] %v313_v26 }
  0x92 PF: > { %s16_s21 = sadd.s32 1, %s416_s21  }
  0x93   : > { %p13_p4 = scmp.ge.s32.totalorder %s16_s21, 4  }
  0x95   :  { %15 = sbr.rel (!%p13_p4) target bundleno = 1 (0x1), region = 77 }

// kernel: basic_block.3
= control target key start
LH: loop header
LB: loop body
LE: loop exit
PB: predicated region body
PF: predicated region fallthrough
CT: control target
= control target key end

     0   :  { %s3470_s21 = smov 0   ;;  %s5329_s0 = inlined_call_operand.vmem [shape: bf16[2,4,16,16], index: 0, kind: input, shape index: {}]   ;;  %s5330_s1 = inlined_call_operand.vmem [shape: bf16[8,36], index: 1, kind: input, shape index: {}]   ;;  %s5331_s2 = inlined_call_operand.vmem [shape: bf16[8,4], index: 2, kind: input, shape index: {}]   ;;  %s5332_s3 = inlined_call_operand.vmem [shape: bf16[2,8,256], index: 3, kind: output, shape index: {0}]   ;;  %s5333_s4 = inlined_call_operand.vmem [shape: f32[2,8,2], index: 4, kind: output, shape index: {1}]   ;;  %s5334_s5 = inlined_call_operand.vmem [shape: bf16[2,8,256], index: 5, kind: output, shape index: {2}]   ;;  %s5335_s6 = inlined_call_operand.vmem [shape: f32[2,8,2], index: 6, kind: output, shape index: {3}]  }
   0x1 LB: > { %s3367_s22 = sadd.s32 4294967295, %s3420_s21   ;;  %p3371_p0 = scmp.ge.s32.totalorder %s3420_s21, 1  ;;  %s3420_s21 = sphi %s3470_s21, %s17_s21  }
   0x2   : > { %p219_p1 = scmp.lt.s32.totalorder %s3420_s21, 3 }
   0x4   : > { %p220_p2 = pnand %p3371_p0, %p219_p1 }
   0x6   : > { %223 = sbr.rel (%p220_p2) target bundleno = 1300 (0x514), region = 32 }
   0xb   : > { %p262_p3 = scmp.lt.s32.totalorder %s3367_s22, 1  ;;  %vm287_vm0 = vsmask.f32 256  ;;  %vm389_vm1 = vsmask.f32 4368  ;;  %s3422_s27 = smov 1  }
   0xc   : > { %vm286_vm2 = vcmask 139264   ;;  %vm3495_vm3 = vmor %vm287_vm0, %vm389_vm1  ;;  %v306_v26 = vld [vmem:[#allocation2 + $0x14] sm:$0x1]  ;;  %vm301_vm4 = vsmask.f32 7938  ;;  %vm322_vm6 = vcmask 0  }
   0xd   : > { %s5440_s22 = smov (!%p262_p3, %s3367_s22), 1  ;;  %vm3502_vm5 = vmand %vm286_vm2, %vm301_vm4  ;;  %vm355_vm8 = vcmask 139400   ;;  %v303_v62 = vld [vmem:[#allocation2 + $0x8] sm:$0x1]  ;;  %vm315_vm11 = vcmask 3072   ;;  %vm348_vm13 = vcmask 142472  }
   0xe   : > { %s3390_s23 = sshll.u32 %s5440_s22, 5  ;;  %v307_v35 = vsel %vm3502_vm5, 0, %v306_v26  ;;  %vm3518_vm7 = vmand %vm322_vm6, %vm287_vm0  ;;  %v304_v63 = vsel %vm3502_vm5, 0, %v303_v62  ;;  %vm502_vm15 = vcmask 131080   ;;  %s3424_s28 = smov 127   ;;  %vm571_vm6 = vcmask 1047556  }
   0xf   : > { %s3484_s26 = scalar_lea.vmem %s5329_s0, %s3390_s23  ;;  %308 = vst [vmem:[#allocation2 + $0x14] sm:$0x1] %v307_v35  ;;  %vm3532_vm9 = vmand %vm355_vm8, %vm287_vm0  ;;  %s3425_s29 = smov 126   ;;  %vm2084_vm8 = vcmask 1046532  }
  0x10   : > { %v382_v0 = vld [vmem:[%s3484_s26 + $0x4] sm:$0xf]  ;;  %v381_v1 = vld [vmem:[%s3484_s26] sm:$0xf]  ;;  %v383_v2 = vld [vmem:[%s3484_s26 + $0x8] sm:$0xf] }
  0x11   : > { %v400_v3 = vshrl.u32 %v382_v0, 16  ;;  %v392_v4 = vshrl.u32 %v381_v1, 16  ;;  %v395_v5 = vshll.u32 %v381_v1, 16  ;;  %v409_v8 = vshrl.u32 %v383_v2, 16  ;;  %v384_v9 = vld [vmem:[%s3484_s26 + $0xc] sm:$0xf]  ;;  %vm3545_vm10 = vmand %vm286_vm2, %vm287_vm0 }
  0x12   : > { %v403_v10 = vshll.u32 %v382_v0, 16  ;;  %v385_v11 = vld [vmem:[%s3484_s26 + $0x10] sm:$0xf]  ;;  %v386_v12 = vld [vmem:[%s3484_s26 + $0x14] sm:$0xf]  ;;  %v417_v13 = vshrl.u32 %v384_v9, 16  ;;  %vm3557_vm12 = vmand %vm315_vm11, %vm301_vm4 }
  0x13   : > { %v402_v6 = vrot.slane %v400_v3, 7  ;;  %v394_v7 = vrot.slane %v392_v4, 7  ;;  %v412_v16 = vshll.u32 %v383_v2, 16  ;;  %v411_v17 = vrot.slane %v409_v8, 7  ;;  %v387_v36 = vld [vmem:[%s3484_s26 + $0x18] sm:$0xf]  ;;  %vm3573_vm14 = vmand %vm348_vm13, %vm301_vm4 }
  0x14   : > { %v426_v18 = vshrl.u32 %v385_v11, 16  ;;  %v434_v19 = vshrl.u32 %v386_v12, 16  ;;  %v419_v20 = vrot.slane %v417_v13, 7  ;;  %v420_v23 = vshll.u32 %v384_v9, 16  ;;  %v388_v37 = vld [vmem:[%s3484_s26 + $0x1c] sm:$0xf]  ;;  %vm3600_vm1 = vmand %vm502_vm15, %vm287_vm0 }
  0x15   : > { %v407_v14 = vrot.slane %v402_v6, 4  ;;  %v397_v15 = vor.u32 %v395_v5, %v394_v7  ;;  %v405_v21 = vor.u32 %v403_v10, %v402_v6  ;;  %v398_v22 = vrot.slane %v394_v7, 4  ;;  %305 = vst [vmem:[#allocation2 + $0x8] sm:$0x1] %v304_v63  ;;  %v289_v1 = vld [vmem:[#allocation2] sm:$0x1] }
  0x16   : > { %v424_v25 = vrot.slane %v419_v20, 4  ;;  %v414_v27 = vor.u32 %v412_v16, %v411_v17  ;;  %v428_v28 = vrot.slane %v426_v18, 7  ;;  %v436_v29 = vrot.slane %v434_v19, 7  ;;  %v331_v50 = vld [vmem:[#allocation2 + $0x14] sm:$0x1]  ;;  %s3428_s30 = smov 64  }
  0x17   : > { %463 = vrot.lane.b32.xlu1 %v407_v14, %s3422_s27  ;;  %459 = vrot.lane.b32.xlu0 %v397_v15, %s3422_s27  ;;  %v437_v30 = vshll.u32 %v386_v12, 16  ;;  %v406_v32 = vsel %vm3495_vm3, %v398_v22, %v405_v21  ;;  %v422_v33 = vor.u32 %v420_v23, %v419_v20  ;;  %v415_v34 = vrot.slane %v411_v17, 4  ;;  %v292_v3 = vld [vmem:[#allocation2 + $0xc] sm:$0x1]  ;;  %v295_v9 = vld [vmem:[#allocation2 + $0x18] sm:$0x1] }
  0x18   : > { %469 = vrot.lane.b32.xlu2 %v424_v25, %s3422_s27  ;;  %v432_v38 = vrot.slane %v428_v28, 4  ;;  %v429_v39 = vshll.u32 %v385_v11, 16  ;;  %v443_v41 = vshrl.u32 %v387_v36, 16  ;;  %v451_v42 = vshrl.u32 %v388_v37, 16  ;;  %v309_v16 = vld [vmem:[#allocation2 + $0x20] sm:$0x1] }
  0x19   : > { %v439_v40 = vor.u32 %v437_v30, %v436_v29  ;;  %v423_v43 = vsel %vm3495_vm3, %v415_v34, %v422_v33  ;;  %v454_v49 = vshll.u32 %v388_v37, 16  ;;  %v332_v51 = vsel %vm3518_vm7, 0, %v331_v50  ;;  %v298_v18 = vld [vmem:[#allocation2 + $0x24] sm:$0x1]  ;;  %v312_v22 = vld [vmem:[#allocation2 + $0x2c] sm:$0x1] }
  0x1a   : > { %v431_v44 = vor.u32 %v429_v39, %v428_v28  ;;  %v445_v47 = vrot.slane %v443_v41, 7  ;;  %v453_v48 = vrot.slane %v451_v42, 7  ;;  %333 = vst [vmem:[#allocation2 + $0x14] sm:$0x1] %v332_v51  ;;  %v446_v52 = vshll.u32 %v387_v36, 16  ;;  %s3429_s7 = smov 80  }
  0x1b   : > { %v440_v46 = vsel %vm3495_vm3, %v432_v38, %v439_v40  ;;  %v441_v53 = vrot.slane %v436_v29, 4  ;;  %v290_v2 = vsel %vm3545_vm10, 0, %v289_v1  ;;  %v293_v5 = vsel %vm3545_vm10, 0, %v292_v3  ;;  %s3430_s8 = smov 96   ;;  %s3431_s9 = smov 16  }
  0x1c   : > { %v449_v54 = vrot.slane %v445_v47, 4  ;;  %v456_v55 = vor.u32 %v454_v49, %v453_v48  ;;  %v448_v56 = vor.u32 %v446_v52, %v445_v47  ;;  %v458_v61 = vrot.slane %v453_v48, 4  ;;  %v324_v4 = vld [vmem:[#allocation2 + $0x8] sm:$0x1]  ;;  %291 = vst [vmem:[#allocation2] sm:$0x1] %v290_v2 }
  0x1d   : > { %v325_v6 = vsel %vm3518_vm7, 0, %v324_v4  ;;  %294 = vst [vmem:[#allocation2 + $0xc] sm:$0x1] %v293_v5  ;;  %v296_v14 = vsel %vm3545_vm10, 0, %v295_v9  ;;  %v310_v17 = vsel %vm3502_vm5, 0, %v309_v16  ;;  %v299_v21 = vsel %vm3545_vm10, 0, %v298_v18 }
  0x1e   : > { %v457_v57 = vsel %vm3495_vm3, %v449_v54, %v456_v55  ;;  %326 = vst [vmem:[#allocation2 + $0x8] sm:$0x1] %v325_v6  ;;  %v313_v25 = vsel %vm3502_vm5, 0, %v312_v22  ;;  %v3423_v29 = vmov 0   ;;  %vm495_vm2 = vcmask 134152   ;;  %s3432_s10 = smov 32  }
  0x1f   : > { %465 = vrot.lane.b32.xlu1 %v414_v27, %s3422_s27  ;;  %461 = vrot.lane.b32.xlu0 %v406_v32, %s3422_s27  ;;  %297 = vst [vmem:[#allocation2 + $0x18] sm:$0x1] %v296_v14  ;;  %vm3619_vm0 = vmand %vm495_vm2, %vm301_vm4  ;;  %vm1272_vm3 = vsmask.f32 3328  ;;  %vm1273_vm4 = vsmask.f32 7440 }
  0x20   : > { %467 = vrot.lane.b32.xlu2 %v423_v43, %s3422_s27  ;;  %311 = vst [vmem:[#allocation2 + $0x20] sm:$0x1] %v310_v17  ;;  %vm3728_vm5 = vmor %vm1272_vm3, %vm1273_vm4  ;;  %s3433_s11 = smov 48   ;;  %s3434_s12 = smov 112   ;;  %vm735_vm10 = vcmask 130048   ;;  %vm751_vm15 = vcmask 785408  }
  0x21   : > { %v364_v59 = vld [vmem:[#allocation2 + $0x14] sm:$0x1]  ;;  %300 = vst [vmem:[#allocation2 + $0x24] sm:$0x1] %v299_v21  ;;  %vm2864_vm3 = vcmask 1045504   ;;  %vm2886_vm4 = vcmask 293888  }
  0x22   : > { %v365_v60 = vsel %vm3532_vm9, 0, %v364_v59  ;;  %314 = vst [vmem:[#allocation2 + $0x2c] sm:$0x1] %v313_v25  ;;  %s5308_s17 = sshll.u32 %s5440_s22, 3 }
  0x23   : > { %366 = vst [vmem:[#allocation2 + $0x14] sm:$0x1] %v365_v60  ;;  %v317_v8 = vld [vmem:[#allocation2] sm:$0xf]  ;;  %s271_s20 = scalar_lea.vmem %s5332_s3, %s5308_s17  ;;  %s280_s24 = scalar_lea.vmem %s5334_s5, %s5308_s17 }
  0x24   : > { %v318_v10 = vsel %vm3557_vm12, 0, %v317_v8  ;;  %v327_v11 = vld [vmem:[#allocation2 + $0xc] sm:$0xf]  ;;  %330 = vst.msk [vmem:[#allocation2 + $0x10] sm:$0xf] %vm315_vm11, %v3423_v29 }
  0x25   : > { %v357_v12 = vld [vmem:[#allocation2 + $0x8] sm:$0x1]  ;;  %319 = vst [vmem:[#allocation2] sm:$0xf] %v318_v10  ;;  %v328_v13 = vsel %vm3557_vm12, 0, %v327_v11 }
  0x26   : > { %v358_v15 = vsel %vm3532_vm9, 0, %v357_v12  ;;  %329 = vst [vmem:[#allocation2 + $0xc] sm:$0xf] %v328_v13  ;;  %v334_v27 = vld [vmem:[#allocation2 + $0x18] sm:$0xf] }
  0x27   : > { %473 = vrot.lane.b32.xlu1 %v440_v46, %s3422_s27  ;;  %471 = vrot.lane.b32.xlu0 %v431_v44, %s3422_s27  ;;  %359 = vst [vmem:[#allocation2 + $0x8] sm:$0x1] %v358_v15  ;;  %v335_v28 = vsel %vm3557_vm12, 0, %v334_v27  ;;  %v338_v30 = vld [vmem:[#allocation2 + $0x20] sm:$0x1] }
  0x28   : > { %475 = vrot.lane.b32.xlu2 %v441_v53, %s3422_s27  ;;  %336 = vst [vmem:[#allocation2 + $0x18] sm:$0xf] %v335_v28  ;;  %v339_v32 = vsel %vm3518_vm7, 0, %v338_v30  ;;  %v341_v33 = vld [vmem:[#allocation2 + $0x24] sm:$0xf] }
  0x29   : > { %363 = vst.msk [vmem:[#allocation2 + $0x10] sm:$0xf] %vm348_vm13, %v3423_v29  ;;  %v345_v35 = vld [vmem:[#allocation2 + $0x2c] sm:$0x1]  ;;  %v342_v39 = vsel %vm3557_vm12, 0, %v341_v33  ;;  %vm742_vm12 = vcmask 392192  }
  0x2a   : > { %321 = vst.msk [vmem:[#allocation2 + $0x4] sm:$0xf] %vm315_vm11, %v3423_v29  ;;  %v511_v31 = vld [vmem:[#allocation2 + $0x14] sm:$0x1]  ;;  %v346_v41 = vsel %vm3518_vm7, 0, %v345_v35  ;;  %vm2083_vm7 = vcmask 1042432  }
  0x2b   : > { %337 = vst.msk [vmem:[#allocation2 + $0x1c] sm:$0xf] %vm315_vm11, %v3423_v29  ;;  %v3426_v27 = vmov 1983009808  }
  0x2c   : > { %v350_v20 = vld [vmem:[#allocation2] sm:$0xf]  ;;  %344 = vst.msk [vmem:[#allocation2 + $0x28] sm:$0xf] %vm315_vm11, %v3423_v29  ;;  %v562_v28 = vunpack.c.l.s4 %v3426_v27  ;;  %vm739_vm11 = vcmask 261120  }
  0x2d   : > { %v351_v23 = vsel %vm3573_vm14, 0, %v350_v20  ;;  %v360_v24 = vld [vmem:[#allocation2 + $0xc] sm:$0xf]  ;;  %354 = vst.msk [vmem:[#allocation2 + $0x4] sm:$0xf] %vm348_vm13, %v3423_v29 }
  0x2e   : > { %352 = vst [vmem:[#allocation2] sm:$0xf] %v351_v23  ;;  %v361_v26 = vsel %vm3573_vm14, 0, %v360_v24  ;;  %v504_v51 = vld [vmem:[#allocation2 + $0x8] sm:$0x1]  ;;  %v3697_v37 = vunpack.c.0.s8 %v562_v28 }
  0x2f   : > { %479 = vrot.lane.b32.xlu1 %v457_v57, %s3422_s27  ;;  %477 = vrot.lane.b32.xlu0 %v448_v56, %s3422_s27  ;;  %362 = vst [vmem:[#allocation2 + $0xc] sm:$0xf] %v361_v26  ;;  %v367_v34 = vld [vmem:[#allocation2 + $0x18] sm:$0xf] }
  0x30   : > { %481 = vrot.lane.b32.xlu2 %v458_v61, %s3422_s27  ;;  %370 = vst.msk [vmem:[#allocation2 + $0x1c] sm:$0xf] %vm348_vm13, %v3423_v29  ;;  %v368_v36 = vsel %vm3573_vm14, 0, %v367_v34  ;;  %s275_s27 = scalar_lea.vmem %s5333_s4, %s5308_s17 }
  0x31   : > { %377 = vst.msk [vmem:[#allocation2 + $0x28] sm:$0xf] %vm348_vm13, %v3423_v29  ;;  %vm745_vm13 = vcmask 523264  }
  0x32   : > { %369 = vst [vmem:[#allocation2 + $0x18] sm:$0xf] %v368_v36 }
  0x33   : > { %340 = vst [vmem:[#allocation2 + $0x20] sm:$0x1] %v339_v32 }
  0x34   : > { %343 = vst [vmem:[#allocation2 + $0x24] sm:$0xf] %v342_v39 }
  0x35   : > { %347 = vst [vmem:[#allocation2 + $0x2c] sm:$0x1] %v346_v41  ;;  %v497_v53 = vld [vmem:[#allocation2] sm:$0xf] }
  0x36   : > { %v507_v62 = vld [vmem:[#allocation2 + $0xc] sm:$0xf]  ;;  %5379 = vst [vmem:[#allocation3_spill] sm:$0xff] %v3697_v37 }
  0x39   : > { %v514_v3 = vld [vmem:[#allocation2 + $0x18] sm:$0xf] }
  0x3a   : > { %v371_v43 = vld [vmem:[#allocation2 + $0x20] sm:$0x1] }
  0x3b   : > { %v372_v44 = vsel %vm3532_vm9, 0, %v371_v43  ;;  %v374_v46 = vld [vmem:[#allocation2 + $0x24] sm:$0xf] }
  0x3c   : > { %373 = vst [vmem:[#allocation2 + $0x20] sm:$0x1] %v372_v44  ;;  %v375_v47 = vsel %vm3573_vm14, 0, %v374_v46  ;;  %v378_v48 = vld [vmem:[#allocation2 + $0x2c] sm:$0x1]  ;;  %vm748_vm14 = vcmask 654336  }
  0x3d   : > { %376 = vst [vmem:[#allocation2 + $0x24] sm:$0xf] %v375_v47  ;;  %v379_v45 = vsel %vm3532_vm9, 0, %v378_v48  ;;  %vm3846_vm9 = vmor %vm2083_vm7, %vm2084_vm8  ;;  %vm2932_vm7 = vcmask 15360  }
  0x3e   : > { %380 = vst [vmem:[#allocation2 + $0x2c] sm:$0x1] %v379_v45 }
  0x43   : > { %v518_v50 = vld [vmem:[#allocation2 + $0x20] sm:$0x1] }
  0x44   : > { %v521_v10 = vld [vmem:[#allocation2 + $0x24] sm:$0xf] }
  0x45   : > { %v525_v59 = vld [vmem:[#allocation2 + $0x2c] sm:$0x1] }
  0x72   : > { %v470_v38 = vpop.permute.xlu2 %469 }
  0x73   : > { %v512_v40 = vsel %vm3600_vm1, %v470_v38, %v511_v31 }
  0x74   : > { %513 = vst [vmem:[#allocation2 + $0x14] sm:$0x1] %v512_v40 }
  0x7a   : > { %v468_v42 = vpop.permute.xlu2 %467 }
  0x7b   : > { %510 = vst.msk [vmem:[#allocation2 + $0x10] sm:$0xf] %vm495_vm2, %v468_v42  ;;  %v3686_v26 = vld [vmem:[#allocation2 + $0x14] sm:$0x1]  ;;  %v3427_v42 = vmov 1934713408  }
  0x7c   : > { %v1311_v29 = vshll.u32 %v3686_v26, 16  ;;  %v576_v43 = vunpack.c.l.s4 %v3427_v42 }
  0x7e   : > { %v3700_v39 = vrot.slane %v1311_v29, 5 }
  0x82   : > { %v476_v49 = vpop.permute.xlu2 %475  ;;  %v3649_v9 = vld [vmem:[#allocation2 + $0x10] sm:$0xf] }
  0x83   : > { %v519_v54 = vsel %vm3600_vm1, %v476_v49, %v518_v50  ;;  %v1302_v18 = vshll.u32 %v3649_v9, 16  ;;  %v552_v19 = vshrl.u32 %v3649_v9, 16 }
  0x84   : > { %520 = vst [vmem:[#allocation2 + $0x20] sm:$0x1] %v519_v54 }
  0x85   : > { %v3678_v22 = vrot.slane %v1302_v18, 5  ;;  %v1307_v23 = vrot.slane %v552_v19, 4 }
  0x87   : > { %v1308_v32 = vor.u32 %v1307_v23, %v3678_v22 }
  0x89   : > { %v464_v55 = vpop.permute.xlu1 %463  ;;  %v460_v56 = vpop.permute.xlu0 %459  ;;  %v3707_v48 = vrot.slane %v1308_v32, 4 }
  0x8a   : > { %v505_v57 = vsel %vm3600_vm1, %v464_v55, %v504_v51  ;;  %v498_v58 = vsel %vm3619_vm0, %v460_v56, %v497_v53  ;;  %v482_v60 = vpop.permute.xlu2 %481 }
  0x8b   : > { %506 = vst [vmem:[#allocation2 + $0x8] sm:$0x1] %v505_v57  ;;  %v526_v61 = vsel %vm3600_vm1, %v482_v60, %v525_v59  ;;  %vm754_vm1 = vcmask 916480  }
  0x8c   : > { %499 = vst [vmem:[#allocation2] sm:$0xf] %v498_v58 }
  0x8d   : > { %527 = vst [vmem:[#allocation2 + $0x2c] sm:$0x1] %v526_v61 }
  0x91   : > { %v466_v63 = vpop.permute.xlu1 %465  ;;  %v462_v0 = vpop.permute.xlu0 %461 }
  0x92   : > { %v508_v1 = vsel %vm3619_vm0, %v466_v63, %v507_v62  ;;  %501 = vst.msk [vmem:[#allocation2 + $0x4] sm:$0xf] %vm495_vm2, %v462_v0  ;;  %v3695_v36 = vld [vmem:[#allocation2 + $0x8] sm:$0x1] }
  0x93   : > { %509 = vst [vmem:[#allocation2 + $0xc] sm:$0xf] %v508_v1  ;;  %v3634_v2 = vld [vmem:[#allocation2] sm:$0xf]  ;;  %v1291_v49 = vshll.u32 %v3695_v36, 16 }
  0x94   : > { %780 = vrot.lane.b32.xlu2 %v3634_v2, %s3424_s28  ;;  %v539_v33 = vshrl.u32 %v3634_v2, 16  ;;  %v1277_v38 = vshll.u32 %v3634_v2, 16 }
  0x96   : > { %v1276_v51 = vrot.slane %v539_v33, 4  ;;  %v1279_v53 = vrot.slane %v1277_v38, 5 }
  0x99   : > { %v474_v4 = vpop.permute.xlu1 %473  ;;  %v472_v5 = vpop.permute.xlu0 %471  ;;  %v3638_v6 = vld [vmem:[#allocation2 + $0x4] sm:$0xf] }
  0x9a   : > { %517 = vst.msk [vmem:[#allocation2 + $0x1c] sm:$0xf] %vm495_vm2, %v474_v4  ;;  %v515_v7 = vsel %vm3619_vm0, %v472_v5, %v514_v3  ;;  %v3643_v8 = vld [vmem:[#allocation2 + $0xc] sm:$0xf]  ;;  %782 = vrot.lane.b32.xlu0 %v3638_v6, %s3424_s28  ;;  %v551_v20 = vshrl.u32 %v3638_v6, 16  ;;  %v1282_v21 = vshll.u32 %v3638_v6, 16  ;;  %v550_v54 = vpack.i.b16 %v3649_v9, %v3638_v6 }
  0x9b   : > { %516 = vst [vmem:[#allocation2 + $0x18] sm:$0xf] %v515_v7  ;;  %784 = vrot.lane.b32.xlu1 %v3643_v8, %s3424_s28  ;;  %v540_v24 = vshrl.u32 %v3643_v8, 16  ;;  %v1297_v25 = vshll.u32 %v3643_v8, 16  ;;  %v538_v52 = vpack.i.b16 %v3643_v8, %v3634_v2  ;;  %v3732_v3 = vld [vmem:[#allocation2 + $0x20] sm:$0x1]  ;;  %v1280_v7 = vor.u32 %v1279_v53, %v1276_v51 }
  0x9c   : > { %786 = vrot.lane.b32.xlu2 %v3649_v9, %s3424_s28  ;;  %v3691_v30 = vrot.slane %v1282_v21, 5  ;;  %v1287_v31 = vrot.slane %v551_v20, 4  ;;  %v553_v55 = vpack.i.b16 %v552_v19, %v551_v20  ;;  %v1293_v5 = vrot.slane %v1291_v49, 5  ;;  %v3787_v49 = vld [vmem:[#allocation2 + $0x2c] sm:$0x1] }
  0x9d   : > { %v1296_v34 = vrot.slane %v540_v24, 4  ;;  %v1299_v35 = vrot.slane %v1297_v25, 5  ;;  %v541_v56 = vpack.i.b16 %v540_v24, %v539_v33  ;;  %v1281_v28 = vrot.slane %v1280_v7, 4 }
  0x9e   : > { %v1288_v40 = vor.u32 %v1287_v31, %v3691_v30  ;;  %v3770_v31 = vunpack.c.0.s8 %v576_v43 }
  0x9f   : > { %v1300_v50 = vor.u32 %v1299_v35, %v1296_v34  ;;  %v3808_v53 = vsel %vm3728_vm5, %v1281_v28, %v3691_v30 }
  0xa0   : > { %v1289_v58 = vrot.slane %v1288_v40, 4 }
  0xa1   : > { %v480_v11 = vpop.permute.xlu1 %479  ;;  %v478_v12 = vpop.permute.xlu0 %477  ;;  %v3653_v13 = vld [vmem:[#allocation2 + $0x1c] sm:$0xf] }
  0xa2   : > { %524 = vst.msk [vmem:[#allocation2 + $0x28] sm:$0xf] %vm495_vm2, %v480_v11  ;;  %v522_v14 = vsel %vm3619_vm0, %v478_v12, %v521_v10  ;;  %v3658_v15 = vld [vmem:[#allocation2 + $0x18] sm:$0xf]  ;;  %v1322_v41 = vshll.u32 %v3653_v13, 16  ;;  %v557_v47 = vshrl.u32 %v3653_v13, 16  ;;  %v3736_v10 = vperm.slane %v550_v54, %v3697_v37 }
  0xa3   : > { %523 = vst [vmem:[#allocation2 + $0x24] sm:$0xf] %v522_v14  ;;  %790 = vrot.lane.b32.xlu1 %v3653_v13, %s3424_s28  ;;  %788 = vrot.lane.b32.xlu0 %v3658_v15, %s3424_s28  ;;  %v545_v44 = vshrl.u32 %v3658_v15, 16  ;;  %v1317_v46 = vshll.u32 %v3658_v15, 16  ;;  %v3739_v11 = vperm.slane %v553_v55, %v3697_v37  ;;  %v3742_v14 = vperm.slane %v541_v56, %v3697_v37 }
  0xa4   : > { %v1324_v59 = vrot.slane %v1322_v41, 5  ;;  %v1327_v62 = vrot.slane %v557_v47, 4  ;;  %v3749_v18 = vsel %vm3728_vm5, %v1289_v58, %v1293_v5  ;;  %v625_v32 = vrot.slane %v3736_v10, 4 }
  0xa5   : > { %v1316_v60 = vrot.slane %v545_v44, 4  ;;  %v1319_v61 = vrot.slane %v1317_v46, 5  ;;  %v599_v34 = vrot.slane %v3742_v14, 4  ;;  %vm2854_vm2 = vcmask 1041408  }
  0xa6   : > { %v1328_v20 = vor.u32 %v1327_v62, %v1324_v59  ;;  %vm2859_vm0 = vcmask 1043456  }
  0xa7   : > { %v1320_v19 = vor.u32 %v1319_v61, %v1316_v60 }
  0xa8   : > { %v1329_v41 = vrot.slane %v1328_v20, 4 }
  0xa9   : > { %v3664_v16 = vld [vmem:[#allocation2 + $0x28] sm:$0xf]  ;;  %v1321_v40 = vrot.slane %v1320_v19, 4  ;;  %v2071_v19 = vld [vmem:[#allocation2] sm:$0xe] }
  0xaa   : > { %v3666_v17 = vld [vmem:[#allocation2 + $0x24] sm:$0xf]  ;;  %v558_v45 = vshrl.u32 %v3664_v16, 16  ;;  %v556_v63 = vpack.i.b16 %v3664_v16, %v3653_v13  ;;  %v1342_v24 = vshll.u32 %v3664_v16, 16 }
  0xab   : > { %1026 = vrot.lane.b32.xlu1 %v3638_v6, %s3425_s29  ;;  %794 = vrot.lane.b32.xlu0 %v3664_v16, %s3424_s28  ;;  %v546_v57 = vshrl.u32 %v3666_v17, 16  ;;  %v544_v0 = vpack.i.b16 %v3666_v17, %v3658_v15  ;;  %v1337_v38 = vshll.u32 %v3666_v17, 16 }
  0xac   : > { %792 = vrot.lane.b32.xlu2 %v3666_v17, %s3424_s28  ;;  %v559_v4 = vpack.i.b16 %v558_v45, %v557_v47  ;;  %v622_v21 = vperm.slane %v556_v63, %v3697_v37  ;;  %v1347_v43 = vrot.slane %v558_v45, 4  ;;  %v1370_v63 = vshrl.u32 %v3749_v18, 16 }
  0xad   : > { %v547_v12 = vpack.i.b16 %v546_v57, %v545_v44  ;;  %v3766_v27 = vperm.slane %v544_v0, %v3697_v37  ;;  %v3781_v44 = vrot.slane %v1342_v24, 5  ;;  %v1336_v56 = vrot.slane %v546_v57, 4  ;;  %v2073_v57 = vld [vmem:[#allocation2 + $0x18] sm:$0xe] }
  0xae   : > { %v3763_v25 = vperm.slane %v559_v4, %v3697_v37  ;;  %v626_v42 = vsel %vm571_vm6, %v622_v21, %v625_v32  ;;  %v623_v58 = vrot.slane %v622_v21, 4  ;;  %v1358_v0 = vshrl.u32 %v3808_v53, 16 }
  0xaf   : > { %v3775_v33 = vperm.slane %v547_v12, %v3697_v37  ;;  %v3791_v51 = vperm.slane %v626_v42, %v3770_v31  ;;  %v1348_v30 = vor.u32 %v1347_v43, %v3781_v44  ;;  %v2102_v12 = vrot.slane %v3653_v13, 5 }
  0xb0   : > { %v624_v28 = vsel %vm571_vm6, %v623_v58, %v3736_v10 }
  0xb1   : > { %v600_v45 = vsel %vm571_vm6, %v3775_v33, %v599_v34  ;;  %v716_v61 = vunpack.c.l.b16 %v3791_v51  ;;  %v1349_v7 = vrot.slane %v1348_v30, 4  ;;  %v597_v34 = vrot.slane %v3775_v33, 4  ;;  %v2072_v33 = vld [vmem:[#allocation2 + $0xc] sm:$0xe] }
  0xb3   : > { %1032 = vrot.lane.b32.xlu1 %v3658_v15, %s3425_s29  ;;  %1024 = vrot.lane.b32.xlu0 %v3634_v2, %s3425_s29  ;;  %v1301_v2 = vrot.slane %v1300_v50, 4  ;;  %v3745_v15 = vperm.slane %v538_v52, %v3697_v37  ;;  %v1351_v50 = vshll.u32 %v3787_v49, 16  ;;  %v3803_v52 = vsel %vm3728_vm5, %v1321_v40, %v1324_v59 }
  0xb4   : > { %1028 = vrot.lane.b32.xlu2 %v3643_v8, %s3425_s29  ;;  %v1331_v8 = vshll.u32 %v3732_v3, 16  ;;  %v3826_v59 = vperm.slane %v600_v45, %v3770_v31  ;;  %v2088_v45 = vrot.slane %v3638_v6, 5  ;;  %v598_v30 = vsel %vm571_vm6, %v597_v34, %v3742_v14 }
  0xb5   : > { %v3759_v23 = vsel %vm3728_vm5, %v1301_v2, %v3678_v22  ;;  %v651_v22 = vrot.slane %v3739_v11, 4  ;;  %v573_v35 = vrot.slane %v3745_v15, 4  ;;  %v1353_v60 = vrot.slane %v1351_v50, 5 }
  0xb6   : > { %v1333_v29 = vrot.slane %v1331_v8, 5  ;;  %v3382_v8 = vrot.slane %v2073_v57, 9  ;;  %v1359_v20 = vshrl.u32 %v3759_v23, 16  ;;  %v686_v24 = vunpack.c.l.b16 %v3826_v59 }
  0xb7   : > { %v652_v46 = vsel %vm571_vm6, %v3763_v25, %v651_v22  ;;  %v574_v47 = vsel %vm571_vm6, %v3766_v27, %v573_v35  ;;  %v649_v22 = vrot.slane %v3763_v25, 4  ;;  %v3852_v10 = vsel %vm3728_vm5, %v1349_v7, %v1353_v60 }
  0xb8   : > { %v3811_v54 = vperm.slane %v652_v46, %v3770_v31  ;;  %v582_v55 = vperm.slane %v574_v47, %v3770_v31  ;;  %v3858_v25 = vperm.slane %v624_v28, %v3770_v31  ;;  %v687_v43 = vpack.c.b16 %v686_v24, %v686_v24  ;;  %v2074_v46 = vld [vmem:[#allocation2 + $0x24] sm:$0xe] }
  0xb9   : > { %v2109_v47 = vrot.slane %v3664_v16, 5  ;;  %v2112_v50 = vrot.slane %v3787_v49, 5  ;;  %v2090_v60 = vrot.slane %v2088_v45, 4  ;;  %v2091_v49 = vrot.slane %v3695_v36, 5 }
  0xba   : > { %v721_v2 = vunpack.c.l.b16 %v3811_v54  ;;  %v585_v4 = vrot.slane %v582_v55, 4  ;;  %v681_v32 = vunpack.c.l.b16 %v582_v55  ;;  %v2095_v6 = vrot.slane %v3649_v9, 5 }
  0xbb   : > { %1038 = vrot.lane.b32.xlu1 %v3664_v16, %s3425_s29  ;;  %1030 = vrot.lane.b32.xlu0 %v3649_v9, %s3425_s29  ;;  %v2111_v57 = vrot.slane %v2109_v47, 4  ;;  %v635_v16 = vrot.slane %v3858_v25, 4  ;;  %v2105_v7 = vrot.slane %v3732_v3, 5  ;;  %v3893_v9 = vsel %vm3846_vm9, %v2090_v60, %v2091_v49 }
  0xbc   : > { %1034 = vrot.lane.b32.xlu2 %v3653_v13, %s3425_s29  ;;  %v722_v35 = vpack.c.b16 %v721_v2, %v721_v2  ;;  %v570_v13 = vrot.slane %v3766_v27, 4  ;;  %v3862_v27 = vsel %vm3846_vm9, %v3382_v8, %v2102_v12  ;;  %v682_v55 = vpack.c.b16 %v681_v32, %v681_v32  ;;  %5387 = vst [vmem:[#allocation7_spill] sm:$0xff] %v3893_v9 }
  0xbd   : > { %5384 = vst [vmem:[#allocation4_spill] sm:$0xff] %v3862_v27  ;;  %v3383_v2 = vrot.slane %v2074_v46, 9  ;;  %v3883_v14 = vsel %vm3846_vm9, %v2111_v57, %v2112_v50  ;;  %v637_v28 = vrot.slane %v3791_v51, 4  ;;  %v1360_v49 = vpack.i.b16 %v1359_v20, %v1358_v0 }
  0xbe   : > { %v572_v58 = vsel %vm571_vm6, %v570_v13, %v3745_v15  ;;  %5385 = vst [vmem:[#allocation5_spill] sm:$0xff] %v3883_v14  ;;  %v2098_v15 = vrot.slane %v3686_v26, 5  ;;  %v2097_v26 = vrot.slane %v2095_v6, 4 }
  0xbf   : > { %v638_v57 = vsel %vm571_vm6, 0, %v637_v28  ;;  %v663_v28 = vrot.slane %v3811_v54, 4 }
  0xc0   : > { %v726_v20 = vunpack.c.l.b16 %v638_v57 }
  0xc3   : > { %1585 = vrot.lane.b32.xlu1 %v3749_v18, %s3424_s28  ;;  %1036 = vrot.lane.b32.xlu0 %v3666_v17, %s3425_s29  ;;  %v3797_v17 = vsel %vm3728_vm5, %v3707_v48, %v3700_v39  ;;  %v1339_v39 = vrot.slane %v1337_v38, 5  ;;  %v3820_v48 = vsel %vm3728_vm5, %v1329_v41, %v1333_v29  ;;  %v717_v29 = vpack.c.b16 %v716_v61, %v716_v61 }
  0xc4   : > { %1587 = vrot.lane.b32.xlu2 %v3759_v23, %s3424_s28  ;;  %v1371_v62 = vshrl.u32 %v3797_v17, 16  ;;  %v1369_v21 = vpack.i.b16 %v3797_v17, %v3749_v18  ;;  %v586_v38 = vsel %vm571_vm6, 0, %v585_v4  ;;  %v3380_v41 = vrot.slane %v2071_v19, 9 }
  0xc5   : > { %v1340_v5 = vor.u32 %v1339_v39, %v1336_v56  ;;  %v691_v56 = vunpack.c.l.b16 %v586_v38  ;;  %v650_v39 = vsel %vm571_vm6, %v649_v22, %v3739_v11  ;;  %v3381_v61 = vrot.slane %v2072_v33, 9 }
  0xc6   : > { %v3878_v4 = vperm.slane %v650_v39, %v3770_v31  ;;  %v604_v11 = vperm.slane %v598_v30, %v3770_v31  ;;  %v3889_v8 = vsel %vm3846_vm9, %v3380_v41, %v2088_v45  ;;  %v3896_v19 = vperm.slane %v572_v58, %v3770_v31 }
  0xc7   : > { %v1341_v42 = vrot.slane %v1340_v5, 4  ;;  %v2104_v5 = vrot.slane %v2102_v12, 4  ;;  %5386 = vst [vmem:[#allocation6_spill] sm:$0xff] %v3889_v8  ;;  %v692_v36 = vpack.c.b16 %v691_v56, %v691_v56  ;;  %v3900_v24 = vsel %vm3846_vm9, %v3381_v61, %v2095_v6 }
  0xc8   : > { %5388 = vst [vmem:[#allocation8_spill] sm:$0xff] %v3900_v24  ;;  %v1375_v3 = vpack.i.b16 %v3852_v10, %v3820_v48  ;;  %v636_v12 = vsel %vm571_vm6, 0, %v635_v16  ;;  %v2117_v32 = vshrl.u32 %v3889_v8, 16  ;;  %v2129_v22 = vshrl.u32 %v3893_v9, 16 }
  0xc9   : > { %v2118_v34 = vshrl.u32 %v3900_v24, 16  ;;  %v701_v13 = vunpack.c.l.b16 %v3878_v4  ;;  %v666_v51 = vunpack.c.l.b16 %v604_v11  ;;  %v3923_v38 = vsel %vm3846_vm9, %v2104_v5, %v2105_v7 }
  0xca   : > { %5391 = vst [vmem:[#allocation11_spill] sm:$0xff] %v3923_v38  ;;  %v706_v33 = vunpack.c.l.b16 %v636_v12  ;;  %v3932_v50 = vsel %vm3728_vm5, %v1341_v42, %v3781_v44  ;;  %v1357_v45 = vpack.i.b16 %v3759_v23, %v3808_v53  ;;  %v3940_v40 = vperm.slane %v1369_v21, %v3697_v37 }
  0xcb   : > { %1591 = vrot.lane.b32.xlu1 %v3803_v52, %s3424_s28  ;;  %1583 = vrot.lane.b32.xlu0 %v3808_v53, %s3424_s28  ;;  %v2123_v56 = vshrl.u32 %v3862_v27, 16  ;;  %v2135_v39 = vshrl.u32 %v3923_v38, 16  ;;  %v2119_v30 = vpack.i.b16 %v2118_v34, %v2117_v32  ;;  %v3945_v1 = vperm.slane %v1375_v3, %v3697_v37 }
  0xcc   : > { %1593 = vrot.lane.b32.xlu2 %v3820_v48, %s3424_s28  ;;  %v702_v44 = vpack.c.b16 %v701_v13, %v701_v13  ;;  %v667_v42 = vpack.c.b16 %v666_v51, %v666_v51  ;;  %v707_v60 = vpack.c.b16 %v706_v33, %v706_v33  ;;  %v1443_v6 = vrot.slane %v3940_v40, 4 }
  0xcd   : > { %v1364_v5 = vshrl.u32 %v3803_v52, 16  ;;  %v3963_v7 = vperm.slane %v2119_v30, %v3697_v37  ;;  %v1383_v13 = vperm.slane %v1357_v45, %v3697_v37  ;;  %v1409_v51 = vperm.slane %v1360_v49, %v3697_v37 }
  0xce   : > { %v1444_v3 = vsel %vm571_vm6, %v3945_v1, %v1443_v6  ;;  %v1376_v33 = vshrl.u32 %v3820_v48, 16  ;;  %v661_v49 = vrot.slane %v3878_v4, 4  ;;  %vm3171_vm5 = vcmask 31744  }
  0xcf   : > { %5392 = vst [vmem:[#allocation12_spill] sm:$0xff] %v3963_v7  ;;  %v1391_v57 = vrot.slane %v1383_v13, 4 }
  0xd3   : > { %718 = vrot.lane.b32.xlu1 %v717_v29, %s3428_s30  ;;  %1589 = vrot.lane.b32.xlu0 %v3797_v17, %s3424_s28  ;;  %v3910_v29 = vsel %vm3846_vm9, %v3383_v2, %v2109_v47  ;;  %v2136_v47 = vshrl.u32 %v3883_v14, 16  ;;  %v1365_v2 = vshrl.u32 %v3932_v50, 16 }
  0xd4   : > { %723 = vrot.lane.b32.xlu2 %v722_v35, %s3429_s7  ;;  %5389 = vst [vmem:[#allocation9_spill] sm:$0xff] %v3910_v29  ;;  %v3918_v35 = vsel %vm3846_vm9, %v2097_v26, %v2098_v15  ;;  %v2124_v46 = vshrl.u32 %v3910_v29, 16  ;;  %v1363_v15 = vpack.i.b16 %v3932_v50, %v3803_v52  ;;  %v611_v26 = vrot.slane %v3826_v59, 4 }
  0xd5   : > { %5390 = vst [vmem:[#allocation10_spill] sm:$0xff] %v3918_v35  ;;  %v2130_v41 = vshrl.u32 %v3918_v35, 16  ;;  %v2137_v21 = vpack.i.b16 %v2136_v47, %v2135_v39  ;;  %v1366_v34 = vpack.i.b16 %v1365_v2, %v1364_v5  ;;  %v664_v39 = vsel %vm571_vm6, 0, %v663_v28 }
  0xd6   : > { %v2125_v16 = vpack.i.b16 %v2124_v46, %v2123_v56  ;;  %v1388_v59 = vperm.slane %v1363_v15, %v3697_v37  ;;  %v727_v46 = vpack.c.b16 %v726_v20, %v726_v20  ;;  %v3987_v56 = vperm.slane %v1444_v3, %v3770_v31 }
  0xd7   : > { %v2131_v58 = vpack.i.b16 %v2130_v41, %v2129_v22  ;;  %v3976_v22 = vperm.slane %v2137_v21, %v3697_v37  ;;  %v1377_v41 = vshrl.u32 %v3852_v10, 16  ;;  %v1417_v21 = vrot.slane %v1409_v51, 4 }
  0xd8   : > { %v3973_v32 = vperm.slane %v2125_v16, %v3697_v37  ;;  %v731_v16 = vunpack.c.l.b16 %v664_v39  ;;  %v1534_v2 = vunpack.c.l.b16 %v3987_v56  ;;  %v1392_v6 = vsel %vm571_vm6, %v1388_v59, %v1391_v57 }
  0xd9   : > { %v3966_v0 = vperm.slane %v2131_v58, %v3697_v37  ;;  %5395 = vst [vmem:[#allocation15_spill] sm:$0xff] %v3976_v22  ;;  %v1389_v28 = vrot.slane %v1388_v59, 4 }
  0xda   : > { %5394 = vst [vmem:[#allocation14_spill] sm:$0xff] %v3973_v32 }
  0xdb   : > { %688 = vrot.lane.b32.xlu1 %v687_v43, %s3429_s7  ;;  %683 = vrot.lane.b32.xlu0 %v682_v55, %s3428_s30  ;;  %v583_v43 = vrot.slane %v3896_v19, 4  ;;  %v609_v55 = vrot.slane %v604_v11, 4  ;;  %5393 = vst [vmem:[#allocation13_spill] sm:$0xff] %v3966_v0  ;;  %v2228_v54 = vrot.slane %v3966_v0, 4 }
  0xdc   : > { %693 = vrot.lane.b32.xlu2 %v692_v36, %s3430_s8 }
  0xdd   : > { %v584_v61 = vsel %vm571_vm6, 0, %v583_v43  ;;  %v610_v11 = vsel %vm571_vm6, 0, %v609_v55  ;;  %v2176_v43 = vrot.slane %v3963_v7, 4  ;;  %v612_v55 = vsel %vm571_vm6, 0, %v611_v26 }
  0xde   : > { %v671_v36 = vunpack.c.l.b16 %v584_v61  ;;  %v676_v12 = vunpack.c.l.b16 %v610_v11  ;;  %v3996_v58 = vsel %vm571_vm6, %v3976_v22, %v2228_v54  ;;  %v696_v61 = vunpack.c.l.b16 %v612_v55 }
  0xdf   : > { %v3992_v30 = vsel %vm571_vm6, %v3973_v32, %v2176_v43  ;;  %5397 = vst [vmem:[#allocation17_spill] sm:$0xff] %v3996_v58  ;;  %v662_v26 = vsel %vm571_vm6, 0, %v661_v49 }
  0xe0   : > { %v672_v47 = vpack.c.b16 %v671_v36, %v671_v36  ;;  %v677_v45 = vpack.c.b16 %v676_v12, %v676_v12  ;;  %5396 = vst [vmem:[#allocation16_spill] sm:$0xff] %v3992_v30  ;;  %v697_v20 = vpack.c.b16 %v696_v61, %v696_v61  ;;  %v1535_v36 = vpack.c.b16 %v1534_v2, %v1534_v2 }
  0xe1   : > { %v1441_v61 = vrot.slane %v3945_v1, 4 }
  0xe3   : > { %703 = vrot.lane.b32.xlu1 %v702_v44, %s3431_s9  ;;  %668 = vrot.lane.b32.xlu0 %v667_v42, %s3431_s9  ;;  %v1414_v44 = vperm.slane %v1366_v34, %v3697_v37  ;;  %v1378_v42 = vpack.i.b16 %v1377_v41, %v1376_v33  ;;  %v711_v33 = vunpack.c.l.b16 %v662_v26  ;;  %v1442_v1 = vsel %vm571_vm6, %v1441_v61, %v3940_v40 }
  0xe4   : > { %708 = vrot.lane.b32.xlu2 %v707_v60, %s3432_s10  ;;  %v1372_v60 = vpack.i.b16 %v1371_v62, %v1370_v63  ;;  %v732_v62 = vpack.c.b16 %v731_v16, %v731_v16  ;;  %v1400_v63 = vperm.slane %v1392_v6, %v3770_v31  ;;  %v1455_v6 = vrot.slane %v3987_v56, 4 }
  0xe5   : > { %v1466_v11 = vperm.slane %v1378_v42, %v3697_v37  ;;  %v1418_v15 = vsel %vm571_vm6, %v1414_v44, %v1417_v21  ;;  %v1415_v12 = vrot.slane %v1414_v44, 4  ;;  %v712_v39 = vpack.c.b16 %v711_v33, %v711_v33 }
  0xe6   : > { %v1461_v5 = vperm.slane %v1372_v60, %v3697_v37  ;;  %v1426_v3 = vperm.slane %v1418_v15, %v3770_v31  ;;  %v1499_v43 = vunpack.c.l.b16 %v1400_v63  ;;  %v1403_v49 = vrot.slane %v1400_v63, 4 }
  0xe7   : > { %v1467_v4 = vrot.slane %v1466_v11, 4  ;;  %v4043_v26 = vperm.slane %v1442_v1, %v3770_v31 }
  0xe8   : > { %v1469_v41 = vrot.slane %v1461_v5, 4  ;;  %v1504_v54 = vunpack.c.l.b16 %v1426_v3  ;;  %v1500_v44 = vpack.c.b16 %v1499_v43, %v1499_v43 }
  0xe9   : > { %v1468_v55 = vsel %vm571_vm6, %v1467_v4, %v1461_v5  ;;  %v1453_v4 = vrot.slane %v4043_v26, 4 }
  0xea   : > { %v1505_v57 = vpack.c.b16 %v1504_v54, %v1504_v54  ;;  %v1474_v60 = vperm.slane %v1468_v55, %v3770_v31 }
  0xeb   : > { %728 = vrot.lane.b32.xlu0 %v727_v46, %s3430_s8  ;;  %673 = vrot.lane.b32.xlu1 %v672_v47, %s3432_s10  ;;  %v1470_v46 = vsel %vm571_vm6, %v1466_v11, %v1469_v41  ;;  %v1416_v47 = vsel %vm571_vm6, %v1415_v12, %v1409_v51 }
  0xec   : > { %678 = vrot.lane.b32.xlu2 %v677_v45, %s3433_s11  ;;  %v1390_v45 = vsel %vm571_vm6, %v1389_v28, %v1383_v13  ;;  %v1478_v59 = vperm.slane %v1470_v46, %v3770_v31  ;;  %v1422_v42 = vperm.slane %v1416_v47, %v3770_v31  ;;  %v1519_v2 = vunpack.c.l.b16 %v1474_v60 }
  0xed   : > { %v4031_v51 = vperm.slane %v1390_v45, %v3770_v31  ;;  %v1429_v28 = vrot.slane %v1426_v3, 4  ;;  %v1454_v47 = vsel %vm571_vm6, 0, %v1453_v4 }
  0xee   : > { %v4018_v34 = vpop.permute.xlu2 %780  ;;  %v1539_v13 = vunpack.c.l.b16 %v1478_v59  ;;  %v1484_v16 = vunpack.c.l.b16 %v1422_v42  ;;  %v1481_v41 = vrot.slane %v1478_v59, 4  ;;  %v1427_v61 = vrot.slane %v1422_v42, 4 }
  0xef   : > { %v1401_v11 = vrot.slane %v4031_v51, 4  ;;  %v1430_v55 = vsel %vm571_vm6, 0, %v1429_v28 }
  0xf0   : > { %v1540_v15 = vpack.c.b16 %v1539_v13, %v1539_v13  ;;  %v1485_v5 = vpack.c.b16 %v1484_v16, %v1484_v16  ;;  %v1482_v45 = vsel %vm571_vm6, 0, %v1481_v41  ;;  %v1514_v59 = vunpack.c.l.b16 %v1430_v55 }
  0xf1   : > { %v1402_v56 = vsel %vm571_vm6, 0, %v1401_v11  ;;  %v1479_v13 = vrot.slane %v1474_v60, 4  ;;  %v1428_v11 = vsel %vm571_vm6, 0, %v1427_v61 }
  0xf2   : > { %v1489_v12 = vunpack.c.l.b16 %v1402_v56  ;;  %v1494_v60 = vunpack.c.l.b16 %v1428_v11 }
  0xf3   : > { %698 = vrot.lane.b32.xlu0 %v697_v20, %s3434_s12  ;;  %733 = vrot.lane.b32.xlu1 %v732_v62, %s3434_s12  ;;  %v1520_v20 = vpack.c.b16 %v1519_v2, %v1519_v2  ;;  %v1404_v62 = vsel %vm571_vm6, 0, %v1403_v49  ;;  %v1515_v2 = vpack.c.b16 %v1514_v59, %v1514_v59  ;;  %v1480_v1 = vsel %vm571_vm6, 0, %v1479_v13 }
  0xf4   : > { %1536 = vrot.lane.b32.xlu2 %v1535_v36, %s3428_s30  ;;  %v1456_v36 = vsel %vm571_vm6, 0, %v1455_v6  ;;  %v1509_v63 = vunpack.c.l.b16 %v1404_v62  ;;  %v1490_v46 = vpack.c.b16 %v1489_v12, %v1489_v12  ;;  %v1495_v12 = vpack.c.b16 %v1494_v60, %v1494_v60 }
  0xf5   : > { %v1544_v40 = vunpack.c.l.b16 %v1456_v36 }
  0xf6   : > { %v4034_v21 = vpop.permute.xlu2 %786  ;;  %v1510_v43 = vpack.c.b16 %v1509_v63, %v1509_v63 }
  0xf7   : > { %v1545_v54 = vpack.c.b16 %v1544_v40, %v1544_v40 }
  0xfb   : > { %713 = vrot.lane.b32.xlu0 %v712_v39, %s3433_s11  ;;  %1501 = vrot.lane.b32.xlu1 %v1500_v44, %s3428_s30  ;;  %v1524_v44 = vunpack.c.l.b16 %v1454_v47 }
  0xfc   : > { %1506 = vrot.lane.b32.xlu2 %v1505_v57, %s3429_s7  ;;  %v1549_v57 = vunpack.c.l.b16 %v1482_v45  ;;  %v799_v45 = vshrl.u32 %v4018_v34, 16 }
  0xfd   : > { %v1525_v16 = vpack.c.b16 %v1524_v44, %v1524_v44 }
  0xfe   : > { %v1550_v6 = vpack.c.b16 %v1549_v57, %v1549_v57 }
 0x103   : > { %1541 = vrot.lane.b32.xlu0 %v1540_v15, %s3429_s7  ;;  %1486 = vrot.lane.b32.xlu1 %v1485_v5, %s3431_s9 }
 0x104   : > { %1521 = vrot.lane.b32.xlu2 %v1520_v20, %s3431_s9  ;;  %v1529_v20 = vunpack.c.l.b16 %v1480_v1 }
 0x106   : > { %v793_v33 = vpop.permute.xlu2 %792  ;;  %v1530_v4 = vpack.c.b16 %v1529_v20, %v1529_v20 }
 0x107   : > { %v806_v62 = vshrl.u32 %v793_v33, 16 }
 0x10b   : > { %1511 = vrot.lane.b32.xlu0 %v1510_v43, %s3430_s8  ;;  %1546 = vrot.lane.b32.xlu1 %v1545_v54, %s3430_s8 }
 0x10c   : > { %1491 = vrot.lane.b32.xlu2 %v1490_v46, %s3432_s10  ;;  %v4056_v39 = vpop.permute.xlu0 %782 }
 0x10d   : > { %v785_v3 = vpop.permute.xlu1 %784  ;;  %v810_v40 = vpack.i.b16 %v4034_v21, %v4056_v39 }
 0x10e   : > { %v4058_v49 = vpop.permute.xlu2 %1028  ;;  %v798_v15 = vpack.i.b16 %v785_v3, %v4018_v34  ;;  %v800_v43 = vshrl.u32 %v785_v3, 16 }
 0x10f   : > { %v4078_v54 = vperm.slane %v810_v40, %v3697_v37 }
 0x110   : > { %v4067_v63 = vperm.slane %v798_v15, %v3697_v37  ;;  %v801_v61 = vpack.i.b16 %v800_v43, %v799_v45 }
 0x111   : > { %v884_v3 = vrot.slane %v4078_v54, 4 }
 0x112   : > { %v4104_v11 = vperm.slane %v801_v61, %v3697_v37 }
 0x113   : > { %1526 = vrot.lane.b32.xlu0 %v1525_v16, %s3432_s10  ;;  %1516 = vrot.lane.b32.xlu1 %v1515_v2, %s3434_s12 }
 0x114   : > { %1551 = vrot.lane.b32.xlu2 %v1550_v6, %s3434_s12 }
 0x115   : > { %v791_v5 = vpop.permute.xlu1 %790  ;;  %v789_v42 = vpop.permute.xlu0 %788 }
 0x116   : > { %v804_v36 = vpack.i.b16 %v793_v33, %v789_v42  ;;  %v805_v56 = vshrl.u32 %v789_v42, 16  ;;  %v832_v33 = vrot.slane %v4067_v63, 4  ;;  %v1035_v46 = vpop.permute.xlu2 %1034 }
 0x117   : > { %v1061_v45 = vshrl.u32 %v1035_v46, 16 }
 0x118   : > { %v807_v28 = vpack.i.b16 %v806_v62, %v805_v56  ;;  %v4072_v41 = vperm.slane %v804_v36, %v3697_v37  ;;  %v812_v36 = vshrl.u32 %v4034_v21, 16  ;;  %v811_v56 = vshrl.u32 %v4056_v39, 16 }
 0x11a   : > { %v4082_v44 = vperm.slane %v807_v28, %v3697_v37  ;;  %v833_v57 = vsel %vm571_vm6, %v4072_v41, %v832_v33  ;;  %v813_v43 = vpack.i.b16 %v812_v36, %v811_v56  ;;  %v817_v33 = vshrl.u32 %v791_v5, 16 }
 0x11b   : > { %1496 = vrot.lane.b32.xlu0 %v1495_v12, %s3433_s11  ;;  %1531 = vrot.lane.b32.xlu1 %v1530_v4, %s3433_s11  ;;  %v4091_v16 = vperm.slane %v833_v57, %v3770_v31 }
 0x11c   : > { %v856_v2 = vrot.slane %v4082_v44, 4 }
 0x11d   : > { %v1027_v47 = vpop.permute.xlu1 %1026  ;;  %v795_v55 = vpop.permute.xlu0 %794  ;;  %v940_v60 = vunpack.c.l.b16 %v4091_v16 }
 0x11e   : > { %v816_v59 = vpack.i.b16 %v795_v55, %v791_v5  ;;  %v4108_v20 = vpop.permute.xlu2 %1587  ;;  %v857_v62 = vsel %vm571_vm6, %v856_v2, %v4104_v11  ;;  %v818_v12 = vshrl.u32 %v795_v55, 16 }
 0x11f   : > { %v941_v4 = vpack.c.b16 %v940_v60, %v940_v60  ;;  %v4116_v28 = vperm.slane %v857_v62, %v3770_v31 }
 0x120   : > { %v4088_v13 = vperm.slane %v816_v59, %v3697_v37  ;;  %v1055_v59 = vshrl.u32 %v1027_v47, 16  ;;  %v819_v57 = vpack.i.b16 %v818_v12, %v817_v33  ;;  %v1044_v12 = vshrl.u32 %v4058_v49, 16 }
 0x121   : > { %v925_v21 = vunpack.c.l.b16 %v4116_v28 }
 0x122   : > { %v885_v34 = vsel %vm571_vm6, %v4088_v13, %v884_v3 }
 0x123   : > { %1595 = vrot.lane.b32.xlu0 %v3932_v50, %s3424_s28  ;;  %1597 = vrot.lane.b32.xlu1 %v3852_v10, %s3424_s28  ;;  %v4101_v6 = vperm.slane %v885_v34, %v3770_v31 }
 0x125   : > { %v1033_v1 = vpop.permute.xlu1 %1032  ;;  %v1025_v15 = vpop.permute.xlu0 %1024  ;;  %v975_v42 = vunpack.c.l.b16 %v4101_v6 }
 0x126   : > { %v1043_v60 = vshrl.u32 %v1025_v15, 16  ;;  %v4123_v62 = vpop.permute.xlu2 %1593  ;;  %v1042_v5 = vpack.i.b16 %v4058_v49, %v1025_v15 }
 0x127   : > { %v976_v40 = vpack.c.b16 %v975_v42, %v975_v42  ;;  %v4121_v42 = vperm.slane %v813_v43, %v3697_v37  ;;  %v1620_v14 = vshrl.u32 %v4123_v62, 16 }
 0x128   : > { %v4138_v15 = vperm.slane %v1042_v5, %v3697_v37 }
 0x129   : > { %977 = vrot.lane.b32.xlu2 %v976_v40, %s3428_s30 }
 0x12b   : > { %942 = vrot.lane.b32.xlu1 %v941_v4, %s3428_s30  ;;  %v4129_v4 = vperm.slane %v819_v57, %v3697_v37 }
 0x12d   : > { %v1039_v61 = vpop.permute.xlu1 %1038  ;;  %v1031_v3 = vpop.permute.xlu0 %1030 }
 0x12e   : > { %v1060_v39 = vpack.i.b16 %v1039_v61, %v1035_v46  ;;  %v1062_v2 = vshrl.u32 %v1039_v61, 16  ;;  %v1054_v55 = vpack.i.b16 %v1031_v3, %v1027_v47  ;;  %v1056_v34 = vshrl.u32 %v1031_v3, 16 }
 0x12f   : > { %v926_v46 = vpack.c.b16 %v925_v21, %v925_v21  ;;  %v910_v61 = vrot.slane %v4121_v42, 4  ;;  %v1045_v3 = vpack.i.b16 %v1044_v12, %v1043_v60  ;;  %v896_v12 = vrot.slane %v4101_v6, 4 }
 0x130   : > { %v1063_v36 = vpack.i.b16 %v1062_v2, %v1061_v45  ;;  %v1057_v56 = vpack.i.b16 %v1056_v34, %v1055_v59  ;;  %v1120_v40 = vperm.slane %v1054_v55, %v3697_v37  ;;  %v1125_v47 = vperm.slane %v1060_v39, %v3697_v37 }
 0x131   : > { %v911_v2 = vsel %vm571_vm6, %v4129_v4, %v910_v61  ;;  %v1049_v55 = vshrl.u32 %v1033_v1, 16 }
 0x132   : > { %v1128_v33 = vrot.slane %v1120_v40, 4  ;;  %v4133_v43 = vperm.slane %v1057_v56, %v3697_v37  ;;  %v1151_v49 = vperm.slane %v1063_v36, %v3697_v37 }
 0x133   : > { %927 = vrot.lane.b32.xlu1 %v926_v46, %s3431_s9  ;;  %v1076_v46 = vrot.slane %v4138_v15, 4 }
 0x134   : > { %v1154_v45 = vrot.slane %v4133_v43, 4  ;;  %v1129_v59 = vsel %vm571_vm6, %v1125_v47, %v1128_v33  ;;  %v1094_v33 = vperm.slane %v1045_v3, %v3697_v37 }
 0x135   : > { %v4143_v57 = vpop.permute.xlu1 %1585  ;;  %v1037_v21 = vpop.permute.xlu0 %1036  ;;  %v4146_v39 = vperm.slane %v1129_v59, %v3770_v31 }
 0x136   : > { %v1048_v34 = vpack.i.b16 %v1037_v21, %v1033_v1  ;;  %v1050_v60 = vshrl.u32 %v1037_v21, 16  ;;  %v1155_v5 = vsel %vm571_vm6, %v1151_v49, %v1154_v45  ;;  %v4163_v45 = vperm.slane %v911_v2, %v3770_v31 }
 0x137   : > { %v1219_v36 = vunpack.c.l.b16 %v4146_v39  ;;  %v4153_v56 = vperm.slane %v1155_v5, %v3770_v31  ;;  %v858_v21 = vrot.slane %v4104_v11, 4  ;;  %v4166_v5 = vpop.permute.xlu2 %723  ;;  %v1614_v9 = vshrl.u32 %v4143_v57, 16 }
 0x138   : > { %v1051_v59 = vpack.i.b16 %v1050_v60, %v1049_v55  ;;  %v4159_v58 = vperm.slane %v1048_v34, %v3697_v37  ;;  %5398 = vst [vmem:[#allocation18_spill] sm:$0xff] %v4166_v5  ;;  %v1102_v34 = vrot.slane %v1094_v33, 4  ;;  %v897_v60 = vsel %vm571_vm6, 0, %v896_v12 }
 0x139   : > { %v1220_v61 = vpack.c.b16 %v1219_v36, %v1219_v36  ;;  %v1224_v1 = vunpack.c.l.b16 %v4153_v56  ;;  %v859_v2 = vsel %vm571_vm6, %v4082_v44, %v858_v21  ;;  %v1126_v36 = vrot.slane %v1125_v47, 4 }
 0x13a   : > { %v1099_v6 = vperm.slane %v1051_v59, %v3697_v37  ;;  %v1077_v30 = vsel %vm571_vm6, %v4159_v58, %v1076_v46  ;;  %v980_v46 = vunpack.c.l.b16 %v4163_v45  ;;  %v867_v22 = vperm.slane %v859_v2, %v3770_v31 }
 0x13b   : > { %1221 = vrot.lane.b32.xlu0 %v1220_v61, %s3428_s30  ;;  %v1225_v3 = vpack.c.b16 %v1224_v1, %v1224_v1  ;;  %v1085_v55 = vperm.slane %v1077_v30, %v3770_v31  ;;  %v985_v30 = vunpack.c.l.b16 %v897_v60  ;;  %v908_v12 = vrot.slane %v4129_v4, 4 }
 0x13c   : > { %v1103_v61 = vsel %vm571_vm6, %v1099_v6, %v1102_v34  ;;  %v981_v44 = vpack.c.b16 %v980_v46, %v980_v46  ;;  %v1127_v21 = vsel %vm571_vm6, %v1126_v36, %v1120_v40  ;;  %v945_v34 = vunpack.c.l.b16 %v867_v22 }
 0x13d   : > { %v4176_v11 = vpop.permute.xlu1 %1591  ;;  %1226 = vrot.lane.b32.xlu1 %v1225_v3, %s3429_s7  ;;  %v4179_v59 = vpop.permute.xlu0 %1583  ;;  %v1184_v0 = vunpack.c.l.b16 %v1085_v55  ;;  %v1088_v7 = vrot.slane %v1085_v55, 4  ;;  %v4187_v47 = vperm.slane %v1103_v61, %v3770_v31  ;;  %v1152_v3 = vrot.slane %v1151_v49, 4 }
 0x13e   : > { %v986_v32 = vpack.c.b16 %v985_v30, %v985_v30  ;;  %v909_v4 = vsel %vm571_vm6, %v908_v12, %v4121_v42  ;;  %v4197_v55 = vperm.slane %v1127_v21, %v3770_v31  ;;  %v946_v46 = vpack.c.b16 %v945_v34, %v945_v34 }
 0x13f   : > { %v1185_v1 = vpack.c.b16 %v1184_v0, %v1184_v0  ;;  %v4191_v0 = vpop.permute.xlu2 %693  ;;  %v1089_v60 = vsel %vm571_vm6, 0, %v1088_v7  ;;  %v1189_v49 = vunpack.c.l.b16 %v4187_v47  ;;  %v1153_v36 = vsel %vm571_vm6, %v1152_v3, %v4133_v43 }
 0x140   : > { %5399 = vst [vmem:[#allocation19_spill] sm:$0xff] %v4191_v0  ;;  %v1194_v61 = vunpack.c.l.b16 %v1089_v60  ;;  %v915_v7 = vperm.slane %v909_v4, %v3770_v31  ;;  %v1138_v42 = vrot.slane %v4197_v55, 4  ;;  %v830_v30 = vrot.slane %v4072_v41, 4 }
 0x141   : > { %1186 = vrot.lane.b32.xlu2 %v1185_v1, %s3428_s30  ;;  %v1100_v1 = vrot.slane %v1099_v6, 4  ;;  %v1190_v12 = vpack.c.b16 %v1189_v49, %v1189_v49  ;;  %v844_v49 = vrot.slane %v4091_v16, 4  ;;  %v1074_v16 = vrot.slane %v4159_v58, 4 }
 0x142   : > { %v1195_v43 = vpack.c.b16 %v1194_v61, %v1194_v61  ;;  %v960_v21 = vunpack.c.l.b16 %v915_v7  ;;  %v1139_v3 = vsel %vm571_vm6, 0, %v1138_v42  ;;  %v831_v4 = vsel %vm571_vm6, %v830_v30, %v4067_v63 }
 0x143   : > { %982 = vrot.lane.b32.xlu0 %v981_v44, %s3429_s7  ;;  %v882_v44 = vrot.slane %v4088_v13, 4  ;;  %v1101_v6 = vsel %vm571_vm6, %v1100_v1, %v1094_v33  ;;  %v870_v1 = vrot.slane %v867_v22, 4  ;;  %v4233_v42 = vperm.slane %v831_v4, %v3770_v31 }
 0x144   : > { %v1107_v61 = vperm.slane %v1101_v6, %v3770_v31  ;;  %v845_v63 = vsel %vm571_vm6, 0, %v844_v49  ;;  %v1075_v58 = vsel %vm571_vm6, %v1074_v16, %v4138_v15  ;;  %v1140_v15 = vrot.slane %v4146_v39, 4 }
 0x145   : > { %v4199_v2 = vpop.permute.xlu1 %718  ;;  %987 = vrot.lane.b32.xlu1 %v986_v32, %s3430_s8  ;;  %v4202_v40 = vpop.permute.xlu0 %1589  ;;  %v4212_v32 = vperm.slane %v1153_v36, %v3770_v31  ;;  %v961_v36 = vpack.c.b16 %v960_v21, %v960_v21  ;;  %v883_v33 = vsel %vm571_vm6, %v882_v44, %v4078_v54  ;;  %v871_v54 = vsel %vm571_vm6, 0, %v870_v1 }
 0x146   : > { %5400 = vst [vmem:[#allocation20_spill] sm:$0xff] %v4199_v2  ;;  %v4238_v30 = vperm.slane %v883_v33, %v3770_v31  ;;  %v1169_v21 = vunpack.c.l.b16 %v1107_v61  ;;  %v842_v22 = vrot.slane %v4233_v42, 4  ;;  %v950_v6 = vunpack.c.l.b16 %v845_v63 }
 0x147   : > { %v1204_v60 = vunpack.c.l.b16 %v4212_v32  ;;  %v4226_v13 = vpop.permute.xlu2 %708  ;;  %v955_v49 = vunpack.c.l.b16 %v871_v54  ;;  %v920_v33 = vrot.slane %v915_v7, 4  ;;  %v922_v35 = vrot.slane %v4163_v45, 4 }
 0x148   : > { %v1170_v4 = vpack.c.b16 %v1169_v21, %v1169_v21  ;;  %v951_v1 = vpack.c.b16 %v950_v6, %v950_v6  ;;  %v1615_v24 = vshrl.u32 %v4202_v40, 16  ;;  %v1613_v8 = vpack.i.b16 %v4202_v40, %v4143_v57 }
 0x149   : > { %947 = vrot.lane.b32.xlu2 %v946_v46, %s3429_s7  ;;  %v1209_v46 = vunpack.c.l.b16 %v1139_v3  ;;  %v956_v63 = vpack.c.b16 %v955_v49, %v955_v49  ;;  %v921_v54 = vsel %vm571_vm6, 0, %v920_v33 }
 0x14a   : > { %v1679_v38 = vperm.slane %v1613_v8, %v3697_v37 }
 0x14b   : > { %1191 = vrot.lane.b32.xlu0 %v1190_v12, %s3429_s7  ;;  %v1205_v12 = vpack.c.b16 %v1204_v60, %v1204_v60  ;;  %v894_v60 = vrot.slane %v4238_v30, 4 }
 0x14d   : > { %v4218_v34 = vpop.permute.xlu1 %688  ;;  %1196 = vrot.lane.b32.xlu1 %v1195_v43, %s3430_s8  ;;  %v4221_v41 = vpop.permute.xlu0 %683  ;;  %v1210_v43 = vpack.c.b16 %v1209_v46, %v1209_v46  ;;  %v843_v46 = vsel %vm571_vm6, 0, %v842_v22 }
 0x14e   : > { %5401 = vst [vmem:[#allocation21_spill] sm:$0xff] %v4218_v34  ;;  %v930_v21 = vunpack.c.l.b16 %v843_v46 }
 0x151   : > { %962 = vrot.lane.b32.xlu2 %v961_v36, %s3431_s9  ;;  %v4252_v36 = vpop.permute.xlu2 %678 }
 0x153   : > { %1206 = vrot.lane.b32.xlu0 %v1205_v12, %s3431_s9  ;;  %v895_v12 = vsel %vm571_vm6, 0, %v894_v60  ;;  %v931_v60 = vpack.c.b16 %v930_v21, %v930_v21 }
 0x154   : > { %v965_v22 = vunpack.c.l.b16 %v895_v12 }
 0x155   : > { %v4244_v44 = vpop.permute.xlu1 %703  ;;  %1211 = vrot.lane.b32.xlu1 %v1210_v43, %s3432_s10  ;;  %v4247_v3 = vpop.permute.xlu0 %668  ;;  %v4258_v43 = vperm.slane %v1075_v58, %v3770_v31  ;;  %v1141_v58 = vsel %vm571_vm6, 0, %v1140_v15  ;;  %v868_v15 = vrot.slane %v4116_v28, 4 }
 0x156   : > { %v966_v49 = vpack.c.b16 %v965_v22, %v965_v22 }
 0x157   : > { %v1086_v6 = vrot.slane %v4258_v43, 4 }
 0x159   : > { %1171 = vrot.lane.b32.xlu2 %v1170_v4, %s3431_s9  ;;  %v970_v4 = vunpack.c.l.b16 %v921_v54  ;;  %v4271_v46 = vpop.permute.xlu2 %1536  ;;  %v1087_v39 = vsel %vm571_vm6, 0, %v1086_v6  ;;  %v923_v6 = vsel %vm571_vm6, 0, %v922_v35 }
 0x15a   : > { %v1174_v54 = vunpack.c.l.b16 %v1087_v39 }
 0x15b   : > { %952 = vrot.lane.b32.xlu0 %v951_v1, %s3430_s8  ;;  %v1112_v1 = vrot.slane %v1107_v61, 4  ;;  %v971_v33 = vpack.c.b16 %v970_v4, %v970_v4 }
 0x15c   : > { %v1175_v4 = vpack.c.b16 %v1174_v54, %v1174_v54 }
 0x15d   : > { %v4263_v16 = vpop.permute.xlu1 %673  ;;  %957 = vrot.lane.b32.xlu1 %v956_v63, %s3434_s12  ;;  %v4266_v7 = vpop.permute.xlu0 %728  ;;  %v1229_v63 = vunpack.c.l.b16 %v1141_v58  ;;  %v1113_v12 = vsel %vm571_vm6, 0, %v1112_v1  ;;  %v869_v58 = vsel %vm571_vm6, 0, %v868_v15  ;;  %v990_v1 = vunpack.c.l.b16 %v923_v6 }
 0x15e   : > { %5402 = vst [vmem:[#allocation22_spill] sm:$0xff] %v4266_v7  ;;  %v935_v35 = vunpack.c.l.b16 %v869_v58 }
 0x15f   : > { %v1230_v22 = vpack.c.b16 %v1229_v63, %v1229_v63  ;;  %v1166_v63 = vrot.slane %v4153_v56, 4 }
 0x160   : > { %v936_v15 = vpack.c.b16 %v935_v35, %v935_v35 }
 0x161   : > { %932 = vrot.lane.b32.xlu2 %v931_v60, %s3432_s10  ;;  %v1179_v60 = vunpack.c.l.b16 %v1113_v12  ;;  %v991_v12 = vpack.c.b16 %v990_v1, %v990_v1 }
 0x163   : > { %967 = vrot.lane.b32.xlu0 %v966_v49, %s3432_s10  ;;  %v1180_v45 = vpack.c.b16 %v1179_v60, %v1179_v60  ;;  %v4287_v49 = vpop.permute.xlu2 %1506  ;;  %v1164_v60 = vrot.slane %v4212_v32, 4 }
 0x165   : > { %v4277_v21 = vpop.permute.xlu1 %733  ;;  %972 = vrot.lane.b32.xlu1 %v971_v33, %s3433_s11  ;;  %v4280_v61 = vpop.permute.xlu0 %698  ;;  %v1114_v33 = vrot.slane %v4187_v47, 4  ;;  %v1165_v1 = vsel %vm571_vm6, 0, %v1164_v60 }
 0x166   : > { %5403 = vst [vmem:[#allocation23_spill] sm:$0xff] %v4277_v21  ;;  %v1214_v35 = vunpack.c.l.b16 %v1165_v1 }
 0x167   : > { %5404 = vst [vmem:[#allocation24_spill] sm:$0xff] %v4280_v61  ;;  %v1115_v54 = vsel %vm571_vm6, 0, %v1114_v33 }
 0x168   : > { %v1199_v47 = vunpack.c.l.b16 %v1115_v54  ;;  %v1215_v32 = vpack.c.b16 %v1214_v35, %v1214_v35 }
 0x169   : > { %1231 = vrot.lane.b32.xlu2 %v1230_v22, %s3430_s8  ;;  %v1167_v22 = vsel %vm571_vm6, 0, %v1166_v63 }
 0x16a   : > { %v1234_v58 = vunpack.c.l.b16 %v1167_v22  ;;  %v1200_v56 = vpack.c.b16 %v1199_v47, %v1199_v47 }
 0x16b   : > { %1176 = vrot.lane.b32.xlu0 %v1175_v4, %s3432_s10 }
 0x16c   : > { %v1235_v33 = vpack.c.b16 %v1234_v58, %v1234_v58  ;;  %v1602_v58 = vshrl.u32 %v4179_v59, 16 }
 0x16d   : > { %v4290_v39 = vpop.permute.xlu1 %1501  ;;  %1181 = vrot.lane.b32.xlu1 %v1180_v45, %s3433_s11  ;;  %v4293_v28 = vpop.permute.xlu0 %713 }
 0x16e   : > { %v1522_v45 = vpop.permute.xlu2 %1521 }
 0x16f   : > { %v1570_v60 = vsel %vm735_vm10, %v4043_v26, %v1522_v45  ;;  %v1601_v26 = vpack.i.b16 %v4108_v20, %v4179_v59 }
 0x171   : > { %992 = vrot.lane.b32.xlu2 %v991_v12, %s3434_s12 }
 0x173   : > { %937 = vrot.lane.b32.xlu0 %v936_v15, %s3433_s11 }
 0x175   : > { %v4301_v6 = vpop.permute.xlu1 %1486  ;;  %v4303_v4 = vpop.permute.xlu0 %1541 }
 0x176   : > { %v4312_v54 = vpop.permute.xlu2 %1491 }
 0x179   : > { %1201 = vrot.lane.b32.xlu2 %v1200_v56, %s3434_s12 }
 0x17b   : > { %1236 = vrot.lane.b32.xlu0 %v1235_v33, %s3434_s12 }
 0x17d   : > { %v4308_v63 = vpop.permute.xlu1 %1546  ;;  %v4310_v12 = vpop.permute.xlu0 %1511 }
 0x17e   : > { %v4317_v47 = vpop.permute.xlu2 %1551 }
 0x181   : > { %1216 = vrot.lane.b32.xlu2 %v1215_v32, %s3433_s11  ;;  %v1603_v32 = vshrl.u32 %v4108_v20, 16 }
 0x183   : > { %v1604_v45 = vpack.i.b16 %v1603_v32, %v1602_v58 }
 0x185   : > { %v4315_v15 = vpop.permute.xlu1 %1516  ;;  %v1527_v22 = vpop.permute.xlu0 %1526  ;;  %v1653_v29 = vperm.slane %v1604_v45, %v3697_v37  ;;  %v1687_v45 = vrot.slane %v1679_v38, 4 }
 0x186   : > { %v1572_v56 = vsel %vm739_vm11, %v1570_v60, %v1527_v22  ;;  %v1616_v22 = vpack.i.b16 %v1615_v24, %v1614_v9  ;;  %v4335_v60 = vpop.permute.xlu2 %977 }
 0x187   : > { %v1661_v61 = vrot.slane %v1653_v29, 4 }
 0x188   : > { %v1705_v24 = vperm.slane %v1616_v22, %v3697_v37 }
 0x18d   : > { %v1532_v1 = vpop.permute.xlu1 %1531  ;;  %v4323_v33 = vpop.permute.xlu0 %1496 }
 0x18e   : > { %v4326_v35 = vsel %vm742_vm12, %v1572_v56, %v1532_v1  ;;  %v1608_v56 = vshrl.u32 %v4176_v11, 16  ;;  %v1627_v1 = vperm.slane %v1601_v26, %v3697_v37 }
 0x190   : > { %v1635_v7 = vrot.slane %v1627_v1, 4 }
 0x195   : > { %v1598_v27 = vpop.permute.xlu1 %1597  ;;  %v1596_v21 = vpop.permute.xlu0 %1595 }
 0x196   : > { %v1619_v20 = vpack.i.b16 %v1598_v27, %v4123_v62  ;;  %v1621_v59 = vshrl.u32 %v1598_v27, 16  ;;  %v1607_v57 = vpack.i.b16 %v1596_v21, %v4176_v11  ;;  %v1609_v9 = vshrl.u32 %v1596_v21, 16 }
 0x197   : > { %v1713_v62 = vrot.slane %v1705_v24, 4 }
 0x198   : > { %v1622_v40 = vpack.i.b16 %v1621_v59, %v1620_v14  ;;  %v1684_v58 = vperm.slane %v1619_v20, %v3697_v37  ;;  %v1610_v32 = vpack.i.b16 %v1609_v9, %v1608_v56  ;;  %v1632_v26 = vperm.slane %v1607_v57, %v3697_v37 }
 0x19a   : > { %v1710_v8 = vperm.slane %v1622_v40, %v3697_v37  ;;  %v1658_v0 = vperm.slane %v1610_v32, %v3697_v37  ;;  %v1685_v27 = vrot.slane %v1684_v58, 4  ;;  %v1688_v11 = vsel %vm571_vm6, %v1684_v58, %v1687_v45 }
 0x19b   : > { %v4349_v5 = vpop.permute.xlu2 %1186  ;;  %v1636_v14 = vsel %vm571_vm6, %v1632_v26, %v1635_v7  ;;  %v1696_v22 = vperm.slane %v1688_v11, %v3770_v31 }
 0x19c   : > { %v1659_v21 = vrot.slane %v1658_v0, 4  ;;  %v1644_v56 = vperm.slane %v1636_v14, %v3770_v31  ;;  %v1714_v59 = vsel %vm571_vm6, %v1710_v8, %v1713_v62  ;;  %v1662_v57 = vsel %vm571_vm6, %v1658_v0, %v1661_v61 }
 0x19d   : > { %v4355_v20 = vpop.permute.xlu1 %942  ;;  %v1778_v9 = vunpack.c.l.b16 %v1696_v22  ;;  %v4360_v32 = vperm.slane %v1714_v59, %v3770_v31  ;;  %v1686_v7 = vsel %vm571_vm6, %v1685_v27, %v1679_v38  ;;  %v1670_v34 = vperm.slane %v1662_v57, %v3770_v31 }
 0x19e   : > { %v1743_v40 = vunpack.c.l.b16 %v1644_v56  ;;  %v1660_v58 = vsel %vm571_vm6, %v1659_v21, %v1653_v29  ;;  %v1647_v45 = vrot.slane %v1644_v56, 4  ;;  %v1711_v2 = vrot.slane %v1710_v8, 4 }
 0x19f   : > { %v1779_v37 = vpack.c.b16 %v1778_v9, %v1778_v9  ;;  %v1783_v14 = vunpack.c.l.b16 %v4360_v32  ;;  %v1666_v62 = vperm.slane %v1660_v58, %v3770_v31  ;;  %v1633_v0 = vrot.slane %v1632_v26, 4 }
 0x1a0   : > { %v1744_v11 = vpack.c.b16 %v1743_v40, %v1743_v40  ;;  %v1648_v29 = vsel %vm571_vm6, 0, %v1647_v45  ;;  %v4373_v38 = vperm.slane %v1686_v7, %v3770_v31  ;;  %v1748_v27 = vunpack.c.l.b16 %v1670_v34 }
 0x1a1   : > { %1780 = vrot.lane.b32.xlu0 %v1779_v37, %s3428_s30  ;;  %v1784_v61 = vpack.c.b16 %v1783_v14, %v1783_v14  ;;  %v1728_v21 = vunpack.c.l.b16 %v1666_v62  ;;  %v1712_v8 = vsel %vm571_vm6, %v1711_v2, %v1705_v24  ;;  %v1699_v56 = vrot.slane %v1696_v22, 4 }
 0x1a2   : > { %1745 = vrot.lane.b32.xlu2 %v1744_v11, %s3428_s30  ;;  %v1555_v37 = vsel %vm735_vm10, %v4031_v51, %v4301_v6  ;;  %v1753_v26 = vunpack.c.l.b16 %v1648_v29  ;;  %v1634_v57 = vsel %vm571_vm6, %v1633_v0, %v1627_v1  ;;  %v1697_v40 = vrot.slane %v4373_v38, 4 }
 0x1a3   : > { %v4369_v59 = vpop.permute.xlu2 %947  ;;  %1785 = vrot.lane.b32.xlu1 %v1784_v61, %s3429_s7  ;;  %v1749_v58 = vpack.c.b16 %v1748_v27, %v1748_v27  ;;  %v1729_v45 = vpack.c.b16 %v1728_v21, %v1728_v21  ;;  %v1718_v7 = vperm.slane %v1712_v8, %v3770_v31  ;;  %v1557_v11 = vsel %vm739_vm11, %v1555_v37, %v4312_v54 }
 0x1a4   : > { %v1700_v2 = vsel %vm571_vm6, 0, %v1699_v56  ;;  %v4387_v24 = vperm.slane %v1634_v57, %v3770_v31  ;;  %v1559_v51 = vsel %vm742_vm12, %v1557_v11, %v4323_v33  ;;  %v1754_v6 = vpack.c.b16 %v1753_v26, %v1753_v26 }
 0x1a5   : > { %v928_v9 = vpop.permute.xlu1 %927  ;;  %v1698_v22 = vsel %vm571_vm6, 0, %v1697_v40  ;;  %v1763_v54 = vunpack.c.l.b16 %v1718_v7  ;;  %v1788_v14 = vunpack.c.l.b16 %v1700_v2  ;;  %v1576_v0 = vsel %vm745_vm13, %v4326_v35, %v4271_v46 }
 0x1a6   : > { %v1561_v33 = vsel %vm745_vm13, %v1559_v51, %v4290_v39  ;;  %v1673_v29 = vrot.slane %v1670_v34, 4  ;;  %v1645_v27 = vrot.slane %v4387_v24, 4  ;;  %v1768_v21 = vunpack.c.l.b16 %v1698_v22 }
 0x1a7   : > { %v1671_v56 = vrot.slane %v1666_v62, 4  ;;  %v1578_v37 = vsel %vm748_vm14, %v1576_v0, %v4303_v4  ;;  %v1563_v26 = vsel %vm748_vm14, %v1561_v33, %v4287_v49  ;;  %v1764_v46 = vpack.c.b16 %v1763_v54, %v1763_v54 }
 0x1a8   : > { %v1789_v35 = vpack.c.b16 %v1788_v14, %v1788_v14  ;;  %v1674_v39 = vsel %vm571_vm6, 0, %v1673_v29  ;;  %v1646_v57 = vsel %vm571_vm6, 0, %v1645_v27  ;;  %v1769_v34 = vpack.c.b16 %v1768_v21, %v1768_v21 }
 0x1a9   : > { %1750 = vrot.lane.b32.xlu0 %v1749_v58, %s3429_s7  ;;  %v1672_v40 = vsel %vm571_vm6, 0, %v1671_v56  ;;  %v1580_v4 = vsel %vm751_vm15, %v1578_v37, %v4308_v63  ;;  %v1565_v49 = vsel %vm751_vm15, %v1563_v26, %v4310_v12  ;;  %v1758_v58 = vunpack.c.l.b16 %v1674_v39 }
 0x1aa   : > { %1730 = vrot.lane.b32.xlu2 %v1729_v45, %s3431_s9  ;;  %v1733_v45 = vunpack.c.l.b16 %v1646_v57  ;;  %v4423_v11 = vsel %vm754_vm1, %v1580_v4, %v4317_v47  ;;  %v4427_v2 = vsel %vm754_vm1, %v1565_v49, %v4315_v15  ;;  %v1725_v22 = vrot.slane %v4360_v32, 4 }
 0x1ab   : > { %v4393_v1 = vpop.permute.xlu2 %962  ;;  %1755 = vrot.lane.b32.xlu1 %v1754_v6, %s3430_s8  ;;  %v1723_v6 = vrot.slane %v1718_v7, 4  ;;  %v1738_v63 = vunpack.c.l.b16 %v1672_v40  ;;  %v1759_v14 = vpack.c.b16 %v1758_v58, %v1758_v58  ;;  %v996_v15 = vsel %vm735_vm10, %v4233_v42, %v928_v9 }
 0x1ac   : > { %v1734_v12 = vpack.c.b16 %v1733_v45, %v1733_v45  ;;  %v1726_v33 = vsel %vm571_vm6, 0, %v1725_v22 }
 0x1ad   : > { %v4402_v61 = vpop.permute.xlu0 %1221  ;;  %v1724_v0 = vsel %vm571_vm6, 0, %v1723_v6  ;;  %v1739_v47 = vpack.c.b16 %v1738_v63, %v1738_v63  ;;  %v1793_v27 = vunpack.c.l.b16 %v1726_v33 }
 0x1ae   : > { %v1773_v32 = vunpack.c.l.b16 %v1724_v0 }
 0x1af   : > { %v4405_v8 = vpop.permute.xlu1 %1226  ;;  %v1794_v26 = vpack.c.b16 %v1793_v27, %v1793_v27 }
 0x1b0   : > { %v1774_v37 = vpack.c.b16 %v1773_v32, %v1773_v32 }
 0x1b1   : > { %1765 = vrot.lane.b32.xlu0 %v1764_v46, %s3431_s9 }
 0x1b2   : > { %1790 = vrot.lane.b32.xlu2 %v1789_v35, %s3430_s8 }
 0x1b3   : > { %v1172_v62 = vpop.permute.xlu2 %1171  ;;  %1770 = vrot.lane.b32.xlu1 %v1769_v34, %s3432_s10 }
 0x1b5   : > { %v983_v51 = vpop.permute.xlu0 %982 }
 0x1b7   : > { %v988_v54 = vpop.permute.xlu1 %987 }
 0x1b9   : > { %1735 = vrot.lane.b32.xlu0 %v1734_v12, %s3432_s10 }
 0x1ba   : > { %1760 = vrot.lane.b32.xlu2 %v1759_v14, %s3434_s12 }
 0x1bb   : > { %v933_v29 = vpop.permute.xlu2 %932  ;;  %1740 = vrot.lane.b32.xlu1 %v1739_v47, %s3433_s11 }
 0x1bc   : > { %v998_v7 = vsel %vm739_vm11, %v996_v15, %v933_v29  ;;  %v738_v15 = vsel %vm735_vm10, %v3896_v19, %v4247_v3 }
 0x1bd   : > { %v1192_v21 = vpop.permute.xlu0 %1191  ;;  %v741_v29 = vsel %vm739_vm11, %v738_v15, %v4263_v16  ;;  %v5405_v16 = vld [vmem:[#allocation20_spill] sm:$0xff] }
 0x1bf   : > { %v1197_v56 = vpop.permute.xlu1 %1196 }
 0x1c1   : > { %1795 = vrot.lane.b32.xlu0 %v1794_v26, %s3434_s12  ;;  %v5409_v26 = vld [vmem:[#allocation24_spill] sm:$0xff] }
 0x1c2   : > { %1775 = vrot.lane.b32.xlu2 %v1774_v37, %s3433_s11  ;;  %v5408_v37 = vld [vmem:[#allocation19_spill] sm:$0xff] }
 0x1c3   : > { %v1232_v46 = vpop.permute.xlu2 %1231  ;;  %1827 = vrot.lane.b32.xlu1 %v3808_v53, %s3425_s29 }
 0x1c5   : > { %v1207_v42 = vpop.permute.xlu0 %1206 }
 0x1c6   : > { %v1255_v9 = vsel %vm735_vm10, %v4197_v55, %v1207_v42  ;;  %v5410_v42 = vld [vmem:[#allocation22_spill] sm:$0xff] }
 0x1c7   : > { %v1212_v35 = vpop.permute.xlu1 %1211 }
 0x1c8   : > { %v1257_v39 = vsel %vm739_vm11, %v1255_v9, %v1212_v35 }
 0x1c9   : > { %1831 = vrot.lane.b32.xlu0 %v3759_v23, %s3425_s29 }
 0x1ca   : > { %1829 = vrot.lane.b32.xlu2 %v3749_v18, %s3425_s29  ;;  %v1011_v18 = vsel %vm735_vm10, %v4238_v30, %v4393_v1  ;;  %v1240_v30 = vsel %vm735_vm10, %v4258_v43, %v1172_v62 }
 0x1cb   : > { %v993_v57 = vpop.permute.xlu2 %992  ;;  %1833 = vrot.lane.b32.xlu1 %v3797_v17, %s3425_s29 }
 0x1cd   : > { %v953_v34 = vpop.permute.xlu0 %952 }
 0x1cf   : > { %v958_v40 = vpop.permute.xlu1 %957 }
 0x1d1   : > { %1837 = vrot.lane.b32.xlu0 %v3820_v48, %s3425_s29 }
 0x1d2   : > { %1835 = vrot.lane.b32.xlu2 %v3803_v52, %s3425_s29 }
 0x1d3   : > { %v1202_v53 = vpop.permute.xlu2 %1201  ;;  %1839 = vrot.lane.b32.xlu1 %v3932_v50, %s3425_s29 }
 0x1d5   : > { %v968_v23 = vpop.permute.xlu0 %967 }
 0x1d6   : > { %v1013_v55 = vsel %vm739_vm11, %v1011_v18, %v968_v23  ;;  %v5411_v23 = vld [vmem:[#allocation23_spill] sm:$0xff] }
 0x1d7   : > { %v973_v17 = vpop.permute.xlu1 %972 }
 0x1d8   : > { %v1015_v4 = vsel %vm742_vm12, %v1013_v55, %v973_v17 }
 0x1d9   : > { %v1017_v52 = vsel %vm745_vm13, %v1015_v4, %v4335_v60  ;;  %v2841_v4 = vrot.slane %v4423_v11, 2 }
 0x1da   : > { %v1019_v49 = vsel %vm748_vm14, %v1017_v52, %v983_v51  ;;  %1841 = vrot.lane.b32.xlu2 %v3852_v10, %s3425_s29 }
 0x1db   : > { %v1021_v48 = vsel %vm751_vm15, %v1019_v49, %v988_v54  ;;  %v1217_v50 = vpop.permute.xlu2 %1216 }
 0x1dc   : > { %v1259_v58 = vsel %vm742_vm12, %v1257_v39, %v1217_v50 }
 0x1dd   : > { %v1261_v1 = vsel %vm745_vm13, %v1259_v58, %v4402_v61  ;;  %v1177_v45 = vpop.permute.xlu0 %1176 }
 0x1de   : > { %v1242_v6 = vsel %vm739_vm11, %v1240_v30, %v1177_v45  ;;  %v1263_v60 = vsel %vm748_vm14, %v1261_v1, %v4405_v8 }
 0x1df   : > { %v1182_v51 = vpop.permute.xlu1 %1181  ;;  %v1265_v10 = vsel %vm751_vm15, %v1263_v60, %v1232_v46 }
 0x1e0   : > { %v1244_v22 = vsel %vm742_vm12, %v1242_v6, %v1182_v51 }
 0x1e1   : > { %v1246_v63 = vsel %vm745_vm13, %v1244_v22, %v4349_v5  ;;  %v1023_v5 = vsel %vm754_vm1, %v1021_v48, %v993_v57 }
 0x1e2   : > { %v1248_v54 = vsel %vm748_vm14, %v1246_v63, %v1192_v21  ;;  %v2833_v35 = vrot.slane %v1023_v5, 6 }
 0x1e3   : > { %v1250_v43 = vsel %vm751_vm15, %v1248_v54, %v1197_v56  ;;  %v5406_v56 = vld [vmem:[#allocation21_spill] sm:$0xff] }
 0x1e4   : > { %v1252_v3 = vsel %vm754_vm1, %v1250_v43, %v1202_v53 }
 0x1e5   : > { %v938_v62 = vpop.permute.xlu0 %937  ;;  %v2836_v39 = vrot.slane %v1252_v3, 4 }
 0x1e6   : > { %v1000_v61 = vsel %vm742_vm12, %v998_v7, %v938_v62 }
 0x1e7   : > { %v1002_v14 = vsel %vm745_vm13, %v1000_v61, %v4355_v20  ;;  %v759_v20 = vsel %vm735_vm10, %v3858_v25, %v4244_v44  ;;  %v5407_v44 = vld [vmem:[#allocation18_spill] sm:$0xff] }
 0x1e8   : > { %v1004_v8 = vsel %vm748_vm14, %v1002_v14, %v4369_v59  ;;  %v744_v59 = vsel %vm742_vm12, %v741_v29, %v4252_v36  ;;  %v761_v7 = vsel %vm739_vm11, %v759_v20, %v4226_v13 }
 0x1e9   : > { %v1006_v12 = vsel %vm751_vm15, %v1004_v8, %v953_v34  ;;  %v763_v32 = vsel %vm742_vm12, %v761_v7, %v4293_v28  ;;  %v747_v27 = vsel %vm745_vm13, %v744_v59, %v4221_v41  ;;  %v2840_v34 = vrot.slane %v4427_v2, 2 }
 0x1ea   : > { %v765_v21 = vsel %vm745_vm13, %v763_v32, %v5405_v16  ;;  %v750_v25 = vsel %vm748_vm14, %v747_v27, %v5406_v56  ;;  %v1008_v28 = vsel %vm754_vm1, %v1006_v12, %v958_v40  ;;  %v5415_v16 = vld [vmem:[#allocation3_spill] sm:$0xff] }
 0x1eb   : > { %v767_v36 = vsel %vm748_vm14, %v765_v21, %v5407_v44  ;;  %v753_v13 = vsel %vm751_vm15, %v750_v25, %v5408_v37  ;;  %v2832_v46 = vrot.slane %v1008_v28, 6 }
 0x1ec   : > { %v756_v41 = vsel %vm754_vm1, %v753_v13, %v5409_v26  ;;  %v769_v9 = vsel %vm751_vm15, %v767_v36, %v5410_v42 }
 0x1ed   : > { %v1237_v0 = vpop.permute.xlu0 %1236  ;;  %v2856_v53 = vsel %vm2854_vm2, %v756_v41, %v2832_v46  ;;  %v771_v55 = vsel %vm754_vm1, %v769_v9, %v5411_v23 }
 0x1ee   : > { %v1267_v33 = vsel %vm754_vm1, %v1265_v10, %v1237_v0  ;;  %v2861_v40 = vsel %vm2859_vm0, %v2856_v53, %v2836_v39  ;;  %v2858_v52 = vsel %vm2854_vm2, %v771_v55, %v2833_v35 }
 0x1ef   : > { %v2837_v57 = vrot.slane %v1267_v33, 4  ;;  %v4526_v17 = vsel %vm2864_vm3, %v2861_v40, %v2840_v34 }
 0x1f0   : > { %5412 = vst [vmem:[#allocation20_spill] sm:$0xff] %v4526_v17 }
 0x1f1   : > { %v2863_v49 = vsel %vm2859_vm0, %v2858_v52, %v2837_v57 }
 0x1f2   : > { %v4532_v2 = vsel %vm2864_vm3, %v2863_v49, %v2841_v4 }
 0x1f3   : > { %5413 = vst [vmem:[#allocation21_spill] sm:$0xff] %v4532_v2 }
 0x1fc   : > { %v1746_v47 = vpop.permute.xlu2 %1745 }
 0x204   : > { %v1731_v19 = vpop.permute.xlu2 %1730 }
 0x205   : > { %v1799_v43 = vsel %vm735_vm10, %v4387_v24, %v1731_v19 }
 0x20c   : > { %v1791_v18 = vpop.permute.xlu2 %1790 }
 0x213   : > { %v1781_v48 = vpop.permute.xlu0 %1780 }
 0x214   : > { %v4534_v58 = vpop.permute.xlu2 %1760 }
 0x215   : > { %v1786_v50 = vpop.permute.xlu1 %1785 }
 0x21b   : > { %v1751_v30 = vpop.permute.xlu0 %1750 }
 0x21c   : > { %v1776_v45 = vpop.permute.xlu2 %1775 }
 0x21d   : > { %v1756_v1 = vpop.permute.xlu1 %1755 }
 0x223   : > { %v1766_v6 = vpop.permute.xlu0 %1765 }
 0x224   : > { %v1814_v60 = vsel %vm735_vm10, %v4373_v38, %v1766_v6  ;;  %v1830_v14 = vpop.permute.xlu2 %1829 }
 0x225   : > { %v1771_v51 = vpop.permute.xlu1 %1770  ;;  %v1858_v7 = vshrl.u32 %v1830_v14, 16 }
 0x226   : > { %v1816_v11 = vsel %vm739_vm11, %v1814_v60, %v1771_v51 }
 0x227   : > { %v1818_v10 = vsel %vm742_vm12, %v1816_v11, %v1776_v45 }
 0x228   : > { %v1820_v22 = vsel %vm745_vm13, %v1818_v10, %v1781_v48 }
 0x229   : > { %v1822_v63 = vsel %vm748_vm14, %v1820_v22, %v1786_v50 }
 0x22a   : > { %v1824_v54 = vsel %vm751_vm15, %v1822_v63, %v1791_v18 }
 0x22b   : > { %v1736_v62 = vpop.permute.xlu0 %1735 }
 0x22c   : > { %v1801_v61 = vsel %vm739_vm11, %v1799_v43, %v1736_v62  ;;  %v1836_v20 = vpop.permute.xlu2 %1835 }
 0x22d   : > { %v1741_v8 = vpop.permute.xlu1 %1740  ;;  %v1852_v13 = vshrl.u32 %v1836_v20, 16 }
 0x22e   : > { %v1803_v38 = vsel %vm742_vm12, %v1801_v61, %v1741_v8 }
 0x22f   : > { %v1805_v12 = vsel %vm745_vm13, %v1803_v38, %v1746_v47 }
 0x230   : > { %v1807_v0 = vsel %vm748_vm14, %v1805_v12, %v1751_v30 }
 0x231   : > { %v1809_v33 = vsel %vm751_vm15, %v1807_v0, %v1756_v1 }
 0x233   : > { %v1796_v5 = vpop.permute.xlu0 %1795 }
 0x234   : > { %v4551_v15 = vsel %vm754_vm1, %v1824_v54, %v1796_v5  ;;  %v1842_v3 = vpop.permute.xlu2 %1841 }
 0x235   : > { %5414 = vst [vmem:[#allocation18_spill] sm:$0xff] %v4551_v15  ;;  %v1828_v29 = vpop.permute.xlu1 %1827  ;;  %v1865_v25 = vshrl.u32 %v1842_v3, 16 }
 0x236   : > { %v1846_v28 = vshrl.u32 %v1828_v29, 16 }
 0x23b   : > { %v1832_v24 = vpop.permute.xlu0 %1831 }
 0x23c   : > { %v1847_v47 = vshrl.u32 %v1832_v24, 16  ;;  %v1845_v26 = vpack.i.b16 %v1832_v24, %v1828_v29  ;;  %v5416_v29 = vld [vmem:[#allocation4_spill] sm:$0xff]  ;;  %v5420_v24 = vld [vmem:[#allocation6_spill] sm:$0xff] }
 0x23d   : > { %v1834_v59 = vpop.permute.xlu1 %1833 }
 0x23e   : > { %v1857_v32 = vpack.i.b16 %v1834_v59, %v1830_v14  ;;  %v1859_v27 = vshrl.u32 %v1834_v59, 16  ;;  %v1848_v57 = vpack.i.b16 %v1847_v47, %v1846_v28  ;;  %v1871_v23 = vperm.slane %v1845_v26, %v5415_v16  ;;  %v5421_v59 = vld [vmem:[#allocation7_spill] sm:$0xff] }
 0x23f   : > { %v4589_v14 = vsel %vm754_vm1, %v1809_v33, %v4534_v58  ;;  %v5418_v58 = vld [vmem:[#allocation9_spill] sm:$0xff] }
 0x240   : > { %v1860_v19 = vpack.i.b16 %v1859_v27, %v1858_v7  ;;  %v4554_v21 = vperm.slane %v1857_v32, %v5415_v16  ;;  %v1897_v48 = vperm.slane %v1848_v57, %v5415_v16  ;;  %v1879_v30 = vrot.slane %v1871_v23, 4  ;;  %v5419_v33 = vld [vmem:[#allocation5_spill] sm:$0xff]  ;;  %v5422_v7 = vld [vmem:[#allocation8_spill] sm:$0xff] }
 0x242   : > { %v4557_v44 = vperm.slane %v1860_v19, %v5415_v16  ;;  %v1931_v41 = vrot.slane %v4554_v21, 4  ;;  %v1905_v32 = vrot.slane %v1897_v48, 4  ;;  %v5423_v19 = vld [vmem:[#allocation10_spill] sm:$0xff] }
 0x243   : > { %v1838_v56 = vpop.permute.xlu0 %1837 }
 0x244   : > { %v1863_v36 = vpack.i.b16 %v1842_v3, %v1838_v56  ;;  %v1864_v37 = vshrl.u32 %v1838_v56, 16  ;;  %v1957_v34 = vrot.slane %v4557_v44, 4 }
 0x245   : > { %v1840_v46 = vpop.permute.xlu1 %1839 }
 0x246   : > { %v1866_v42 = vpack.i.b16 %v1865_v25, %v1864_v37  ;;  %v4561_v9 = vperm.slane %v1863_v36, %v5415_v16  ;;  %v1851_v35 = vpack.i.b16 %v1840_v46, %v1836_v20  ;;  %v1853_v39 = vshrl.u32 %v1840_v46, 16  ;;  %v5417_v20 = vld [vmem:[#allocation11_spill] sm:$0xff] }
 0x248   : > { %v4566_v53 = vsel %vm571_vm6, %v4561_v9, %v1931_v41  ;;  %v1954_v18 = vperm.slane %v1866_v42, %v5415_v16  ;;  %v1854_v40 = vpack.i.b16 %v1853_v39, %v1852_v13  ;;  %v1876_v55 = vperm.slane %v1851_v35, %v5415_v16 }
 0x249   : > { %v1929_v56 = vrot.slane %v4561_v9, 4 }
 0x24a   : > { %v4572_v4 = vsel %vm571_vm6, %v1954_v18, %v1957_v34  ;;  %v1902_v52 = vperm.slane %v1854_v40, %v5415_v16  ;;  %v1877_v49 = vrot.slane %v1876_v55, 4  ;;  %v1880_v51 = vsel %vm571_vm6, %v1876_v55, %v1879_v30 }
 0x24b   : > { %v1888_v54 = vperm.slane %v1880_v51, %v3770_v31  ;;  %v1955_v47 = vrot.slane %v1954_v18, 4  ;;  %v1930_v26 = vsel %vm571_vm6, %v1929_v56, %v4554_v21 }
 0x24c   : > { %v1903_v50 = vrot.slane %v1902_v52, 4  ;;  %v1878_v1 = vsel %vm571_vm6, %v1877_v49, %v1871_v23  ;;  %v1906_v27 = vsel %vm571_vm6, %v1902_v52, %v1905_v32 }
 0x24d   : > { %v4579_v6 = vperm.slane %v1878_v1, %v3770_v31  ;;  %v1987_v0 = vunpack.c.l.b16 %v1888_v54  ;;  %v1914_v3 = vperm.slane %v1906_v27, %v3770_v31  ;;  %v1891_v25 = vrot.slane %v1888_v54, 4 }
 0x24e   : > { %v1904_v45 = vsel %vm571_vm6, %v1903_v50, %v1897_v48  ;;  %v1956_v13 = vsel %vm571_vm6, %v1955_v47, %v4557_v44  ;;  %v4640_v44 = vperm.slane %v1930_v26, %v3770_v31  ;;  %v2122_v54 = vpack.i.b16 %v5418_v58, %v5416_v29 }
 0x24f   : > { %v1910_v60 = vperm.slane %v1904_v45, %v3770_v31  ;;  %v1889_v11 = vrot.slane %v4579_v6, 4  ;;  %v1988_v5 = vpack.c.b16 %v1987_v0, %v1987_v0  ;;  %v1992_v36 = vunpack.c.l.b16 %v1914_v3 }
 0x250   : > { %v1917_v37 = vrot.slane %v1914_v3, 4  ;;  %v1892_v28 = vsel %vm571_vm6, 0, %v1891_v25  ;;  %v4635_v42 = vperm.slane %v1956_v13, %v3770_v31  ;;  %5424 = vst [vmem:[#allocation19_spill] sm:$0xff] %v4640_v44  ;;  %v1941_v57 = vrot.slane %v4640_v44, 4  ;;  %v5425_v13 = vld [vmem:[#allocation14_spill] sm:$0xff] }
 0x251   : > { %v1972_v10 = vunpack.c.l.b16 %v1910_v60  ;;  %v1915_v22 = vrot.slane %v1910_v60, 4  ;;  %v1890_v63 = vsel %vm571_vm6, 0, %v1889_v11  ;;  %v1993_v41 = vpack.c.b16 %v1992_v36, %v1992_v36 }
 0x252   : > { %v1977_v62 = vunpack.c.l.b16 %v1890_v63  ;;  %v1918_v46 = vsel %vm571_vm6, 0, %v1917_v37  ;;  %v1997_v9 = vunpack.c.l.b16 %v1892_v28  ;;  %v2007_v21 = vunpack.c.l.b16 %v4635_v42 }
 0x253   : > { %v1973_v43 = vpack.c.b16 %v1972_v10, %v1972_v10  ;;  %v1916_v61 = vsel %vm571_vm6, 0, %v1915_v22  ;;  %v2002_v35 = vunpack.c.l.b16 %v1918_v46  ;;  %v1942_v40 = vsel %vm571_vm6, 0, %v1941_v57 }
 0x254   : > { %v1982_v8 = vunpack.c.l.b16 %v1916_v61  ;;  %v1978_v38 = vpack.c.b16 %v1977_v62, %v1977_v62  ;;  %v1998_v39 = vpack.c.b16 %v1997_v9, %v1997_v9  ;;  %v2008_v18 = vpack.c.b16 %v2007_v21, %v2007_v21 }
 0x255   : > { %1974 = vrot.lane.b32.xlu0 %v1973_v43, %s3431_s9  ;;  %v2003_v34 = vpack.c.b16 %v2002_v35, %v2002_v35  ;;  %v2012_v23 = vunpack.c.l.b16 %v1942_v40  ;;  %v2128_v25 = vpack.i.b16 %v5423_v19, %v5421_v59  ;;  %v2174_v28 = vrot.slane %v5425_v13, 4 }
 0x256   : > { %v1983_v12 = vpack.c.b16 %v1982_v8, %v1982_v8  ;;  %1979 = vrot.lane.b32.xlu1 %v1978_v38, %s3432_s10  ;;  %v2116_v8 = vpack.i.b16 %v5422_v7, %v5420_v24 }
 0x257   : > { %v2013_v55 = vpack.c.b16 %v2012_v23, %v2012_v23  ;;  %v5426_v23 = vld [vmem:[#allocation12_spill] sm:$0xff] }
 0x258   : > { %1984 = vrot.lane.b32.xlu2 %v1983_v12, %s3433_s11 }
 0x25d   : > { %1989 = vrot.lane.b32.xlu0 %v1988_v5, %s3428_s30  ;;  %v2134_v5 = vpack.i.b16 %v5419_v33, %v5417_v20 }
 0x25e   : > { %2594 = vrot.lane.b32.xlu1 %v5416_v29, %s3425_s29 }
 0x25f   : > { %v4684_v56 = vperm.slane %v2134_v5, %v5415_v16 }
 0x260   : > { %2596 = vrot.lane.b32.xlu2 %v5417_v20, %s3425_s29 }
 0x261   : > { %v2200_v35 = vrot.slane %v4684_v56, 4 }
 0x265   : > { %2598 = vrot.lane.b32.xlu0 %v5418_v58, %s3425_s29 }
 0x266   : > { %2600 = vrot.lane.b32.xlu1 %v5419_v33, %s3425_s29 }
 0x268   : > { %2350 = vrot.lane.b32.xlu2 %v5416_v29, %s3424_s28  ;;  %v4674_v29 = vperm.slane %v2116_v8, %v5415_v16 }
 0x26d   : > { %2352 = vrot.lane.b32.xlu0 %v5417_v20, %s3424_s28 }
 0x26e   : > { %2354 = vrot.lane.b32.xlu1 %v5418_v58, %s3424_s28 }
 0x270   : > { %2356 = vrot.lane.b32.xlu2 %v5419_v33, %s3424_s28 }
 0x275   : > { %2586 = vrot.lane.b32.xlu0 %v5420_v24, %s3425_s29 }
 0x276   : > { %2588 = vrot.lane.b32.xlu1 %v5421_v59, %s3425_s29 }
 0x278   : > { %2590 = vrot.lane.b32.xlu2 %v5422_v7, %s3425_s29 }
 0x27d   : > { %2592 = vrot.lane.b32.xlu0 %v5423_v19, %s3425_s29 }
 0x27e   : > { %2342 = vrot.lane.b32.xlu1 %v5420_v24, %s3424_s28 }
 0x280   : > { %2344 = vrot.lane.b32.xlu2 %v5421_v59, %s3424_s28 }
 0x285   : > { %2346 = vrot.lane.b32.xlu0 %v5422_v7, %s3424_s28 }
 0x286   : > { %2348 = vrot.lane.b32.xlu1 %v5423_v19, %s3424_s28 }
 0x288   : > { %1994 = vrot.lane.b32.xlu2 %v1993_v41, %s3429_s7 }
 0x28d   : > { %1999 = vrot.lane.b32.xlu0 %v1998_v39, %s3430_s8 }
 0x28e   : > { %2004 = vrot.lane.b32.xlu1 %v2003_v34, %s3434_s12 }
 0x290   : > { %2009 = vrot.lane.b32.xlu2 %v2008_v18, %s3431_s9 }
 0x298   : > { %2014 = vrot.lane.b32.xlu2 %v2013_v55, %s3432_s10  ;;  %v2175_v55 = vsel %vm571_vm6, %v2174_v28, %v5426_v23 }
 0x2b2   : > { %v1985_v52 = vpop.permute.xlu2 %1984 }
 0x2ba   : > { %v2597_v49 = vpop.permute.xlu2 %2596 }
 0x2bb   : > { %v2623_v21 = vshrl.u32 %v2597_v49, 16 }
 0x2c2   : > { %v4650_v48 = vpop.permute.xlu2 %2350 }
 0x2c7   : > { %v1975_v50 = vpop.permute.xlu0 %1974 }
 0x2c8   : > { %v2043_v30 = vsel %vm735_vm10, %v4579_v6, %v1975_v50  ;;  %v1980_v1 = vpop.permute.xlu1 %1979  ;;  %v4664_v6 = vperm.slane %v2122_v54, %v5415_v16 }
 0x2c9   : > { %v2045_v45 = vsel %vm739_vm11, %v2043_v30, %v1980_v1 }
 0x2ca   : > { %v4655_v60 = vpop.permute.xlu2 %2356  ;;  %v2047_v51 = vsel %vm742_vm12, %v2045_v45, %v1985_v52  ;;  %v2148_v38 = vrot.slane %v4664_v6, 4  ;;  %v4707_v52 = vperm.slane %v2128_v25, %v5415_v16 }
 0x2cc   : > { %v2149_v24 = vsel %vm571_vm6, %v2148_v38, %v4674_v29 }
 0x2cd   : > { %v4690_v33 = vperm.slane %v2149_v24, %v3770_v31 }
 0x2cf   : > { %v1990_v11 = vpop.permute.xlu0 %1989  ;;  %v2160_v19 = vrot.slane %v4690_v33, 4 }
 0x2d0   : > { %v2049_v10 = vsel %vm745_vm13, %v2047_v51, %v1990_v11  ;;  %v2595_v22 = vpop.permute.xlu1 %2594  ;;  %v5427_v51 = vld [vmem:[#allocation15_spill] sm:$0xff] }
 0x2d1   : > { %v2611_v32 = vshrl.u32 %v2595_v22, 16  ;;  %v2226_v11 = vrot.slane %v5427_v51, 4  ;;  %v2161_v54 = vsel %vm571_vm6, 0, %v2160_v19 }
 0x2d2   : > { %v2591_v63 = vpop.permute.xlu2 %2590 }
 0x2d3   : > { %v2606_v26 = vshrl.u32 %v2591_v63, 16 }
 0x2d7   : > { %v2599_v43 = vpop.permute.xlu0 %2598 }
 0x2d8   : > { %v2601_v62 = vpop.permute.xlu1 %2600  ;;  %v2612_v0 = vshrl.u32 %v2599_v43, 16  ;;  %v2610_v27 = vpack.i.b16 %v2599_v43, %v2595_v22  ;;  %v2201_v43 = vsel %vm571_vm6, %v2200_v35, %v4707_v52 }
 0x2d9   : > { %v2624_v36 = vshrl.u32 %v2601_v62, 16  ;;  %v2622_v39 = vpack.i.b16 %v2601_v62, %v2597_v49  ;;  %v4734_v62 = vld [vmem:[%s3484_s26 + $0x18] sm:$0xf]  ;;  %v4774_v51 = vperm.slane %v2201_v43, %v3770_v31 }
 0x2da   : > { %v4661_v61 = vpop.permute.xlu2 %2344  ;;  %v2613_v7 = vpack.i.b16 %v2612_v0, %v2611_v32  ;;  %v4687_v20 = vperm.slane %v2610_v27, %v5415_v16  ;;  %v4744_v27 = vld [vmem:[%s3484_s26] sm:$0xf] }
 0x2db   : > { %v2625_v40 = vpack.i.b16 %v2624_v36, %v2623_v21  ;;  %v4716_v1 = vperm.slane %v2622_v39, %v5415_v16  ;;  %v2953_v36 = vshrl.u32 %v4734_v62, 16  ;;  %5429 = vst [vmem:[#allocation22_spill] sm:$0xff] %v4774_v51 }
 0x2dc   : > { %v4696_v41 = vperm.slane %v2613_v7, %v5415_v16  ;;  %v2636_v34 = vrot.slane %v4687_v20, 4  ;;  %v4747_v7 = vld [vmem:[%s3484_s26 + $0x8] sm:$0xf] }
 0x2dd   : > { %v4737_v8 = vperm.slane %v2625_v40, %v5415_v16  ;;  %v2688_v13 = vrot.slane %v4716_v1, 4  ;;  %v2947_v19 = vshrl.u32 %v4747_v7, 16 }
 0x2de   : > { %v2662_v50 = vrot.slane %v4696_v41, 4 }
 0x2df   : > { %v4669_v12 = vpop.permute.xlu0 %2352 }
 0x2e0   : > { %v4676_v58 = vpop.permute.xlu1 %2354 }
 0x2e2   : > { %v1995_v3 = vpop.permute.xlu2 %1994 }
 0x2e3   : > { %v4679_v47 = vsel %vm748_vm14, %v2049_v10, %v1995_v3  ;;  %v4723_v10 = vld [vmem:[%s3484_s26 + $0x10] sm:$0xf] }
 0x2e4   : > { %v2952_v25 = vshrl.u32 %v4723_v10, 16 }
 0x2e7   : > { %v2587_v37 = vpop.permute.xlu0 %2586 }
 0x2e8   : > { %v2604_v46 = vpack.i.b16 %v2591_v63, %v2587_v37  ;;  %v2605_v9 = vshrl.u32 %v2587_v37, 16  ;;  %v2589_v57 = vpop.permute.xlu1 %2588  ;;  %v4728_v63 = vperm.slane %v2175_v55, %v3770_v31  ;;  %v2380_v37 = vshrl.u32 %v4655_v60, 16 }
 0x2e9   : > { %v2617_v38 = vshrl.u32 %v2589_v57, 16 }
 0x2ea   : > { %v2607_v18 = vpack.i.b16 %v2606_v26, %v2605_v9  ;;  %v4701_v59 = vperm.slane %v2604_v46, %v5415_v16  ;;  %v2379_v9 = vshrl.u32 %v4669_v12, 16 }
 0x2ec   : > { %v2637_v49 = vsel %vm571_vm6, %v2636_v34, %v4701_v59  ;;  %v4713_v30 = vperm.slane %v2607_v18, %v5415_v16  ;;  %v2946_v18 = vshrl.u32 %v4744_v27, 16 }
 0x2ed   : > { %v4719_v45 = vperm.slane %v2637_v49, %v3770_v31 }
 0x2ee   : > { %v2663_v22 = vsel %vm571_vm6, %v2662_v50, %v4713_v30  ;;  %v2954_v50 = vpack.i.b16 %v2953_v36, %v2952_v25  ;;  %v2248_v25 = vunpack.c.l.b16 %v2161_v54  ;;  %v2948_v36 = vpack.i.b16 %v2947_v19, %v2946_v18 }
 0x2ef   : > { %v2593_v0 = vpop.permute.xlu0 %2592  ;;  %v4740_v5 = vperm.slane %v2663_v22, %v3770_v31  ;;  %v2648_v32 = vrot.slane %v4719_v45, 4  ;;  %v2381_v22 = vpack.i.b16 %v2380_v37, %v2379_v9  ;;  %v2368_v37 = vshrl.u32 %v4676_v58, 16 }
 0x2f0   : > { %v2616_v3 = vpack.i.b16 %v2593_v0, %v2589_v57  ;;  %v2618_v24 = vshrl.u32 %v2593_v0, 16  ;;  %v4753_v28 = vpop.permute.xlu1 %2342  ;;  %v2714_v57 = vrot.slane %v4737_v8, 4  ;;  %v4787_v43 = vperm.slane %v2954_v50, %v5415_v16 }
 0x2f1   : > { %v2731_v26 = vunpack.c.l.b16 %v4740_v5  ;;  %v2649_v46 = vsel %vm571_vm6, 0, %v2648_v32  ;;  %v5430_v32 = vld [vmem:[#allocation13_spill] sm:$0xff]  ;;  %v2373_v54 = vshrl.u32 %v4661_v61, 16  ;;  %v2367_v18 = vshrl.u32 %v4650_v48, 16 }
 0x2f2   : > { %v2619_v35 = vpack.i.b16 %v2618_v24, %v2617_v38  ;;  %v4759_v21 = vperm.slane %v2616_v3, %v5415_v16  ;;  %v2736_v39 = vunpack.c.l.b16 %v2649_v46  ;;  %v2243_v38 = vunpack.c.l.b16 %v4728_v63 }
 0x2f3   : > { %v2732_v34 = vpack.c.b16 %v2731_v26, %v2731_v26  ;;  %v2227_v3 = vsel %vm571_vm6, %v2226_v11, %v5430_v32  ;;  %v2212_v11 = vrot.slane %v4774_v51, 4 }
 0x2f4   : > { %v2689_v40 = vsel %vm571_vm6, %v2688_v13, %v4759_v21  ;;  %v4767_v23 = vperm.slane %v2619_v35, %v5415_v16  ;;  %v2737_v55 = vpack.c.b16 %v2736_v39, %v2736_v39  ;;  %v4794_v35 = vperm.slane %v2227_v3, %v3770_v31 }
 0x2f5   : > { %2733 = vrot.lane.b32.xlu0 %v2732_v34, %s3431_s9  ;;  %v4771_v49 = vperm.slane %v2689_v40, %v3770_v31  ;;  %v4799_v39 = vperm.slane %v2381_v22, %v5415_v16  ;;  %v2244_v34 = vpack.c.b16 %v2243_v38, %v2243_v38  ;;  %v2249_v40 = vpack.c.b16 %v2248_v25, %v2248_v25 }
 0x2f6   : > { %2738 = vrot.lane.b32.xlu2 %v2737_v55, %s3432_s10  ;;  %v2715_v0 = vsel %vm571_vm6, %v2714_v57, %v4767_v23  ;;  %v4803_v55 = vperm.slane %v2948_v36, %v5415_v16  ;;  %v3003_v22 = vrot.slane %v4787_v43, 4  ;;  %v2369_v3 = vpack.i.b16 %v2368_v37, %v2367_v18  ;;  %v4828_v18 = vld [vmem:[%s3484_s26 + $0x1c] sm:$0xf] }
 0x2f7   : > { %5428 = vst [vmem:[#allocation24_spill] sm:$0xff] %v4771_v49  ;;  %v4783_v24 = vperm.slane %v2715_v0, %v3770_v31  ;;  %v2700_v13 = vrot.slane %v4771_v49, 4  ;;  %v4790_v26 = vpop.permute.xlu0 %2346  ;;  %v2278_v38 = vunpack.c.l.b16 %v4794_v35  ;;  %v2470_v25 = vrot.slane %v4799_v39, 4 }
 0x2f8   : > { %v2349_v46 = vpop.permute.xlu1 %2348  ;;  %v2362_v50 = vshrl.u32 %v4790_v26, 16  ;;  %v2361_v36 = vshrl.u32 %v4753_v28, 16 }
 0x2f9   : > { %v2766_v9 = vunpack.c.l.b16 %v4783_v24  ;;  %v2374_v57 = vshrl.u32 %v2349_v46, 16  ;;  %v2701_v32 = vsel %vm571_vm6, 0, %v2700_v13  ;;  %v2213_v13 = vsel %vm571_vm6, 0, %v2212_v11 }
 0x2fa   : > { %v2771_v37 = vunpack.c.l.b16 %v2701_v32  ;;  %v2378_v11 = vpack.i.b16 %v4655_v60, %v4669_v12  ;;  %v4838_v32 = vperm.slane %v2369_v3, %v5415_v16  ;;  %v2279_v2 = vpack.c.b16 %v2278_v38, %v2278_v38 }
 0x2fb   : > { %v2767_v19 = vpack.c.b16 %v2766_v9, %v2766_v9  ;;  %v2375_v0 = vpack.i.b16 %v2374_v57, %v2373_v54  ;;  %v4819_v54 = vld [vmem:[%s3484_s26 + $0x4] sm:$0xf]  ;;  %v4822_v57 = vld [vmem:[%s3484_s26 + $0xc] sm:$0xf] }
 0x2fc   : > { %v2772_v51 = vpack.c.b16 %v2771_v37, %v2771_v37  ;;  %v4857_v44 = vperm.slane %v2378_v11, %v5415_v16  ;;  %v2418_v37 = vrot.slane %v4838_v32, 4 }
 0x2fd   : > { %2245 = vrot.lane.b32.xlu0 %v2244_v34, %s3431_s9  ;;  %2768 = vrot.lane.b32.xlu1 %v2767_v19, %s3431_s9  ;;  %v4814_v9 = vperm.slane %v2375_v0, %v5415_v16  ;;  %v4825_v34 = vld [vmem:[%s3484_s26 + $0x14] sm:$0xf]  ;;  %v2363_v19 = vpack.i.b16 %v2362_v50, %v2361_v36  ;;  %v1967_v0 = vrot.slane %v4635_v42, 4  ;;  %v2958_v50 = vshrl.u32 %v4819_v54, 16 }
 0x2fe   : > { %2250 = vrot.lane.b32.xlu2 %v2249_v40, %s3432_s10  ;;  %v3004_v40 = vsel %vm571_vm6, %v3003_v22, %v4803_v55  ;;  %v2959_v36 = vshrl.u32 %v4822_v57, 16  ;;  %v2965_v42 = vshrl.u32 %v4828_v18, 16  ;;  %v2372_v22 = vpack.i.b16 %v2349_v46, %v4661_v61 }
 0x2ff   : > { %v2471_v17 = vsel %vm571_vm6, %v2470_v25, %v4814_v9  ;;  %v2964_v25 = vshrl.u32 %v4825_v34, 16  ;;  %v4850_v12 = vperm.slane %v3004_v40, %v3770_v31  ;;  %v4853_v3 = vperm.slane %v2363_v19, %v5415_v16 }
 0x300   : > { %v4841_v15 = vperm.slane %v2471_v17, %v3770_v31  ;;  %v1968_v17 = vsel %vm571_vm6, 0, %v1967_v0  ;;  %v2951_v46 = vpack.i.b16 %v4734_v62, %v4723_v10  ;;  %v2283_v40 = vunpack.c.l.b16 %v2213_v13 }
 0x301   : > { %v2966_v38 = vpack.i.b16 %v2965_v42, %v2964_v25  ;;  %v2960_v49 = vpack.i.b16 %v2959_v36, %v2958_v50  ;;  %v4868_v0 = vperm.slane %v2372_v22, %v5415_v16  ;;  %v2017_v11 = vunpack.c.l.b16 %v1968_v17 }
 0x302   : > { %v2522_v60 = vunpack.c.l.b16 %v4841_v15  ;;  %v2419_v10 = vsel %vm571_vm6, %v2418_v37, %v4853_v3  ;;  %v2444_v62 = vrot.slane %v4857_v44, 4  ;;  %v2186_v13 = vrot.slane %v4728_v63, 4 }
 0x303   : > { %v4865_v19 = vperm.slane %v2966_v38, %v5415_v16  ;;  %v2945_v50 = vpack.i.b16 %v4747_v7, %v4744_v27  ;;  %v4880_v36 = vperm.slane %v2951_v46, %v5415_v16  ;;  %v2284_v25 = vpack.c.b16 %v2283_v40, %v2283_v40 }
 0x304   : > { %v2523_v61 = vpack.c.b16 %v2522_v60, %v2522_v60  ;;  %v4883_v42 = vperm.slane %v2960_v49, %v5415_v16  ;;  %v2018_v60 = vpack.c.b16 %v2017_v11, %v2017_v11  ;;  %v4889_v38 = vperm.slane %v2419_v10, %v3770_v31 }
 0x305   : > { %2280 = vrot.lane.b32.xlu1 %v2279_v2, %s3431_s9  ;;  %2773 = vrot.lane.b32.xlu0 %v2772_v51, %s3432_s10  ;;  %v3072_v2 = vunpack.c.l.b16 %v4850_v12  ;;  %v2674_v51 = vrot.slane %v4740_v5, 4  ;;  %v3055_v22 = vrot.slane %v4865_v19, 4  ;;  %v2445_v5 = vsel %vm571_vm6, %v2444_v62, %v4868_v0 }
 0x306   : > { %2524 = vrot.lane.b32.xlu2 %v2523_v61, %s3431_s9  ;;  %v2664_v27 = vrot.slane %v4713_v30, 4  ;;  %v2187_v7 = vsel %vm571_vm6, 0, %v2186_v13  ;;  %v4897_v49 = vperm.slane %v2945_v50, %v5415_v16  ;;  %v2977_v61 = vrot.slane %v4880_v36, 4 }
 0x307   : > { %v3073_v17 = vpack.c.b16 %v3072_v2, %v3072_v2  ;;  %v2675_v63 = vsel %vm571_vm6, 0, %v2674_v51  ;;  %v4901_v46 = vperm.slane %v2445_v5, %v3770_v31  ;;  %v3056_v37 = vsel %vm571_vm6, %v3055_v22, %v4883_v42 }
 0x308   : > { %v2366_v30 = vpack.i.b16 %v4676_v58, %v4650_v48  ;;  %v2741_v40 = vunpack.c.l.b16 %v2675_v63  ;;  %v2487_v11 = vunpack.c.l.b16 %v4889_v38  ;;  %v2726_v2 = vrot.slane %v4783_v24, 4 }
 0x309   : > { %v2253_v51 = vunpack.c.l.b16 %v2187_v7  ;;  %v2360_v10 = vpack.i.b16 %v4790_v26, %v4753_v28  ;;  %v4913_v62 = vperm.slane %v3056_v37, %v3770_v31  ;;  %v2978_v13 = vsel %vm571_vm6, %v2977_v61, %v4897_v49 }
 0x30a   : > { %v4919_v48 = vsel %vm571_vm6, %v4696_v41, %v2664_v27  ;;  %v2456_v58 = vrot.slane %v4901_v46, 4  ;;  %v4923_v50 = vperm.slane %v2366_v30, %v5415_v16  ;;  %v2742_v24 = vpack.c.b16 %v2741_v40, %v2741_v40 }
 0x30b   : > { %v2963_v28 = vpack.i.b16 %v4828_v18, %v4825_v34  ;;  %v2727_v26 = vsel %vm571_vm6, 0, %v2726_v2  ;;  %v4929_v22 = vperm.slane %v2978_v13, %v3770_v31  ;;  %v2716_v5 = vrot.slane %v4767_v23, 4 }
 0x30c   : > { %v4933_v41 = vperm.slane %v2360_v10, %v5415_v16  ;;  %v2238_v63 = vrot.slane %v4794_v35, 4  ;;  %v2457_v34 = vsel %vm571_vm6, 0, %v2456_v58  ;;  %v2392_v18 = vrot.slane %v4923_v50, 4  ;;  %v2000_v58 = vpop.permute.xlu0 %1999 }
 0x30d   : > { %2019 = vrot.lane.b32.xlu1 %v2018_v60, %s3433_s11  ;;  %2285 = vrot.lane.b32.xlu0 %v2284_v25, %s3432_s10  ;;  %v2488_v25 = vpack.c.b16 %v2487_v11, %v2487_v11  ;;  %v2254_v60 = vpack.c.b16 %v2253_v51, %v2253_v51  ;;  %v2776_v27 = vunpack.c.l.b16 %v2727_v26  ;;  %v2957_v23 = vpack.i.b16 %v4822_v57, %v4819_v54 }
 0x30e   : > { %3074 = vrot.lane.b32.xlu2 %v3073_v17, %s3431_s9  ;;  %v3107_v17 = vunpack.c.l.b16 %v4913_v62  ;;  %v4945_v7 = vperm.slane %v2963_v28, %v5415_v16  ;;  %v2989_v61 = vrot.slane %v4929_v22, 4  ;;  %v2393_v37 = vsel %vm571_vm6, %v2392_v18, %v4933_v41 }
 0x30f   : > { %v2527_v35 = vunpack.c.l.b16 %v2457_v34  ;;  %v4952_v40 = vsel %vm571_vm6, %v4737_v8, %v2716_v5  ;;  %v2239_v11 = vsel %vm571_vm6, 0, %v2238_v63  ;;  %v4957_v2 = vperm.slane %v4566_v53, %v3770_v31 }
 0x310   : > { %v3108_v30 = vpack.c.b16 %v3107_v17, %v3107_v17  ;;  %v2777_v54 = vpack.c.b16 %v2776_v27, %v2776_v27  ;;  %v4960_v57 = vperm.slane %v2957_v23, %v5415_v16  ;;  %v3029_v51 = vrot.slane %v4945_v7, 4 }
 0x311   : > { %v2638_v10 = vrot.slane %v4701_v59, 4  ;;  %v4965_v13 = vperm.slane %v2393_v37, %v3770_v31  ;;  %v2990_v8 = vsel %vm571_vm6, 0, %v2989_v61  ;;  %v2528_v53 = vpack.c.b16 %v2527_v35, %v2527_v35  ;;  %v2005_v59 = vpop.permute.xlu1 %2004 }
 0x312   : > { %v2472_v16 = vrot.slane %v4814_v9, 4  ;;  %v2053_v28 = vsel %vm751_vm15, %v4679_v47, %v2000_v58  ;;  %v2022_v26 = vunpack.c.l.b16 %v4957_v2  ;;  %v3077_v5 = vunpack.c.l.b16 %v2990_v8 }
 0x313   : > { %v2639_v17 = vsel %vm571_vm6, %v4687_v20, %v2638_v10  ;;  %v2404_v9 = vrot.slane %v4965_v13, 4  ;;  %v2055_v47 = vsel %vm754_vm1, %v2053_v28, %v2005_v59  ;;  %v2482_v58 = vrot.slane %v4841_v15, 4 }
 0x314   : > { %v2023_v20 = vpack.c.b16 %v2022_v26, %v2022_v26  ;;  %v3078_v23 = vpack.c.b16 %v3077_v5, %v3077_v5  ;;  %v4997_v61 = vperm.slane %v2639_v17, %v3770_v31  ;;  %v3015_v59 = vrot.slane %v4850_v12, 4 }
 0x315   : > { %2743 = vrot.lane.b32.xlu0 %v2742_v24, %s3433_s11  ;;  %2489 = vrot.lane.b32.xlu1 %v2488_v25, %s3431_s9  ;;  %v2420_v24 = vrot.slane %v4853_v3, 4  ;;  %v2288_v25 = vunpack.c.l.b16 %v2239_v11  ;;  %v3030_v3 = vsel %vm571_vm6, %v3029_v51, %v4960_v57  ;;  %v2405_v37 = vsel %vm571_vm6, 0, %v2404_v9 }
 0x316   : > { %2255 = vrot.lane.b32.xlu2 %v2254_v60, %s3433_s11  ;;  %v2150_v60 = vrot.slane %v4674_v29, 4  ;;  %v4990_v18 = vperm.slane %v3030_v3, %v3770_v31  ;;  %v4994_v29 = vsel %vm571_vm6, %v4799_v39, %v2472_v16  ;;  %v2746_v35 = vunpack.c.l.b16 %v4997_v61 }
 0x317   : > { %v4984_v63 = vsel %vm571_vm6, %v4838_v32, %v2420_v24  ;;  %v2289_v27 = vpack.c.b16 %v2288_v25, %v2288_v25  ;;  %v2690_v32 = vrot.slane %v4759_v21, 4  ;;  %v2492_v11 = vunpack.c.l.b16 %v2405_v37  ;;  %v5431_v37 = vld [vmem:[#allocation16_spill] sm:$0xff] }
 0x318   : > { %v2151_v34 = vsel %vm571_vm6, %v4664_v6, %v2150_v60  ;;  %v3041_v39 = vrot.slane %v4990_v18, 4  ;;  %v2747_v8 = vpack.c.b16 %v2746_v35, %v2746_v35  ;;  %v2202_v25 = vrot.slane %v4707_v52, 4 }
 0x319   : > { %v5004_v6 = vperm.slane %v2151_v34, %v3770_v31  ;;  %v2691_v21 = vsel %vm571_vm6, %v4716_v1, %v2690_v32  ;;  %v2493_v24 = vpack.c.b16 %v2492_v11, %v2492_v11  ;;  %v5035_v52 = vperm.slane %v4572_v4, %v3770_v31 }
 0x31a   : > { %v3042_v10 = vsel %vm571_vm6, 0, %v3041_v39  ;;  %v2203_v15 = vsel %vm571_vm6, %v4684_v56, %v2202_v25  ;;  %v3016_v17 = vsel %vm571_vm6, 0, %v3015_v59  ;;  %v2430_v34 = vrot.slane %v4889_v38, 4  ;;  %v5055_v39 = vpop.permute.xlu2 %2009  ;;  %v5432_v59 = vld [vmem:[#allocation17_spill] sm:$0xff] }
 0x31b   : > { %v3112_v16 = vunpack.c.l.b16 %v3042_v10  ;;  %v5031_v60 = vperm.slane %v2203_v15, %v3770_v31  ;;  %v2027_v12 = vunpack.c.l.b16 %v5035_v52  ;;  %v2446_v38 = vrot.slane %v4868_v0, 4 }
 0x31c   : > { %v2431_v32 = vsel %vm571_vm6, 0, %v2430_v34  ;;  %v3067_v35 = vrot.slane %v4913_v62, 4  ;;  %v2979_v0 = vrot.slane %v4897_v49, 4  ;;  %v2162_v34 = vrot.slane %v5004_v6, 4 }
 0x31d   : > { %3109 = vrot.lane.b32.xlu0 %v3108_v30, %s3431_s9  ;;  %2778 = vrot.lane.b32.xlu1 %v2777_v54, %s3433_s11  ;;  %v2844_v30 = vrot.slane %v2055_v47, 6  ;;  %v2258_v54 = vunpack.c.l.b16 %v5004_v6  ;;  %v3113_v26 = vpack.c.b16 %v3112_v16, %v3112_v16  ;;  %v2293_v56 = vunpack.c.l.b16 %v5031_v60 }
 0x31e   : > { %2529 = vrot.lane.b32.xlu2 %v2528_v53, %s3432_s10  ;;  %v5019_v53 = vperm.slane %v2691_v21, %v3770_v31  ;;  %v3082_v47 = vunpack.c.l.b16 %v3016_v17  ;;  %v2497_v11 = vunpack.c.l.b16 %v2431_v32  ;;  %v3068_v10 = vsel %vm571_vm6, 0, %v3067_v35 }
 0x31f   : > { %v5014_v51 = vsel %vm2854_vm2, %v4589_v14, %v2844_v30  ;;  %v2259_v1 = vpack.c.b16 %v2258_v54, %v2258_v54  ;;  %v2483_v14 = vsel %vm571_vm6, 0, %v2482_v58  ;;  %v5053_v30 = vperm.slane %v5431_v37, %v3770_v31 }
 0x320   : > { %v2781_v28 = vunpack.c.l.b16 %v5019_v53  ;;  %v2532_v5 = vunpack.c.l.b16 %v2483_v14  ;;  %v3083_v4 = vpack.c.b16 %v3082_v47, %v3082_v47  ;;  %v2447_v54 = vsel %vm571_vm6, %v4857_v44, %v2446_v38 }
 0x321   : > { %v2263_v21 = vunpack.c.l.b16 %v5053_v30  ;;  %v5073_v16 = vperm.slane %v2447_v54, %v3770_v31  ;;  %v2980_v49 = vsel %vm571_vm6, %v4880_v36, %v2979_v0 }
 0x322   : > { %v2782_v3 = vpack.c.b16 %v2781_v28, %v2781_v28  ;;  %v2533_v9 = vpack.c.b16 %v2532_v5, %v2532_v5  ;;  %v5077_v25 = vpop.permute.xlu2 %2014  ;;  %v5088_v5 = vperm.slane %v2980_v49, %v3770_v31 }
 0x323   : > { %v2264_v62 = vpack.c.b16 %v2263_v21, %v2263_v21  ;;  %v2537_v28 = vunpack.c.l.b16 %v5073_v16 }
 0x325   : > { %2290 = vrot.lane.b32.xlu0 %v2289_v27, %s3433_s11  ;;  %2024 = vrot.lane.b32.xlu1 %v2023_v20, %s3428_s30  ;;  %v2294_v27 = vpack.c.b16 %v2293_v56, %v2293_v56  ;;  %v2028_v20 = vpack.c.b16 %v2027_v12, %v2027_v12  ;;  %v2538_v36 = vpack.c.b16 %v2537_v28, %v2537_v28  ;;  %v3087_v56 = vunpack.c.l.b16 %v5088_v5 }
 0x326   : > { %3079 = vrot.lane.b32.xlu2 %v3078_v23, %s3432_s10  ;;  %v5046_v23 = vperm.slane %v4919_v48, %v3770_v31 }
 0x327   : > { %v3088_v32 = vpack.c.b16 %v3087_v56, %v3087_v56 }
 0x328   : > { %v2751_v48 = vunpack.c.l.b16 %v5046_v23 }
 0x32a   : > { %v2752_v58 = vpack.c.b16 %v2751_v48, %v2751_v48  ;;  %v2702_v48 = vrot.slane %v5019_v53, 4  ;;  %v5124_v53 = vperm.slane %v4994_v29, %v3770_v31 }
 0x32d   : > { %2748 = vrot.lane.b32.xlu0 %v2747_v8, %s3428_s30  ;;  %2494 = vrot.lane.b32.xlu1 %v2493_v24, %s3432_s10  ;;  %v2498_v8 = vpack.c.b16 %v2497_v11, %v2497_v11  ;;  %v5067_v24 = vperm.slane %v4952_v40, %v3770_v31  ;;  %v1943_v40 = vrot.slane %v4957_v2, 4 }
 0x32e   : > { %2260 = vrot.lane.b32.xlu2 %v2259_v1, %s3428_s30  ;;  %v3117_v1 = vunpack.c.l.b16 %v3068_v10 }
 0x32f   : > { %v2786_v44 = vunpack.c.l.b16 %v5067_v24  ;;  %v1944_v17 = vsel %vm571_vm6, 0, %v1943_v40 }
 0x330   : > { %v3118_v14 = vpack.c.b16 %v3117_v1, %v3117_v1  ;;  %v2214_v1 = vrot.slane %v5031_v60, 4 }
 0x331   : > { %v2787_v15 = vpack.c.b16 %v2786_v44, %v2786_v44  ;;  %v1969_v44 = vrot.slane %v5035_v52, 4 }
 0x332   : > { %v2215_v29 = vsel %vm571_vm6, 0, %v2214_v1  ;;  %v2188_v1 = vrot.slane %v5053_v30, 4  ;;  %v5434_v30 = vld [vmem:[#allocation19_spill] sm:$0xff] }
 0x333   : > { %v2303_v52 = vunpack.c.l.b16 %v2215_v29 }
 0x335   : > { %3114 = vrot.lane.b32.xlu0 %v3113_v26, %s3432_s10  ;;  %2783 = vrot.lane.b32.xlu1 %v2782_v3, %s3428_s30  ;;  %v5085_v26 = vperm.slane %v5432_v59, %v3770_v31  ;;  %v2394_v3 = vrot.slane %v4933_v41, 4  ;;  %v2650_v41 = vrot.slane %v4997_v61, 4  ;;  %v1970_v59 = vsel %vm571_vm6, 0, %v1969_v44 }
 0x336   : > { %2534 = vrot.lane.b32.xlu2 %v2533_v9, %s3433_s11  ;;  %v2032_v9 = vunpack.c.l.b16 %v1944_v17 }
 0x337   : > { %v2298_v2 = vunpack.c.l.b16 %v5085_v26  ;;  %v2395_v12 = vsel %vm571_vm6, %v4923_v50, %v2394_v3  ;;  %v2651_v38 = vsel %vm571_vm6, 0, %v2650_v41  ;;  %v2163_v50 = vsel %vm571_vm6, 0, %v2162_v34 }
 0x338   : > { %v5103_v37 = vperm.slane %v2395_v12, %v3770_v31  ;;  %v2268_v11 = vunpack.c.l.b16 %v2163_v50  ;;  %v2037_v3 = vunpack.c.l.b16 %v1970_v59  ;;  %v2240_v12 = vrot.slane %v5085_v26, 4 }
 0x339   : > { %v3057_v41 = vrot.slane %v4883_v42, 4  ;;  %v2304_v34 = vpack.c.b16 %v2303_v52, %v2303_v52  ;;  %v2728_v50 = vrot.slane %v5067_v24, 4  ;;  %v2484_v59 = vrot.slane %v5124_v53, 4 }
 0x33a   : > { %v2502_v6 = vunpack.c.l.b16 %v5103_v37  ;;  %v2189_v52 = vsel %vm571_vm6, 0, %v2188_v1 }
 0x33c   : > { %v2503_v10 = vpack.c.b16 %v2502_v6, %v2502_v6 }
 0x33d   : > { %2295 = vrot.lane.b32.xlu0 %v2294_v27, %s3428_s30  ;;  %2029 = vrot.lane.b32.xlu1 %v2028_v20, %s3429_s7  ;;  %v3031_v27 = vrot.slane %v4960_v57, 4  ;;  %v2299_v20 = vpack.c.b16 %v2298_v2, %v2298_v2  ;;  %v2756_v57 = vunpack.c.l.b16 %v2651_v38  ;;  %v2676_v2 = vrot.slane %v5046_v23, 4 }
 0x33e   : > { %3084 = vrot.lane.b32.xlu2 %v3083_v4, %s3433_s11  ;;  %v2033_v4 = vpack.c.b16 %v2032_v9, %v2032_v9  ;;  %v3058_v23 = vsel %vm571_vm6, %v4865_v19, %v3057_v41 }
 0x33f   : > { %v3032_v61 = vsel %vm571_vm6, %v4945_v7, %v3031_v27  ;;  %v2757_v54 = vpack.c.b16 %v2756_v57, %v2756_v57  ;;  %v2269_v7 = vpack.c.b16 %v2268_v11, %v2268_v11  ;;  %v2038_v27 = vpack.c.b16 %v2037_v3, %v2037_v3 }
 0x340   : > { %v5115_v21 = vperm.slane %v3032_v61, %v3770_v31  ;;  %v2991_v61 = vrot.slane %v5088_v5, 4  ;;  %v5167_v19 = vperm.slane %v3058_v23, %v3770_v31 }
 0x342   : > { %v3122_v0 = vunpack.c.l.b16 %v5115_v21  ;;  %v3127_v5 = vunpack.c.l.b16 %v5167_v19 }
 0x344   : > { %v3123_v49 = vpack.c.b16 %v3122_v0, %v3122_v0 }
 0x345   : > { %2753 = vrot.lane.b32.xlu0 %v2752_v58, %s3429_s7  ;;  %2499 = vrot.lane.b32.xlu1 %v2498_v8, %s3433_s11  ;;  %v2703_v58 = vsel %vm571_vm6, 0, %v2702_v48  ;;  %v3005_v8 = vrot.slane %v4803_v55, 4 }
 0x346   : > { %2265 = vrot.lane.b32.xlu2 %v2264_v62, %s3429_s7  ;;  %v2791_v62 = vunpack.c.l.b16 %v2703_v58  ;;  %v2729_v58 = vsel %vm571_vm6, 0, %v2728_v50 }
 0x347   : > { %v3006_v55 = vsel %vm571_vm6, %v4787_v43, %v3005_v8  ;;  %v2796_v0 = vunpack.c.l.b16 %v2729_v58 }
 0x348   : > { %v2792_v28 = vpack.c.b16 %v2791_v62, %v2791_v62 }
 0x34d   : > { %3119 = vrot.lane.b32.xlu0 %v3118_v14, %s3433_s11  ;;  %2788 = vrot.lane.b32.xlu1 %v2787_v15, %s3429_s7  ;;  %v2542_v14 = vunpack.c.l.b16 %v5124_v53  ;;  %v5133_v15 = vperm.slane %v3006_v55, %v3770_v31  ;;  %v2406_v55 = vrot.slane %v5103_v37, 4  ;;  %v2273_v37 = vunpack.c.l.b16 %v2189_v52 }
 0x34e   : > { %2539 = vrot.lane.b32.xlu2 %v2538_v36, %s3428_s30 }
 0x34f   : > { %v2543_v60 = vpack.c.b16 %v2542_v14, %v2542_v14  ;;  %v3092_v17 = vunpack.c.l.b16 %v5133_v15  ;;  %v2407_v3 = vsel %vm571_vm6, 0, %v2406_v55  ;;  %v2274_v23 = vpack.c.b16 %v2273_v37, %v2273_v37 }
 0x350   : > { %v2739_v47 = vpop.permute.xlu2 %2738 }
 0x355   : > { %2300 = vrot.lane.b32.xlu0 %v2299_v20, %s3429_s7  ;;  %2034 = vrot.lane.b32.xlu1 %v2033_v4, %s3430_s8  ;;  %v3093_v20 = vpack.c.b16 %v3092_v17, %v3092_v17  ;;  %v5151_v4 = vperm.slane %v4984_v63, %v3770_v31  ;;  %v3043_v17 = vrot.slane %v5115_v21, 4  ;;  %v2458_v21 = vrot.slane %v5073_v16, 4 }
 0x356   : > { %3089 = vrot.lane.b32.xlu2 %v3088_v32, %s3428_s30  ;;  %v2677_v32 = vsel %vm571_vm6, 0, %v2676_v2  ;;  %v5435_v2 = vld [vmem:[#allocation22_spill] sm:$0xff] }
 0x357   : > { %v2507_v38 = vunpack.c.l.b16 %v5151_v4 }
 0x358   : > { %v2251_v35 = vpop.permute.xlu2 %2250 }
 0x35d   : > { %2758 = vrot.lane.b32.xlu0 %v2757_v54, %s3430_s8  ;;  %2504 = vrot.lane.b32.xlu1 %v2503_v10, %s3428_s30  ;;  %v2508_v10 = vpack.c.b16 %v2507_v38, %v2507_v38  ;;  %v3017_v38 = vrot.slane %v5133_v15, 4 }
 0x35e   : > { %2270 = vrot.lane.b32.xlu2 %v2269_v7, %s3430_s8 }
 0x360   : > { %v2525_v40 = vpop.permute.xlu2 %2524 }
 0x365   : > { %3124 = vrot.lane.b32.xlu0 %v3123_v49, %s3428_s30  ;;  %2793 = vrot.lane.b32.xlu1 %v2792_v28, %s3430_s8  ;;  %v2573_v49 = vsel %vm735_vm10, %v4901_v46, %v2525_v40  ;;  %v3128_v28 = vpack.c.b16 %v3127_v5, %v3127_v5  ;;  %v2058_v46 = vsel %vm735_vm10, %v5434_v30, %v5055_v39  ;;  %v2485_v40 = vsel %vm571_vm6, 0, %v2484_v59  ;;  %s284_s30 = scalar_lea.vmem %s5335_s6, %s5308_s17 }
 0x366   : > { %2544 = vrot.lane.b32.xlu2 %v2543_v60, %s3429_s7  ;;  %v2797_v60 = vpack.c.b16 %v2796_v0, %v2796_v0  ;;  %v2060_v53 = vsel %vm739_vm11, %v2058_v46, %v5077_v25 }
 0x367   : > { %v2734_v43 = vpop.permute.xlu0 %2733 }
 0x368   : > { %v2802_v36 = vsel %vm735_vm10, %v4719_v45, %v2734_v43  ;;  %v3075_v9 = vpop.permute.xlu2 %3074  ;;  %v2241_v45 = vsel %vm571_vm6, 0, %v2240_v12 }
 0x369   : > { %v5145_v56 = vsel %vm739_vm11, %v2802_v36, %v2739_v47  ;;  %v2761_v47 = vunpack.c.l.b16 %v2677_v32  ;;  %v2308_v48 = vunpack.c.l.b16 %v2241_v45  ;;  %v3143_v36 = vsel %vm735_vm10, %v4929_v22, %v3075_v9 }
 0x36a   : > { %v2552_v45 = vunpack.c.l.b16 %v2485_v40  ;;  %v3044_v22 = vsel %vm571_vm6, 0, %v3043_v17 }
 0x36b   : > { %v2762_v54 = vpack.c.b16 %v2761_v47, %v2761_v47  ;;  %v2309_v24 = vpack.c.b16 %v2308_v48, %v2308_v48  ;;  %v3132_v47 = vunpack.c.l.b16 %v3044_v22 }
 0x36d   : > { %2305 = vrot.lane.b32.xlu0 %v2304_v34, %s3430_s8  ;;  %2039 = vrot.lane.b32.xlu1 %v2038_v27, %s3434_s12  ;;  %v2512_v27 = vunpack.c.l.b16 %v2407_v3  ;;  %v3133_v48 = vpack.c.b16 %v3132_v47, %v3132_v47 }
 0x36e   : > { %3094 = vrot.lane.b32.xlu2 %v3093_v20, %s3429_s7 }
 0x36f   : > { %v2769_v42 = vpop.permute.xlu1 %2768  ;;  %v2246_v26 = vpop.permute.xlu0 %2245  ;;  %v2513_v9 = vpack.c.b16 %v2512_v27, %v2512_v27 }
 0x370   : > { %v2314_v63 = vsel %vm735_vm10, %v4690_v33, %v2246_v26  ;;  %v2256_v57 = vpop.permute.xlu2 %2255  ;;  %v2992_v33 = vsel %vm571_vm6, 0, %v2991_v61  ;;  %v2553_v26 = vpack.c.b16 %v2552_v45, %v2552_v45 }
 0x371   : > { %v2316_v6 = vsel %vm739_vm11, %v2314_v63, %v2251_v35  ;;  %v5433_v35 = vld [vmem:[#allocation24_spill] sm:$0xff]  ;;  %v3097_v62 = vunpack.c.l.b16 %v2992_v33 }
 0x372   : > { %v5170_v11 = vsel %vm742_vm12, %v2316_v6, %v2256_v57  ;;  %v2817_v31 = vsel %vm735_vm10, %v5433_v35, %v2769_v42  ;;  %v2459_v42 = vsel %vm571_vm6, 0, %v2458_v21  ;;  %v2432_v57 = vrot.slane %v5151_v4, 4 }
 0x373   : > { %v3098_v43 = vpack.c.b16 %v3097_v62, %v3097_v62  ;;  %v2547_v50 = vunpack.c.l.b16 %v2459_v42 }
 0x374   : > { %v2433_v15 = vsel %vm571_vm6, 0, %v2432_v57 }
 0x375   : > { %2763 = vrot.lane.b32.xlu0 %v2762_v54, %s3434_s12  ;;  %2509 = vrot.lane.b32.xlu1 %v2508_v10, %s3429_s7  ;;  %v3018_v10 = vsel %vm571_vm6, 0, %v3017_v38  ;;  %v2548_v58 = vpack.c.b16 %v2547_v50, %v2547_v50  ;;  %v2517_v4 = vunpack.c.l.b16 %v2433_v15  ;;  %v5436_v15 = vld [vmem:[#allocation18_spill] sm:$0xff] }
 0x376   : > { %2310 = vrot.lane.b32.xlu2 %v2309_v24, %s3434_s12  ;;  %v3102_v33 = vunpack.c.l.b16 %v3018_v10  ;;  %v3069_v24 = vrot.slane %v5167_v19, 4 }
 0x377   : > { %v2281_v8 = vpop.permute.xlu1 %2280  ;;  %v2774_v7 = vpop.permute.xlu0 %2773  ;;  %v2518_v0 = vpack.c.b16 %v2517_v4, %v2517_v4 }
 0x378   : > { %v2819_v44 = vsel %vm739_vm11, %v2817_v31, %v2774_v7  ;;  %v2530_v14 = vpop.permute.xlu2 %2529  ;;  %v2329_v12 = vsel %vm735_vm10, %v5435_v2, %v2281_v8  ;;  %v3103_v8 = vpack.c.b16 %v3102_v33, %v3102_v33  ;;  %v3070_v7 = vsel %vm571_vm6, 0, %v3069_v24 }
 0x379   : > { %v2575_v29 = vsel %vm739_vm11, %v2573_v49, %v2530_v14  ;;  %v3137_v62 = vunpack.c.l.b16 %v3070_v7  ;;  %vm2930_vm6 = vcmask 7168  }
 0x37b   : > { %v3138_v14 = vpack.c.b16 %v3137_v62, %v3137_v62 }
 0x37d   : > { %3129 = vrot.lane.b32.xlu0 %v3128_v28, %s3429_s7  ;;  %2798 = vrot.lane.b32.xlu1 %v2797_v60, %s3434_s12 }
 0x37e   : > { %3099 = vrot.lane.b32.xlu2 %v3098_v43, %s3430_s8 }
 0x37f   : > { %v2020_v41 = vpop.permute.xlu1 %2019  ;;  %v2286_v34 = vpop.permute.xlu0 %2285 }
 0x380   : > { %v2062_v39 = vsel %vm742_vm12, %v2060_v53, %v2020_v41  ;;  %v2331_v20 = vsel %vm739_vm11, %v2329_v12, %v2286_v34  ;;  %v3080_v32 = vpop.permute.xlu2 %3079 }
 0x381   : > { %v3145_v25 = vsel %vm739_vm11, %v3143_v36, %v3080_v32 }
 0x385   : > { %2514 = vrot.lane.b32.xlu0 %v2513_v9, %s3430_s8  ;;  %2275 = vrot.lane.b32.xlu1 %v2274_v23, %s3434_s12 }
 0x386   : > { %2554 = vrot.lane.b32.xlu2 %v2553_v26, %s3434_s12 }
 0x387   : > { %v2490_v16 = vpop.permute.xlu1 %2489  ;;  %v2744_v63 = vpop.permute.xlu0 %2743 }
 0x388   : > { %v2806_v61 = vsel %vm742_vm12, %v5145_v56, %v2744_v63  ;;  %v2261_v6 = vpop.permute.xlu2 %2260 }
 0x389   : > { %v2320_v54 = vsel %vm745_vm13, %v5170_v11, %v2261_v6 }
 0x38d   : > { %3134 = vrot.lane.b32.xlu0 %v3133_v48, %s3430_s8  ;;  %2549 = vrot.lane.b32.xlu1 %v2548_v58, %s3430_s8 }
 0x38f   : > { %v2779_v56 = vpop.permute.xlu1 %2778  ;;  %v3110_v5 = vpop.permute.xlu0 %3109 }
 0x390   : > { %v2821_v35 = vsel %vm742_vm12, %v2819_v44, %v2779_v56  ;;  %v2535_v31 = vpop.permute.xlu2 %2534  ;;  %v3158_v46 = vsel %vm735_vm10, %v4990_v18, %v3110_v5 }
 0x391   : > { %v5225_v11 = vsel %vm742_vm12, %v2575_v29, %v2535_v31  ;;  %v2558_v29 = vsel %vm735_vm10, %v4965_v13, %v2490_v16 }
 0x395   : > { %3104 = vrot.lane.b32.xlu0 %v3103_v8, %s3434_s12  ;;  %2519 = vrot.lane.b32.xlu1 %v2518_v0, %s3434_s12 }
 0x397   : > { %v2025_v1 = vpop.permute.xlu1 %2024  ;;  %v2291_v19 = vpop.permute.xlu0 %2290 }
 0x398   : > { %v2064_v55 = vsel %vm745_vm13, %v2062_v39, %v2025_v1  ;;  %v2333_v49 = vsel %vm742_vm12, %v2331_v20, %v2291_v19  ;;  %v3085_v44 = vpop.permute.xlu2 %3084 }
 0x399   : > { %v5233_v28 = vsel %vm742_vm12, %v3145_v25, %v3085_v44 }
 0x39d   : > { %3139 = vrot.lane.b32.xlu1 %v3138_v14, %s3434_s12 }
 0x39f   : > { %v2495_v59 = vpop.permute.xlu1 %2494  ;;  %v2749_v60 = vpop.permute.xlu0 %2748 }
 0x3a0   : > { %v2560_v43 = vsel %vm739_vm11, %v2558_v29, %v2495_v59  ;;  %v2808_v52 = vsel %vm745_vm13, %v2806_v61, %v2749_v60  ;;  %v2266_v3 = vpop.permute.xlu2 %2265 }
 0x3a1   : > { %v2322_v30 = vsel %vm748_vm14, %v2320_v54, %v2266_v3 }
 0x3a7   : > { %v2784_v37 = vpop.permute.xlu1 %2783  ;;  %v3115_v40 = vpop.permute.xlu0 %3114 }
 0x3a8   : > { %v2823_v17 = vsel %vm745_vm13, %v2821_v35, %v2784_v37  ;;  %v3160_v53 = vsel %vm739_vm11, %v3158_v46, %v3115_v40  ;;  %v2540_v36 = vpop.permute.xlu2 %2539 }
 0x3af   : > { %v2030_v13 = vpop.permute.xlu1 %2029  ;;  %v2296_v2 = vpop.permute.xlu0 %2295 }
 0x3b0   : > { %v2066_v12 = vsel %vm748_vm14, %v2064_v55, %v2030_v13  ;;  %v2335_v41 = vsel %vm745_vm13, %v2333_v49, %v2296_v2  ;;  %v3090_v39 = vpop.permute.xlu2 %3089 }
 0x3b1   : > { %v3149_v2 = vsel %vm745_vm13, %v5233_v28, %v3090_v39  ;;  %v2885_v39 = vld [vmem:[%s5330_s1] sm:$0xf] }
 0x3b7   : > { %v2500_v34 = vpop.permute.xlu1 %2499  ;;  %v2754_v27 = vpop.permute.xlu0 %2753 }
 0x3b8   : > { %v2562_v20 = vsel %vm742_vm12, %v2560_v43, %v2500_v34  ;;  %v2271_v45 = vpop.permute.xlu2 %2270  ;;  %v2810_v56 = vsel %vm748_vm14, %v2808_v52, %v2754_v27  ;;  %v2579_v52 = vsel %vm745_vm13, %v5225_v11, %v2540_v36 }
 0x3b9   : > { %v2324_v44 = vsel %vm751_vm15, %v2322_v30, %v2271_v45 }
 0x3bf   : > { %v2789_v21 = vpop.permute.xlu1 %2788  ;;  %v3120_v18 = vpop.permute.xlu0 %3119 }
 0x3c0   : > { %v5249_v32 = vsel %vm742_vm12, %v3160_v53, %v3120_v18  ;;  %v2545_v9 = vpop.permute.xlu2 %2544  ;;  %v2825_v7 = vsel %vm748_vm14, %v2823_v17, %v2789_v21 }
 0x3c1   : > { %v2581_v3 = vsel %vm748_vm14, %v2579_v52, %v2545_v9 }
 0x3c7   : > { %v2035_v25 = vpop.permute.xlu1 %2034  ;;  %v2301_v22 = vpop.permute.xlu0 %2300 }
 0x3c8   : > { %v3095_v26 = vpop.permute.xlu2 %3094  ;;  %v2068_v16 = vsel %vm751_vm15, %v2066_v12, %v2035_v25  ;;  %v2337_v63 = vsel %vm748_vm14, %v2335_v41, %v2301_v22  ;;  %v5437_v25 = vld [vmem:[#allocation21_spill] sm:$0xff] }
 0x3c9   : > { %v3151_v11 = vsel %vm748_vm14, %v3149_v2, %v3095_v26 }
 0x3cf   : > { %v2505_v23 = vpop.permute.xlu1 %2504  ;;  %v2759_v42 = vpop.permute.xlu0 %2758 }
 0x3d0   : > { %v2311_v57 = vpop.permute.xlu2 %2310  ;;  %v2812_v5 = vsel %vm751_vm15, %v2810_v56, %v2759_v42 }
 0x3d7   : > { %v2794_v47 = vpop.permute.xlu1 %2793  ;;  %v5251_v38 = vpop.permute.xlu0 %3124 }
 0x3d8   : > { %v2827_v0 = vsel %vm751_vm15, %v2825_v7, %v2794_v47  ;;  %v3100_v49 = vpop.permute.xlu2 %3099  ;;  %v3164_v9 = vsel %vm745_vm13, %v5249_v32, %v5251_v38  ;;  %v5438_v47 = vld [vmem:[#allocation20_spill] sm:$0xff] }
 0x3d9   : > { %v3153_v12 = vsel %vm751_vm15, %v3151_v11, %v3100_v49 }
 0x3df   : > { %v2040_v50 = vpop.permute.xlu1 %2039  ;;  %v2306_v61 = vpop.permute.xlu0 %2305 }
 0x3e0   : > { %v2070_v6 = vsel %vm754_vm1, %v2068_v16, %v2040_v50  ;;  %v2339_v48 = vsel %vm751_vm15, %v2337_v63, %v2306_v61  ;;  %v2555_v40 = vpop.permute.xlu2 %2554 }
 0x3e1   : > { %v2845_v54 = vrot.slane %v2070_v6, 6  ;;  %v2341_v10 = vsel %vm754_vm1, %v2339_v48, %v2311_v57 }
 0x3e2   : > { %v2849_v58 = vrot.slane %v2341_v10, 4 }
 0x3e3   : > { %v2874_v33 = vsel %vm2854_vm2, %v5436_v15, %v2845_v54 }
 0x3e4   : > { %v2878_v24 = vsel %vm2859_vm0, %v2874_v33, %v2849_v58 }
 0x3e7   : > { %v2510_v4 = vpop.permute.xlu1 %2509  ;;  %v2764_v35 = vpop.permute.xlu0 %2763 }
 0x3e8   : > { %v2814_v31 = vsel %vm754_vm1, %v2812_v5, %v2764_v35 }
 0x3e9   : > { %v2890_v8 = vsel %vm2854_vm2, %v2814_v31, 0 }
 0x3ea   : > { %2899 = vmatpush.bf16.msra.mxu0 %v2890_v8 }
 0x3ef   : > { %v2799_v62 = vpop.permute.xlu1 %2798  ;;  %v3130_v1 = vpop.permute.xlu0 %3129 }
 0x3f0   : > { %v2829_v19 = vsel %vm754_vm1, %v2827_v0, %v2799_v62 }
 0x3f1   : > { %v2892_v55 = vsel %vm2854_vm2, %v2829_v19, 0 }
 0x3f2   : > { %2912 = vmatpush.bf16.msra.mxu1 %v2892_v55 }
 0x3f7   : > { %v2276_v14 = vpop.permute.xlu1 %2275  ;;  %v2515_v29 = vpop.permute.xlu0 %2514 }
 0x3f8   : > { %v2326_v59 = vsel %vm754_vm1, %v2324_v44, %v2276_v14 }
 0x3f9   : > { %v2848_v60 = vrot.slane %v2326_v59, 4 }
 0x3fb   : > { %v2876_v43 = vsel %vm2859_vm0, %v5014_v51, %v2848_v60  ;;  %v2564_v51 = vsel %vm745_vm13, %v2562_v20, %v2505_v23  ;;  %v2934_v20 = vld [vmem:[%s5331_s2] sm:$0xf]  ;;  %v3166_v23 = vsel %vm748_vm14, %v3164_v9, %v3130_v1 }
 0x3fc   : > { %v2566_v36 = vsel %vm748_vm14, %v2564_v51, %v2510_v4 }
 0x3fd   : > { %v2568_v41 = vsel %vm751_vm15, %v2566_v36, %v2515_v29 }
 0x3ff   : > { %v2550_v46 = vpop.permute.xlu1 %2549  ;;  %v3135_v37 = vpop.permute.xlu0 %3134 }
 0x400   : > { %v2583_v17 = vsel %vm751_vm15, %v2581_v3, %v2550_v46  ;;  %v3168_v42 = vsel %vm751_vm15, %v3166_v23, %v3135_v37 }
 0x401   : > { %v2585_v30 = vsel %vm754_vm1, %v2583_v17, %v2555_v40 }
 0x402   : > { %v2853_v53 = vrot.slane %v2585_v30, 2 }
 0x404   : > { %v2883_v13 = vsel %vm2864_vm3, %v2878_v24, %v2853_v53 }
 0x405   : > { %2913 = vmatpush.bf16.msra.mxu1 %v2883_v13 }
 0x407   : > { %v2520_v34 = vpop.permute.xlu1 %2519  ;;  %v3105_v27 = vpop.permute.xlu0 %3104 }
 0x408   : > { %v2570_v21 = vsel %vm754_vm1, %v2568_v41, %v2520_v34  ;;  %v3155_v18 = vsel %vm754_vm1, %v3153_v12, %v3105_v27 }
 0x409   : > { %v2852_v45 = vrot.slane %v2570_v21, 2  ;;  %2914 = vmatpush.bf16.msra.mxu1 %v5437_v25  ;;  %v3175_v28 = vsel %vm2854_vm2, %v3155_v18, 0 }
 0x40a   : > { %3186 = vmatpush.bf16.msra.mxu2 %v3175_v28 }
 0x40b   : > { %v2880_v22 = vsel %vm2864_vm3, %v2876_v43, %v2852_v45 }
 0x40c   : > { %2900 = vmatpush.bf16.msra.mxu0 %v2880_v22  ;;  %3385 = vmatmul.msk.bf16.vlgmr.msra.gmra.mxu1 %vm2886_vm4, %v2885_v39 }
 0x40d   : > { %3386 = vmatmul.msk.bf16.vlgmr.msra.gmra.mxu2 %vm3171_vm5, %v2934_v20 }
 0x40f   : > { %v3140_v26 = vpop.permute.xlu1 %3139 }
 0x410   : > { %2901 = vmatpush.bf16.msra.mxu0 %v5438_v47  ;;  %v3170_v16 = vsel %vm754_vm1, %v3168_v42, %v3140_v26 }
 0x411   : > { %v3177_v63 = vsel %vm2854_vm2, %v3170_v16, 0 }
 0x412   : > { %3199 = vmatpush.bf16.msra.mxu3 %v3177_v63 }
 0x413   : > { %3384 = vmatmul.msk.bf16.vlgmr.msra.gmra.mxu0 %vm2886_vm4, %v2885_v39 }
 0x415   : > { %3387 = vmatmul.msk.bf16.vlgmr.msra.gmra.mxu3 %vm3171_vm5, %v2934_v20 }
 0x489   : > { %v2916_v50 = vpop.f32.mrf.mxu1 }
 0x48a   : > { %v2926_v32 = vmul.f32 %v2916_v50, %v2916_v50 }
 0x490   : > { %v2903_v38 = vpop.f32.mrf.mxu0  ;;  %v3188_v61 = vpop.f32.mrf.mxu2 }
 0x491   : > { %v2920_v57 = vpack.c.bf16 %v2916_v50, %v2903_v38  ;;  %v2922_v6 = vadd.f32 %v2916_v50, %v2903_v38  ;;  %v2925_v48 = vmul.f32 %v2903_v38, %v2903_v38  ;;  %v2918_v54 = vpop.f32.mrf.mxu1  ;;  %v3210_v58 = vmul.f32 %v3188_v61, %v3188_v61 }
 0x493   : > { %2921 = vst [vmem:[%s271_s20] sm:$0xff] %v2920_v57  ;;  %v2927_v10 = vadd.f32 %v2926_v32, %v2925_v48  ;;  %2923 = vadd.xlane.f32.xlu2 %v2922_v6 }
 0x495   : > { %2928 = vadd.xlane.f32.xlu0 %v2927_v10 }
 0x498   : > { %v2905_v15 = vpop.f32.mrf.mxu0  ;;  %v3190_v33 = vpop.f32.mrf.mxu2 }
 0x499   : > { %v3201_v24 = vpop.f32.mrf.mxu3 }
 0x49a   : > { %v3205_v56 = vpack.c.bf16 %v3201_v24, %v3188_v61  ;;  %v3207_v5 = vadd.f32 %v3201_v24, %v3188_v61  ;;  %v3211_v4 = vmul.f32 %v3201_v24, %v3201_v24 }
 0x49c   : > { %3206 = vst [vmem:[%s280_s24] sm:$0xff] %v3205_v56  ;;  %3208 = vadd.xlane.f32.xlu1 %v3207_v5  ;;  %v3212_v35 = vadd.f32 %v3211_v4, %v3210_v58 }
 0x49e   : > { %3213 = vadd.xlane.f32.xlu2 %v3212_v35 }
 0x4a1   : > { %v3203_v31 = vpop.f32.mrf.mxu3 }
 0x506   : > { %v2924_v8 = vpop.xlane.xlu2 %2923 }
 0x508   : > { %v2929_v7 = vpop.xlane.xlu0 %2928 }
 0x509   : > { %v2931_v0 = vsel %vm2930_vm6, %v2924_v8, %v2929_v7 }
 0x50a   : > { %2933 = vst.msk [vmem:[%s275_s27] sm:$0xff] %vm2932_vm7, %v2931_v0 }
 0x50f   : > { %v3209_v62 = vpop.xlane.xlu1 %3208 }
 0x511   : > { %v3214_v1 = vpop.xlane.xlu2 %3213 }
 0x512   : > { %v3215_v19 = vsel %vm2930_vm6, %v3209_v62, %v3214_v1 }
 0x513   : > { %3216 = vst.msk [vmem:[%s284_s30] sm:$0xff] %vm2932_vm7, %v3215_v19 }
 0x514 PF: > { %s17_s21 = sadd.s32 1, %s3420_s21  }
 0x515   : > { %p14_p4 = scmp.ge.s32.totalorder %s17_s21, 4  }
 0x517   :  { %16 = sbr.rel (!%p14_p4) target bundleno = 1 (0x1), region = 98 }

// kernel: basic_block.4
= control target key start
LH: loop header
LB: loop body
LE: loop exit
PB: predicated region body
PF: predicated region fallthrough
CT: control target
= control target key end

     0   :  { %s4040_s18 = smov 0   ;;  %s7181_s0 = inlined_call_operand.vmem [shape: bf16[2,8,256], index: 0, kind: input, shape index: {}]   ;;  %s7182_s1 = inlined_call_operand.vmem [shape: f32[8,1], index: 1, kind: input, shape index: {}]   ;;  %s7183_s2 = inlined_call_operand.vmem [shape: f32[8,1], index: 2, kind: input, shape index: {}]   ;;  %s7184_s3 = inlined_call_operand.vmem [shape: bf16[8,72], index: 3, kind: input, shape index: {}]   ;;  %s7185_s4 = inlined_call_operand.vmem [shape: bf16[2,8,256], index: 4, kind: output, shape index: {0}]   ;;  %s7186_s5 = inlined_call_operand.vmem [shape: f32[2,8,2], index: 5, kind: output, shape index: {1}]  }
   0x1 LB: > { %s3939_s19 = sadd.s32 4294967295, %s3995_s18   ;;  %p3943_p0 = scmp.ge.s32.totalorder %s3995_s18, 1  ;;  %s3995_s18 = sphi %s4040_s18, %s16_s18  }
   0x2   : > { %p190_p1 = scmp.lt.s32.totalorder %s3995_s18, 3 }
   0x4   : > { %p191_p2 = pnand %p3943_p0, %p190_p1 }
   0x6   : > { %194 = sbr.rel (%p191_p2) target bundleno = 1396 (0x574), region = 36 }
   0xb   : > { %v240_v0 = vld [vmem:[%s7182_s1] sm:$0xff]  ;;  %v3997_v1 = vmov 0   ;;  %p222_p3 = scmp.lt.s32.totalorder %s3939_s19, 1  ;;  %s3998_s28 = smov 48   ;;  %v4005_v20 = vmov 1983009808  }
   0xc   : > { %3988 = vset.pattern.permute.xlu0 %v3997_v1  ;;  %v248_v2 = vld [vmem:[%s7183_s2] sm:$0xff]  ;;  %s3999_s29 = smov 80   ;;  %s4000_s30 = smov 112   ;;  %v476_v21 = vunpack.c.l.s4 %v4005_v20  ;;  %vm473_vm0 = vcmask 1047556   ;;  %v4006_v42 = vmov 1934713408  }
   0xd   : > { %243 = vperm.xlu0 %3988, %v240_v0   ;;  %s7668_s19 = smov (!%p222_p3, %s3939_s19), 1  ;;  %s4001_s6 = smov 64   ;;  %v490_v43 = vunpack.c.l.s4 %v4006_v42  ;;  %vm259_vm1 = vsmask.f32 256  ;;  %vm633_vm2 = vsmask.f32 4368 }
   0xe   : > { %s4055_s24 = sshll.u32 %s7668_s19, 3  ;;  %s4002_s7 = smov 96   ;;  %v4068_v29 = vunpack.c.0.s8 %v476_v21  ;;  %vm4135_vm3 = vmor %vm259_vm1, %vm633_vm2  ;;  %vm258_vm4 = vcmask 139264   ;;  %vm285_vm5 = vsmask.f32 7938  ;;  %vm318_vm7 = vcmask 0  }
   0xf   : > { %s226_s27 = scalar_lea.vmem %s7181_s0, %s4055_s24  ;;  %s4003_s8 = smov 16   ;;  %v4084_v55 = vunpack.c.0.s8 %v490_v43  ;;  %vm4186_vm6 = vmand %vm258_vm4, %vm285_vm5  ;;  %vm379_vm9 = vcmask 139400   ;;  %vm311_vm12 = vcmask 3072   ;;  %vm850_vm13 = vcmask 131080  }
  0x10   : > { %v237_v4 = vld [vmem:[%s226_s27] sm:$0xff]  ;;  %s4004_s9 = smov 32   ;;  %s4007_s10 = smov 1   ;;  %vm4198_vm8 = vmand %vm318_vm7, %vm259_vm1  ;;  %317 = vst.msk [vmem:[#allocation2 + $0x4] sm:$0xf] %vm311_vm12, %v3997_v1 }
  0x11   : > { %v238_v5 = vunpack.c.l.bf16 %v237_v4  ;;  %v239_v6 = vunpack.c.h.bf16 %v237_v4  ;;  %vm4212_vm10 = vmand %vm379_vm9, %vm259_vm1  ;;  %326 = vst.msk [vmem:[#allocation2 + $0x10] sm:$0xf] %vm311_vm12, %v3997_v1  ;;  %s4008_s11 = smov 127   ;;  %s4009_s12 = smov 126   ;;  %vm1786_vm9 = vsmask.f32 7440 }
  0x12   : > { %vm4238_vm11 = vmand %vm258_vm4, %vm259_vm1  ;;  %333 = vst.msk [vmem:[#allocation2 + $0x1c] sm:$0xf] %vm311_vm12, %v3997_v1  ;;  %s231_s17 = scalar_lea.vmem %s7185_s4, %s4055_s24  ;;  %s235_s21 = scalar_lea.vmem %s7186_s5, %s4055_s24 }
  0x13   : > { %vm4258_vm14 = vmand %vm311_vm12, %vm285_vm5  ;;  %340 = vst.msk [vmem:[#allocation2 + $0x28] sm:$0xf] %vm311_vm12, %v3997_v1 }
  0x14   : > { %vm4263_vm15 = vmand %vm850_vm13, %vm259_vm1  ;;  %vm372_vm1 = vcmask 142472   ;;  %347 = vst.msk [vmem:[#allocation2 + $0x34] sm:$0xf] %vm311_vm12, %v3997_v1  ;;  %vm1143_vm13 = vcmask 392192  }
  0x15   : > { %251 = vperm.xlu0 %3988, %v248_v2   ;;  %354 = vst.msk [vmem:[#allocation2 + $0x40] sm:$0xf] %vm311_vm12, %v3997_v1  ;;  %vm4285_vm2 = vmand %vm372_vm1, %vm285_vm5 }
  0x16   : > { %361 = vst.msk [vmem:[#allocation2 + $0x4c] sm:$0xf] %vm311_vm12, %v3997_v1 }
  0x17   : > { %368 = vst.msk [vmem:[#allocation2 + $0x58] sm:$0xf] %vm311_vm12, %v3997_v1  ;;  %vm1140_vm12 = vcmask 261120  }
  0x18   : > { %378 = vst.msk [vmem:[#allocation2 + $0x4] sm:$0xf] %vm372_vm1, %v3997_v1 }
  0x19   : > { %387 = vst.msk [vmem:[#allocation2 + $0x10] sm:$0xf] %vm372_vm1, %v3997_v1 }
  0x1a   : > { %394 = vst.msk [vmem:[#allocation2 + $0x1c] sm:$0xf] %vm372_vm1, %v3997_v1 }
  0x1b   : > { %401 = vst.msk [vmem:[#allocation2 + $0x28] sm:$0xf] %vm372_vm1, %v3997_v1 }
  0x1c   : > { %408 = vst.msk [vmem:[#allocation2 + $0x34] sm:$0xf] %vm372_vm1, %v3997_v1 }
  0x1d   : > { %415 = vst.msk [vmem:[#allocation2 + $0x40] sm:$0xf] %vm372_vm1, %v3997_v1 }
  0x1e   : > { %422 = vst.msk [vmem:[#allocation2 + $0x4c] sm:$0xf] %vm372_vm1, %v3997_v1 }
  0x1f   : > { %429 = vst.msk [vmem:[#allocation2 + $0x58] sm:$0xf] %vm372_vm1, %v3997_v1  ;;  %vm1152_vm1 = vcmask 785408  }
  0x7f   : > { %v244_v3 = vpop.permute.xlu0 %243 }
  0x80   : > { %v246_v7 = vmul.f32 %v244_v3, %v238_v5  ;;  %v247_v8 = vmul.f32 %v244_v3, %v239_v6 }
  0x87   : > { %v252_v9 = vpop.permute.xlu0 %251 }
  0x88   : > { %v254_v10 = vadd.f32 %v252_v9, %v246_v7  ;;  %v255_v11 = vadd.f32 %v252_v9, %v247_v8 }
  0x8a   : > { %v256_v12 = vmax.f32 %v254_v10, 0.0  ;;  %v257_v13 = vmax.f32 %v255_v11, 0.0 }
  0x8c   : > { %v433_v14 = vpack.c.bf16 %v257_v13, %v256_v12 }
  0x8e   : > { %453 = vrot.lane.b32.xlu0 %v433_v14, %s3998_s28  ;;  %445 = vrot.lane.b32.xlu2 %v433_v14, %s3999_s29  ;;  %v435_v28 = vrot.slane %v433_v14, 4 }
  0x8f   : > { %437 = vrot.lane.b32.xlu1 %v433_v14, %s4000_s30 }
  0x96   : > { %449 = vrot.lane.b32.xlu2 %v433_v14, %s4001_s6 }
  0x97   : > { %441 = vrot.lane.b32.xlu1 %v433_v14, %s4002_s7 }
  0x9e   : > { %461 = vrot.lane.b32.xlu2 %v433_v14, %s4003_s8 }
  0x9f   : > { %457 = vrot.lane.b32.xlu1 %v433_v14, %s4004_s9 }
  0xe8   : > { %v446_v15 = vpop.permute.xlu2 %445 }
  0xe9   : > { %v447_v27 = vrot.slane %v446_v15, 4 }
  0xf0   : > { %v450_v16 = vpop.permute.xlu2 %449 }
  0xf1   : > { %v472_v24 = vrot.slane %v450_v16, 4  ;;  %v530_v32 = vsel %vm473_vm0, %v450_v16, %v435_v28 }
  0xf2   : > { %v534_v38 = vperm.slane %v530_v32, %v4068_v29 }
  0xf3   : > { %v474_v34 = vsel %vm473_vm0, %v472_v24, %v433_v14 }
  0xf4   : > { %v478_v40 = vperm.slane %v474_v34, %v4068_v29  ;;  %v543_v50 = vrot.slane %v534_v38, 4 }
  0xf6   : > { %v487_v53 = vrot.slane %v478_v40, 4 }
  0xf8   : > { %v462_v19 = vpop.permute.xlu2 %461 }
  0xf9   : > { %v507_v25 = vrot.slane %v462_v19, 4  ;;  %v564_v33 = vsel %vm473_vm0, %v462_v19, %v447_v27 }
  0xfa   : > { %v568_v39 = vperm.slane %v564_v33, %v4068_v29 }
  0xfb   : > { %v508_v35 = vsel %vm473_vm0, %v507_v25, %v446_v15 }
  0xfc   : > { %v512_v41 = vperm.slane %v508_v35, %v4068_v29  ;;  %v569_v51 = vrot.slane %v568_v39, 4 }
  0xfe   : > { %v513_v54 = vrot.slane %v512_v41, 4 }
 0x100   : > { %v454_v18 = vpop.permute.xlu0 %453 }
 0x101   : > { %v438_v17 = vpop.permute.xlu1 %437  ;;  %v501_v22 = vrot.slane %v454_v18, 4 }
 0x102   : > { %v439_v23 = vrot.slane %v438_v17, 4 }
 0x103   : > { %v502_v30 = vsel %vm473_vm0, %v501_v22, %v438_v17 }
 0x104   : > { %v558_v31 = vsel %vm473_vm0, %v454_v18, %v439_v23  ;;  %v506_v36 = vperm.slane %v502_v30, %v4068_v29 }
 0x105   : > { %v562_v37 = vperm.slane %v558_v31, %v4068_v29 }
 0x106   : > { %v515_v46 = vrot.slane %v506_v36, 4  ;;  %v514_v61 = vsel %vm473_vm0, %v513_v54, %v506_v36 }
 0x107   : > { %v571_v47 = vrot.slane %v562_v37, 4  ;;  %v570_v57 = vsel %vm473_vm0, %v569_v51, %v562_v37  ;;  %v4115_v11 = vperm.slane %v514_v61, %v4084_v55 }
 0x108   : > { %v516_v62 = vsel %vm473_vm0, %v512_v41, %v515_v46  ;;  %v4102_v6 = vperm.slane %v570_v57, %v4084_v55 }
 0x109   : > { %v442_v26 = vpop.permute.xlu1 %441  ;;  %v572_v63 = vsel %vm473_vm0, %v568_v39, %v571_v47  ;;  %v4108_v8 = vperm.slane %v516_v62, %v4084_v55  ;;  %v589_v28 = vshrl.u32 %v4115_v11, 16 }
 0x10a   : > { %v443_v44 = vrot.slane %v442_v26, 4  ;;  %v4112_v10 = vperm.slane %v572_v63, %v4084_v55  ;;  %v613_v33 = vshrl.u32 %v4102_v6, 16  ;;  %v581_v62 = vrot.slane %v4102_v6, 4 }
 0x10b   : > { %v601_v51 = vshrl.u32 %v4108_v8, 16  ;;  %v525_v63 = vrot.slane %v4115_v11, 4 }
 0x111   : > { %v458_v45 = vpop.permute.xlu1 %457 }
 0x112   : > { %v479_v48 = vrot.slane %v458_v45, 4  ;;  %v536_v49 = vsel %vm473_vm0, %v458_v45, %v443_v44 }
 0x113   : > { %v540_v52 = vperm.slane %v536_v49, %v4068_v29 }
 0x114   : > { %v480_v56 = vsel %vm473_vm0, %v479_v48, %v442_v26  ;;  %v625_v48 = vshrl.u32 %v4112_v10, 16 }
 0x115   : > { %v484_v58 = vperm.slane %v480_v56, %v4068_v29  ;;  %v541_v59 = vrot.slane %v540_v52, 4  ;;  %v544_v60 = vsel %vm473_vm0, %v540_v52, %v543_v50 }
 0x116   : > { %v4095_v3 = vperm.slane %v544_v60, %v4084_v55 }
 0x117   : > { %v485_v0 = vrot.slane %v484_v58, 4  ;;  %v542_v2 = vsel %vm473_vm0, %v541_v59, %v534_v38  ;;  %v488_v4 = vsel %vm473_vm0, %v484_v58, %v487_v53 }
 0x118   : > { %v4099_v5 = vperm.slane %v542_v2, %v4084_v55  ;;  %v4105_v7 = vperm.slane %v488_v4, %v4084_v55  ;;  %v623_v14 = vpack.i.b16 %v4112_v10, %v4095_v3  ;;  %v624_v42 = vshrl.u32 %v4095_v3, 16 }
 0x119   : > { %v486_v9 = vsel %vm473_vm0, %v485_v0, %v478_v40 }
 0x11a   : > { %v611_v12 = vpack.i.b16 %v4102_v6, %v4099_v5  ;;  %v4120_v13 = vperm.slane %v486_v9, %v4084_v55  ;;  %v599_v15 = vpack.i.b16 %v4108_v8, %v4105_v7  ;;  %v712_v21 = vshrl.u32 %v623_v14, 16 }
 0x11b   : > { %v612_v23 = vshrl.u32 %v4099_v5, 16  ;;  %v715_v41 = vshll.u32 %v623_v14, 16  ;;  %v600_v43 = vshrl.u32 %v4105_v7, 16  ;;  %v626_v52 = vpack.i.b16 %v625_v48, %v624_v42 }
 0x11c   : > { %v644_v16 = vshrl.u32 %v611_v12, 16  ;;  %v587_v17 = vpack.i.b16 %v4115_v11, %v4120_v13  ;;  %v647_v20 = vshll.u32 %v611_v12, 16  ;;  %v704_v22 = vshrl.u32 %v599_v15, 16 }
 0x11d   : > { %v588_v27 = vshrl.u32 %v4120_v13, 16  ;;  %v714_v35 = vrot.slane %v712_v21, 7  ;;  %v614_v38 = vpack.i.b16 %v613_v33, %v612_v23  ;;  %v707_v40 = vshll.u32 %v599_v15, 16 }
 0x11e   : > { %v646_v18 = vrot.slane %v644_v16, 7  ;;  %v636_v19 = vshrl.u32 %v587_v17, 16  ;;  %v639_v26 = vshll.u32 %v587_v17, 16  ;;  %v706_v37 = vrot.slane %v704_v22, 7 }
 0x11f   : > { %v590_v39 = vpack.i.b16 %v589_v28, %v588_v27  ;;  %v719_v44 = vrot.slane %v714_v35, 4  ;;  %v661_v46 = vshrl.u32 %v614_v38, 16  ;;  %v717_v50 = vor.u32 %v715_v41, %v714_v35 }
 0x120   : > { %v651_v24 = vrot.slane %v646_v18, 4  ;;  %v638_v25 = vrot.slane %v636_v19, 7  ;;  %v649_v32 = vor.u32 %v647_v20, %v646_v18  ;;  %v710_v45 = vrot.slane %v706_v37, 4 }
 0x121   : > { %v653_v47 = vshrl.u32 %v590_v39, 16  ;;  %v709_v49 = vor.u32 %v707_v40, %v706_v37  ;;  %v663_v54 = vrot.slane %v661_v46, 7  ;;  %v602_v57 = vpack.i.b16 %v601_v51, %v600_v43 }
 0x122   : > { %775 = vrot.lane.b32.xlu2 %v651_v24, %s4007_s10  ;;  %v641_v30 = vor.u32 %v639_v26, %v638_v25  ;;  %v642_v31 = vrot.slane %v638_v25, 4  ;;  %v718_v53 = vsel %vm4135_vm3, %v710_v45, %v717_v50  ;;  %v553_v58 = vrot.slane %v4099_v5, 4 }
 0x123   : > { %v655_v56 = vrot.slane %v653_v47, 7  ;;  %v497_v59 = vrot.slane %v4120_v13, 4  ;;  %v664_v60 = vshll.u32 %v614_v38, 16  ;;  %v729_v61 = vshrl.u32 %v626_v52, 16 }
 0x124   : > { %771 = vrot.lane.b32.xlu0 %v641_v30, %s4007_s10  ;;  %v650_v36 = vsel %vm4135_vm3, %v642_v31, %v649_v32  ;;  %v668_v0 = vrot.slane %v663_v54, 4  ;;  %v656_v2 = vshll.u32 %v590_v39, 16  ;;  %v721_v9 = vshrl.u32 %v602_v57, 16  ;;  %v287_v39 = vld [vmem:[#allocation2 + $0x8] sm:$0x1] }
 0x125   : > { %773 = vrot.lane.b32.xlu1 %v650_v36, %s4007_s10  ;;  %v659_v4 = vrot.slane %v655_v56, 4  ;;  %v554_v12 = vsel %vm473_vm0, 0, %v553_v58  ;;  %v4158_v14 = vsel %vm473_vm0, 0, %v497_v59  ;;  %v666_v15 = vor.u32 %v664_v60, %v663_v54 }
 0x126   : > { %v658_v5 = vor.u32 %v656_v2, %v655_v56  ;;  %v731_v13 = vrot.slane %v729_v61, 7  ;;  %v582_v16 = vsel %vm473_vm0, 0, %v581_v62  ;;  %v526_v6 = vsel %vm473_vm0, 0, %v525_v63 }
 0x127   : > { %v555_v11 = vrot.slane %v4095_v3, 4  ;;  %v667_v17 = vsel %vm4135_vm3, %v659_v4, %v666_v15  ;;  %v723_v18 = vrot.slane %v721_v9, 7  ;;  %v617_v19 = vpack.i.b16 %v582_v16, %v554_v12 }
 0x128   : > { %v593_v20 = vpack.i.b16 %v526_v6, %v4158_v14  ;;  %v499_v21 = vrot.slane %v4105_v7, 4  ;;  %v583_v22 = vrot.slane %v4112_v10, 4  ;;  %v736_v23 = vrot.slane %v731_v13, 4 }
 0x129   : > { %v724_v24 = vshll.u32 %v602_v57, 16  ;;  %v732_v25 = vshll.u32 %v626_v52, 16  ;;  %v527_v3 = vrot.slane %v4108_v8, 4  ;;  %v727_v26 = vrot.slane %v723_v18, 4 }
 0x12a   : > { %799 = vrot.lane.b32.xlu2 %v719_v44, %s4007_s10  ;;  %v678_v27 = vshrl.u32 %v617_v19, 16  ;;  %v670_v28 = vshrl.u32 %v593_v20, 16  ;;  %v556_v30 = vsel %vm473_vm0, 0, %v555_v11  ;;  %v4174_v31 = vsel %vm473_vm0, 0, %v499_v21 }
 0x12b   : > { %v726_v32 = vor.u32 %v724_v24, %v723_v18  ;;  %v734_v33 = vor.u32 %v732_v25, %v731_v13  ;;  %v584_v7 = vsel %vm473_vm0, 0, %v583_v22  ;;  %v528_v35 = vsel %vm473_vm0, 0, %v527_v3 }
 0x12c   : > { %795 = vrot.lane.b32.xlu0 %v709_v49, %s4007_s10  ;;  %v629_v10 = vpack.i.b16 %v584_v7, %v556_v30  ;;  %v680_v36 = vrot.slane %v678_v27, 7  ;;  %v672_v37 = vrot.slane %v670_v28, 7  ;;  %v605_v38 = vpack.i.b16 %v528_v35, %v4174_v31 }
 0x12d   : > { %797 = vrot.lane.b32.xlu1 %v718_v53, %s4007_s10  ;;  %v735_v8 = vsel %vm4135_vm3, %v727_v26, %v734_v33  ;;  %v618_v40 = vshrl.u32 %v554_v12, 16  ;;  %v673_v42 = vshll.u32 %v593_v20, 16  ;;  %v594_v44 = vshrl.u32 %v4158_v14, 16 }
 0x12e   : > { %v746_v43 = vshrl.u32 %v629_v10, 16  ;;  %v288_v45 = vsel %vm4186_vm6, 0, %v287_v39  ;;  %v685_v46 = vrot.slane %v680_v36, 4  ;;  %v676_v47 = vrot.slane %v672_v37, 4 }
 0x12f   : > { %v681_v48 = vshll.u32 %v617_v19, 16  ;;  %v738_v49 = vshrl.u32 %v605_v38, 16  ;;  %289 = vst [vmem:[#allocation2 + $0x8] sm:$0x1] %v288_v45  ;;  %v619_v50 = vshrl.u32 %v582_v16, 16  ;;  %v675_v51 = vor.u32 %v673_v42, %v672_v37 }
 0x130   : > { %v595_v53 = vshrl.u32 %v526_v6, 16  ;;  %v748_v54 = vrot.slane %v746_v43, 7  ;;  %v630_v61 = vshrl.u32 %v556_v30, 16  ;;  %v741_v63 = vshll.u32 %v605_v38, 16  ;;  %v290_v43 = vld [vmem:[#allocation2 + $0x14] sm:$0x1] }
 0x131   : > { %v683_v52 = vor.u32 %v681_v48, %v680_v36  ;;  %v620_v56 = vpack.i.b16 %v619_v50, %v618_v40  ;;  %v740_v58 = vrot.slane %v738_v49, 7  ;;  %v606_v14 = vshrl.u32 %v4174_v31, 16  ;;  %v299_v40 = vld [vmem:[#allocation2 + $0x38] sm:$0x1] }
 0x132   : > { %781 = vrot.lane.b32.xlu2 %v668_v0, %s4007_s10  ;;  %v596_v59 = vpack.i.b16 %v595_v53, %v594_v44  ;;  %v753_v62 = vrot.slane %v748_v54, 4  ;;  %v749_v0 = vshll.u32 %v629_v10, 16  ;;  %v631_v15 = vshrl.u32 %v584_v7, 16  ;;  %v261_v53 = vld [vmem:[#allocation2] sm:$0x1] }
 0x133   : > { %v684_v57 = vsel %vm4135_vm3, %v676_v47, %v683_v52  ;;  %v695_v2 = vshrl.u32 %v620_v56, 16  ;;  %v744_v9 = vrot.slane %v740_v58, 4  ;;  %v743_v13 = vor.u32 %v741_v63, %v740_v58  ;;  %v302_v47 = vld [vmem:[#allocation2 + $0x44] sm:$0x1] }
 0x134   : > { %777 = vrot.lane.b32.xlu0 %v658_v5, %s4007_s10  ;;  %v687_v12 = vshrl.u32 %v596_v59, 16  ;;  %v751_v16 = vor.u32 %v749_v0, %v748_v54  ;;  %v607_v6 = vshrl.u32 %v528_v35, 16  ;;  %v632_v11 = vpack.i.b16 %v631_v15, %v630_v61 }
 0x135   : > { %779 = vrot.lane.b32.xlu1 %v667_v17, %s4007_s10  ;;  %v697_v18 = vrot.slane %v695_v2, 7  ;;  %v690_v22 = vshll.u32 %v596_v59, 16  ;;  %v300_v42 = vsel %vm4186_vm6, 0, %v299_v40  ;;  %v291_v45 = vsel %vm4186_vm6, 0, %v290_v43 }
 0x136   : > { %v320_v4 = vld [vmem:[#allocation2 + $0x8] sm:$0x1]  ;;  %v752_v17 = vsel %vm4135_vm3, %v744_v9, %v751_v16  ;;  %v689_v19 = vrot.slane %v687_v12, 7  ;;  %v608_v20 = vpack.i.b16 %v607_v6, %v606_v14  ;;  %v763_v3 = vshrl.u32 %v632_v11, 16  ;;  %301 = vst [vmem:[#allocation2 + $0x38] sm:$0x1] %v300_v42 }
 0x137   : > { %v321_v5 = vsel %vm4198_vm8, 0, %v320_v4  ;;  %v702_v24 = vrot.slane %v697_v18, 4  ;;  %v766_v36 = vshll.u32 %v632_v11, 16  ;;  %292 = vst [vmem:[#allocation2 + $0x14] sm:$0x1] %v291_v45  ;;  %v303_v48 = vsel %vm4186_vm6, 0, %v302_v47 }
 0x138   : > { %322 = vst [vmem:[#allocation2 + $0x8] sm:$0x1] %v321_v5  ;;  %v693_v25 = vrot.slane %v689_v19, 4  ;;  %v755_v26 = vshrl.u32 %v608_v20, 16  ;;  %v692_v30 = vor.u32 %v690_v22, %v689_v19  ;;  %v765_v33 = vrot.slane %v763_v3, 7 }
 0x139   : > { %v758_v35 = vshll.u32 %v608_v20, 16  ;;  %304 = vst [vmem:[#allocation2 + $0x44] sm:$0x1] %v303_v48  ;;  %v262_v54 = vsel %vm4238_vm11, 0, %v261_v53  ;;  %v273_v19 = vld [vmem:[#allocation2 + $0x30] sm:$0x1] }
 0x13a   : > { %805 = vrot.lane.b32.xlu2 %v736_v23, %s4007_s10  ;;  %v698_v23 = vshll.u32 %v620_v56, 16  ;;  %v757_v7 = vrot.slane %v755_v26, 7  ;;  %v770_v10 = vrot.slane %v765_v33, 4  ;;  %v768_v38 = vor.u32 %v766_v36, %v765_v33  ;;  %263 = vst [vmem:[#allocation2] sm:$0x1] %v262_v54 }
 0x13b   : > { %v305_v20 = vld [vmem:[#allocation2 + $0x50] sm:$0x1]  ;;  %v274_v3 = vsel %vm4238_vm11, 0, %v273_v19  ;;  %v296_v26 = vld [vmem:[#allocation2 + $0x2c] sm:$0x1] }
 0x13c   : > { %801 = vrot.lane.b32.xlu0 %v726_v32, %s4007_s10  ;;  %v700_v31 = vor.u32 %v698_v23, %v697_v18  ;;  %v760_v37 = vor.u32 %v758_v35, %v757_v7  ;;  %275 = vst [vmem:[#allocation2 + $0x30] sm:$0x1] %v274_v3 }
 0x13d   : > { %803 = vrot.lane.b32.xlu1 %v735_v8, %s4007_s10  ;;  %v761_v8 = vrot.slane %v757_v7, 4  ;;  %v348_v44 = vld [vmem:[#allocation2 + $0x38] sm:$0x1] }
 0x13e   : > { %v701_v32 = vsel %vm4135_vm3, %v693_v25, %v700_v31  ;;  %v327_v34 = vld [vmem:[#allocation2 + $0x14] sm:$0x1]  ;;  %v297_v31 = vsel %vm4186_vm6, 0, %v296_v26 }
 0x13f   : > { %v381_v27 = vld [vmem:[#allocation2 + $0x8] sm:$0x1]  ;;  %v769_v39 = vsel %vm4135_vm3, %v761_v8, %v768_v38  ;;  %vm843_vm3 = vcmask 134152   ;;  %298 = vst [vmem:[#allocation2 + $0x2c] sm:$0x1] %v297_v31 }
 0x140   : > { %v382_v28 = vsel %vm4212_vm10, 0, %v381_v27  ;;  %v355_v56 = vld [vmem:[#allocation2 + $0x44] sm:$0x1]  ;;  %v306_v27 = vsel %vm4186_vm6, 0, %v305_v20  ;;  %vm4329_vm4 = vmand %vm843_vm3, %vm285_vm5  ;;  %vm2854_vm5 = vcmask 1042432  }
 0x141   : > { %383 = vst [vmem:[#allocation2 + $0x8] sm:$0x1] %v382_v28  ;;  %v356_v58 = vsel %vm4198_vm8, 0, %v355_v56  ;;  %v313_v0 = vld [vmem:[#allocation2] sm:$0xf] }
 0x142   : > { %787 = vrot.lane.b32.xlu2 %v685_v46, %s4007_s10  ;;  %v349_v46 = vsel %vm4198_vm8, 0, %v348_v44  ;;  %357 = vst [vmem:[#allocation2 + $0x44] sm:$0x1] %v356_v58  ;;  %v314_v4 = vsel %vm4258_vm14, 0, %v313_v0  ;;  %v276_v28 = vld [vmem:[#allocation2 + $0x3c] sm:$0x1] }
 0x143   : > { %350 = vst [vmem:[#allocation2 + $0x38] sm:$0x1] %v349_v46  ;;  %v277_v1 = vsel %vm4238_vm11, 0, %v276_v28  ;;  %v344_v44 = vld [vmem:[#allocation2 + $0x30] sm:$0xf] }
 0x144   : > { %783 = vrot.lane.b32.xlu0 %v675_v51, %s4007_s10  ;;  %v328_v51 = vsel %vm4198_vm8, 0, %v327_v34  ;;  %315 = vst [vmem:[#allocation2] sm:$0xf] %v314_v4  ;;  %v345_v45 = vsel %vm4258_vm14, 0, %v344_v44 }
 0x145   : > { %785 = vrot.lane.b32.xlu1 %v684_v57, %s4007_s10  ;;  %329 = vst [vmem:[#allocation2 + $0x14] sm:$0x1] %v328_v51 }
 0x146   : > { %307 = vst [vmem:[#allocation2 + $0x50] sm:$0x1] %v306_v27 }
 0x147   : > { %278 = vst [vmem:[#allocation2 + $0x3c] sm:$0x1] %v277_v1 }
 0x148   : > { %v852_v63 = vld [vmem:[#allocation2 + $0x8] sm:$0x1]  ;;  %346 = vst [vmem:[#allocation2 + $0x30] sm:$0xf] %v345_v45 }
 0x149   : > { %v416_v12 = vld [vmem:[#allocation2 + $0x44] sm:$0x1] }
 0x14a   : > { %811 = vrot.lane.b32.xlu2 %v753_v62, %s4007_s10  ;;  %v409_v50 = vld [vmem:[#allocation2 + $0x38] sm:$0x1]  ;;  %v417_v14 = vsel %vm4212_vm10, 0, %v416_v12 }
 0x14b   : > { %v410_v52 = vsel %vm4212_vm10, 0, %v409_v50  ;;  %418 = vst [vmem:[#allocation2 + $0x44] sm:$0x1] %v417_v14  ;;  %v374_v16 = vld [vmem:[#allocation2] sm:$0xf] }
 0x14c   : > { %807 = vrot.lane.b32.xlu0 %v743_v13, %s4007_s10  ;;  %411 = vst [vmem:[#allocation2 + $0x38] sm:$0x1] %v410_v52  ;;  %v388_v57 = vld [vmem:[#allocation2 + $0x14] sm:$0x1]  ;;  %v375_v11 = vsel %vm4285_vm2, 0, %v374_v16 }
 0x14d   : > { %809 = vrot.lane.b32.xlu1 %v752_v17, %s4007_s10  ;;  %v389_v59 = vsel %vm4212_vm10, 0, %v388_v57  ;;  %376 = vst [vmem:[#allocation2] sm:$0xf] %v375_v11  ;;  %v293_v17 = vld [vmem:[#allocation2 + $0x20] sm:$0x1] }
 0x14e   : > { %390 = vst [vmem:[#allocation2 + $0x14] sm:$0x1] %v389_v59  ;;  %v294_v23 = vsel %vm4186_vm6, 0, %v293_v17  ;;  %v362_v46 = vld [vmem:[#allocation2 + $0x50] sm:$0x1] }
 0x14f   : > { %295 = vst [vmem:[#allocation2 + $0x20] sm:$0x1] %v294_v23  ;;  %v363_v47 = vsel %vm4198_vm8, 0, %v362_v46  ;;  %v341_v50 = vld [vmem:[#allocation2 + $0x2c] sm:$0x1] }
 0x150   : > { %v342_v51 = vsel %vm4198_vm8, 0, %v341_v50  ;;  %v351_v52 = vld [vmem:[#allocation2 + $0x3c] sm:$0xf]  ;;  %364 = vst [vmem:[#allocation2 + $0x50] sm:$0x1] %v363_v47 }
 0x151   : > { %v352_v54 = vsel %vm4258_vm14, 0, %v351_v52  ;;  %343 = vst [vmem:[#allocation2 + $0x2c] sm:$0x1] %v342_v51  ;;  %v405_v12 = vld [vmem:[#allocation2 + $0x30] sm:$0xf] }
 0x152   : > { %793 = vrot.lane.b32.xlu2 %v702_v24, %s4007_s10  ;;  %v264_v24 = vld [vmem:[#allocation2 + $0xc] sm:$0x1]  ;;  %v887_v33 = vld [vmem:[#allocation2 + $0x44] sm:$0x1]  ;;  %353 = vst [vmem:[#allocation2 + $0x3c] sm:$0xf] %v352_v54 }
 0x153   : > { %v880_v5 = vld [vmem:[#allocation2 + $0x38] sm:$0x1]  ;;  %v406_v14 = vsel %vm4285_vm2, 0, %v405_v12 }
 0x154   : > { %789 = vrot.lane.b32.xlu0 %v692_v30, %s4007_s10  ;;  %v265_v30 = vsel %vm4238_vm11, 0, %v264_v24  ;;  %v845_v36 = vld [vmem:[#allocation2] sm:$0xf]  ;;  %407 = vst [vmem:[#allocation2 + $0x30] sm:$0xf] %v406_v14 }
 0x155   : > { %791 = vrot.lane.b32.xlu1 %v701_v32, %s4007_s10  ;;  %v859_v18 = vld [vmem:[#allocation2 + $0x14] sm:$0x1]  ;;  %v308_v32 = vld [vmem:[#allocation2 + $0x5c] sm:$0x1]  ;;  %266 = vst [vmem:[#allocation2 + $0xc] sm:$0x1] %v265_v30 }
 0x156   : > { %v309_v7 = vsel %vm4186_vm6, 0, %v308_v32  ;;  %vm2855_vm6 = vcmask 1046532  }
 0x157   : > { %310 = vst [vmem:[#allocation2 + $0x5c] sm:$0x1] %v309_v7  ;;  %vm4419_vm7 = vmor %vm2854_vm5, %vm2855_vm6  ;;  %vm3851_vm5 = vcmask 15360  }
 0x158   : > { %v402_v17 = vld [vmem:[#allocation2 + $0x2c] sm:$0x1] }
 0x159   : > { %v403_v19 = vsel %vm4212_vm10, 0, %v402_v17  ;;  %v412_v20 = vld [vmem:[#allocation2 + $0x3c] sm:$0xf] }
 0x15a   : > { %817 = vrot.lane.b32.xlu2 %v770_v10, %s4007_s10  ;;  %v267_v10 = vld [vmem:[#allocation2 + $0x18] sm:$0x1]  ;;  %404 = vst [vmem:[#allocation2 + $0x2c] sm:$0x1] %v403_v19  ;;  %v413_v24 = vsel %vm4285_vm2, 0, %v412_v20 }
 0x15b   : > { %414 = vst [vmem:[#allocation2 + $0x3c] sm:$0xf] %v413_v24  ;;  %v876_v31 = vld [vmem:[#allocation2 + $0x30] sm:$0xf] }
 0x15c   : > { %813 = vrot.lane.b32.xlu0 %v760_v37, %s4007_s10  ;;  %v268_v37 = vsel %vm4238_vm11, 0, %v267_v10  ;;  %v323_v34 = vld [vmem:[#allocation2 + $0xc] sm:$0xf] }
 0x15d   : > { %815 = vrot.lane.b32.xlu1 %v769_v39, %s4007_s10  ;;  %v334_v39 = vld [vmem:[#allocation2 + $0x20] sm:$0x1]  ;;  %269 = vst [vmem:[#allocation2 + $0x18] sm:$0x1] %v268_v37  ;;  %v324_v48 = vsel %vm4258_vm14, 0, %v323_v34 }
 0x15e   : > { %v335_v43 = vsel %vm4198_vm8, 0, %v334_v39  ;;  %v369_v56 = vld [vmem:[#allocation2 + $0x5c] sm:$0x1]  ;;  %325 = vst [vmem:[#allocation2 + $0xc] sm:$0xf] %v324_v48 }
 0x15f   : > { %336 = vst [vmem:[#allocation2 + $0x20] sm:$0x1] %v335_v43  ;;  %v370_v58 = vsel %vm4198_vm8, 0, %v369_v56  ;;  %v282_v43 = vld [vmem:[#allocation2 + $0x54] sm:$0x1] }
 0x160   : > { %371 = vst [vmem:[#allocation2 + $0x5c] sm:$0x1] %v370_v58  ;;  %v283_v51 = vsel %vm4238_vm11, 0, %v282_v43  ;;  %vm1785_vm8 = vsmask.f32 3328 }
 0x161   : > { %v873_v37 = vld [vmem:[#allocation2 + $0x2c] sm:$0x1]  ;;  %284 = vst [vmem:[#allocation2 + $0x54] sm:$0x1] %v283_v51 }
 0x162   : > { %v883_v44 = vld [vmem:[#allocation2 + $0x3c] sm:$0xf] }
 0x164   : > { %v330_v59 = vld [vmem:[#allocation2 + $0x18] sm:$0xf] }
 0x168   : > { %v365_v19 = vld [vmem:[#allocation2 + $0x54] sm:$0xf] }
 0x17c   : > { %v776_v2 = vpop.permute.xlu2 %775 }
 0x17d   : > { %v853_v9 = vsel %vm4263_vm15, %v776_v2, %v852_v63  ;;  %v331_v2 = vsel %vm4258_vm14, 0, %v330_v59 }
 0x17e   : > { %854 = vst [vmem:[#allocation2 + $0x8] sm:$0x1] %v853_v9  ;;  %v395_v9 = vld [vmem:[#allocation2 + $0x20] sm:$0x1] }
 0x17f   : > { %v396_v60 = vsel %vm4212_vm10, 0, %v395_v9  ;;  %332 = vst [vmem:[#allocation2 + $0x18] sm:$0xf] %v331_v2 }
 0x180   : > { %397 = vst [vmem:[#allocation2 + $0x20] sm:$0x1] %v396_v60 }
 0x184   : > { %v800_v13 = vpop.permute.xlu2 %799 }
 0x185   : > { %v881_v6 = vsel %vm4263_vm15, %v800_v13, %v880_v5  ;;  %v423_v5 = vld [vmem:[#allocation2 + $0x50] sm:$0x1] }
 0x186   : > { %882 = vst [vmem:[#allocation2 + $0x38] sm:$0x1] %v881_v6  ;;  %v424_v13 = vsel %vm4212_vm10, 0, %v423_v5  ;;  %v384_v6 = vld [vmem:[#allocation2 + $0xc] sm:$0xf] }
 0x187   : > { %425 = vst [vmem:[#allocation2 + $0x50] sm:$0x1] %v424_v13  ;;  %v385_v11 = vsel %vm4285_vm2, 0, %v384_v6  ;;  %v391_v26 = vld [vmem:[#allocation2 + $0x18] sm:$0xf] }
 0x188   : > { %386 = vst [vmem:[#allocation2 + $0xc] sm:$0xf] %v385_v11  ;;  %v866_v27 = vld [vmem:[#allocation2 + $0x20] sm:$0x1]  ;;  %v392_v28 = vsel %vm4285_vm2, 0, %v391_v26 }
 0x189   : > { %393 = vst [vmem:[#allocation2 + $0x18] sm:$0xf] %v392_v28 }
 0x18c   : > { %v782_v22 = vpop.permute.xlu2 %781 }
 0x18d   : > { %v860_v25 = vsel %vm4263_vm15, %v782_v22, %v859_v18  ;;  %v1781_v13 = vld [vmem:[#allocation2 + $0x38] sm:$0x1] }
 0x18e   : > { %861 = vst [vmem:[#allocation2 + $0x14] sm:$0x1] %v860_v25  ;;  %v430_v25 = vld [vmem:[#allocation2 + $0x5c] sm:$0x1]  ;;  %v2890_v26 = vrot.slane %v1781_v13, 5 }
 0x18f   : > { %v431_v3 = vsel %vm4212_vm10, 0, %v430_v25  ;;  %v855_v10 = vld [vmem:[#allocation2 + $0xc] sm:$0xf]  ;;  %v1904_v25 = vshll.u32 %v1781_v13, 16  ;;  %vm4520_vm10 = vmor %vm1785_vm8, %vm1786_vm9 }
 0x190   : > { %432 = vst [vmem:[#allocation2 + $0x5c] sm:$0x1] %v431_v3 }
 0x194   : > { %v806_v35 = vpop.permute.xlu2 %805 }
 0x195   : > { %v888_v38 = vsel %vm4263_vm15, %v806_v35, %v887_v33  ;;  %v894_v33 = vld [vmem:[#allocation2 + $0x50] sm:$0x1]  ;;  %v4392_v21 = vld [vmem:[#allocation2 + $0x14] sm:$0x1]  ;;  %v279_v35 = vld [vmem:[#allocation2 + $0x48] sm:$0x1] }
 0x196   : > { %889 = vst [vmem:[#allocation2 + $0x44] sm:$0x1] %v888_v38  ;;  %v772_v41 = vpop.permute.xlu0 %771  ;;  %v280_v45 = vsel %vm4238_vm11, 0, %v279_v35  ;;  %v2869_v48 = vrot.slane %v4392_v21, 5 }
 0x197   : > { %v846_v40 = vsel %vm4329_vm4, %v772_v41, %v845_v36  ;;  %v774_v42 = vpop.permute.xlu1 %773  ;;  %v270_v41 = vld [vmem:[#allocation2 + $0x24] sm:$0x1]  ;;  %v901_v50 = vld [vmem:[#allocation2 + $0x5c] sm:$0x1]  ;;  %281 = vst [vmem:[#allocation2 + $0x48] sm:$0x1] %v280_v45 }
 0x198   : > { %847 = vst [vmem:[#allocation2] sm:$0xf] %v846_v40  ;;  %v271_v34 = vsel %vm4238_vm11, 0, %v270_v41  ;;  %vm1136_vm11 = vcmask 130048  }
 0x199   : > { %849 = vst.msk [vmem:[#allocation2 + $0x4] sm:$0xf] %vm843_vm3, %v774_v42 }
 0x19a   : > { %272 = vst [vmem:[#allocation2 + $0x24] sm:$0x1] %v271_v34 }
 0x19c   : > { %v788_v53 = vpop.permute.xlu2 %787 }
 0x19d   : > { %v867_v30 = vsel %vm4263_vm15, %v788_v53, %v866_v27  ;;  %v4463_v27 = vld [vmem:[#allocation2 + $0x8] sm:$0x1] }
 0x19e   : > { %v796_v57 = vpop.permute.xlu0 %795  ;;  %868 = vst [vmem:[#allocation2 + $0x20] sm:$0x1] %v867_v30  ;;  %v358_v5 = vld [vmem:[#allocation2 + $0x48] sm:$0xf] }
 0x19f   : > { %v798_v63 = vpop.permute.xlu1 %797  ;;  %v4354_v0 = vld [vmem:[#allocation2] sm:$0xf]  ;;  %v877_v32 = vsel %vm4329_vm4, %v796_v57, %v876_v31  ;;  %v862_v57 = vld [vmem:[#allocation2 + $0x18] sm:$0xf]  ;;  %v359_v6 = vsel %vm4258_vm14, 0, %v358_v5 }
 0x1a0   : > { %879 = vst.msk [vmem:[#allocation2 + $0x34] sm:$0xf] %vm843_vm3, %v798_v63  ;;  %v4359_v4 = vld [vmem:[#allocation2 + $0x4] sm:$0xf]  ;;  %1189 = vrot.lane.b32.xlu2 %v4354_v0, %s4008_s11 }
 0x1a1   : > { %1191 = vrot.lane.b32.xlu0 %v4359_v4, %s4008_s11  ;;  %878 = vst [vmem:[#allocation2 + $0x30] sm:$0xf] %v877_v32  ;;  %v337_v11 = vld [vmem:[#allocation2 + $0x24] sm:$0xf]  ;;  %v7191_v24 = vrot.slane %v4359_v4, 5 }
 0x1a2   : > { %360 = vst [vmem:[#allocation2 + $0x48] sm:$0xf] %v359_v6 }
 0x1a4   : > { %v812_v16 = vpop.permute.xlu2 %811 }
 0x1a5   : > { %v895_v7 = vsel %vm4263_vm15, %v812_v16, %v894_v33  ;;  %v2861_v33 = vrot.slane %v7191_v24, 4 }
 0x1a6   : > { %v778_v18 = vpop.permute.xlu0 %777  ;;  %896 = vst [vmem:[#allocation2 + $0x50] sm:$0x1] %v895_v7  ;;  %v1906_v7 = vrot.slane %v1904_v25, 5 }
 0x1a7   : > { %v780_v22 = vpop.permute.xlu1 %779  ;;  %v4375_v23 = vld [vmem:[#allocation2 + $0x34] sm:$0xf]  ;;  %v856_v36 = vsel %vm4329_vm4, %v778_v18, %v855_v10  ;;  %v338_v18 = vsel %vm4258_vm14, 0, %v337_v11 }
 0x1a8   : > { %858 = vst.msk [vmem:[#allocation2 + $0x10] sm:$0xf] %vm843_vm3, %v780_v22  ;;  %1207 = vrot.lane.b32.xlu2 %v4375_v23, %s4008_s11  ;;  %v912_v54 = vld [vmem:[#allocation2 + $0x30] sm:$0xf]  ;;  %v7192_v12 = vrot.slane %v4375_v23, 5  ;;  %v366_v22 = vsel %vm4258_vm14, 0, %v365_v19 }
 0x1a9   : > { %1485 = vrot.lane.b32.xlu0 %v4359_v4, %s4009_s12  ;;  %857 = vst [vmem:[#allocation2 + $0xc] sm:$0xf] %v856_v36  ;;  %v920_v49 = vrot.slane %v912_v54, 4  ;;  %1205 = vrot.lane.b32.xlu1 %v912_v54, %s4008_s11  ;;  %v1885_v30 = vshrl.u32 %v912_v54, 16  ;;  %v1894_v32 = vshll.u32 %v4375_v23, 16  ;;  %v976_v24 = vrot.slane %v4375_v23, 4 }
 0x1aa   : > { %v2889_v20 = vrot.slane %v7192_v12, 4  ;;  %339 = vst [vmem:[#allocation2 + $0x24] sm:$0xf] %v338_v18  ;;  %vm1146_vm14 = vcmask 523264  }
 0x1ab   : > { %v4432_v2 = vsel %vm473_vm0, %v920_v49, %v4354_v0  ;;  %367 = vst [vmem:[#allocation2 + $0x54] sm:$0xf] %v366_v22  ;;  %v1887_v36 = vrot.slane %v1885_v30, 4  ;;  %v1896_v45 = vrot.slane %v1894_v32, 5 }
 0x1ac   : > { %v794_v1 = vpop.permute.xlu2 %793  ;;  %v4470_v61 = vsel %vm4419_vm7, %v2889_v20, %v2890_v26 }
 0x1ad   : > { %v874_v39 = vsel %vm4263_vm15, %v794_v1, %v873_v37  ;;  %v4472_v31 = vld [vmem:[#allocation2 + $0x50] sm:$0x1]  ;;  %v2862_v1 = vrot.slane %v4463_v27, 5  ;;  %v1888_v37 = vshll.u32 %v912_v54, 16  ;;  %v2985_v41 = vrot.slane %v4470_v61, 4 }
 0x1ae   : > { %v802_v38 = vpop.permute.xlu0 %801  ;;  %875 = vst [vmem:[#allocation2 + $0x2c] sm:$0x1] %v874_v39  ;;  %v2904_v39 = vrot.slane %v4472_v31, 5 }
 0x1af   : > { %v804_v40 = vpop.permute.xlu1 %803  ;;  %v4400_v42 = vld [vmem:[#allocation2 + $0x10] sm:$0xf]  ;;  %v884_v47 = vsel %vm4329_vm4, %v802_v38, %v883_v44  ;;  %v419_v38 = vld [vmem:[#allocation2 + $0x48] sm:$0xf]  ;;  %v1890_v44 = vrot.slane %v1888_v37, 5 }
 0x1b0   : > { %1483 = vrot.lane.b32.xlu2 %v4354_v0, %s4009_s12  ;;  %v7189_v46 = vrot.slane %v4400_v42, 5  ;;  %886 = vst.msk [vmem:[#allocation2 + $0x40] sm:$0xf] %vm843_vm3, %v804_v40  ;;  %v4445_v16 = vld [vmem:[#allocation2 + $0xc] sm:$0xf]  ;;  %v420_v40 = vsel %vm4285_vm2, 0, %v419_v38 }
 0x1b1   : > { %885 = vst [vmem:[#allocation2 + $0x3c] sm:$0xf] %v884_v47  ;;  %1499 = vrot.lane.b32.xlu1 %v912_v54, %s4009_s12  ;;  %v398_v43 = vld [vmem:[#allocation2 + $0x24] sm:$0xf]  ;;  %v1898_v47 = vshrl.u32 %v4375_v23, 16  ;;  %v1813_v25 = vshrl.u32 %v4445_v16, 16 }
 0x1b2   : > { %v2868_v52 = vrot.slane %v7189_v46, 4  ;;  %421 = vst [vmem:[#allocation2 + $0x48] sm:$0xf] %v420_v40  ;;  %v399_v34 = vsel %vm4285_vm2, 0, %v398_v43  ;;  %v1816_v37 = vshll.u32 %v4445_v16, 16  ;;  %v1789_v46 = vshrl.u32 %v4354_v0, 16 }
 0x1b3   : > { %400 = vst [vmem:[#allocation2 + $0x24] sm:$0xf] %v399_v34 }
 0x1b4   : > { %v818_v56 = vpop.permute.xlu2 %817  ;;  %v4425_v58 = vsel %vm4419_vm7, %v2868_v52, %v2869_v48  ;;  %v426_v48 = vld [vmem:[#allocation2 + $0x54] sm:$0xf] }
 0x1b5   : > { %v902_v59 = vsel %vm4263_vm15, %v818_v56, %v901_v50  ;;  %v4495_v50 = vsel %vm4419_vm7, %v2861_v33, %v2862_v1  ;;  %v427_v54 = vsel %vm4285_vm2, 0, %v426_v48  ;;  %v1891_v56 = vor.u32 %v1890_v44, %v1887_v36 }
 0x1b6   : > { %903 = vst [vmem:[#allocation2 + $0x5c] sm:$0x1] %v902_v59  ;;  %v784_v63 = vpop.permute.xlu0 %783  ;;  %vm1149_vm15 = vcmask 654336   ;;  %vm1155_vm2 = vcmask 916480  }
 0x1b7   : > { %v863_v9 = vsel %vm4329_vm4, %v784_v63, %v862_v57  ;;  %v786_v60 = vpop.permute.xlu1 %785  ;;  %v4480_v10 = vld [vmem:[#allocation2 + $0x40] sm:$0xf]  ;;  %v1900_v57 = vrot.slane %v1898_v47, 4  ;;  %428 = vst [vmem:[#allocation2 + $0x54] sm:$0xf] %v427_v54  ;;  %v1892_v6 = vrot.slane %v1891_v56, 4 }
 0x1b8   : > { %864 = vst [vmem:[#allocation2 + $0x18] sm:$0xf] %v863_v9  ;;  %1501 = vrot.lane.b32.xlu2 %v4375_v23, %s4009_s12  ;;  %v4440_v62 = vld [vmem:[#allocation2 + $0x3c] sm:$0xf]  ;;  %v7190_v9 = vrot.slane %v4480_v10, 5  ;;  %v1918_v36 = vshll.u32 %v4480_v10, 16 }
 0x1b9   : > { %865 = vst.msk [vmem:[#allocation2 + $0x1c] sm:$0xf] %vm843_vm3, %v786_v60  ;;  %v948_v14 = vrot.slane %v4440_v62, 4  ;;  %1209 = vrot.lane.b32.xlu0 %v4440_v62, %s4008_s11  ;;  %1193 = vrot.lane.b32.xlu1 %v4445_v16, %s4008_s11  ;;  %v1909_v49 = vshrl.u32 %v4440_v62, 16  ;;  %v2986_v60 = vsel %vm473_vm0, %v2985_v41, %v4495_v50  ;;  %v1912_v5 = vshll.u32 %v4440_v62, 16 }
 0x1ba   : > { %v1901_v11 = vor.u32 %v1900_v57, %v1896_v45  ;;  %v4535_v30 = vsel %vm4520_vm10, %v1892_v6, %v1896_v45  ;;  %v4538_v33 = vperm.slane %v2986_v60, %v4068_v29  ;;  %v890_v38 = vld [vmem:[#allocation2 + $0x48] sm:$0xf]  ;;  %v1782_v41 = vld [vmem:[#allocation2 + $0x44] sm:$0x1]  ;;  %v2896_v40 = vrot.slane %v7190_v9, 4 }
 0x1bb   : > { %v4451_v17 = vsel %vm473_vm0, %v948_v14, %v4445_v16  ;;  %v4506_v14 = vld [vmem:[#allocation2 + $0x20] sm:$0x1]  ;;  %v1911_v20 = vrot.slane %v1909_v49, 4  ;;  %v1914_v22 = vrot.slane %v1912_v5, 5  ;;  %v869_v34 = vld [vmem:[#allocation2 + $0x24] sm:$0xf] }
 0x1bc   : > { %v1902_v32 = vrot.slane %v1901_v11, 4  ;;  %7311 = vst [vmem:[#allocation3_spill] sm:$0xff] %v4538_v33  ;;  %v2876_v44 = vrot.slane %v4506_v14, 5  ;;  %v4559_v54 = vld [vmem:[#allocation2 + $0x2c] sm:$0x1]  ;;  %v1922_v56 = vshrl.u32 %v4480_v10, 16 }
 0x1bd   : > { %v1915_v1 = vor.u32 %v1914_v22, %v1911_v20  ;;  %v1818_v60 = vrot.slane %v1816_v37, 5  ;;  %v1920_v20 = vrot.slane %v1918_v36, 5  ;;  %v2999_v22 = vrot.slane %v4538_v33, 4 }
 0x1be   : > { %v4461_v3 = vpop.permute.xlu0 %807  ;;  %v4551_v45 = vsel %vm4520_vm10, %v1902_v32, %v1906_v7  ;;  %v897_v57 = vld [vmem:[#allocation2 + $0x54] sm:$0xf]  ;;  %v1928_v36 = vshll.u32 %v1782_v41, 16  ;;  %v1792_v9 = vshll.u32 %v4354_v0, 16 }
 0x1bf   : > { %v810_v28 = vpop.permute.xlu1 %809  ;;  %v4514_v18 = vld [vmem:[#allocation2 + $0x18] sm:$0xf]  ;;  %7312 = vst [vmem:[#allocation4_spill] sm:$0xff] %v4551_v45  ;;  %v891_v47 = vsel %vm4329_vm4, %v4461_v3, %v890_v38 }
 0x1c0   : > { %893 = vst.msk [vmem:[#allocation2 + $0x4c] sm:$0xf] %vm843_vm3, %v810_v28  ;;  %1195 = vrot.lane.b32.xlu2 %v4400_v42, %s4008_s11  ;;  %v4482_v35 = vld [vmem:[#allocation2 + $0x1c] sm:$0xf] }
 0x1c1   : > { %1503 = vrot.lane.b32.xlu0 %v4440_v62, %s4009_s12  ;;  %v7188_v51 = vrot.slane %v4482_v35, 5  ;;  %1211 = vrot.lane.b32.xlu1 %v4480_v10, %s4008_s11  ;;  %892 = vst [vmem:[#allocation2 + $0x48] sm:$0xf] %v891_v47 }
 0x1c3   : > { %v2875_v19 = vrot.slane %v7188_v51, 4 }
 0x1c5   : > { %v4566_v3 = vsel %vm4419_vm7, %v2875_v19, %v2876_v44  ;;  %v2897_v19 = vrot.slane %v1782_v41, 5  ;;  %v2883_v44 = vrot.slane %v4559_v54, 5 }
 0x1c6   : > { %v790_v52 = vpop.permute.xlu0 %789  ;;  %7313 = vst [vmem:[#allocation5_spill] sm:$0xff] %v4566_v3 }
 0x1c7   : > { %v792_v59 = vpop.permute.xlu1 %791  ;;  %v4501_v63 = vld [vmem:[#allocation2 + $0x4c] sm:$0xf]  ;;  %v870_v7 = vsel %vm4329_vm4, %v790_v52, %v869_v34  ;;  %v1822_v52 = vshll.u32 %v4400_v42, 16  ;;  %v4594_v47 = vsel %vm4419_vm7, %v2896_v40, %v2897_v19 }
 0x1c8   : > { %872 = vst.msk [vmem:[#allocation2 + $0x28] sm:$0xf] %vm843_vm3, %v792_v59  ;;  %1489 = vrot.lane.b32.xlu2 %v4400_v42, %s4009_s12  ;;  %v982_v15 = vrot.slane %v4501_v63, 4  ;;  %v7187_v13 = vrot.slane %v4501_v63, 5  ;;  %v1916_v59 = vrot.slane %v1915_v1, 4  ;;  %v1924_v1 = vrot.slane %v1922_v56, 4 }
 0x1c9   : > { %1197 = vrot.lane.b32.xlu0 %v4514_v18, %s4008_s11  ;;  %871 = vst [vmem:[#allocation2 + $0x24] sm:$0xf] %v870_v7  ;;  %v1837_v56 = vshrl.u32 %v4514_v18, 16  ;;  %1487 = vrot.lane.b32.xlu1 %v4445_v16, %s4009_s12  ;;  %v4605_v7 = vld [vmem:[#allocation2 + $0x48] sm:$0xf] }
 0x1ca   : > { %v4529_v26 = vsel %vm473_vm0, %v982_v15, %v4482_v35  ;;  %v2903_v28 = vrot.slane %v7187_v13, 4  ;;  %v4583_v8 = vsel %vm4520_vm10, %v1916_v59, %v1920_v20  ;;  %v3013_v59 = vrot.slane %v4594_v47, 4 }
 0x1cb   : > { %v1839_v19 = vrot.slane %v1837_v56, 4 }
 0x1cc   : > { %v4546_v43 = vsel %vm4419_vm7, %v2903_v28, %v2904_v39  ;;  %v1815_v39 = vrot.slane %v1813_v25, 4 }
 0x1cd   : > { %v2991_v48 = vrot.slane %v4546_v43, 4 }
 0x1ce   : > { %v814_v49 = vpop.permute.xlu0 %813  ;;  %v1819_v32 = vor.u32 %v1818_v60, %v1815_v39  ;;  %v1925_v39 = vor.u32 %v1924_v1, %v1920_v20 }
 0x1cf   : > { %v898_v5 = vsel %vm4329_vm4, %v814_v49, %v897_v57  ;;  %v816_v15 = vpop.permute.xlu1 %815  ;;  %v4570_v6 = vld [vmem:[#allocation2 + $0x28] sm:$0xf]  ;;  %v2992_v11 = vsel %vm473_vm0, %v2991_v48, %v4566_v3  ;;  %v4596_v48 = vrot.slane %v1822_v52, 5  ;;  %v1930_v49 = vrot.slane %v1928_v36, 5 }
 0x1d0   : > { %899 = vst [vmem:[#allocation2 + $0x54] sm:$0xf] %v898_v5  ;;  %v2880_v25 = vrot.slane %v4570_v6, 5  ;;  %v4578_v28 = vperm.slane %v2992_v11, %v4068_v29  ;;  %v1820_v34 = vrot.slane %v1819_v32, 4  ;;  %v1926_v57 = vrot.slane %v1925_v39, 4  ;;  %1213 = vrot.lane.b32.xlu2 %v4605_v7, %s4008_s11 }
 0x1d1   : > { %900 = vst.msk [vmem:[#allocation2 + $0x58] sm:$0xf] %vm843_vm3, %v816_v15  ;;  %1215 = vrot.lane.b32.xlu0 %v4501_v63, %s4008_s11  ;;  %v2833_v60 = vld [vmem:[#allocation2 + $0x24] sm:$0xe]  ;;  %v1840_v5 = vshll.u32 %v4514_v18, 16  ;;  %1505 = vrot.lane.b32.xlu1 %v4480_v10, %s4009_s12  ;;  %v1794_v3 = vrot.slane %v1792_v9, 5 }
 0x1d2   : > { %v4589_v37 = vsel %vm473_vm0, %v4578_v28, %v2999_v22  ;;  %v2882_v38 = vrot.slane %v2880_v25, 4  ;;  %v4610_v40 = vsel %vm4520_vm10, %v1820_v34, %v4596_v48  ;;  %v3956_v11 = vrot.slane %v2833_v60, 9  ;;  %v4622_v22 = vld [vmem:[#allocation2 + $0x5c] sm:$0x1]  ;;  %v4682_v13 = vld [vmem:[#allocation2 + $0x24] sm:$0xf] }
 0x1d3   : > { %7314 = vst [vmem:[#allocation6_spill] sm:$0xff] %v4589_v37  ;;  %v4618_v16 = vsel %vm4520_vm10, %v1926_v57, %v1930_v49  ;;  %v2911_v57 = vrot.slane %v4622_v22, 5  ;;  %v1846_v49 = vshll.u32 %v4482_v35, 16  ;;  %v1856_v37 = vshll.u32 %v4506_v14, 16 }
 0x1d4   : > { %v4600_v41 = vsel %vm4419_vm7, %v2882_v38, %v2883_v44  ;;  %v4628_v36 = vsel %vm4419_vm7, %v3956_v11, %v2880_v25  ;;  %v3014_v38 = vsel %vm473_vm0, %v3013_v59, %v4425_v58  ;;  %v1842_v44 = vrot.slane %v1840_v5, 5 }
 0x1d5   : > { %7315 = vst [vmem:[#allocation7_spill] sm:$0xff] %v4600_v41  ;;  %v4647_v59 = vperm.slane %v3014_v38, %v4068_v29  ;;  %v1802_v11 = vshrl.u32 %v4359_v4, 16  ;;  %vm3805_vm3 = vcmask 588800   ;;  %vm3849_vm4 = vcmask 7168  }
 0x1d6   : > { %v1843_v25 = vor.u32 %v1842_v44, %v1839_v19  ;;  %v1004_v44 = vrot.slane %v4480_v10, 4 }
 0x1d7   : > { %v2837_v15 = vld [vmem:[#allocation2 + $0x54] sm:$0xe]  ;;  %7316 = vst [vmem:[#allocation8_spill] sm:$0xff] %v4647_v59 }
 0x1d8   : > { %v4620_v20 = vld [vmem:[#allocation2 + $0x58] sm:$0xf]  ;;  %v3960_v52 = vrot.slane %v2837_v15, 9  ;;  %1507 = vrot.lane.b32.xlu2 %v4605_v7, %s4009_s12  ;;  %v1798_v15 = vshll.u32 %v4359_v4, 16 }
 0x1d9   : > { %v1010_v32 = vrot.slane %v4620_v20, 4  ;;  %v2908_v1 = vrot.slane %v4620_v20, 5  ;;  %1491 = vrot.lane.b32.xlu0 %v4514_v18, %s4009_s12  ;;  %1199 = vrot.lane.b32.xlu1 %v4482_v35, %s4008_s11 }
 0x1db   : > { %v4636_v34 = vsel %vm473_vm0, %v1010_v32, %v4570_v6  ;;  %v4640_v39 = vsel %vm4419_vm7, %v3960_v52, %v2908_v1  ;;  %v2910_v56 = vrot.slane %v2908_v1, 4  ;;  %v1844_v52 = vrot.slane %v1843_v25, 4 }
 0x1dc   : > { %v4660_v32 = vrot.slane %v1846_v49, 5  ;;  %v3027_v1 = vrot.slane %v4647_v59, 4  ;;  %v4674_v25 = vrot.slane %v1798_v15, 5  ;;  %v1804_v49 = vrot.slane %v1802_v11, 4  ;;  %v2835_v11 = vld [vmem:[#allocation2 + $0x3c] sm:$0xe] }
 0x1dd   : > { %v4651_v60 = vsel %vm4419_vm7, %v2910_v56, %v2911_v57  ;;  %v2834_v56 = vld [vmem:[#allocation2 + $0x30] sm:$0xe]  ;;  %v4690_v15 = vsel %vm473_vm0, %v1004_v44, %v4400_v42  ;;  %v1850_v44 = vshrl.u32 %v4482_v35, 16  ;;  %v3958_v33 = vrot.slane %v2835_v11, 9  ;;  %v4704_v59 = vld [vmem:[#allocation2 + $0x18] sm:$0xe] }
 0x1de   : > { %7317 = vst [vmem:[#allocation9_spill] sm:$0xff] %v4651_v60  ;;  %v3019_v5 = vrot.slane %v4651_v60, 4  ;;  %v4672_v57 = vsel %vm4520_vm10, %v1844_v52, %v4660_v32  ;;  %v3957_v51 = vrot.slane %v2834_v56, 9  ;;  %v2831_v52 = vld [vmem:[#allocation2 + $0xc] sm:$0xe]  ;;  %v1808_v56 = vshll.u32 %v4463_v27, 16 }
 0x1df   : > { %v1791_v60 = vrot.slane %v1789_v46, 4  ;;  %v977_v27 = vsel %vm473_vm0, %v976_v24, %v4359_v4  ;;  %v4718_v11 = vperm.slane %v4451_v17, %v4068_v29  ;;  %v7321_v24 = vrot.slane %v4480_v10, 5 }
 0x1e0   : > { %v3020_v19 = vsel %vm473_vm0, %v3019_v5, %v4600_v41  ;;  %1201 = vrot.lane.b32.xlu2 %v4682_v13, %s4008_s11  ;;  %v7319_v41 = vrot.slane %v4375_v23, 5  ;;  %v7320_v23 = vrot.slane %v4359_v4, 5  ;;  %v7322_v4 = vrot.slane %v4400_v42, 5 }
 0x1e1   : > { %v4664_v38 = vperm.slane %v3020_v19, %v4068_v29  ;;  %1509 = vrot.lane.b32.xlu0 %v4501_v63, %s4009_s12  ;;  %v2830_v19 = vld [vmem:[#allocation2] sm:$0xe]  ;;  %1493 = vrot.lane.b32.xlu1 %v4482_v35, %s4009_s12  ;;  %v1795_v9 = vor.u32 %v1794_v3, %v1791_v60  ;;  %v926_v17 = vrot.slane %v4605_v7, 4  ;;  %v4742_v10 = vperm.slane %v4432_v2, %v4068_v29 }
 0x1e2   : > { %v3953_v12 = vrot.slane %v2830_v19, 9  ;;  %v4699_v0 = vsel %vm4419_vm7, %v3957_v51, %v7319_v41  ;;  %v1810_v51 = vrot.slane %v1808_v56, 5  ;;  %v1852_v41 = vrot.slane %v1850_v44, 4 }
 0x1e3   : > { %v4678_v5 = vsel %vm473_vm0, %v4664_v38, %v3027_v1  ;;  %v1805_v1 = vor.u32 %v1804_v49, %v4674_v25  ;;  %v3954_v49 = vrot.slane %v2831_v52, 9  ;;  %v4726_v52 = vsel %vm4419_vm7, %v3958_v33, %v7321_v24 }
 0x1e4   : > { %7318 = vst [vmem:[#allocation10_spill] sm:$0xff] %v4678_v5  ;;  %v4714_v46 = vsel %vm4419_vm7, %v3953_v12, %v7320_v23  ;;  %v981_v33 = vperm.slane %v977_v27, %v4068_v29  ;;  %v1946_v56 = vshrl.u32 %v4501_v63, 16  ;;  %v1933_v44 = vshrl.u32 %v4605_v7, 16 }
 0x1e5   : > { %v1806_v19 = vrot.slane %v1805_v1, 4  ;;  %v4732_v12 = vsel %vm4419_vm7, %v3954_v49, %v7322_v4  ;;  %v1942_v1 = vshll.u32 %v4501_v63, 16  ;;  %v1936_v49 = vshll.u32 %v4605_v7, 16 }
 0x1e6   : > { %v1796_v23 = vrot.slane %v1795_v9, 4  ;;  %v1826_v24 = vshrl.u32 %v4400_v42, 16  ;;  %v1948_v27 = vrot.slane %v1946_v56, 4  ;;  %v1935_v4 = vrot.slane %v1933_v44, 4 }
 0x1e7   : > { %v4738_v60 = vsel %vm4520_vm10, %v1806_v19, %v1810_v51  ;;  %v1952_v19 = vshll.u32 %v4472_v31, 16  ;;  %v1853_v51 = vor.u32 %v1852_v41, %v4660_v32  ;;  %v1944_v2 = vrot.slane %v1942_v1, 5 }
 0x1e8   : > { %1219 = vrot.lane.b32.xlu2 %v4620_v20, %s4008_s11  ;;  %v1938_v3 = vrot.slane %v1936_v49, 5  ;;  %v927_v5 = vsel %vm473_vm0, %v926_v17, %v4514_v18  ;;  %v987_v7 = vperm.slane %v4529_v26, %v4068_v29  ;;  %v990_v42 = vrot.slane %v981_v33, 4 }
 0x1e9   : > { %3191 = vrot.lane.b32.xlu0 %v4699_v0, %s4008_s11  ;;  %v1949_v9 = vor.u32 %v1948_v27, %v1944_v2  ;;  %v931_v32 = vperm.slane %v927_v5, %v4068_v29  ;;  %v934_v41 = vrot.slane %v4742_v10, 4  ;;  %3485 = vrot.lane.b32.xlu1 %v4699_v0, %s4009_s12  ;;  %v2052_v1 = vrot.slane %v4551_v45, 4 }
 0x1ea   : > { %v1939_v31 = vor.u32 %v1938_v3, %v1935_v4  ;;  %v1954_v56 = vrot.slane %v1952_v19, 5  ;;  %v991_v14 = vsel %vm473_vm0, %v987_v7, %v990_v42  ;;  %v988_v44 = vrot.slane %v987_v7, 4 }
 0x1eb   : > { %v1950_v18 = vrot.slane %v1949_v9, 4  ;;  %v1854_v17 = vrot.slane %v1853_v51, 4  ;;  %v935_v3 = vsel %vm473_vm0, %v931_v32, %v934_v41  ;;  %v1996_v5 = vrot.slane %v4535_v30, 4 }
 0x1ec   : > { %v1940_v26 = vrot.slane %v1939_v31, 4  ;;  %v1828_v49 = vrot.slane %v1826_v24, 4  ;;  %v1858_v27 = vrot.slane %v1856_v37, 5  ;;  %v4770_v4 = vsel %vm473_vm0, %v988_v44, %v981_v33 }
 0x1ed   : > { %v4774_v19 = vsel %vm4520_vm10, %v1950_v18, %v1954_v56  ;;  %v1861_v42 = vshrl.u32 %v4682_v13, 16  ;;  %v1864_v51 = vshll.u32 %v4682_v13, 16  ;;  %v1870_v24 = vshll.u32 %v4570_v6, 16  ;;  %v4795_v18 = vld [vmem:[#allocation2 + $0x54] sm:$0xf] }
 0x1ee   : > { %7323 = vst [vmem:[#allocation11_spill] sm:$0xff] %v4774_v19  ;;  %v4778_v7 = vsel %vm4520_vm10, %v1940_v26, %v1944_v2  ;;  %v2058_v9 = vrot.slane %v4774_v19, 4  ;;  %v1874_v37 = vshrl.u32 %v4570_v6, 16  ;;  %v932_v33 = vrot.slane %v931_v32, 4 }
 0x1ef   : > { %v2053_v2 = vsel %vm473_vm0, %v2052_v1, %v4738_v60  ;;  %v4793_v41 = vsel %vm4520_vm10, %v1854_v17, %v1858_v27  ;;  %v1863_v56 = vrot.slane %v1861_v42, 4  ;;  %v1866_v44 = vrot.slane %v1864_v51, 5 }
 0x1f0   : > { %1495 = vrot.lane.b32.xlu2 %v4682_v13, %s4009_s12  ;;  %7325 = vst [vmem:[#allocation13_spill] sm:$0xff] %v4793_v41  ;;  %v4800_v32 = vsel %vm4520_vm10, %v1796_v23, %v4674_v25  ;;  %v1829_v26 = vor.u32 %v1828_v49, %v4596_v48  ;;  %v1880_v1 = vshll.u32 %v4559_v54, 16  ;;  %v1872_v42 = vrot.slane %v1870_v24, 5 }
 0x1f1   : > { %3175 = vrot.lane.b32.xlu0 %v4714_v46, %s4008_s11  ;;  %7326 = vst [vmem:[#allocation14_spill] sm:$0xff] %v4800_v32  ;;  %v4810_v17 = vsel %vm473_vm0, %v1996_v5, %v4800_v32  ;;  %v1867_v27 = vor.u32 %v1866_v44, %v1863_v56  ;;  %v1876_v51 = vrot.slane %v1874_v37, 4  ;;  %3469 = vrot.lane.b32.xlu1 %v4714_v46, %s4009_s12  ;;  %v1976_v48 = vshll.u32 %v4622_v22, 16 }
 0x1f2   : > { %v4815_v25 = vperm.slane %v2053_v2, %v4068_v29  ;;  %v4819_v23 = vperm.slane %v991_v14, %v4084_v55  ;;  %v4823_v54 = vsel %vm473_vm0, %v932_v33, %v4742_v10  ;;  %v954_v5 = vrot.slane %v4795_v18, 4 }
 0x1f3   : > { %v4831_v24 = vperm.slane %v4690_v15, %v4068_v29  ;;  %v4833_v22 = vrot.slane %v1829_v26, 4  ;;  %v1882_v14 = vrot.slane %v1880_v1, 5  ;;  %v4836_v37 = vperm.slane %v935_v3, %v4084_v55 }
 0x1f4   : > { %7327 = vst [vmem:[#allocation15_spill] sm:$0xff] %v4819_v23  ;;  %v962_v10 = vrot.slane %v4718_v11, 4  ;;  %v1877_v2 = vor.u32 %v1876_v51, %v1872_v42  ;;  %v1966_v56 = vshll.u32 %v4620_v20, 16  ;;  %v1970_v44 = vshrl.u32 %v4620_v20, 16 }
 0x1f5   : > { %v1957_v15 = vshrl.u32 %v4795_v18, 16  ;;  %v1960_v26 = vshll.u32 %v4795_v18, 16  ;;  %v1002_v1 = vrot.slane %v4819_v23, 4  ;;  %v1018_v51 = vrot.slane %v4831_v24, 4 }
 0x1f6   : > { %v1968_v49 = vrot.slane %v1966_v56, 5  ;;  %v946_v19 = vrot.slane %v4836_v37, 4  ;;  %v1878_v45 = vrot.slane %v1877_v2, 4 }
 0x1f8   : > { %1513 = vrot.lane.b32.xlu2 %v4620_v20, %s4009_s12  ;;  %v1959_v20 = vrot.slane %v1957_v15, 4 }
 0x1f9   : > { %1203 = vrot.lane.b32.xlu0 %v4570_v6, %s4008_s11  ;;  %1217 = vrot.lane.b32.xlu1 %v4795_v18, %s4008_s11 }
 0x1fa   : > { %v4787_v31 = vpop.permute.xlu2 %1189 }
 0x1fb   : > { %7324 = vst [vmem:[#allocation12_spill] sm:$0xff] %v4787_v31  ;;  %v4805_v31 = vsel %vm473_vm0, %v2058_v9, %v4793_v41  ;;  %v1868_v9 = vrot.slane %v1867_v27, 4  ;;  %v1978_v27 = vrot.slane %v1976_v48, 5  ;;  %v1962_v48 = vrot.slane %v1960_v26, 5 }
 0x1fc   : > { %v1047_v26 = vshrl.u32 %v4836_v37, 16 }
 0x1fd   : > { %v4841_v33 = vsel %vm4520_vm10, %v1868_v9, %v1872_v42  ;;  %v1972_v9 = vrot.slane %v1970_v44, 4  ;;  %v955_v42 = vsel %vm473_vm0, %v954_v5, %v4682_v13  ;;  %v1963_v56 = vor.u32 %v1962_v48, %v1959_v20 }
 0x1fe   : > { %v959_v41 = vperm.slane %v955_v42, %v4068_v29  ;;  %v4864_v5 = vsel %vm473_vm0, 0, %v1002_v1 }
 0x1ff   : > { %v1973_v32 = vor.u32 %v1972_v9, %v1968_v49  ;;  %v1964_v9 = vrot.slane %v1963_v56, 4 }
 0x200   : > { %v963_v13 = vsel %vm473_vm0, %v959_v41, %v962_v10  ;;  %v960_v44 = vrot.slane %v959_v41, 4  ;;  %3487 = vrot.lane.b32.xlu2 %v4470_v61, %s4009_s12  ;;  %v4877_v10 = vsel %vm473_vm0, 0, %v946_v19 }
 0x201   : > { %1497 = vrot.lane.b32.xlu0 %v4570_v6, %s4009_s12  ;;  %v1015_v6 = vperm.slane %v4636_v34, %v4068_v29  ;;  %v1974_v2 = vrot.slane %v1973_v32, 4  ;;  %v4869_v15 = vperm.slane %v963_v13, %v4084_v55  ;;  %7329 = vst [vmem:[#allocation17_spill] sm:$0xff] %v4877_v10  ;;  %v4883_v32 = vsel %vm4520_vm10, %v1878_v45, %v1882_v14 }
 0x202   : > { %v4850_v3 = vpop.permute.xlu2 %1207  ;;  %v961_v41 = vsel %vm473_vm0, %v960_v44, %v4718_v11  ;;  %v4895_v19 = vsel %vm4520_vm10, %v1964_v9, %v1968_v49  ;;  %v4918_v9 = vperm.slane %v4770_v4, %v4084_v55  ;;  %1511 = vrot.lane.b32.xlu1 %v4795_v18, %s4009_s12  ;;  %v2080_v4 = vrot.slane %v4618_v16, 4 }
 0x203   : > { %7328 = vst [vmem:[#allocation16_spill] sm:$0xff] %v4850_v3  ;;  %v1071_v3 = vshrl.u32 %v4819_v23, 16  ;;  %v1019_v34 = vsel %vm473_vm0, %v1015_v6, %v1018_v51  ;;  %v4887_v1 = vsel %vm4520_vm10, %v1974_v2, %v1978_v27  ;;  %v974_v20 = vrot.slane %v4869_v15, 4 }
 0x204   : > { %v4874_v42 = vperm.slane %v1019_v34, %v4084_v55  ;;  %v2086_v48 = vrot.slane %v4887_v1, 4  ;;  %v2030_v27 = vrot.slane %v4895_v19, 4  ;;  %v1048_v49 = vshrl.u32 %v4869_v15, 16  ;;  %7332 = vst [vmem:[#allocation20_spill] sm:$0xff] %v4918_v9 }
 0x205   : > { %v4907_v13 = vsel %vm473_vm0, 0, %v974_v20  ;;  %v4927_v51 = vperm.slane %v4823_v54, %v4084_v55  ;;  %v2066_v54 = vrot.slane %v4815_v25, 4 }
 0x206   : > { %v1072_v11 = vshrl.u32 %v4874_v42, 16  ;;  %v1030_v56 = vrot.slane %v4874_v42, 4  ;;  %7331 = vst [vmem:[#allocation19_spill] sm:$0xff] %v4907_v13  ;;  %v2087_v44 = vsel %vm473_vm0, %v2086_v48, %v4883_v32  ;;  %v2031_v45 = vsel %vm473_vm0, %v2030_v27, %v4841_v33 }
 0x207   : > { %7333 = vst [vmem:[#allocation21_spill] sm:$0xff] %v4927_v51  ;;  %v1016_v48 = vrot.slane %v1015_v6, 4  ;;  %v2024_v6 = vrot.slane %v4583_v8, 4  ;;  %v4944_v18 = vpack.i.b16 %v1048_v49, %v1047_v26  ;;  %v1054_v34 = vshrl.u32 %v4907_v13, 16 }
 0x208   : > { %v4912_v2 = vpack.i.b16 %v1072_v11, %v1071_v3  ;;  %v4923_v20 = vsel %vm473_vm0, 0, %v1030_v56  ;;  %v4933_v3 = vperm.slane %v4810_v17, %v4068_v29  ;;  %v7334_v11 = vshll.u32 %v4392_v21, 16  ;;  %3195 = vrot.lane.b32.xlu2 %v4726_v52, %s4008_s11 }
 0x209   : > { %3489 = vrot.lane.b32.xlu0 %v4726_v52, %s4009_s12  ;;  %7335 = vst [vmem:[#allocation22_spill] sm:$0xff] %v4944_v18  ;;  %v4947_v17 = vperm.slane %v961_v41, %v4084_v55  ;;  %v1000_v56 = vrot.slane %v4918_v9, 4  ;;  %v1035_v23 = vshrl.u32 %v4927_v51, 16  ;;  %v1017_v41 = vsel %vm473_vm0, %v1016_v48, %v4831_v24 }
 0x20a   : > { %v4902_v14 = vpop.permute.xlu2 %1483  ;;  %v1834_v27 = vrot.slane %v7334_v11, 5  ;;  %v1053_v11 = vshrl.u32 %v4877_v10, 16  ;;  %v4967_v49 = vperm.slane %v1017_v41, %v4084_v55  ;;  %v2025_v10 = vsel %vm473_vm0, %v2024_v6, %v4610_v40  ;;  %3193 = vrot.lane.b32.xlu1 %v4470_v61, %s4008_s11 }
 0x20b   : > { %7330 = vst [vmem:[#allocation18_spill] sm:$0xff] %v4902_v14  ;;  %v2002_v14 = vrot.slane %v4778_v7, 4  ;;  %v1036_v26 = vshrl.u32 %v4947_v17, 16  ;;  %v2063_v24 = vperm.slane %v4805_v31, %v4068_v29  ;;  %v4984_v41 = vsel %vm473_vm0, 0, %v1000_v56 }
 0x20c   : > { %7336 = vst [vmem:[#allocation23_spill] sm:$0xff] %v4947_v17  ;;  %v4952_v21 = vsel %vm4520_vm10, %v4833_v22, %v1834_v27  ;;  %v4964_v22 = vpack.i.b16 %v1054_v34, %v1053_v11  ;;  %v944_v27 = vrot.slane %v4927_v51, 4  ;;  %v972_v34 = vrot.slane %v4947_v17, 4  ;;  %v7396_v51 = vld [vmem:[#allocation13_spill] sm:$0xff] }
 0x20d   : > { %v2081_v62 = vsel %vm473_vm0, %v2080_v4, %v4952_v21  ;;  %7338 = vst [vmem:[#allocation25_spill] sm:$0xff] %v4967_v49  ;;  %v4978_v48 = vpack.i.b16 %v1036_v26, %v1035_v23  ;;  %v1059_v4 = vshrl.u32 %v4918_v9, 16  ;;  %v1060_v11 = vshrl.u32 %v4967_v49, 16 }
 0x20e   : > { %7337 = vst [vmem:[#allocation24_spill] sm:$0xff] %v4964_v22  ;;  %v1028_v22 = vrot.slane %v4967_v49, 4  ;;  %v2003_v6 = vsel %vm473_vm0, %v2002_v14, %v4672_v57  ;;  %v4993_v31 = vsel %vm473_vm0, 0, %v944_v27  ;;  %v4996_v23 = vsel %vm473_vm0, 0, %v972_v34 }
 0x20f   : > { %7340 = vst [vmem:[#allocation27_spill] sm:$0xff] %v4984_v41  ;;  %v5001_v56 = vperm.slane %v2025_v10, %v4068_v29  ;;  %v2091_v26 = vperm.slane %v2087_v44, %v4068_v29  ;;  %v5004_v13 = vpack.i.b16 %v1060_v11, %v1059_v4  ;;  %v1065_v61 = vshrl.u32 %v4984_v41, 16 }
 0x210   : > { %7341 = vst [vmem:[#allocation28_spill] sm:$0xff] %v4993_v31  ;;  %3471 = vrot.lane.b32.xlu2 %v4495_v50, %s4009_s12  ;;  %v2007_v44 = vperm.slane %v2003_v6, %v4068_v29  ;;  %v2067_v34 = vsel %vm473_vm0, %v2063_v24, %v2066_v54  ;;  %v1042_v4 = vshrl.u32 %v4996_v23, 16  ;;  %v7345_v11 = vrot.slane %v4482_v35, 5 }
 0x211   : > { %3473 = vrot.lane.b32.xlu0 %v4732_v12, %s4009_s12  ;;  %7342 = vst [vmem:[#allocation29_spill] sm:$0xff] %v4996_v23  ;;  %v2035_v41 = vperm.slane %v2031_v45, %v4068_v29  ;;  %v2010_v54 = vrot.slane %v4933_v3, 4  ;;  %v1078_v35 = vshrl.u32 %v4923_v20, 16  ;;  %v5044_v45 = vperm.slane %v2067_v34, %v4084_v55 }
 0x212   : > { %v4972_v18 = vpop.permute.xlu2 %1501  ;;  %7343 = vst [vmem:[#allocation30_spill] sm:$0xff] %v5004_v13  ;;  %v7346_v13 = vrot.slane %v4704_v59, 9  ;;  %v2038_v59 = vrot.slane %v5001_v56, 4  ;;  %3177 = vrot.lane.b32.xlu1 %v4495_v50, %s4008_s11 }
 0x213   : > { %7339 = vst [vmem:[#allocation26_spill] sm:$0xff] %v4972_v18  ;;  %v4988_v18 = vperm.slane %v2081_v62, %v4068_v29  ;;  %v5007_v62 = vsel %vm473_vm0, 0, %v1028_v22  ;;  %v1041_v22 = vshrl.u32 %v4993_v31, 16  ;;  %v1077_v31 = vshrl.u32 %v4864_v5, 16  ;;  %v5038_v23 = vpop.permute.xlu0 %1191 }
 0x214   : > { %7344 = vst [vmem:[#allocation31_spill] sm:$0xff] %v5007_v62  ;;  %v1066_v10 = vshrl.u32 %v5007_v62, 16  ;;  %v5027_v14 = vsel %vm4419_vm7, %v7346_v13, %v7345_v11  ;;  %v2064_v13 = vrot.slane %v2063_v24, 4  ;;  %v2836_v11 = vld [vmem:[#allocation2 + $0x48] sm:$0xe]  ;;  %v2039_v24 = vsel %vm473_vm0, %v2035_v41, %v2038_v59 }
 0x215   : > { %v2094_v27 = vrot.slane %v4988_v18, 4  ;;  %v5034_v6 = vpack.i.b16 %v1042_v4, %v1041_v22  ;;  %7349 = vst [vmem:[#allocation34_spill] sm:$0xff] %v5038_v23  ;;  %v2011_v4 = vsel %vm473_vm0, %v2007_v44, %v2010_v54  ;;  %v5068_v34 = vperm.slane %v2039_v24, %v4084_v55 }
 0x216   : > { %v5031_v62 = vpack.i.b16 %v1066_v10, %v1065_v61  ;;  %7350 = vst [vmem:[#allocation35_spill] sm:$0xff] %v5044_v45  ;;  %v5047_v10 = vpack.i.b16 %v1078_v35, %v1077_v31  ;;  %v2147_v54 = vshrl.u32 %v5044_v45, 16  ;;  %v3959_v59 = vrot.slane %v2836_v11, 9 }
 0x217   : > { %7348 = vst [vmem:[#allocation33_spill] sm:$0xff] %v5034_v6  ;;  %v2095_v61 = vsel %vm473_vm0, %v2091_v26, %v2094_v27  ;;  %v5056_v6 = vperm.slane %v2011_v4, %v4084_v55  ;;  %v2065_v27 = vsel %vm473_vm0, %v2064_v13, %v4815_v25  ;;  %v2078_v4 = vrot.slane %v5044_v45, 4 }
 0x218   : > { %7347 = vst [vmem:[#allocation32_spill] sm:$0xff] %v5031_v62  ;;  %v5050_v22 = vperm.slane %v2095_v61, %v4084_v55  ;;  %3179 = vrot.lane.b32.xlu2 %v4732_v12, %s4008_s11  ;;  %v2092_v61 = vrot.slane %v2091_v26, 4  ;;  %v2124_v25 = vshrl.u32 %v5068_v34, 16  ;;  %v2008_v24 = vrot.slane %v2007_v44, 4 }
 0x219   : > { %3477 = vrot.lane.b32.xlu0 %v5027_v14, %s4009_s12  ;;  %7351 = vst [vmem:[#allocation36_spill] sm:$0xff] %v5047_v10  ;;  %v2123_v50 = vshrl.u32 %v5056_v6, 16  ;;  %v5081_v10 = vperm.slane %v2065_v27, %v4084_v55  ;;  %v2022_v11 = vrot.slane %v5056_v6, 4  ;;  %v2050_v26 = vrot.slane %v5068_v34, 4 }
 0x21a   : > { %v5053_v23 = vpop.permute.xlu2 %1195  ;;  %v2148_v35 = vshrl.u32 %v5050_v22, 16  ;;  %v2106_v13 = vrot.slane %v5050_v22, 4  ;;  %v2036_v45 = vrot.slane %v2035_v41, 4  ;;  %v2093_v41 = vsel %vm473_vm0, %v2092_v61, %v4988_v18 }
 0x21b   : > { %7352 = vst [vmem:[#allocation37_spill] sm:$0xff] %v5053_v23  ;;  %v5087_v62 = vpack.i.b16 %v2124_v25, %v2123_v50  ;;  %v5098_v27 = vsel %vm473_vm0, 0, %v2022_v11  ;;  %v5101_v31 = vsel %vm473_vm0, 0, %v2050_v26  ;;  %v7358_v50 = vrot.slane %v4501_v63, 5  ;;  %v5109_v25 = vpop.permute.xlu0 %1485 }
 0x21c   : > { %v5076_v23 = vpack.i.b16 %v2148_v35, %v2147_v54  ;;  %7354 = vst [vmem:[#allocation39_spill] sm:$0xff] %v5081_v10  ;;  %v5090_v54 = vsel %vm473_vm0, 0, %v2078_v4  ;;  %v5093_v35 = vsel %vm473_vm0, 0, %v2106_v13  ;;  %v5115_v11 = vperm.slane %v2093_v41, %v4084_v55 }
 0x21d   : > { %7355 = vst [vmem:[#allocation40_spill] sm:$0xff] %v5087_v62  ;;  %v2902_v4 = vsel %vm4419_vm7, %v3959_v59, %v7358_v50  ;;  %v2009_v26 = vsel %vm473_vm0, %v2008_v24, %v4933_v3  ;;  %v2037_v63 = vsel %vm473_vm0, %v2036_v45, %v5001_v56  ;;  %v5127_v59 = vpop.permute.xlu1 %1205  ;;  %v2135_v61 = vshrl.u32 %v5081_v10, 16 }
 0x21e   : > { %7353 = vst [vmem:[#allocation38_spill] sm:$0xff] %v5076_v23  ;;  %3493 = vrot.lane.b32.xlu1 %v2902_v4, %s4009_s12  ;;  %v5123_v53 = vperm.slane %v2009_v26, %v4084_v55  ;;  %v2136_v41 = vshrl.u32 %v5115_v11, 16  ;;  %v5132_v50 = vperm.slane %v2037_v63, %v4084_v55  ;;  %v2076_v3 = vrot.slane %v5081_v10, 4 }
 0x21f   : > { %7356 = vst [vmem:[#allocation41_spill] sm:$0xff] %v5098_v27  ;;  %v2104_v24 = vrot.slane %v5115_v11, 4  ;;  %v3025_v10 = vrot.slane %v4664_v38, 4 }
 0x220   : > { %7357 = vst [vmem:[#allocation42_spill] sm:$0xff] %v5101_v31  ;;  %3199 = vrot.lane.b32.xlu2 %v2902_v4, %s4008_s11  ;;  %v5136_v13 = vpack.i.b16 %v2136_v41, %v2135_v61  ;;  %v2111_v26 = vshrl.u32 %v5123_v53, 16  ;;  %v2112_v44 = vshrl.u32 %v5132_v50, 16  ;;  %v2020_v56 = vrot.slane %v5123_v53, 4 }
 0x221   : > { %3197 = vrot.lane.b32.xlu0 %v4594_v47, %s4008_s11  ;;  %7359 = vst [vmem:[#allocation43_spill] sm:$0xff] %v5115_v11  ;;  %v5144_v45 = vsel %vm473_vm0, 0, %v2076_v3  ;;  %v5147_v63 = vsel %vm473_vm0, 0, %v2104_v24  ;;  %v2129_v3 = vshrl.u32 %v5098_v27, 16  ;;  %v2130_v24 = vshrl.u32 %v5101_v31, 16 }
 0x222   : > { %v5120_v18 = vpop.permute.xlu2 %1489  ;;  %7361 = vst [vmem:[#allocation45_spill] sm:$0xff] %v5123_v53  ;;  %v5150_v62 = vpack.i.b16 %v2112_v44, %v2111_v26  ;;  %v2141_v44 = vshrl.u32 %v5144_v45, 16  ;;  %v7377_v53 = vld [vmem:[#allocation3_spill] sm:$0xff] }
 0x223   : > { %7360 = vst [vmem:[#allocation44_spill] sm:$0xff] %v5120_v18  ;;  %v2048_v18 = vrot.slane %v5132_v50, 4  ;;  %v5170_v26 = vpack.i.b16 %v2130_v24, %v2129_v3  ;;  %v2142_v3 = vshrl.u32 %v5147_v63, 16  ;;  %v2957_v24 = vrot.slane %v4726_v52, 4 }
 0x224   : > { %7362 = vst [vmem:[#allocation46_spill] sm:$0xff] %v5132_v50  ;;  %v7378_v50 = vld [vmem:[#allocation5_spill] sm:$0xff] }
 0x225   : > { %7363 = vst [vmem:[#allocation47_spill] sm:$0xff] %v5136_v13  ;;  %v5157_v13 = vsel %vm473_vm0, 0, %v2020_v56  ;;  %v5160_v23 = vsel %vm473_vm0, 0, %v2048_v18  ;;  %v5172_v56 = vpop.permute.xlu1 %1499  ;;  %v2958_v52 = vsel %vm473_vm0, %v2957_v24, %v4732_v12  ;;  %v7375_v24 = vld [vmem:[#allocation8_spill] sm:$0xff] }
 0x226   : > { %7364 = vst [vmem:[#allocation48_spill] sm:$0xff] %v5150_v62  ;;  %3491 = vrot.lane.b32.xlu1 %v4594_v47, %s4009_s12  ;;  %v2117_v18 = vshrl.u32 %v5157_v13, 16  ;;  %v2118_v61 = vshrl.u32 %v5160_v23, 16  ;;  %v2154_v62 = vshrl.u32 %v5093_v35, 16 }
 0x227   : > { %7366 = vst [vmem:[#allocation50_spill] sm:$0xff] %v5157_v13  ;;  %v2963_v13 = vrot.slane %v4640_v39, 4 }
 0x228   : > { %7367 = vst [vmem:[#allocation51_spill] sm:$0xff] %v5160_v23  ;;  %3183 = vrot.lane.b32.xlu2 %v5027_v14, %s4008_s11  ;;  %v5180_v47 = vpack.i.b16 %v2118_v61, %v2117_v18  ;;  %v2935_v18 = vrot.slane %v2902_v4, 4  ;;  %v2929_v4 = vrot.slane %v4699_v0, 4  ;;  %v7371_v0 = vld [vmem:[#allocation10_spill] sm:$0xff] }
 0x229   : > { %3181 = vrot.lane.b32.xlu0 %v4425_v58, %s4008_s11  ;;  %7368 = vst [vmem:[#allocation52_spill] sm:$0xff] %v5170_v26  ;;  %v5190_v26 = vpack.i.b16 %v2142_v3, %v2141_v44 }
 0x22a   : > { %v5178_v27 = vpop.permute.xlu2 %1213  ;;  %v2936_v61 = vsel %vm473_vm0, %v2935_v18, %v5027_v14  ;;  %v5235_v14 = vperm.slane %v7371_v0, %v4084_v55  ;;  %v5251_v18 = vperm.slane %v2958_v52, %v4068_v29 }
 0x22b   : > { %v5154_v41 = vpop.permute.xlu0 %1209  ;;  %v5224_v11 = vperm.slane %v2936_v61, %v4068_v29 }
 0x22c   : > { %7365 = vst [vmem:[#allocation49_spill] sm:$0xff] %v5154_v41  ;;  %v2153_v41 = vshrl.u32 %v5090_v54, 16 }
 0x22d   : > { %v5205_v44 = vpop.permute.xlu1 %1193  ;;  %7370 = vst [vmem:[#allocation54_spill] sm:$0xff] %v5224_v11  ;;  %v2941_v0 = vrot.slane %v5224_v11, 4 }
 0x22e   : > { %v5182_v31 = vpack.i.b16 %v2154_v62, %v2153_v41  ;;  %3475 = vrot.lane.b32.xlu1 %v4425_v58, %s4009_s12  ;;  %v2964_v62 = vsel %vm473_vm0, %v2963_v13, %v4628_v36  ;;  %7372 = vst [vmem:[#allocation10_spill] sm:$0xff] %v5235_v14 }
 0x22f   : > { %v5217_v58 = vperm.slane %v2964_v62, %v4068_v29  ;;  %v2930_v62 = vsel %vm473_vm0, %v2929_v4, %v4714_v46  ;;  %7376 = vst [vmem:[#allocation8_spill] sm:$0xff] %v5251_v18 }
 0x230   : > { %3495 = vrot.lane.b32.xlu2 %v4546_v43, %s4009_s12  ;;  %v5261_v4 = vperm.slane %v2930_v62, %v4068_v29 }
 0x231   : > { %3497 = vrot.lane.b32.xlu0 %v4640_v39, %s4009_s12  ;;  %7369 = vst [vmem:[#allocation53_spill] sm:$0xff] %v5217_v58  ;;  %v2969_v38 = vrot.slane %v5217_v58, 4 }
 0x232   : > { %v5207_v3 = vpop.permute.xlu2 %1507  ;;  %7379 = vst [vmem:[#allocation3_spill] sm:$0xff] %v5261_v4 }
 0x233   : > { %v5193_v23 = vpop.permute.xlu0 %1503 }
 0x235   : > { %v5237_v13 = vpop.permute.xlu1 %1211 }
 0x236   : > { %3203 = vrot.lane.b32.xlu1 %v4640_v39, %s4008_s11  ;;  %v7373_v39 = vld [vmem:[#allocation6_spill] sm:$0xff] }
 0x237   : > { %v5244_v61 = vperm.slane %v7373_v39, %v4084_v55 }
 0x238   : > { %3481 = vrot.lane.b32.xlu2 %v4628_v36, %s4009_s12 }
 0x239   : > { %3201 = vrot.lane.b32.xlu0 %v4546_v43, %s4008_s11  ;;  %v2997_v43 = vrot.slane %v4578_v28, 4  ;;  %7374 = vst [vmem:[#allocation6_spill] sm:$0xff] %v5244_v61  ;;  %v3026_v28 = vsel %vm473_vm0, %v3025_v10, %v7375_v24  ;;  %v2970_v10 = vsel %vm473_vm0, %v2969_v38, %v5251_v18  ;;  %v3080_v62 = vshrl.u32 %v5244_v61, 16 }
 0x23a   : > { %v5246_v12 = vpop.permute.xlu2 %1201  ;;  %v5266_v52 = vperm.slane %v3026_v28, %v4084_v55  ;;  %v3081_v24 = vshrl.u32 %v5235_v14, 16  ;;  %v5280_v38 = vperm.slane %v2970_v10, %v4084_v55  ;;  %v3039_v10 = vrot.slane %v5235_v14, 4 }
 0x23b   : > { %v5220_v41 = vpop.permute.xlu0 %1197  ;;  %v2998_v58 = vsel %vm473_vm0, %v2997_v43, %v7377_v53  ;;  %v2942_v53 = vsel %vm473_vm0, %v2941_v0, %v5261_v4  ;;  %v3011_v0 = vrot.slane %v5244_v61, 4 }
 0x23c   : > { %7380 = vst [vmem:[#allocation5_spill] sm:$0xff] %v5266_v52  ;;  %v5273_v43 = vperm.slane %v2998_v58, %v4084_v55  ;;  %v5286_v46 = vpack.i.b16 %v3081_v24, %v3080_v62  ;;  %v5303_v62 = vsel %vm473_vm0, 0, %v3039_v10 }
 0x23d   : > { %7382 = vst [vmem:[#allocation56_spill] sm:$0xff] %v5280_v38  ;;  %v5284_v28 = vpop.permute.xlu1 %1487  ;;  %v5300_v4 = vsel %vm473_vm0, 0, %v3011_v0  ;;  %v3087_v61 = vshrl.u32 %v5303_v62, 16 }
 0x23e   : > { %7381 = vst [vmem:[#allocation55_spill] sm:$0xff] %v5273_v43  ;;  %3479 = vrot.lane.b32.xlu1 %v7378_v50, %s4009_s12 }
 0x23f   : > { %7383 = vst [vmem:[#allocation57_spill] sm:$0xff] %v5286_v46  ;;  %v3086_v46 = vshrl.u32 %v5300_v4, 16 }
 0x240   : > { %2244 = vrot.lane.b32.xlu2 %v4738_v60, %s4008_s11  ;;  %7385 = vst [vmem:[#allocation59_spill] sm:$0xff] %v5300_v4  ;;  %v7388_v4 = vld [vmem:[#allocation14_spill] sm:$0xff] }
 0x241   : > { %3185 = vrot.lane.b32.xlu0 %v7378_v50, %s4008_s11  ;;  %v5292_v50 = vperm.slane %v2942_v53, %v4084_v55  ;;  %7386 = vst [vmem:[#allocation60_spill] sm:$0xff] %v5303_v62  ;;  %v5317_v0 = vpack.i.b16 %v3087_v61, %v3086_v46  ;;  %v7389_v62 = vld [vmem:[#allocation9_spill] sm:$0xff]  ;;  %v7390_v61 = vld [vmem:[#allocation7_spill] sm:$0xff] }
 0x242   : > { %v5294_v11 = vpop.permute.xlu2 %1219 }
 0x243   : > { %v5268_v39 = vpop.permute.xlu0 %1215  ;;  %7384 = vst [vmem:[#allocation58_spill] sm:$0xff] %v5292_v50 }
 0x244   : > { %7387 = vst [vmem:[#allocation61_spill] sm:$0xff] %v5317_v0  ;;  %v7391_v0 = vld [vmem:[#allocation4_spill] sm:$0xff] }
 0x245   : > { %v5319_v10 = vpop.permute.xlu1 %1505 }
 0x246   : > { %3187 = vrot.lane.b32.xlu1 %v4628_v36, %s4008_s11 }
 0x248   : > { %2538 = vrot.lane.b32.xlu2 %v4738_v60, %s4009_s12 }
 0x249   : > { %2258 = vrot.lane.b32.xlu0 %v4535_v30, %s4008_s11 }
 0x24a   : > { %v5321_v24 = vpop.permute.xlu2 %1495 }
 0x24b   : > { %v5309_v58 = vpop.permute.xlu0 %1491 }
 0x24d   : > { %v5331_v36 = vpop.permute.xlu1 %1199 }
 0x24e   : > { %2242 = vrot.lane.b32.xlu1 %v7388_v4, %s4008_s11 }
 0x250   : > { %3205 = vrot.lane.b32.xlu2 %v7389_v62, %s4008_s11 }
 0x251   : > { %2552 = vrot.lane.b32.xlu0 %v4535_v30, %s4009_s12 }
 0x252   : > { %v5333_v60 = vpop.permute.xlu2 %1513 }
 0x253   : > { %v5325_v53 = vpop.permute.xlu0 %1509 }
 0x255   : > { %v5343_v30 = vpop.permute.xlu1 %1493 }
 0x256   : > { %2260 = vrot.lane.b32.xlu1 %v7391_v0, %s4008_s11 }
 0x258   : > { %3189 = vrot.lane.b32.xlu2 %v7390_v61, %s4008_s11 }
 0x259   : > { %3483 = vrot.lane.b32.xlu0 %v7390_v61, %s4009_s12 }
 0x25a   : > { %v5345_v14 = vpop.permute.xlu2 %3487 }
 0x25b   : > { %v5337_v46 = vpop.permute.xlu0 %3191 }
 0x25d   : > { %v5355_v50 = vpop.permute.xlu1 %3485 }
 0x25e   : > { %2536 = vrot.lane.b32.xlu1 %v7388_v4, %s4009_s12 }
 0x260   : > { %2262 = vrot.lane.b32.xlu2 %v4583_v8, %s4008_s11 }
 0x261   : > { %2246 = vrot.lane.b32.xlu0 %v4610_v40, %s4008_s11 }
 0x262   : > { %v5357_v38 = vpop.permute.xlu2 %3195 }
 0x263   : > { %v5349_v18 = vpop.permute.xlu0 %3175 }
 0x265   : > { %v5367_v43 = vpop.permute.xlu1 %3469 }
 0x266   : > { %2554 = vrot.lane.b32.xlu1 %v7391_v0, %s4009_s12 }
 0x268   : > { %2556 = vrot.lane.b32.xlu2 %v4583_v8, %s4009_s12 }
 0x269   : > { %2264 = vrot.lane.b32.xlu0 %v4618_v16, %s4008_s11 }
 0x26a   : > { %v5369_v4 = vpop.permute.xlu2 %3471 }
 0x26b   : > { %v5361_v61 = vpop.permute.xlu0 %1203 }
 0x26d   : > { %v5379_v9 = vpop.permute.xlu1 %1217 }
 0x26e   : > { %3499 = vrot.lane.b32.xlu1 %v7389_v62, %s4009_s12 }
 0x270   : > { %2250 = vrot.lane.b32.xlu2 %v4672_v57, %s4008_s11 }
 0x271   : > { %2540 = vrot.lane.b32.xlu0 %v4610_v40, %s4009_s12  ;;  %v7394_v40 = vld [vmem:[#allocation11_spill] sm:$0xff] }
 0x272   : > { %v5381_v0 = vpop.permute.xlu2 %3179 }
 0x273   : > { %v5373_v52 = vpop.permute.xlu0 %1497  ;;  %7392 = vst [vmem:[#allocation14_spill] sm:$0xff] %v5381_v0 }
 0x275   : > { %v5391_v49 = vpop.permute.xlu1 %1511 }
 0x276   : > { %2248 = vrot.lane.b32.xlu1 %v4952_v21, %s4008_s11 }
 0x278   : > { %2268 = vrot.lane.b32.xlu2 %v7394_v40, %s4008_s11 }
 0x279   : > { %2558 = vrot.lane.b32.xlu0 %v4618_v16, %s4009_s12 }
 0x27a   : > { %v5393_v62 = vpop.permute.xlu2 %3199 }
 0x27b   : > { %v5385_v8 = vpop.permute.xlu0 %3489  ;;  %7395 = vst [vmem:[#allocation7_spill] sm:$0xff] %v5393_v62 }
 0x27c   : > { %7393 = vst [vmem:[#allocation9_spill] sm:$0xff] %v5385_v8 }
 0x27d   : > { %v5403_v16 = vpop.permute.xlu1 %3193 }
 0x27e   : > { %2542 = vrot.lane.b32.xlu1 %v4952_v21, %s4009_s12  ;;  %7398 = vst [vmem:[#allocation11_spill] sm:$0xff] %v5403_v16 }
 0x280   : > { %2544 = vrot.lane.b32.xlu2 %v4672_v57, %s4009_s12 }
 0x281   : > { %2252 = vrot.lane.b32.xlu0 %v7396_v51, %s4008_s11 }
 0x282   : > { %v5405_v0 = vpop.permute.xlu2 %3183 }
 0x283   : > { %v5397_v17 = vpop.permute.xlu0 %3473  ;;  %7399 = vst [vmem:[#allocation13_spill] sm:$0xff] %v5405_v0 }
 0x284   : > { %7397 = vst [vmem:[#allocation4_spill] sm:$0xff] %v5397_v17 }
 0x285   : > { %v5415_v62 = vpop.permute.xlu1 %3177 }
 0x286   : > { %2266 = vrot.lane.b32.xlu1 %v4778_v7, %s4008_s11  ;;  %7400 = vst [vmem:[#allocation62_spill] sm:$0xff] %v5415_v62 }
 0x288   : > { %2560 = vrot.lane.b32.xlu2 %v4778_v7, %s4009_s12 }
 0x289   : > { %2546 = vrot.lane.b32.xlu0 %v7396_v51, %s4009_s12 }
 0x28a   : > { %v5417_v21 = vpop.permute.xlu2 %3495 }
 0x28b   : > { %v5409_v8 = vpop.permute.xlu0 %3477  ;;  %7401 = vst [vmem:[#allocation63_spill] sm:$0xff] %v5417_v21 }
 0x28e   : > { %2254 = vrot.lane.b32.xlu1 %v4841_v33, %s4008_s11 }
 0x290   : > { %2256 = vrot.lane.b32.xlu2 %v4883_v32, %s4008_s11  ;;  %v5427_v51 = vpop.permute.xlu1 %3493 }
 0x291   : > { %2562 = vrot.lane.b32.xlu0 %v7394_v40, %s4009_s12  ;;  %v7404_v40 = vpack.i.b16 %v4869_v15, %v4836_v37 }
 0x292   : > { %v5429_v16 = vpop.permute.xlu2 %3481 }
 0x293   : > { %v5421_v57 = vpop.permute.xlu0 %3197  ;;  %v1092_v21 = vunpack.c.l.b16 %v7404_v40 }
 0x294   : > { %7402 = vst [vmem:[#allocation64_spill] sm:$0xff] %v5421_v57 }
 0x295   : > { %v1093_v0 = vpack.c.b16 %v1092_v21, %v1092_v21  ;;  %v1124_v21 = vunpack.c.l.b16 %v4912_v2 }
 0x296   : > { %2272 = vrot.lane.b32.xlu1 %v4887_v1, %s4008_s11 }
 0x298   : > { %2550 = vrot.lane.b32.xlu2 %v4883_v32, %s4009_s12  ;;  %v5442_v62 = vpop.permute.xlu1 %3491 }
 0x299   : > { %2270 = vrot.lane.b32.xlu0 %v4895_v19, %s4008_s11  ;;  %7405 = vst [vmem:[#allocation66_spill] sm:$0xff] %v5442_v62 }
 0x29a   : > { %v5444_v57 = vpop.permute.xlu2 %2244 }
 0x29b   : > { %v5433_v7 = vpop.permute.xlu0 %3181  ;;  %7406 = vst [vmem:[#allocation67_spill] sm:$0xff] %v5444_v57 }
 0x29c   : > { %7403 = vst [vmem:[#allocation65_spill] sm:$0xff] %v5433_v7  ;;  %v7407_v7 = vpack.i.b16 %v4923_v20, %v4864_v5  ;;  %v1080_v5 = vunpack.c.l.b16 %v4978_v48 }
 0x29e   : > { %v1128_v37 = vunpack.c.l.b16 %v7407_v7  ;;  %2548 = vrot.lane.b32.xlu1 %v4841_v33, %s4009_s12 }
 0x2a0   : > { %2566 = vrot.lane.b32.xlu2 %v4887_v1, %s4009_s12  ;;  %v5456_v15 = vpop.permute.xlu1 %3475  ;;  %v1129_v40 = vpack.c.b16 %v1128_v37, %v1128_v37  ;;  %v7412_v1 = vld [vmem:[#allocation15_spill] sm:$0xff] }
 0x2a1   : > { %1094 = vrot.lane.b32.xlu0 %v1093_v0, %s4001_s6  ;;  %7408 = vst [vmem:[#allocation68_spill] sm:$0xff] %v5456_v15  ;;  %v1125_v0 = vpack.c.b16 %v1124_v21, %v1124_v21  ;;  %v7413_v20 = vpack.i.b16 %v4874_v42, %v7412_v1  ;;  %v7415_v37 = vld [vmem:[#allocation19_spill] sm:$0xff]  ;;  %v1081_v15 = vpack.c.b16 %v1080_v5, %v1080_v5  ;;  %v7421_v1 = vld [vmem:[#allocation22_spill] sm:$0xff] }
 0x2a2   : > { %v5458_v32 = vpop.permute.xlu2 %2538  ;;  %v7423_v5 = vld [vmem:[#allocation31_spill] sm:$0xff] }
 0x2a3   : > { %v5447_v17 = vpop.permute.xlu0 %3497  ;;  %7409 = vst [vmem:[#allocation69_spill] sm:$0xff] %v5458_v32  ;;  %v1120_v7 = vunpack.c.l.b16 %v7413_v20  ;;  %v1096_v20 = vunpack.c.l.b16 %v7421_v1  ;;  %v7429_v1 = vld [vmem:[#allocation30_spill] sm:$0xff] }
 0x2a5   : > { %v1121_v48 = vpack.c.b16 %v1120_v7, %v1120_v7 }
 0x2a6   : > { %2564 = vrot.lane.b32.xlu1 %v4895_v19, %s4009_s12 }
 0x2a8   : > { %1126 = vrot.lane.b32.xlu2 %v1125_v0, %s3999_s29  ;;  %v5468_v33 = vpop.permute.xlu1 %3203  ;;  %v7419_v0 = vld [vmem:[#allocation24_spill] sm:$0xff] }
 0x2a9   : > { %1130 = vrot.lane.b32.xlu0 %v1129_v40, %s4002_s7  ;;  %7411 = vst [vmem:[#allocation71_spill] sm:$0xff] %v5468_v33  ;;  %v7416_v40 = vld [vmem:[#allocation17_spill] sm:$0xff] }
 0x2aa   : > { %v5473_v2 = vpop.permute.xlu2 %3205  ;;  %v7417_v21 = vpack.i.b16 %v7415_v37, %v7416_v40  ;;  %v7424_v40 = vld [vmem:[#allocation27_spill] sm:$0xff] }
 0x2ab   : > { %v5462_v57 = vpop.permute.xlu0 %3201  ;;  %7414 = vst [vmem:[#allocation15_spill] sm:$0xff] %v5473_v2 }
 0x2ac   : > { %7410 = vst [vmem:[#allocation70_spill] sm:$0xff] %v5462_v57  ;;  %v1100_v32 = vunpack.c.l.b16 %v7417_v21  ;;  %v1104_v57 = vunpack.c.l.b16 %v7419_v0 }
 0x2ae   : > { %v1101_v62 = vpack.c.b16 %v1100_v32, %v1100_v32  ;;  %1122 = vrot.lane.b32.xlu1 %v1121_v48, %s4001_s6  ;;  %v1105_v37 = vpack.c.b16 %v1104_v57, %v1104_v57  ;;  %v1097_v32 = vpack.c.b16 %v1096_v20, %v1096_v20  ;;  %v7427_v48 = vld [vmem:[#allocation32_spill] sm:$0xff]  ;;  %v1108_v57 = vunpack.c.l.b16 %v7429_v1 }
 0x2af   : > { %v1237_v1 = vrot.slane %v5127_v59, 4 }
 0x2b0   : > { %1102 = vrot.lane.b32.xlu2 %v1101_v62, %s4002_s7  ;;  %v5484_v42 = vpop.permute.xlu1 %3479 }
 0x2b1   : > { %1082 = vrot.lane.b32.xlu0 %v1081_v15, %s4003_s8  ;;  %7420 = vst [vmem:[#allocation17_spill] sm:$0xff] %v5484_v42  ;;  %v7425_v15 = vpack.i.b16 %v7423_v5, %v7424_v40  ;;  %v7430_v42 = vld [vmem:[#allocation16_spill] sm:$0xff] }
 0x2b2   : > { %v5487_v2 = vpop.permute.xlu2 %3189 }
 0x2b3   : > { %v5479_v19 = vpop.permute.xlu0 %3185  ;;  %7422 = vst [vmem:[#allocation24_spill] sm:$0xff] %v5487_v2  ;;  %v1112_v7 = vunpack.c.l.b16 %v7425_v15  ;;  %v1293_v2 = vrot.slane %v7430_v42, 4  ;;  %v7433_v15 = vld [vmem:[#allocation26_spill] sm:$0xff] }
 0x2b4   : > { %7418 = vst [vmem:[#allocation19_spill] sm:$0xff] %v5479_v19  ;;  %v1116_v19 = vunpack.c.l.b16 %v7427_v48 }
 0x2b5   : > { %v1113_v21 = vpack.c.b16 %v1112_v7, %v1112_v7  ;;  %v1587_v7 = vrot.slane %v7433_v15, 4 }
 0x2b6   : > { %1098 = vrot.lane.b32.xlu1 %v1097_v32, %s3999_s29  ;;  %v1117_v40 = vpack.c.b16 %v1116_v19, %v1116_v19  ;;  %v7436_v19 = vld [vmem:[#allocation35_spill] sm:$0xff] }
 0x2b7   : > { %v1588_v32 = vsel %vm473_vm0, %v1587_v7, %v5109_v25  ;;  %v7444_v7 = vpack.i.b16 %v5068_v34, %v5056_v6  ;;  %v7450_v6 = vld [vmem:[#allocation41_spill] sm:$0xff] }
 0x2b8   : > { %1114 = vrot.lane.b32.xlu2 %v1113_v21, %s4004_s9  ;;  %v5498_v62 = vpop.permute.xlu1 %3187  ;;  %v1109_v21 = vpack.c.b16 %v1108_v57, %v1108_v57  ;;  %v5525_v25 = vperm.slane %v1588_v32, %v4068_v29  ;;  %v7442_v57 = vld [vmem:[#allocation12_spill] sm:$0xff] }
 0x2b9   : > { %1106 = vrot.lane.b32.xlu0 %v1105_v37, %s4000_s30  ;;  %7428 = vst [vmem:[#allocation31_spill] sm:$0xff] %v5498_v62  ;;  %v7432_v37 = vld [vmem:[#allocation33_spill] sm:$0xff] }
 0x2ba   : > { %v5502_v5 = vpop.permute.xlu2 %2262  ;;  %v1088_v20 = vunpack.c.l.b16 %v7432_v37 }
 0x2bb   : > { %v5493_v0 = vpop.permute.xlu0 %2258  ;;  %7431 = vst [vmem:[#allocation27_spill] sm:$0xff] %v5502_v5  ;;  %v7437_v5 = vpack.i.b16 %v5050_v22, %v7436_v19  ;;  %v1238_v22 = vsel %vm473_vm0, %v1237_v1, %v7442_v57 }
 0x2bc   : > { %7426 = vst [vmem:[#allocation22_spill] sm:$0xff] %v5493_v0  ;;  %v7434_v0 = vld [vmem:[#allocation34_spill] sm:$0xff]  ;;  %v1089_v62 = vpack.c.b16 %v1088_v20, %v1088_v20 }
 0x2bd   : > { %v1294_v48 = vsel %vm473_vm0, %v1293_v2, %v7434_v0  ;;  %v2196_v37 = vunpack.c.l.b16 %v7437_v5  ;;  %v7438_v2 = vld [vmem:[#allocation29_spill] sm:$0xff]  ;;  %v7439_v0 = vld [vmem:[#allocation28_spill] sm:$0xff] }
 0x2be   : > { %v5518_v15 = vperm.slane %v1294_v48, %v4068_v29  ;;  %1110 = vrot.lane.b32.xlu1 %v1109_v21, %s4003_s8  ;;  %v2168_v48 = vunpack.c.l.b16 %v7444_v7 }
 0x2bf   : > { %v2197_v20 = vpack.c.b16 %v2196_v37, %v2196_v37  ;;  %v7448_v37 = vpack.i.b16 %v5093_v35, %v5090_v54  ;;  %v7453_v54 = vld [vmem:[#allocation48_spill] sm:$0xff] }
 0x2c0   : > { %1090 = vrot.lane.b32.xlu2 %v1089_v62, %s3998_s28  ;;  %v5528_v59 = vpop.permute.xlu1 %2242  ;;  %v7452_v62 = vld [vmem:[#allocation47_spill] sm:$0xff]  ;;  %v2169_v21 = vpack.c.b16 %v2168_v48, %v2168_v48  ;;  %v2156_v35 = vunpack.c.l.b16 %v7453_v54 }
 0x2c1   : > { %1118 = vrot.lane.b32.xlu0 %v1117_v40, %s3998_s28  ;;  %v7440_v40 = vpack.i.b16 %v7438_v2, %v7439_v0  ;;  %7441 = vst [vmem:[#allocation30_spill] sm:$0xff] %v5528_v59  ;;  %v7445_v2 = vld [vmem:[#allocation36_spill] sm:$0xff]  ;;  %v7446_v0 = vld [vmem:[#allocation38_spill] sm:$0xff]  ;;  %v2204_v57 = vunpack.c.l.b16 %v7448_v37 }
 0x2c2   : > { %v5532_v5 = vpop.permute.xlu2 %2556  ;;  %v1132_v32 = vunpack.c.l.b16 %v7445_v2  ;;  %v7449_v59 = vld [vmem:[#allocation42_spill] sm:$0xff]  ;;  %v1531_v2 = vrot.slane %v5172_v56, 4 }
 0x2c3   : > { %v5512_v42 = vpop.permute.xlu0 %2552  ;;  %v1084_v33 = vunpack.c.l.b16 %v7440_v40  ;;  %7443 = vst [vmem:[#allocation16_spill] sm:$0xff] %v5532_v5  ;;  %v2200_v40 = vunpack.c.l.b16 %v7446_v0  ;;  %v7451_v34 = vpack.i.b16 %v7449_v59, %v7450_v6  ;;  %v1243_v0 = vrot.slane %v5178_v27, 4 }
 0x2c4   : > { %7435 = vst [vmem:[#allocation32_spill] sm:$0xff] %v5512_v42  ;;  %v7447_v42 = vld [vmem:[#allocation40_spill] sm:$0xff]  ;;  %v7454_v59 = vpack.i.b16 %v5147_v63, %v5144_v45  ;;  %v1133_v27 = vpack.c.b16 %v1132_v32, %v1132_v32  ;;  %v7456_v45 = vld [vmem:[#allocation51_spill] sm:$0xff]  ;;  %v7457_v63 = vld [vmem:[#allocation50_spill] sm:$0xff] }
 0x2c5   : > { %v1085_v19 = vpack.c.b16 %v1084_v33, %v1084_v33  ;;  %v2172_v1 = vunpack.c.l.b16 %v7447_v42  ;;  %v5549_v7 = vunpack.c.l.b16 %v7451_v34  ;;  %v5552_v33 = vperm.slane %v1238_v22, %v4068_v29  ;;  %v7455_v22 = vld [vmem:[#allocation49_spill] sm:$0xff] }
 0x2c6   : > { %v1537_v42 = vrot.slane %v5207_v3, 4  ;;  %v5564_v37 = vunpack.c.l.b16 %v7454_v59  ;;  %v1265_v6 = vrot.slane %v7455_v22, 4  ;;  %v1244_v56 = vsel %vm473_vm0, %v1243_v0, %v5220_v41  ;;  %v7459_v41 = vld [vmem:[#allocation18_spill] sm:$0xff] }
 0x2c7   : > { %1086 = vrot.lane.b32.xlu1 %v1085_v19, %s4004_s9  ;;  %v2173_v48 = vpack.c.b16 %v2172_v1, %v2172_v1  ;;  %v2205_v34 = vpack.c.b16 %v2204_v57, %v2204_v57  ;;  %v7458_v54 = vpack.i.b16 %v7456_v45, %v7457_v63  ;;  %v1251_v22 = vrot.slane %v5552_v33, 4 }
 0x2c8   : > { %v1538_v3 = vsel %vm473_vm0, %v1537_v42, %v5309_v58  ;;  %2170 = vrot.lane.b32.xlu2 %v2169_v21, %s4001_s6  ;;  %v1532_v19 = vsel %vm473_vm0, %v1531_v2, %v7459_v41  ;;  %v5583_v32 = vpop.permute.xlu1 %2260  ;;  %v1248_v21 = vperm.slane %v1244_v56, %v4068_v29  ;;  %v5590_v57 = vpack.c.b16 %v2156_v35, %v2156_v35  ;;  %v7460_v42 = vld [vmem:[#allocation52_spill] sm:$0xff] }
 0x2c9   : > { %2198 = vrot.lane.b32.xlu0 %v2197_v20, %s4001_s6  ;;  %v2184_v20 = vunpack.c.l.b16 %v7452_v62  ;;  %v5570_v62 = vpack.c.b16 %v2200_v40, %v2200_v40  ;;  %v5578_v59 = vunpack.c.l.b16 %v7458_v54  ;;  %v2180_v45 = vunpack.c.l.b16 %v7460_v42 }
 0x2ca   : > { %v5588_v1 = vpop.permute.xlu2 %2250  ;;  %v1266_v2 = vsel %vm473_vm0, %v1265_v6, %v5205_v44  ;;  %v1321_v63 = vrot.slane %v5237_v13, 4  ;;  %v1299_v54 = vrot.slane %v5268_v39, 4  ;;  %v1536_v56 = vperm.slane %v1532_v19, %v4068_v29  ;;  %v7461_v19 = vld [vmem:[#allocation37_spill] sm:$0xff] }
 0x2cb   : > { %v5558_v5 = vpop.permute.xlu0 %3483  ;;  %v2185_v58 = vpack.c.b16 %v2184_v20, %v2184_v20  ;;  %v1542_v20 = vperm.slane %v1538_v3, %v4068_v29  ;;  %v1615_v41 = vrot.slane %v5319_v10, 4  ;;  %v1593_v35 = vrot.slane %v5325_v53, 4 }
 0x2cc   : > { %v2161_v42 = vpack.c.b16 %v5578_v59, %v5578_v59  ;;  %v1559_v0 = vrot.slane %v5193_v23, 4  ;;  %v1300_v44 = vsel %vm473_vm0, %v1299_v54, %v5331_v36  ;;  %v2164_v13 = vunpack.c.l.b16 %v5180_v47 }
 0x2cd   : > { %v2208_v39 = vunpack.c.l.b16 %v5182_v31  ;;  %v5612_v6 = vperm.slane %v1266_v2, %v4068_v29  ;;  %v1249_v10 = vrot.slane %v1248_v21, 4  ;;  %v5616_v53 = vpack.c.b16 %v2180_v45, %v2180_v45  ;;  %v7462_v31 = vld [vmem:[#allocation44_spill] sm:$0xff] }
 0x2ce   : > { %v1322_v23 = vsel %vm473_vm0, %v1321_v63, %v7461_v19  ;;  %v1560_v36 = vsel %vm473_vm0, %v1559_v0, %v5284_v28  ;;  %v1327_v47 = vrot.slane %v5294_v11, 4  ;;  %v1543_v54 = vrot.slane %v1542_v20, 4 }
 0x2cf   : > { %1134 = vrot.lane.b32.xlu1 %v1133_v27, %s4000_s30  ;;  %v1616_v2 = vsel %vm473_vm0, %v1615_v41, %v7462_v31  ;;  %v1304_v40 = vperm.slane %v1300_v44, %v4068_v29  ;;  %v1594_v45 = vsel %vm473_vm0, %v1593_v35, %v5343_v30  ;;  %v1545_v63 = vrot.slane %v1536_v56, 4 }
 0x2d0   : > { %2206 = vrot.lane.b32.xlu2 %v2205_v34, %s4002_s7  ;;  %v1252_v28 = vsel %vm473_vm0, %v1248_v21, %v1251_v22  ;;  %v5633_v0 = vpop.permute.xlu1 %2536  ;;  %v5635_v11 = vpack.c.b16 %v2164_v13, %v2164_v13  ;;  %v5637_v27 = vpack.c.b16 %v2208_v39, %v2208_v39  ;;  %v1326_v41 = vperm.slane %v1322_v23, %v4068_v29 }
 0x2d1   : > { %2174 = vrot.lane.b32.xlu0 %v2173_v48, %s3999_s29  ;;  %v2192_v48 = vunpack.c.l.b16 %v5190_v26  ;;  %v1271_v26 = vrot.slane %v5379_v9, 4  ;;  %7463 = vst [vmem:[#allocation33_spill] sm:$0xff] %v5633_v0  ;;  %v1250_v44 = vsel %vm473_vm0, %v1249_v10, %v5552_v33  ;;  %v5643_v30 = vperm.slane %v1560_v36, %v4068_v29  ;;  %v7493_v0 = vld [vmem:[#allocation70_spill] sm:$0xff] }
 0x2d2   : > { %v1328_v9 = vsel %vm473_vm0, %v1327_v47, %v5361_v61  ;;  %v5647_v34 = vpop.permute.xlu2 %2268  ;;  %v5650_v22 = vperm.slane %v1616_v2, %v4068_v29  ;;  %v1544_v21 = vsel %vm473_vm0, %v1543_v54, %v1536_v56  ;;  %v1546_v35 = vsel %vm473_vm0, %v1542_v20, %v1545_v63 }
 0x2d3   : > { %v5614_v3 = vpop.permute.xlu0 %2246  ;;  %v1598_v13 = vperm.slane %v1594_v45, %v4068_v29  ;;  %v1279_v39 = vrot.slane %v5612_v6, 4  ;;  %v1305_v33 = vrot.slane %v1304_v40, 4  ;;  %v1272_v10 = vsel %vm473_vm0, %v1271_v26, %v5246_v12 }
 0x2d4   : > { %v5659_v61 = vpack.c.b16 %v2192_v48, %v2192_v48  ;;  %v5662_v19 = vperm.slane %v1250_v44, %v4084_v55  ;;  %v5665_v23 = vperm.slane %v1252_v28, %v4084_v55  ;;  %v7465_v20 = vrot.slane %v5518_v15, 4 }
 0x2d5   : > { %v1332_v36 = vperm.slane %v1328_v9, %v4068_v29  ;;  %v1335_v47 = vrot.slane %v1326_v41, 4  ;;  %v1573_v54 = vrot.slane %v5643_v30, 4  ;;  %v5673_v12 = vperm.slane %v1544_v21, %v4084_v55 }
 0x2d6   : > { %7464 = vst [vmem:[#allocation26_spill] sm:$0xff] %v5662_v19  ;;  %v1308_v56 = vsel %vm473_vm0, %v1304_v40, %v7465_v20  ;;  %v1629_v31 = vrot.slane %v5650_v22, 4  ;;  %v1621_v2 = vrot.slane %v5333_v60, 4  ;;  %v1599_v45 = vrot.slane %v1598_v13, 4 }
 0x2d7   : > { %7466 = vst [vmem:[#allocation34_spill] sm:$0xff] %v5673_v12  ;;  %v5683_v40 = vperm.slane %v1272_v10, %v4068_v29  ;;  %2202 = vrot.lane.b32.xlu1 %v5570_v62, %s3999_s29  ;;  %v1306_v26 = vsel %vm473_vm0, %v1305_v33, %v5518_v15  ;;  %v5690_v63 = vperm.slane %v1308_v56, %v4084_v55  ;;  %v3223_v28 = vrot.slane %v5337_v46, 4 }
 0x2d8   : > { %v1565_v44 = vrot.slane %v5391_v49, 4  ;;  %2158 = vrot.lane.b32.xlu2 %v5590_v57, %s4003_s8  ;;  %v7467_v60 = vrot.slane %v5525_v25, 4  ;;  %v3573_v21 = vrot.slane %v5345_v14, 4  ;;  %v1333_v62 = vrot.slane %v1332_v36, 4  ;;  %v5701_v15 = vpop.permute.xlu1 %2554 }
 0x2d9   : > { %2186 = vrot.lane.b32.xlu0 %v2185_v58, %s4003_s8  ;;  %v5676_v58 = vperm.slane %v1546_v35, %v4084_v55  ;;  %v3551_v35 = vrot.slane %v5447_v17, 4  ;;  %7468 = vst [vmem:[#allocation35_spill] sm:$0xff] %v5701_v15  ;;  %v3517_v33 = vrot.slane %v5355_v50, 4  ;;  %v1336_v46 = vsel %vm473_vm0, %v1332_v36, %v1335_v47 }
 0x2da   : > { %v1602_v9 = vsel %vm473_vm0, %v1598_v13, %v7467_v60  ;;  %v1622_v49 = vsel %vm473_vm0, %v1621_v2, %v5373_v52  ;;  %v3523_v57 = vrot.slane %v5427_v51, 4  ;;  %v2545_v10 = vpop.permute.xlu2 %2544  ;;  %v5709_v20 = vperm.slane %v1306_v26, %v4084_v55  ;;  %v7475_v60 = vld [vmem:[#allocation9_spill] sm:$0xff] }
 0x2db   : > { %v5678_v48 = vpop.permute.xlu0 %2264  ;;  %v1600_v14 = vsel %vm473_vm0, %v1599_v45, %v5525_v25  ;;  %v3574_v17 = vsel %vm473_vm0, %v3573_v21, %v5369_v4  ;;  %v1280_v50 = vsel %vm473_vm0, %v5683_v40, %v1279_v39  ;;  %v5718_v13 = vperm.slane %v1602_v9, %v4084_v55 }
 0x2dc   : > { %7469 = vst [vmem:[#allocation29_spill] sm:$0xff] %v5709_v20  ;;  %v3224_v52 = vsel %vm473_vm0, %v3223_v28, %v5349_v18  ;;  %v3518_v51 = vsel %vm473_vm0, %v3517_v33, %v5367_v43  ;;  %v1566_v56 = vsel %vm473_vm0, %v1565_v44, %v5321_v24  ;;  %v1334_v4 = vsel %vm473_vm0, %v1333_v62, %v1326_v41 }
 0x2dd   : > { %v5732_v25 = vperm.slane %v1336_v46, %v4084_v55  ;;  %v1626_v39 = vperm.slane %v1622_v49, %v4068_v29  ;;  %v3552_v18 = vsel %vm473_vm0, %v3551_v35, %v5429_v16  ;;  %v5738_v43 = vperm.slane %v1600_v14, %v4084_v55  ;;  %v7477_v14 = vld [vmem:[#allocation4_spill] sm:$0xff] }
 0x2de   : > { %v5741_v24 = vperm.slane %v3574_v17, %v4068_v29  ;;  %v5744_v36 = vperm.slane %v1280_v50, %v4084_v55  ;;  %v3524_v59 = vsel %vm473_vm0, %v3523_v57, %v5409_v8  ;;  %v5751_v41 = vperm.slane %v3224_v52, %v4068_v29 }
 0x2df   : > { %7470 = vst [vmem:[#allocation28_spill] sm:$0xff] %v5738_v43  ;;  %v3251_v47 = vrot.slane %v5357_v38, 4  ;;  %v5755_v16 = vperm.slane %v3518_v51, %v4068_v29  ;;  %v5758_v2 = vperm.slane %v1566_v56, %v4068_v29  ;;  %v7472_v45 = vpack.c.b16 %v5549_v7, %v5549_v7  ;;  %v7478_v51 = vld [vmem:[#allocation14_spill] sm:$0xff] }
 0x2e0   : > { %7471 = vst [vmem:[#allocation12_spill] sm:$0xff] %v5751_v41  ;;  %v5765_v8 = vperm.slane %v1334_v4, %v4084_v55  ;;  %v5768_v26 = vperm.slane %v3552_v18, %v4068_v29  ;;  %2182 = vrot.lane.b32.xlu2 %v5616_v53, %s4000_s30  ;;  %v1263_v28 = vrot.slane %v5665_v23, 4  ;;  %v1627_v44 = vrot.slane %v1626_v39, 4  ;;  %v5778_v7 = vpop.permute.xlu1 %3499 }
 0x2e1   : > { %2162 = vrot.lane.b32.xlu0 %v2161_v42, %s4004_s9  ;;  %2178 = vrot.lane.b32.xlu1 %v7472_v45, %s4002_s7  ;;  %v3545_v9 = vrot.slane %v7475_v60, 4  ;;  %v5776_v21 = vperm.slane %v3524_v59, %v4068_v29  ;;  %v1389_v62 = vshrl.u32 %v5732_v25, 16  ;;  %v1277_v33 = vrot.slane %v5683_v40, 4 }
 0x2e2   : > { %7473 = vst [vmem:[#allocation36_spill] sm:$0xff] %v5765_v8  ;;  %v1630_v53 = vsel %vm473_vm0, %v1626_v39, %v1629_v31  ;;  %v2561_v46 = vpop.permute.xlu2 %2560  ;;  %v1363_v49 = vpack.i.b16 %v5744_v36, %v5665_v23  ;;  %v1574_v57 = vsel %vm473_vm0, %v5758_v2, %v1573_v54  ;;  %v1388_v52 = vshrl.u32 %v5690_v63, 16 }
 0x2e3   : > { %v5748_v42 = vpop.permute.xlu0 %2540  ;;  %7474 = vst [vmem:[#allocation38_spill] sm:$0xff] %v5768_v26  ;;  %v3546_v17 = vsel %vm473_vm0, %v3545_v9, %v7477_v14  ;;  %v2590_v50 = vrot.slane %v2561_v46, 4  ;;  %v3252_v40 = vsel %vm473_vm0, %v3251_v47, %v7478_v51  ;;  %v3557_v31 = vrot.slane %v5768_v26, 4 }
 0x2e4   : > { %7476 = vst [vmem:[#allocation40_spill] sm:$0xff] %v5776_v21  ;;  %v5799_v56 = vsel %vm473_vm0, 0, %v1263_v28  ;;  %v1261_v4 = vrot.slane %v5662_v19, 4  ;;  %v1628_v54 = vsel %vm473_vm0, %v1627_v44, %v5650_v22  ;;  %v3529_v39 = vrot.slane %v5776_v21, 4  ;;  %v7480_v44 = vld [vmem:[#allocation7_spill] sm:$0xff] }
 0x2e5   : > { %v5806_v18 = vsel %vm473_vm0, %v2590_v50, %v2545_v10  ;;  %v1390_v59 = vpack.i.b16 %v1389_v62, %v1388_v52  ;;  %v5809_v47 = vperm.slane %v1630_v53, %v4084_v55  ;;  %v5812_v45 = vperm.slane %v1574_v57, %v4084_v55 }
 0x2e6   : > { %7479 = vst [vmem:[#allocation42_spill] sm:$0xff] %v5806_v18  ;;  %v1409_v60 = vunpack.c.l.b16 %v1363_v49  ;;  %v1278_v22 = vsel %vm473_vm0, %v1277_v33, %v5612_v6  ;;  %v3229_v9 = vrot.slane %v7480_v44, 4  ;;  %v7481_v10 = vpack.c.b16 %v5564_v37, %v5564_v37  ;;  %v7484_v37 = vld [vmem:[#allocation13_spill] sm:$0xff] }
 0x2e7   : > { %v5827_v46 = vperm.slane %v1628_v54, %v4084_v55  ;;  %v5830_v57 = vperm.slane %v3252_v40, %v4068_v29  ;;  %v5837_v33 = vsel %vm473_vm0, 0, %v1261_v4  ;;  %v3530_v14 = vsel %vm473_vm0, %v3529_v39, %v5755_v16 }
 0x2e8   : > { %2194 = vrot.lane.b32.xlu2 %v5659_v61, %s3998_s28  ;;  %v3230_v49 = vsel %vm473_vm0, %v3229_v9, %v7484_v37  ;;  %v1441_v50 = vunpack.c.l.b16 %v1390_v59  ;;  %v1347_v52 = vrot.slane %v5732_v25, 4  ;;  %v5847_v51 = vperm.slane %v1278_v22, %v4084_v55 }
 0x2e9   : > { %2210 = vrot.lane.b32.xlu0 %v5637_v27, %s4000_s30  ;;  %v5815_v27 = vperm.slane %v3546_v17, %v4068_v29  ;;  %2190 = vrot.lane.b32.xlu1 %v7481_v10, %s4004_s9  ;;  %7482 = vst [vmem:[#allocation41_spill] sm:$0xff] %v5827_v46  ;;  %v5843_v17 = vpop.permute.xlu1 %2248  ;;  %v1410_v61 = vpack.c.b16 %v1409_v60, %v1409_v60  ;;  %v1319_v39 = vrot.slane %v5690_v63, 4  ;;  %v1557_v44 = vrot.slane %v5676_v58, 4 }
 0x2ea   : > { %7483 = vst [vmem:[#allocation47_spill] sm:$0xff] %v5830_v57  ;;  %v5849_v40 = vpop.permute.xlu2 %2256  ;;  %v1657_v4 = vpack.i.b16 %v5812_v45, %v5676_v58  ;;  %v5861_v22 = vperm.slane %v3230_v49, %v4068_v29  ;;  %v5864_v9 = vperm.slane %v3530_v14, %v4084_v55  ;;  %v1387_v60 = vpack.i.b16 %v5732_v25, %v5690_v63  ;;  %v7489_v49 = vld [vmem:[#allocation71_spill] sm:$0xff] }
 0x2eb   : > { %v2559_v28 = vpop.permute.xlu0 %2558  ;;  %v3558_v6 = vsel %vm473_vm0, %v3557_v31, %v5815_v27  ;;  %7485 = vst [vmem:[#allocation48_spill] sm:$0xff] %v5847_v51  ;;  %v1683_v31 = vshrl.u32 %v5809_v47, 16  ;;  %v1682_v10 = vshrl.u32 %v5718_v13, 16  ;;  %v1442_v37 = vpack.c.b16 %v1441_v50, %v1441_v50 }
 0x2ec   : > { %v5855_v54 = vperm.slane %v3558_v6, %v4084_v55  ;;  %7487 = vst [vmem:[#allocation51_spill] sm:$0xff] %v5861_v22  ;;  %v2352_v6 = vrot.slane %v5647_v34, 4  ;;  %v1291_v35 = vrot.slane %v5744_v36, 4  ;;  %v5873_v53 = vsel %vm473_vm0, 0, %v1347_v52  ;;  %v7490_v52 = vld [vmem:[#allocation31_spill] sm:$0xff] }
 0x2ed   : > { %7488 = vst [vmem:[#allocation50_spill] sm:$0xff] %v5864_v9  ;;  %v3257_v59 = vrot.slane %v7489_v49, 4  ;;  %v2668_v62 = vrot.slane %v2559_v28, 4  ;;  %v1684_v38 = vpack.i.b16 %v1683_v31, %v1682_v10  ;;  %v1703_v18 = vunpack.c.l.b16 %v1657_v4  ;;  %v7497_v9 = vld [vmem:[#allocation11_spill] sm:$0xff] }
 0x2ee   : > { %7486 = vst [vmem:[#allocation49_spill] sm:$0xff] %v5855_v54  ;;  %v1571_v63 = vrot.slane %v5758_v2, 4  ;;  %v5883_v34 = vsel %vm473_vm0, 0, %v1319_v39  ;;  %v1317_v2 = vrot.slane %v5709_v20, 4  ;;  %v3235_v31 = vrot.slane %v5861_v22, 4 }
 0x2ef   : > { %v3258_v28 = vsel %vm473_vm0, %v3257_v59, %v7490_v52  ;;  %v1437_v10 = vunpack.c.l.b16 %v1387_v60  ;;  %v5895_v39 = vsel %vm473_vm0, 0, %v1291_v35  ;;  %v5901_v52 = vsel %vm473_vm0, 0, %v1557_v44 }
 0x2f0   : > { %1443 = vrot.lane.b32.xlu2 %v1442_v37, %s3999_s29  ;;  %v1735_v37 = vunpack.c.l.b16 %v1684_v38  ;;  %v1572_v50 = vsel %vm473_vm0, %v1571_v63, %v5643_v30  ;;  %v1613_v35 = vrot.slane %v5718_v13, 4  ;;  %v1641_v60 = vrot.slane %v5809_v47, 4 }
 0x2f1   : > { %1411 = vrot.lane.b32.xlu0 %v1410_v61, %s4001_s6  ;;  %2166 = vrot.lane.b32.xlu1 %v5635_v11, %s3998_s28  ;;  %v2543_v4 = vpop.permute.xlu1 %2542  ;;  %v5906_v11 = vperm.slane %v3258_v28, %v4068_v29  ;;  %v7492_v61 = vld [vmem:[#allocation15_spill] sm:$0xff]  ;;  %v1681_v38 = vpack.i.b16 %v5809_v47, %v5718_v13  ;;  %v3236_v30 = vsel %vm473_vm0, %v3235_v31, %v5751_v41  ;;  %v5920_v28 = vsel %vm473_vm0, 0, %v1317_v2 }
 0x2f2   : > { %v2669_v59 = vsel %vm473_vm0, %v2668_v62, %v2543_v4  ;;  %v2551_v49 = vpop.permute.xlu2 %2550  ;;  %v3313_v22 = vrot.slane %v7492_v61, 4  ;;  %v3285_v62 = vrot.slane %v7493_v0, 4  ;;  %v1438_v44 = vpack.c.b16 %v1437_v10, %v1437_v10  ;;  %v7494_v4 = vld [vmem:[#allocation24_spill] sm:$0xff]  ;;  %v7495_v0 = vld [vmem:[#allocation19_spill] sm:$0xff] }
 0x2f3   : > { %v2253_v14 = vpop.permute.xlu0 %2252  ;;  %7491 = vst [vmem:[#allocation18_spill] sm:$0xff] %v5906_v11  ;;  %v1736_v13 = vpack.c.b16 %v1735_v37, %v1735_v37  ;;  %v5928_v54 = vperm.slane %v1572_v50, %v4084_v55  ;;  %v3279_v31 = vrot.slane %v7497_v9, 4  ;;  %v3263_v10 = vrot.slane %v5906_v11, 4  ;;  %v7499_v9 = vld [vmem:[#allocation64_spill] sm:$0xff] }
 0x2f4   : > { %v5880_v25 = vsel %vm473_vm0, %v2352_v6, %v2253_v14  ;;  %v1393_v6 = vpack.i.b16 %v5873_v53, %v5883_v34  ;;  %v1704_v14 = vpack.c.b16 %v1703_v18, %v1703_v18  ;;  %v1369_v18 = vpack.i.b16 %v5895_v39, %v5799_v56 }
 0x2f5   : > { %v3314_v61 = vsel %vm473_vm0, %v3313_v22, %v7494_v4  ;;  %v3286_v15 = vsel %vm473_vm0, %v3285_v62, %v7495_v0  ;;  %7496 = vst [vmem:[#allocation52_spill] sm:$0xff] %v5928_v54  ;;  %v5934_v2 = vsel %vm473_vm0, 0, %v1641_v60  ;;  %v1731_v22 = vunpack.c.l.b16 %v1681_v38 }
 0x2f6   : > { %v1445_v63 = vunpack.c.l.b16 %v1393_v6  ;;  %v1365_v6 = vshrl.u32 %v5744_v36, 16  ;;  %v1417_v37 = vunpack.c.l.b16 %v1369_v18  ;;  %v5939_v62 = vsel %vm473_vm0, 0, %v1613_v35 }
 0x2f7   : > { %7498 = vst [vmem:[#allocation37_spill] sm:$0xff] %v5939_v62  ;;  %v5942_v50 = vperm.slane %v3236_v30, %v4084_v55  ;;  %v3307_v4 = vrot.slane %v7499_v9, 4  ;;  %v5946_v0 = vperm.slane %v3314_v61, %v4068_v29  ;;  %v5949_v60 = vperm.slane %v3286_v15, %v4068_v29  ;;  %v7503_v61 = vld [vmem:[#allocation65_spill] sm:$0xff] }
 0x2f8   : > { %1737 = vrot.lane.b32.xlu2 %v1736_v13, %s3999_s29  ;;  %v2673_v38 = vperm.slane %v2669_v59, %v4068_v29  ;;  %v1446_v18 = vpack.c.b16 %v1445_v63, %v1445_v63  ;;  %v1687_v35 = vpack.i.b16 %v5934_v2, %v5939_v62  ;;  %v7502_v13 = vld [vmem:[#allocation62_spill] sm:$0xff]  ;;  %v3264_v15 = vsel %vm473_vm0, %v3263_v10, %v5830_v57 }
 0x2f9   : > { %1705 = vrot.lane.b32.xlu0 %v1704_v14, %s4001_s6  ;;  %v1585_v14 = vrot.slane %v5812_v45, 4  ;;  %1439 = vrot.lane.b32.xlu1 %v1438_v44, %s4001_s6  ;;  %7500 = vst [vmem:[#allocation44_spill] sm:$0xff] %v5946_v0  ;;  %v5951_v44 = vpop.permute.xlu1 %2266  ;;  %v3280_v9 = vsel %vm473_vm0, %v3279_v31, %v7502_v13  ;;  %v3308_v11 = vsel %vm473_vm0, %v3307_v4, %v7503_v61  ;;  %v7504_v59 = vshrl.u32 %v5665_v23, 16 }
 0x2fa   : > { %7501 = vst [vmem:[#allocation9_spill] sm:$0xff] %v5949_v60  ;;  %v2567_v36 = vpop.permute.xlu2 %2566  ;;  %v1732_v26 = vpack.c.b16 %v1731_v22, %v1731_v22  ;;  %v1418_v21 = vpack.c.b16 %v1417_v37, %v1417_v37  ;;  %v3319_v62 = vrot.slane %v5946_v0, 4  ;;  %v3291_v31 = vrot.slane %v5949_v60, 4 }
 0x2fb   : > { %v2547_v47 = vpop.permute.xlu0 %2546  ;;  %v5957_v30 = vsel %vm473_vm0, 0, %v1585_v14  ;;  %v2674_v41 = vrot.slane %v2567_v36, 4  ;;  %v1366_v63 = vpack.i.b16 %v1365_v6, %v7504_v59  ;;  %v1353_v14 = vshrl.u32 %v5847_v51, 16 }
 0x2fc   : > { %v1663_v4 = vpack.i.b16 %v5957_v30, %v5901_v52  ;;  %v5975_v10 = vperm.slane %v3264_v15, %v4084_v55  ;;  %v2682_v22 = vrot.slane %v2673_v38, 4  ;;  %v1739_v37 = vunpack.c.l.b16 %v1687_v35 }
 0x2fd   : > { %v2675_v13 = vsel %vm473_vm0, %v2674_v41, %v2551_v49  ;;  %v5979_v36 = vperm.slane %v3280_v9, %v4068_v29  ;;  %v1345_v49 = vrot.slane %v5765_v8, 4  ;;  %v1413_v59 = vunpack.c.l.b16 %v1366_v63 }
 0x2fe   : > { %v2679_v23 = vperm.slane %v2675_v13, %v4068_v29  ;;  %v1659_v35 = vshrl.u32 %v5812_v45, 16  ;;  %v1740_v45 = vpack.c.b16 %v1739_v37, %v1739_v37  ;;  %v1639_v37 = vrot.slane %v5827_v46, 4 }
 0x2ff   : > { %7505 = vst [vmem:[#allocation4_spill] sm:$0xff] %v5979_v36  ;;  %v6011_v60 = vsel %vm473_vm0, 0, %v1345_v49  ;;  %v1414_v49 = vpack.c.b16 %v1413_v59, %v1413_v59 }
 0x300   : > { %v2680_v61 = vrot.slane %v2679_v23, 4  ;;  %v5987_v15 = vsel %vm473_vm0, %v2679_v23, %v2682_v22  ;;  %1419 = vrot.lane.b32.xlu2 %v1418_v21, %s4002_s7  ;;  %v1711_v23 = vunpack.c.l.b16 %v1663_v4  ;;  %v1671_v4 = vshrl.u32 %v5827_v46, 16  ;;  %v7514_v46 = vld [vmem:[#allocation68_spill] sm:$0xff] }
 0x301   : > { %1447 = vrot.lane.b32.xlu0 %v1446_v18, %s4002_s7  ;;  %v5982_v18 = vperm.slane %v3308_v11, %v4068_v29  ;;  %1733 = vrot.lane.b32.xlu1 %v1732_v26, %s4001_s6  ;;  %7507 = vst [vmem:[#allocation7_spill] sm:$0xff] %v5987_v15  ;;  %v3292_v11 = vsel %vm473_vm0, %v3291_v31, %v5979_v36  ;;  %v5995_v13 = vpop.permute.xlu1 %2254  ;;  %v1377_v31 = vshrl.u32 %v5765_v8, 16  ;;  %v7513_v8 = vld [vmem:[#allocation63_spill] sm:$0xff] }
 0x302   : > { %v6003_v63 = vsel %vm473_vm0, %v2680_v61, %v2673_v38  ;;  %v6005_v21 = vpop.permute.xlu2 %1126  ;;  %v6019_v38 = vperm.slane %v3292_v11, %v4084_v55  ;;  %v7511_v61 = vld [vmem:[#allocation66_spill] sm:$0xff]  ;;  %v1647_v11 = vshrl.u32 %v5928_v54, 16  ;;  %v3579_v57 = vrot.slane %v7513_v8, 4 }
 0x303   : > { %v2563_v6 = vpop.permute.xlu0 %2562  ;;  %7506 = vst [vmem:[#allocation14_spill] sm:$0xff] %v5982_v18  ;;  %v3320_v9 = vsel %vm473_vm0, %v3319_v62, %v5982_v18  ;;  %v7512_v62 = vshrl.u32 %v5676_v58, 16  ;;  %v7515_v58 = vshrl.u32 %v5709_v20, 16 }
 0x304   : > { %v2646_v41 = vrot.slane %v2563_v6, 4  ;;  %v7508_v6 = vshrl.u32 %v5662_v19, 16  ;;  %7510 = vst [vmem:[#allocation71_spill] sm:$0xff] %v6019_v38  ;;  %v1583_v19 = vrot.slane %v5928_v54, 4  ;;  %v1665_v54 = vshrl.u32 %v5957_v30, 16  ;;  %v7522_v38 = vld [vmem:[#allocation22_spill] sm:$0xff] }
 0x305   : > { %v1660_v0 = vpack.i.b16 %v1659_v35, %v7512_v62  ;;  %v1378_v59 = vpack.i.b16 %v1377_v31, %v7515_v58  ;;  %v1555_v35 = vrot.slane %v5673_v12, 4  ;;  %v6043_v62 = vsel %vm473_vm0, 0, %v1639_v37  ;;  %v7516_v58 = vld [vmem:[#allocation17_spill] sm:$0xff] }
 0x306   : > { %v5998_v26 = vsel %vm473_vm0, %v2646_v41, %v2547_v47  ;;  %v1354_v22 = vpack.i.b16 %v1353_v14, %v7508_v6  ;;  %v1670_v47 = vshrl.u32 %v5738_v43, 16  ;;  %v1611_v41 = vrot.slane %v5738_v43, 4 }
 0x307   : > { %v6016_v14 = vperm.slane %v3320_v9, %v4084_v55  ;;  %v3601_v6 = vrot.slane %v7511_v61, 4  ;;  %v1712_v43 = vpack.c.b16 %v1711_v23, %v1711_v23  ;;  %v1381_v9 = vpack.i.b16 %v6011_v60, %v5920_v28 }
 0x308   : > { %v1397_v18 = vunpack.c.l.b16 %v1354_v22  ;;  %v3607_v22 = vrot.slane %v5778_v7, 4  ;;  %v1672_v23 = vpack.i.b16 %v1671_v4, %v1670_v47  ;;  %v1358_v31 = vshrl.u32 %v5837_v33, 16 }
 0x309   : > { %7509 = vst [vmem:[#allocation13_spill] sm:$0xff] %v6016_v14  ;;  %1741 = vrot.lane.b32.xlu0 %v1740_v45, %s4002_s7  ;;  %v1289_v45 = vrot.slane %v5847_v51, 4  ;;  %v3602_v61 = vsel %vm473_vm0, %v3601_v6, %v7514_v46  ;;  %1415 = vrot.lane.b32.xlu1 %v1414_v49, %s3999_s29  ;;  %v6047_v51 = vpop.permute.xlu1 %2272  ;;  %v1707_v46 = vunpack.c.l.b16 %v1660_v0  ;;  %v6050_v49 = vsel %vm473_vm0, 0, %v1611_v41 }
 0x30a   : > { %1713 = vrot.lane.b32.xlu2 %v1712_v43, %s4002_s7  ;;  %v1398_v6 = vpack.c.b16 %v1397_v18, %v1397_v18  ;;  %v3580_v7 = vsel %vm473_vm0, %v3579_v57, %v7516_v58  ;;  %v6055_v43 = vpop.permute.xlu2 %1102  ;;  %v1429_v47 = vunpack.c.l.b16 %v1381_v9  ;;  %v7518_v4 = vshrl.u32 %v5673_v12, 16 }
 0x30b   : > { %v6027_v36 = vpop.permute.xlu0 %2270  ;;  %7517 = vst [vmem:[#allocation31_spill] sm:$0xff] %v6055_v43  ;;  %v1290_v8 = vsel %vm473_vm0, 0, %v1289_v45  ;;  %v6061_v20 = vperm.slane %v3602_v61, %v4068_v29  ;;  %v1675_v0 = vpack.i.b16 %v6043_v62, %v6050_v49  ;;  %v6067_v41 = vsel %vm473_vm0, 0, %v1555_v35 }
 0x30c   : > { %v1648_v37 = vpack.i.b16 %v1647_v11, %v7518_v4  ;;  %v3608_v57 = vsel %vm473_vm0, %v3607_v22, %v5558_v5  ;;  %v1425_v9 = vunpack.c.l.b16 %v1378_v59  ;;  %v1719_v11 = vunpack.c.l.b16 %v1672_v23  ;;  %v7521_v23 = vld [vmem:[#allocation27_spill] sm:$0xff] }
 0x30d   : > { %v1371_v45 = vshrl.u32 %v5895_v39, 16  ;;  %v3584_v61 = vperm.slane %v3580_v7, %v4068_v29  ;;  %v1708_v58 = vpack.c.b16 %v1707_v46, %v1707_v46  ;;  %v1359_v4 = vshrl.u32 %v1290_v8, 16 }
 0x30e   : > { %v1664_v43 = vshrl.u32 %v5901_v52, 16  ;;  %v1430_v12 = vpack.c.b16 %v1429_v47, %v1429_v47  ;;  %v1691_v35 = vunpack.c.l.b16 %v1648_v37  ;;  %v1382_v5 = vshrl.u32 %v5920_v28, 16 }
 0x30f   : > { %v6080_v59 = vperm.slane %v3608_v57, %v4068_v29  ;;  %v1723_v39 = vunpack.c.l.b16 %v1675_v0  ;;  %v1652_v22 = vshrl.u32 %v6067_v41, 16  ;;  %v3615_v52 = vrot.slane %v6061_v20, 4 }
 0x310   : > { %v1426_v46 = vpack.c.b16 %v1425_v9, %v1425_v9  ;;  %v7519_v7 = vshrl.u32 %v5799_v56, 16  ;;  %v3585_v47 = vrot.slane %v3584_v61, 4  ;;  %v7520_v37 = vrot.slane %v5741_v24, 4  ;;  %v7523_v56 = vld [vmem:[#allocation16_spill] sm:$0xff] }
 0x311   : > { %1399 = vrot.lane.b32.xlu0 %v1398_v6, %s4003_s8  ;;  %1709 = vrot.lane.b32.xlu1 %v1708_v58, %s3999_s29  ;;  %v6087_v6 = vpack.c.b16 %v1719_v11, %v1719_v11  ;;  %v2549_v0 = vpop.permute.xlu1 %2548  ;;  %v1360_v58 = vpack.i.b16 %v1359_v4, %v1358_v31  ;;  %v2318_v14 = vrot.slane %v7521_v23, 4  ;;  %v2290_v9 = vrot.slane %v7522_v38, 4 }
 0x312   : > { %1431 = vrot.lane.b32.xlu2 %v1430_v12, %s4004_s9  ;;  %v1372_v28 = vpack.i.b16 %v1371_v45, %v7519_v7  ;;  %v3588_v57 = vsel %vm473_vm0, %v3584_v61, %v7520_v37  ;;  %v6097_v15 = vpop.permute.xlu2 %1114  ;;  %v1692_v12 = vpack.c.b16 %v1691_v35, %v1691_v35  ;;  %v6100_v11 = vsel %vm473_vm0, 0, %v1583_v19 }
 0x313   : > { %v6075_v18 = vpop.permute.xlu0 %1094  ;;  %v2612_v45 = vrot.slane %v7523_v56, 4  ;;  %v3616_v7 = vsel %vm473_vm0, %v6080_v59, %v3615_v52  ;;  %v1724_v61 = vpack.c.b16 %v1723_v39, %v1723_v39  ;;  %v1357_v31 = vpack.i.b16 %v1290_v8, %v5837_v33  ;;  %v7524_v52 = vld [vmem:[#allocation30_spill] sm:$0xff] }
 0x314   : > { %v2319_v30 = vsel %vm473_vm0, %v2318_v14, %v5614_v3  ;;  %v2324_v4 = vrot.slane %v6027_v36, 4  ;;  %v1421_v38 = vunpack.c.l.b16 %v1372_v28  ;;  %v1395_v35 = vshrl.u32 %v5873_v53, 16 }
 0x315   : > { %v2613_v19 = vsel %vm473_vm0, %v2612_v45, %v5748_v42  ;;  %v1405_v23 = vunpack.c.l.b16 %v1360_v58  ;;  %v6113_v37 = vpack.i.b16 %v1665_v54, %v1664_v43  ;;  %v1653_v39 = vshrl.u32 %v6100_v11, 16 }
 0x316   : > { %v2291_v33 = vsel %vm473_vm0, %v2290_v9, %v7524_v52  ;;  %v6119_v3 = vperm.slane %v3616_v7, %v4084_v55  ;;  %v2296_v36 = vrot.slane %v5951_v44, 4  ;;  %v1383_v53 = vshrl.u32 %v6011_v60, 16 }
 0x317   : > { %v6127_v42 = vsel %vm473_vm0, %v3585_v47, %v5741_v24  ;;  %v6130_v54 = vperm.slane %v3588_v57, %v4084_v55  ;;  %v6133_v8 = vperm.slane %v2319_v30, %v4068_v29  ;;  %v6136_v43 = vunpack.c.l.b16 %v1357_v31 }
 0x318   : > { %v2617_v44 = vperm.slane %v2613_v19, %v4068_v29  ;;  %v2325_v28 = vsel %vm473_vm0, %v2324_v4, %v5995_v13  ;;  %v1422_v60 = vpack.c.b16 %v1421_v38, %v1421_v38  ;;  %v7525_v24 = vshrl.u32 %v5883_v34, 16 }
 0x319   : > { %1693 = vrot.lane.b32.xlu0 %v1692_v12, %s4003_s8  ;;  %1427 = vrot.lane.b32.xlu1 %v1426_v46, %s4003_s8  ;;  %v6147_v57 = vperm.slane %v2291_v33, %v4068_v29  ;;  %v2565_v58 = vpop.permute.xlu1 %2564  ;;  %v1406_v9 = vpack.c.b16 %v1405_v23, %v1405_v23  ;;  %v1715_v46 = vunpack.c.l.b16 %v6113_v37  ;;  %v1654_v12 = vpack.i.b16 %v1653_v39, %v1652_v22  ;;  %v7526_v33 = vld [vmem:[#allocation23_spill] sm:$0xff] }
 0x31a   : > { %1725 = vrot.lane.b32.xlu2 %v1724_v61, %s4004_s9  ;;  %v6144_v47 = vpack.i.b16 %v1395_v35, %v7525_v24  ;;  %v2297_v56 = vsel %vm473_vm0, %v2296_v36, %v5588_v1  ;;  %v2618_v45 = vrot.slane %v2565_v58, 4  ;;  %v6152_v13 = vpop.permute.xlu2 %1090  ;;  %v6154_v7 = vpack.i.b16 %v1383_v53, %v1382_v5  ;;  %v7527_v36 = vld [vmem:[#allocation21_spill] sm:$0xff] }
 0x31b   : > { %v6122_v14 = vpop.permute.xlu0 %1130  ;;  %v2346_v61 = vrot.slane %v5583_v32, 4  ;;  %v2332_v31 = vrot.slane %v6133_v8, 4  ;;  %v2374_v30 = vrot.slane %v5678_v48, 4  ;;  %v6162_v4 = vperm.slane %v2325_v28, %v4068_v29  ;;  %v7529_v28 = vld [vmem:[#allocation67_spill] sm:$0xff] }
 0x31c   : > { %v2626_v22 = vrot.slane %v2617_v44, 4  ;;  %v2380_v1 = vrot.slane %v6047_v51, 4  ;;  %v2619_v38 = vsel %vm473_vm0, %v2618_v45, %v2549_v0  ;;  %v6170_v32 = vperm.slane %v2297_v56, %v4068_v29 }
 0x31d   : > { %v2375_v5 = vsel %vm473_vm0, %v2374_v30, %v5843_v17  ;;  %v2623_v35 = vperm.slane %v2619_v38, %v4068_v29  ;;  %v3599_v48 = vrot.slane %v6130_v54, 4  ;;  %v2304_v19 = vrot.slane %v6147_v57, 4 }
 0x31e   : > { %v3613_v23 = vrot.slane %v6080_v59, 4  ;;  %v3668_v0 = vshrl.u32 %v6130_v54, 16  ;;  %v3669_v37 = vshrl.u32 %v6119_v3, 16  ;;  %v2333_v39 = vsel %vm473_vm0, %v6162_v4, %v2332_v31 }
 0x31f   : > { %v2624_v17 = vrot.slane %v2623_v35, 4  ;;  %v6181_v52 = vsel %vm473_vm0, %v2623_v35, %v2626_v22  ;;  %v7528_v53 = vpack.i.b16 %v7526_v33, %v7527_v36  ;;  %v6194_v24 = vperm.slane %v2375_v5, %v4068_v29 }
 0x320   : > { %v2381_v58 = vsel %vm473_vm0, %v2380_v1, %v5849_v40  ;;  %v6199_v56 = vpack.i.b16 %v3669_v37, %v3668_v0  ;;  %v3627_v30 = vrot.slane %v6119_v3, 4  ;;  %v6213_v22 = vperm.slane %v2333_v39, %v4084_v55 }
 0x321   : > { %1423 = vrot.lane.b32.xlu0 %v1422_v60, %s4000_s30  ;;  %1721 = vrot.lane.b32.xlu1 %v6087_v6, %s4003_s8  ;;  %v2347_v60 = vsel %vm473_vm0, %v2346_v61, %v7529_v28  ;;  %v2305_v6 = vsel %vm473_vm0, %v6170_v32, %v2304_v19  ;;  %v6204_v45 = vsel %vm473_vm0, %v2624_v17, %v2617_v44  ;;  %v6206_v31 = vpop.permute.xlu1 %1122  ;;  %v6209_v61 = vsel %vm473_vm0, 0, %v3599_v48 }
 0x322   : > { %1407 = vrot.lane.b32.xlu2 %v1406_v9, %s3998_s28  ;;  %v6215_v40 = vpop.permute.xlu2 %2170  ;;  %v1716_v9 = vpack.c.b16 %v1715_v46, %v1715_v46  ;;  %v1699_v1 = vunpack.c.l.b16 %v1654_v12  ;;  %v1677_v38 = vshrl.u32 %v6043_v62, 16  ;;  %v6219_v5 = vperm.slane %v2347_v60, %v4068_v29 }
 0x323   : > { %v1083_v51 = vpop.permute.xlu0 %1082  ;;  %v3614_v44 = vsel %vm473_vm0, %v3613_v23, %v6061_v20  ;;  %v6224_v35 = vperm.slane %v2381_v58, %v4068_v29  ;;  %v6227_v48 = vsel %vm473_vm0, 0, %v3627_v30  ;;  %v6230_v19 = vperm.slane %v2305_v6, %v4084_v55 }
 0x324   : > { %v6189_v59 = vsel %vm1136_vm11, %v7528_v53, %v1083_v51  ;;  %v3674_v46 = vshrl.u32 %v6209_v61, 16  ;;  %v3675_v12 = vshrl.u32 %v6227_v48, 16  ;;  %v2388_v20 = vrot.slane %v6194_v24, 4 }
 0x325   : > { %v6240_v23 = vperm.slane %v5880_v25, %v4068_v29  ;;  %v1402_v51 = vpack.c.b16 %v6136_v43, %v6136_v43  ;;  %v1433_v0 = vunpack.c.l.b16 %v6154_v7  ;;  %v6246_v37 = vperm.slane %v3614_v44, %v4084_v55 }
 0x326   : > { %v1700_v39 = vpack.c.b16 %v1699_v1, %v1699_v1  ;;  %v2416_v33 = vpack.i.b16 %v6213_v22, %v6230_v19  ;;  %v6252_v36 = vpack.i.b16 %v3675_v12, %v3674_v46  ;;  %v2360_v53 = vrot.slane %v6219_v5, 4 }
 0x327   : > { %v2389_v25 = vsel %vm473_vm0, %v6224_v35, %v2388_v20  ;;  %v1651_v43 = vpack.i.b16 %v6100_v11, %v6067_v41  ;;  %v6262_v7 = vperm.slane %v6127_v42, %v4084_v55  ;;  %v7531_v28 = vshrl.u32 %v6050_v49, 16 }
 0x328   : > { %v2361_v58 = vsel %vm473_vm0, %v6240_v23, %v2360_v53  ;;  %v1449_v30 = vunpack.c.l.b16 %v6144_v47  ;;  %v1434_v11 = vpack.c.b16 %v1433_v0, %v1433_v0  ;;  %v2462_v42 = vunpack.c.l.b16 %v2416_v33 }
 0x329   : > { %1717 = vrot.lane.b32.xlu0 %v1716_v9, %s4000_s30  ;;  %1403 = vrot.lane.b32.xlu1 %v1402_v51, %s4004_s9  ;;  %v1678_v60 = vpack.i.b16 %v1677_v38, %v7531_v28  ;;  %v6269_v6 = vpop.permute.xlu1 %1098  ;;  %v6273_v9 = vperm.slane %v2389_v25, %v4084_v55  ;;  %v3657_v1 = vshrl.u32 %v6246_v37, 16  ;;  %v1695_v44 = vunpack.c.l.b16 %v1651_v43  ;;  %v7534_v43 = vld [vmem:[#allocation40_spill] sm:$0xff] }
 0x32a   : > { %1701 = vrot.lane.b32.xlu2 %v1700_v39, %s3998_s28  ;;  %7532 = vst [vmem:[#allocation70_spill] sm:$0xff] %v6269_v6  ;;  %v6275_v41 = vpop.permute.xlu2 %2206  ;;  %v1689_v49 = vshrl.u32 %v5934_v2, 16  ;;  %v3531_v38 = vrot.slane %v5755_v16, 4  ;;  %v6281_v46 = vperm.slane %v2361_v58, %v4084_v55  ;;  %v3656_v12 = vshrl.u32 %v6262_v7, 16  ;;  %v7533_v39 = vld [vmem:[#allocation37_spill] sm:$0xff]  ;;  %v7535_v58 = vld [vmem:[#allocation38_spill] sm:$0xff] }
 0x32b   : > { %v6248_v17 = vpop.permute.xlu0 %1106  ;;  %v1727_v47 = vunpack.c.l.b16 %v1678_v60  ;;  %v3559_v20 = vrot.slane %v5815_v27, 4  ;;  %v2330_v51 = vrot.slane %v6162_v4, 4  ;;  %v1450_v0 = vpack.c.b16 %v1449_v30, %v1449_v30 }
 0x32c   : > { %7530 = vst [vmem:[#allocation15_spill] sm:$0xff] %v6248_v17  ;;  %v1688_v33 = vshrl.u32 %v7533_v39, 16  ;;  %v2463_v53 = vpack.c.b16 %v2462_v42, %v2462_v42  ;;  %v3658_v2 = vpack.i.b16 %v3657_v1, %v3656_v12  ;;  %v2400_v16 = vrot.slane %v6273_v9, 4  ;;  %v7557_v17 = vld [vmem:[#allocation43_spill] sm:$0xff] }
 0x32d   : > { %v6291_v28 = vsel %vm473_vm0, %v7534_v43, %v3531_v38  ;;  %v6295_v60 = vsel %vm473_vm0, %v7535_v58, %v3559_v20  ;;  %v1696_v27 = vpack.c.b16 %v1695_v44, %v1695_v44  ;;  %v2302_v30 = vrot.slane %v6170_v32, 4  ;;  %v7537_v20 = vld [vmem:[#allocation20_spill] sm:$0xff] }
 0x32e   : > { %v6298_v4 = vpack.i.b16 %v1689_v49, %v1688_v33  ;;  %v2372_v42 = vrot.slane %v6281_v46, 4  ;;  %v2386_v1 = vrot.slane %v6224_v35, 4  ;;  %v2331_v38 = vsel %vm473_vm0, %v2330_v51, %v6133_v8  ;;  %v7536_v49 = vld [vmem:[#allocation25_spill] sm:$0xff]  ;;  %v7539_v51 = vld [vmem:[#allocation46_spill] sm:$0xff] }
 0x32f   : > { %v2440_v44 = vpack.i.b16 %v6273_v9, %v6281_v46  ;;  %v6313_v33 = vsel %vm473_vm0, 0, %v2400_v16  ;;  %v2358_v35 = vrot.slane %v6240_v23, 4 }
 0x330   : > { %v6329_v23 = vsel %vm473_vm0, 0, %v2372_v42  ;;  %v2418_v42 = vshrl.u32 %v6213_v22, 16 }
 0x331   : > { %1435 = vrot.lane.b32.xlu0 %v1434_v11, %s3998_s28  ;;  %1451 = vrot.lane.b32.xlu1 %v1450_v0, %s4000_s30  ;;  %v1728_v11 = vpack.c.b16 %v1727_v47, %v1727_v47  ;;  %v1111_v12 = vpop.permute.xlu1 %1110  ;;  %v7538_v0 = vpack.i.b16 %v7536_v49, %v7537_v20  ;;  %v3705_v47 = vunpack.c.l.b16 %v3658_v2  ;;  %v2490_v49 = vunpack.c.l.b16 %v2440_v44 }
 0x332   : > { %2464 = vrot.lane.b32.xlu2 %v2463_v53, %s4001_s6  ;;  %v2159_v39 = vpop.permute.xlu2 %2158  ;;  %v7540_v53 = vld [vmem:[#allocation45_spill] sm:$0xff]  ;;  %v2446_v20 = vpack.i.b16 %v6313_v33, %v6329_v23 }
 0x333   : > { %v1119_v25 = vpop.permute.xlu0 %1118  ;;  %v1160_v32 = vsel %vm1136_vm11, %v7538_v0, %v1111_v12  ;;  %v7541_v43 = vpack.i.b16 %v7539_v51, %v7540_v53  ;;  %v2303_v12 = vsel %vm473_vm0, %v2302_v30, %v6147_v57  ;;  %v2387_v57 = vsel %vm473_vm0, %v2386_v1, %v6194_v24 }
 0x334   : > { %v1162_v8 = vsel %vm1140_vm12, %v1160_v32, %v6097_v15  ;;  %v6332_v15 = vperm.slane %v2331_v38, %v4084_v55  ;;  %v7542_v38 = vld [vmem:[#allocation32_spill] sm:$0xff]  ;;  %v7543_v32 = vld [vmem:[#allocation50_spill] sm:$0xff]  ;;  %v2359_v24 = vsel %vm473_vm0, %v2358_v35, %v6219_v5  ;;  %v6354_v1 = vperm.slane %v2303_v12, %v4084_v55 }
 0x335   : > { %v6322_v58 = vsel %vm1136_vm11, %v7541_v43, %v2159_v39  ;;  %v1164_v2 = vsel %vm1143_vm13, %v1162_v8, %v1119_v25  ;;  %v3706_v25 = vpack.c.b16 %v3705_v47, %v3705_v47  ;;  %v2584_v0 = vrot.slane %v7542_v38, 4  ;;  %v7551_v38 = vld [vmem:[#allocation69_spill] sm:$0xff] }
 0x336   : > { %v1166_v16 = vsel %vm1146_vm14, %v1164_v2, %v6206_v31  ;;  %v1743_v31 = vunpack.c.l.b16 %v6298_v4  ;;  %v3632_v39 = vshrl.u32 %v7543_v32, 16  ;;  %7544 = vst [vmem:[#allocation24_spill] sm:$0xff] %v6354_v1  ;;  %v2417_v8 = vshrl.u32 %v6230_v19, 16 }
 0x337   : > { %v6361_v4 = vperm.slane %v2387_v57, %v4084_v55  ;;  %v2491_v53 = vpack.c.b16 %v2490_v49, %v2490_v49  ;;  %v2498_v43 = vunpack.c.l.b16 %v2446_v20  ;;  %v2406_v2 = vshrl.u32 %v6332_v15, 16 }
 0x338   : > { %v2419_v12 = vpack.i.b16 %v2418_v42, %v2417_v8  ;;  %v6374_v57 = vperm.slane %v5998_v26, %v4068_v29  ;;  %v3541_v20 = vrot.slane %v7543_v32, 4  ;;  %v2316_v42 = vrot.slane %v6230_v19, 4 }
 0x339   : > { %1729 = vrot.lane.b32.xlu0 %v1728_v11, %s3998_s28  ;;  %v1168_v11 = vsel %vm1149_vm15, %v1166_v16, %v6005_v21  ;;  %1697 = vrot.lane.b32.xlu1 %v1696_v27, %s4004_s9  ;;  %v7545_v21 = vld [vmem:[#allocation49_spill] sm:$0xff]  ;;  %v7546_v27 = vld [vmem:[#allocation35_spill] sm:$0xff]  ;;  %7547 = vst [vmem:[#allocation19_spill] sm:$0xff] %v6361_v4  ;;  %v2344_v16 = vrot.slane %v6213_v22, 4  ;;  %v2405_v22 = vshrl.u32 %v6354_v1, 16  ;;  %v2430_v8 = vshrl.u32 %v6361_v4, 16 }
 0x33a   : > { %v1170_v44 = vsel %vm1152_vm1, %v1168_v11, %v6122_v14  ;;  %3707 = vrot.lane.b32.xlu2 %v3706_v25, %s4003_s8  ;;  %v3633_v47 = vshrl.u32 %v7545_v21, 16  ;;  %v2640_v51 = vrot.slane %v7546_v27, 4  ;;  %v1087_v14 = vpop.permute.xlu1 %1086  ;;  %v6365_v35 = vpop.permute.xlu2 %2182  ;;  %v6370_v25 = vperm.slane %v2359_v24, %v4084_v55 }
 0x33b   : > { %v6340_v30 = vpop.permute.xlu0 %2198  ;;  %v1142_v5 = vsel %vm1140_vm12, %v6189_v59, %v1087_v14  ;;  %7548 = vst [vmem:[#allocation11_spill] sm:$0xff] %v6365_v35  ;;  %v1744_v24 = vpack.c.b16 %v1743_v31, %v1743_v31  ;;  %v2499_v27 = vpack.c.b16 %v2498_v43, %v2498_v43  ;;  %v2652_v19 = vrot.slane %v6374_v57, 4 }
 0x33c   : > { %7549 = vst [vmem:[#allocation64_spill] sm:$0xff] %v6370_v25  ;;  %v1145_v49 = vsel %vm1143_vm13, %v1142_v5, %v6152_v13  ;;  %v3634_v11 = vpack.i.b16 %v3633_v47, %v3632_v39  ;;  %v2641_v26 = vsel %vm473_vm0, %v2640_v51, %v7551_v38  ;;  %v2407_v5 = vpack.i.b16 %v2406_v2, %v2405_v22  ;;  %v7552_v47 = vld [vmem:[#allocation33_spill] sm:$0xff] }
 0x33d   : > { %v6381_v59 = vsel %vm1146_vm14, %v1145_v49, %v6075_v18  ;;  %v2466_v18 = vunpack.c.l.b16 %v2419_v12  ;;  %v6393_v39 = vsel %vm473_vm0, 0, %v2344_v16  ;;  %v2429_v31 = vshrl.u32 %v6370_v25, 16  ;;  %v7553_v12 = vld [vmem:[#allocation42_spill] sm:$0xff] }
 0x33e   : > { %7550 = vst [vmem:[#allocation62_spill] sm:$0xff] %v6381_v59  ;;  %v6401_v51 = vsel %vm473_vm0, 0, %v3541_v20  ;;  %v6404_v43 = vperm.slane %v2641_v26, %v4068_v29  ;;  %v6408_v2 = vperm.slane %v7553_v12, %v4068_v29  ;;  %v3677_v16 = vunpack.c.l.b16 %v3634_v11 }
 0x33f   : > { %v2442_v22 = vshrl.u32 %v6273_v9, 16  ;;  %v2424_v20 = vshrl.u32 %v6393_v39, 16  ;;  %v2431_v38 = vpack.i.b16 %v2430_v8, %v2429_v31  ;;  %v2450_v12 = vunpack.c.l.b16 %v2407_v5 }
 0x340   : > { %v2398_v11 = vrot.slane %v6361_v4, 4  ;;  %v2342_v9 = vrot.slane %v6332_v15, 4  ;;  %v6429_v8 = vperm.slane %v6003_v63, %v4084_v55  ;;  %v3569_v5 = vrot.slane %v7545_v21, 4 }
 0x341   : > { %2492 = vrot.lane.b32.xlu0 %v2491_v53, %s4001_s6  ;;  %v2585_v53 = vsel %vm473_vm0, %v2584_v0, %v7552_v47  ;;  %1745 = vrot.lane.b32.xlu1 %v1744_v24, %s4000_s30  ;;  %v6412_v0 = vsel %vm473_vm0, 0, %v2316_v42  ;;  %v2467_v47 = vpack.c.b16 %v2466_v18, %v2466_v18  ;;  %v2653_v42 = vsel %vm473_vm0, %v2652_v19, %v6404_v43 }
 0x342   : > { %2500 = vrot.lane.b32.xlu2 %v2499_v27, %s4002_s7  ;;  %v1135_v49 = vpop.permute.xlu1 %1134  ;;  %v6419_v24 = vpop.permute.xlu2 %2194  ;;  %v2441_v27 = vshrl.u32 %v6281_v46, 16  ;;  %v2423_v62 = vshrl.u32 %v6412_v0, 16  ;;  %7555 = vst [vmem:[#allocation66_spill] sm:$0xff] %v6429_v8  ;;  %v2370_v18 = vrot.slane %v6370_v25, 4  ;;  %v3678_v31 = vpack.c.b16 %v3677_v16, %v3677_v16  ;;  %v7558_v16 = vld [vmem:[#allocation39_spill] sm:$0xff]  ;;  %v7570_v25 = vld [vmem:[#allocation13_spill] sm:$0xff] }
 0x343   : > { %v6390_v14 = vpop.permute.xlu0 %2174  ;;  %v6417_v26 = vsel %vm1155_vm2, %v1170_v44, %v1135_v49  ;;  %v2314_v44 = vrot.slane %v6354_v1, 4  ;;  %v2478_v46 = vunpack.c.l.b16 %v2431_v38  ;;  %v6436_v34 = vperm.slane %v2585_v53, %v4068_v29 }
 0x344   : > { %7554 = vst [vmem:[#allocation65_spill] sm:$0xff] %v6417_v26  ;;  %v2443_v19 = vpack.i.b16 %v2442_v22, %v2441_v27  ;;  %v2425_v49 = vpack.i.b16 %v2424_v20, %v2423_v62  ;;  %v6439_v13 = vperm.slane %v2653_v42, %v4084_v55  ;;  %v2451_v63 = vpack.c.b16 %v2450_v12, %v2450_v12 }
 0x345   : > { %v2596_v35 = vrot.slane %v6408_v2, 4  ;;  %v7559_v22 = vpack.i.b16 %v7557_v17, %v7558_v16  ;;  %v6453_v29 = vsel %vm473_vm0, 0, %v2342_v9  ;;  %v3597_v53 = vrot.slane %v6262_v7, 4 }
 0x346   : > { %7556 = vst [vmem:[#allocation63_spill] sm:$0xff] %v6439_v13  ;;  %v6458_v20 = vsel %vm473_vm0, 0, %v2314_v44  ;;  %v6461_v38 = vsel %vm473_vm0, 0, %v2370_v18  ;;  %v6464_v12 = vsel %vm473_vm0, 0, %v3569_v5  ;;  %v2692_v17 = vrot.slane %v6429_v8, 4 }
 0x347   : > { %v2474_v42 = vunpack.c.l.b16 %v2425_v49  ;;  %v2479_v27 = vpack.c.b16 %v2478_v46, %v2478_v46  ;;  %v2410_v44 = vpack.i.b16 %v6453_v29, %v6458_v20  ;;  %v2723_v18 = vshrl.u32 %v6439_v13, 16 }
 0x348   : > { %v2664_v5 = vrot.slane %v6439_v13, 4  ;;  %v2654_v16 = vrot.slane %v6404_v43, 4  ;;  %v2435_v49 = vshrl.u32 %v6461_v38, 16  ;;  %v6482_v46 = vsel %vm473_vm0, 0, %v3597_v53 }
 0x349   : > { %2468 = vrot.lane.b32.xlu0 %v2467_v47, %s3999_s29  ;;  %v6442_v47 = vsel %vm473_vm0, 0, %v2398_v11  ;;  %3679 = vrot.lane.b32.xlu1 %v3678_v31, %s4003_s8  ;;  %v2494_v11 = vunpack.c.l.b16 %v2443_v19  ;;  %v2597_v19 = vsel %vm473_vm0, %v2596_v35, %v6436_v34  ;;  %v6493_v43 = vsel %vm473_vm0, 0, %v2692_v17 }
 0x34a   : > { %2452 = vrot.lane.b32.xlu2 %v2451_v63, %s4003_s8  ;;  %v2436_v9 = vshrl.u32 %v6442_v47, 16  ;;  %v6470_v31 = vpop.permute.xlu2 %1443  ;;  %v2724_v63 = vshrl.u32 %v6429_v8, 16  ;;  %v6490_v59 = vsel %vm473_vm0, 0, %v2664_v5  ;;  %7562 = vst [vmem:[#allocation27_spill] sm:$0xff] %v6493_v43  ;;  %v2448_v35 = vshrl.u32 %v6313_v33, 16 }
 0x34b   : > { %v2187_v26 = vpop.permute.xlu0 %2186  ;;  %7560 = vst [vmem:[#allocation68_spill] sm:$0xff] %v6470_v31  ;;  %v2495_v6 = vpack.c.b16 %v2494_v11, %v2494_v11  ;;  %v3625_v32 = vrot.slane %v6246_v37, 4  ;;  %v2598_v5 = vrot.slane %v6436_v34, 4  ;;  %v2447_v33 = vshrl.u32 %v6329_v23, 16 }
 0x34c   : > { %v6450_v62 = vsel %vm1136_vm11, %v7559_v22, %v2187_v26  ;;  %v6467_v26 = vpop.permute.xlu1 %2202  ;;  %v2422_v22 = vpack.i.b16 %v6393_v39, %v6412_v0  ;;  %v6487_v31 = vpack.i.b16 %v2724_v63, %v2723_v18  ;;  %7561 = vst [vmem:[#allocation17_spill] sm:$0xff] %v6490_v59  ;;  %v2655_v39 = vsel %vm473_vm0, %v6374_v57, %v2654_v16 }
 0x34d   : > { %v2475_v0 = vpack.c.b16 %v2474_v42, %v2474_v42  ;;  %v2454_v18 = vunpack.c.l.b16 %v2410_v44  ;;  %v2437_v63 = vpack.i.b16 %v2436_v9, %v2435_v49  ;;  %v3339_v11 = vshrl.u32 %v5975_v10, 16 }
 0x34e   : > { %v6510_v53 = vperm.slane %v2597_v19, %v4084_v55  ;;  %v2470_v57 = vunpack.c.l.b16 %v2422_v22  ;;  %v3662_v34 = vshrl.u32 %v6482_v46, 16  ;;  %v2449_v44 = vpack.i.b16 %v2448_v35, %v2447_v33  ;;  %v7568_v33 = vld [vmem:[#allocation71_spill] sm:$0xff] }
 0x34f   : > { %v6526_v16 = vsel %vm473_vm0, 0, %v3625_v32  ;;  %v2455_v49 = vpack.c.b16 %v2454_v18, %v2454_v18  ;;  %v2486_v22 = vunpack.c.l.b16 %v2437_v63  ;;  %v7567_v35 = vshrl.u32 %v5942_v50, 16 }
 0x350   : > { %7563 = vst [vmem:[#allocation22_spill] sm:$0xff] %v6510_v53  ;;  %v3362_v42 = vshrl.u32 %v7568_v33, 16  ;;  %v6543_v18 = vperm.slane %v6204_v45, %v4084_v55  ;;  %v2471_v63 = vpack.c.b16 %v2470_v57, %v2470_v57  ;;  %v3363_v4 = vshrl.u32 %v7570_v25, 16 }
 0x351   : > { %2480 = vrot.lane.b32.xlu0 %v2479_v27, %s4003_s8  ;;  %2496 = vrot.lane.b32.xlu1 %v2495_v6, %s3999_s29  ;;  %v7564_v6 = vld [vmem:[#allocation7_spill] sm:$0xff]  ;;  %v3340_v32 = vpack.i.b16 %v3339_v11, %v7567_v35  ;;  %v2487_v11 = vpack.c.b16 %v2486_v22, %v2486_v22  ;;  %v2411_v57 = vshrl.u32 %v6458_v20, 16  ;;  %v3331_v8 = vrot.slane %v7570_v25, 4 }
 0x352   : > { %2476 = vrot.lane.b32.xlu2 %v2475_v0, %s4000_s30  ;;  %v6518_v9 = vperm.slane %v7564_v6, %v4084_v55  ;;  %v6528_v19 = vpop.permute.xlu2 %1737  ;;  %v2434_v6 = vpack.i.b16 %v6442_v47, %v6461_v38  ;;  %7569 = vst [vmem:[#allocation23_spill] sm:$0xff] %v6543_v18  ;;  %v2608_v0 = vrot.slane %v6510_v53, 4  ;;  %v2730_v47 = vshrl.u32 %v6493_v43, 16 }
 0x353   : > { %v2163_v27 = vpop.permute.xlu0 %2162  ;;  %7566 = vst [vmem:[#allocation30_spill] sm:$0xff] %v6528_v19  ;;  %v3383_v22 = vunpack.c.l.b16 %v3340_v32 }
 0x354   : > { %v6505_v17 = vsel %vm1140_vm12, %v6322_v58, %v2163_v27  ;;  %v6521_v58 = vperm.slane %v2655_v39, %v4084_v55  ;;  %v6523_v23 = vpop.permute.xlu1 %2178  ;;  %v2599_v39 = vsel %vm473_vm0, %v6408_v2, %v2598_v5  ;;  %v3663_v27 = vshrl.u32 %v6526_v16, 16 }
 0x355   : > { %7565 = vst [vmem:[#allocation16_spill] sm:$0xff] %v6523_v23  ;;  %v2502_v2 = vunpack.c.l.b16 %v2449_v44  ;;  %v2729_v5 = vshrl.u32 %v6490_v59, 16  ;;  %v2694_v38 = vrot.slane %v6518_v9, 4  ;;  %v2736_v45 = vshrl.u32 %v6518_v9, 16 }
 0x356   : > { %v2735_v23 = vshrl.u32 %v6521_v58, 16  ;;  %v2412_v44 = vshrl.u32 %v6453_v29, 16  ;;  %v3664_v59 = vpack.i.b16 %v3663_v27, %v3662_v34  ;;  %v2666_v19 = vrot.slane %v6521_v58, 4 }
 0x357   : > { %v6558_v21 = vpack.i.b16 %v2730_v47, %v2729_v5  ;;  %v6570_v29 = vsel %vm473_vm0, 0, %v2694_v38  ;;  %v2503_v34 = vpack.c.b16 %v2502_v2, %v2502_v2  ;;  %v2636_v27 = vrot.slane %v6543_v18, 4 }
 0x358   : > { %v6561_v43 = vpack.i.b16 %v2736_v45, %v2735_v23  ;;  %7571 = vst [vmem:[#allocation21_spill] sm:$0xff] %v6570_v29  ;;  %v2700_v23 = vshrl.u32 %v6543_v18, 16  ;;  %v2742_v2 = vshrl.u32 %v6570_v29, 16  ;;  %v3639_v45 = vshrl.u32 %v6464_v12, 16 }
 0x359   : > { %2456 = vrot.lane.b32.xlu0 %v2455_v49, %s4004_s9  ;;  %2472 = vrot.lane.b32.xlu1 %v2471_v63, %s4002_s7  ;;  %v2482_v49 = vunpack.c.l.b16 %v2434_v6  ;;  %v2699_v63 = vshrl.u32 %v6510_v53, 16  ;;  %v6567_v6 = vsel %vm473_vm0, 0, %v2608_v0  ;;  %v6581_v0 = vsel %vm473_vm0, 0, %v2666_v19 }
 0x35a   : > { %2488 = vrot.lane.b32.xlu2 %v2487_v11, %s3998_s28  ;;  %v6574_v32 = vpop.permute.xlu2 %1419  ;;  %v2413_v11 = vpack.i.b16 %v2412_v44, %v2411_v57  ;;  %7573 = vst [vmem:[#allocation37_spill] sm:$0xff] %v6581_v0  ;;  %v2741_v19 = vshrl.u32 %v6581_v0, 16  ;;  %v7588_v0 = vld [vmem:[#allocation48_spill] sm:$0xff] }
 0x35b   : > { %v2211_v35 = vpop.permute.xlu0 %2210  ;;  %7572 = vst [vmem:[#allocation67_spill] sm:$0xff] %v6574_v32  ;;  %v2483_v47 = vpack.c.b16 %v2482_v49, %v2482_v49  ;;  %v3384_v49 = vpack.c.b16 %v3383_v22, %v3383_v22  ;;  %v6619_v22 = vperm.slane %v2599_v39, %v4084_v55 }
 0x35c   : > { %v2191_v1 = vpop.permute.xlu1 %2190 }
 0x35d   : > { %v2231_v5 = vsel %vm1140_vm12, %v6450_v62, %v2191_v1  ;;  %v6586_v1 = vpack.i.b16 %v2700_v23, %v2699_v63  ;;  %v6589_v62 = vsel %vm473_vm0, 0, %v2636_v27  ;;  %v7574_v63 = vpack.i.b16 %v6464_v12, %v6401_v51 }
 0x35e   : > { %v2233_v20 = vsel %vm1143_vm13, %v2231_v5, %v6419_v24  ;;  %v3364_v27 = vpack.i.b16 %v3363_v4, %v3362_v42  ;;  %v3247_v42 = vrot.slane %v5942_v50, 4 }
 0x35f   : > { %v2235_v38 = vsel %vm1146_vm14, %v2233_v20, %v6340_v30  ;;  %v3681_v5 = vunpack.c.l.b16 %v7574_v63  ;;  %v6624_v20 = vperm.slane %v6291_v28, %v4084_v55  ;;  %v2706_v63 = vshrl.u32 %v6589_v62, 16 }
 0x360   : > { %v2237_v24 = vsel %vm1149_vm15, %v2235_v38, %v6467_v26 }
 0x361   : > { %2504 = vrot.lane.b32.xlu0 %v2503_v34, %s4000_s30  ;;  %v2239_v57 = vsel %vm1152_vm1, %v2237_v24, %v6275_v41  ;;  %v6610_v34 = vperm.slane %v6295_v60, %v4084_v55  ;;  %2484 = vrot.lane.b32.xlu1 %v2483_v47, %s4004_s9  ;;  %v6616_v41 = vpack.i.b16 %v2742_v2, %v2741_v19  ;;  %v2458_v60 = vunpack.c.l.b16 %v2413_v11 }
 0x362   : > { %v6614_v23 = vsel %vm1155_vm2, %v2239_v57, %v2211_v35  ;;  %3385 = vrot.lane.b32.xlu2 %v3384_v49, %s4003_s8  ;;  %v3713_v24 = vunpack.c.l.b16 %v3664_v59  ;;  %v6628_v47 = vperm.slane %v6181_v52, %v4084_v55  ;;  %v3682_v39 = vpack.c.b16 %v3681_v5, %v3681_v5 }
 0x363   : > { %v6601_v44 = vpop.permute.xlu0 %1411  ;;  %7575 = vst [vmem:[#allocation40_spill] sm:$0xff] %v6614_v23  ;;  %v3643_v28 = vpack.i.b16 %v6610_v34, %v6624_v20  ;;  %v3275_v59 = vrot.slane %v5975_v10, 4  ;;  %v3411_v11 = vunpack.c.l.b16 %v3364_v27  ;;  %v2610_v19 = vrot.slane %v6619_v22, 4  ;;  %v7579_v27 = vld [vmem:[#allocation5_spill] sm:$0xff] }
 0x364   : > { %7576 = vst [vmem:[#allocation38_spill] sm:$0xff] %v6616_v41  ;;  %v2167_v38 = vpop.permute.xlu1 %2166  ;;  %v6632_v2 = vpop.permute.xlu2 %1713  ;;  %v3714_v57 = vpack.c.b16 %v3713_v24, %v3713_v24  ;;  %v2705_v49 = vshrl.u32 %v6567_v6, 16 }
 0x365   : > { %v2218_v35 = vsel %vm1143_vm13, %v6505_v17, %v2167_v38  ;;  %7577 = vst [vmem:[#allocation25_spill] sm:$0xff] %v6632_v2  ;;  %v3661_v17 = vpack.i.b16 %v6526_v16, %v6482_v46  ;;  %v2638_v38 = vrot.slane %v6628_v47, 4  ;;  %v2712_v46 = vshrl.u32 %v6628_v47, 16 }
 0x366   : > { %v2220_v4 = vsel %vm1146_vm14, %v2218_v35, %v6215_v40  ;;  %v2459_v40 = vpack.c.b16 %v2458_v60, %v2458_v60  ;;  %v2711_v35 = vshrl.u32 %v6619_v22, 16  ;;  %v6659_v16 = vsel %vm473_vm0, 0, %v3275_v59 }
 0x367   : > { %v6642_v52 = vsel %vm1149_vm15, %v2220_v4, %v6390_v14  ;;  %v3069_v60 = vshrl.u32 %v7579_v27, 16  ;;  %v6662_v24 = vpack.i.b16 %v2706_v63, %v2705_v49  ;;  %v6667_v4 = vsel %vm473_vm0, 0, %v2610_v19 }
 0x368   : > { %7578 = vst [vmem:[#allocation20_spill] sm:$0xff] %v6642_v52  ;;  %v6670_v26 = vsel %vm473_vm0, 0, %v2638_v38  ;;  %v6672_v30 = vpack.i.b16 %v2712_v46, %v2711_v35  ;;  %v3709_v59 = vunpack.c.l.b16 %v3661_v17  ;;  %v3689_v14 = vunpack.c.l.b16 %v3643_v28  ;;  %v7581_v38 = vld [vmem:[#allocation55_spill] sm:$0xff] }
 0x369   : > { %3683 = vrot.lane.b32.xlu0 %v3682_v39, %s4004_s9  ;;  %2460 = vrot.lane.b32.xlu1 %v2459_v40, %s3998_s28  ;;  %v3248_v39 = vsel %vm473_vm0, 0, %v3247_v42  ;;  %v3412_v42 = vpack.c.b16 %v3411_v11, %v3411_v11  ;;  %v3638_v63 = vshrl.u32 %v6401_v51, 16  ;;  %v3068_v23 = vshrl.u32 %v7581_v38, 16 }
 0x36a   : > { %3715 = vrot.lane.b32.xlu2 %v3714_v57, %s3998_s28  ;;  %7580 = vst [vmem:[#allocation46_spill] sm:$0xff] %v6672_v30  ;;  %v3343_v19 = vpack.i.b16 %v6659_v16, %v3248_v39  ;;  %v2717_v28 = vshrl.u32 %v6667_v4, 16  ;;  %v2718_v12 = vshrl.u32 %v6670_v26, 16  ;;  %v3710_v17 = vpack.c.b16 %v3709_v59, %v3709_v59 }
 0x36b   : > { %v6650_v5 = vpop.permute.xlu0 %1705  ;;  %v3690_v46 = vpack.c.b16 %v3689_v14, %v3689_v14  ;;  %v3640_v49 = vpack.i.b16 %v3639_v45, %v3638_v63  ;;  %v3070_v2 = vpack.i.b16 %v3069_v60, %v3068_v23  ;;  %v3303_v51 = vrot.slane %v7568_v33, 4 }
 0x36c   : > { %v6674_v40 = vpop.permute.xlu1 %1439  ;;  %v6679_v57 = vpop.permute.xlu2 %1431  ;;  %v3387_v13 = vunpack.c.l.b16 %v3343_v19  ;;  %v6693_v52 = vpack.i.b16 %v2718_v12, %v2717_v28  ;;  %v3332_v60 = vsel %vm473_vm0, 0, %v3331_v8  ;;  %v3645_v19 = vshrl.u32 %v6610_v34, 16 }
 0x36d   : > { %v3685_v35 = vunpack.c.l.b16 %v3640_v49  ;;  %v3117_v59 = vunpack.c.l.b16 %v3070_v2  ;;  %v3304_v23 = vsel %vm473_vm0, 0, %v3303_v51  ;;  %v3644_v63 = vshrl.u32 %v6624_v20, 16 }
 0x36e   : > { %7583 = vst [vmem:[#allocation32_spill] sm:$0xff] %v6693_v52  ;;  %v3388_v45 = vpack.c.b16 %v3387_v13, %v3387_v13  ;;  %v3367_v12 = vpack.i.b16 %v3332_v60, %v3304_v23  ;;  %v7584_v2 = vpack.i.b16 %v6119_v3, %v6130_v54  ;;  %v3345_v51 = vshrl.u32 %v6659_v16, 16 }
 0x36f   : > { %v3686_v28 = vpack.c.b16 %v3685_v35, %v3685_v35  ;;  %v3646_v13 = vpack.i.b16 %v3645_v19, %v3644_v63  ;;  %v3037_v8 = vrot.slane %v7579_v27, 4  ;;  %v3344_v35 = vshrl.u32 %v3248_v39, 16  ;;  %v7586_v19 = vld [vmem:[#allocation58_spill] sm:$0xff] }
 0x370   : > { %v3717_v49 = vunpack.c.l.b16 %v7584_v2  ;;  %v3044_v16 = vshrl.u32 %v7586_v19, 16  ;;  %v7587_v39 = vld [vmem:[#allocation26_spill] sm:$0xff] }
 0x371   : > { %3413 = vrot.lane.b32.xlu0 %v3412_v42, %s4003_s8  ;;  %3711 = vrot.lane.b32.xlu1 %v3710_v17, %s4004_s9  ;;  %v3118_v17 = vpack.c.b16 %v3117_v59, %v3117_v59  ;;  %v3415_v59 = vunpack.c.l.b16 %v3367_v12  ;;  %v3693_v54 = vunpack.c.l.b16 %v3646_v13  ;;  %v3346_v63 = vpack.i.b16 %v3345_v51, %v3344_v35 }
 0x372   : > { %3691 = vrot.lane.b32.xlu2 %v3690_v46, %s4001_s6  ;;  %v3718_v3 = vpack.c.b16 %v3717_v49, %v3717_v49  ;;  %v1351_v29 = vpack.i.b16 %v7588_v0, %v7587_v39  ;;  %v7589_v0 = vld [vmem:[#allocation47_spill] sm:$0xff]  ;;  %v7591_v39 = vld [vmem:[#allocation12_spill] sm:$0xff] }
 0x373   : > { %v6689_v11 = vpop.permute.xlu0 %1447  ;;  %v3416_v2 = vpack.c.b16 %v3415_v59, %v3415_v59  ;;  %v3694_v32 = vpack.c.b16 %v3693_v54, %v3693_v54  ;;  %v3391_v49 = vunpack.c.l.b16 %v3346_v63  ;;  %v3265_v35 = vrot.slane %v7589_v0, 4 }
 0x374   : > { %7582 = vst [vmem:[#allocation45_spill] sm:$0xff] %v6689_v11  ;;  %v6697_v42 = vpop.permute.xlu1 %1733  ;;  %v6699_v14 = vpop.permute.xlu2 %1725  ;;  %v3009_v11 = vrot.slane %v7581_v38, 4  ;;  %v3368_v59 = vshrl.u32 %v3304_v23, 16  ;;  %v3543_v54 = vrot.slane %v6624_v20, 4 }
 0x375   : > { %v3392_v63 = vpack.c.b16 %v3391_v49, %v3391_v49  ;;  %v7595_v49 = vld [vmem:[#allocation52_spill] sm:$0xff] }
 0x376   : > { %v6729_v12 = vsel %vm473_vm0, 0, %v3009_v11 }
 0x379   : > { %3389 = vrot.lane.b32.xlu0 %v3388_v45, %s4004_s9  ;;  %3687 = vrot.lane.b32.xlu1 %v3686_v28, %s3998_s28  ;;  %v7585_v45 = vld [vmem:[#allocation56_spill] sm:$0xff]  ;;  %v6723_v28 = vsel %vm473_vm0, 0, %v3037_v8 }
 0x37a   : > { %3119 = vrot.lane.b32.xlu2 %v3118_v17, %s4003_s8  ;;  %v3045_v53 = vshrl.u32 %v7585_v45, 16  ;;  %v3073_v13 = vpack.i.b16 %v6723_v28, %v6729_v12  ;;  %v2981_v23 = vrot.slane %v7585_v45, 4  ;;  %v7599_v45 = vld [vmem:[#allocation14_spill] sm:$0xff] }
 0x37b   : > { %v6706_v46 = vpop.permute.xlu0 %1741 }
 0x37c   : > { %v6716_v18 = vpop.permute.xlu1 %1415  ;;  %v6719_v52 = vpop.permute.xlu2 %1407  ;;  %v3046_v17 = vpack.i.b16 %v3045_v53, %v3044_v16  ;;  %v3571_v53 = vrot.slane %v6610_v34, 4 }
 0x37e   : > { %v3089_v8 = vunpack.c.l.b16 %v3046_v17 }
 0x380   : > { %v3090_v17 = vpack.c.b16 %v3089_v8, %v3089_v8  ;;  %v3721_v8 = vunpack.c.l.b16 %v6199_v56 }
 0x381   : > { %3719 = vrot.lane.b32.xlu0 %v3718_v3, %s4001_s6  ;;  %3417 = vrot.lane.b32.xlu1 %v3416_v2, %s4004_s9  ;;  %v3369_v3 = vshrl.u32 %v3332_v60, 16  ;;  %v3121_v2 = vunpack.c.l.b16 %v3073_v13  ;;  %v7593_v60 = vld [vmem:[#allocation51_spill] sm:$0xff] }
 0x382   : > { %3695 = vrot.lane.b32.xlu2 %v3694_v32, %s3999_s29  ;;  %v6749_v32 = vsel %vm473_vm0, 0, %v3571_v53 }
 0x383   : > { %v1400_v41 = vpop.permute.xlu0 %1399  ;;  %v3370_v0 = vpack.i.b16 %v3369_v3, %v3368_v59  ;;  %v3122_v53 = vpack.c.b16 %v3121_v2, %v3121_v2  ;;  %v7596_v3 = vld [vmem:[#allocation29_spill] sm:$0xff]  ;;  %v2953_v2 = vrot.slane %v7586_v19, 4  ;;  %v3321_v19 = vrot.slane %v7599_v45, 4 }
 0x384   : > { %v6735_v51 = vsel %vm1136_vm11, %v1351_v29, %v1400_v41  ;;  %v6740_v11 = vpop.permute.xlu1 %1709  ;;  %v6743_v16 = vpop.permute.xlu2 %1701  ;;  %v3237_v29 = vrot.slane %v7591_v39, 4  ;;  %v7592_v41 = vld [vmem:[#allocation18_spill] sm:$0xff]  ;;  %v6758_v39 = vsel %vm473_vm0, 0, %v3543_v54  ;;  %v7597_v54 = vld [vmem:[#allocation36_spill] sm:$0xff]  ;;  %v7603_v45 = vld [vmem:[#allocation41_spill] sm:$0xff] }
 0x385   : > { %7590 = vst [vmem:[#allocation35_spill] sm:$0xff] %v6740_v11  ;;  %v3266_v34 = vsel %vm473_vm0, %v7592_v41, %v3265_v35  ;;  %v7594_v11 = vld [vmem:[#allocation34_spill] sm:$0xff]  ;;  %v3419_v56 = vunpack.c.l.b16 %v3370_v0 }
 0x386   : > { %v3238_v20 = vsel %vm473_vm0, %v7593_v60, %v3237_v29  ;;  %v1645_v13 = vpack.i.b16 %v7595_v49, %v7594_v11  ;;  %v6761_v35 = vperm.slane %v3266_v34, %v4084_v55  ;;  %v1375_v29 = vpack.i.b16 %v7597_v54, %v7596_v3  ;;  %v7598_v54 = vld [vmem:[#allocation4_spill] sm:$0xff] }
 0x387   : > { %v6771_v11 = vperm.slane %v3238_v20, %v4084_v55  ;;  %v2982_v60 = vsel %vm473_vm0, 0, %v2981_v23  ;;  %v2954_v23 = vsel %vm473_vm0, 0, %v2953_v2  ;;  %v3420_v0 = vpack.c.b16 %v3419_v56, %v3419_v56 }
 0x389   : > { %3393 = vrot.lane.b32.xlu0 %v3392_v63, %s3998_s28  ;;  %v3649_v63 = vpack.i.b16 %v6749_v32, %v6758_v39  ;;  %3091 = vrot.lane.b32.xlu1 %v3090_v17, %s4003_s8  ;;  %v3349_v20 = vpack.i.b16 %v6761_v35, %v6771_v11 }
 0x38a   : > { %3123 = vrot.lane.b32.xlu2 %v3122_v53, %s4004_s9  ;;  %v3293_v53 = vrot.slane %v7598_v54, 4 }
 0x38b   : > { %v1694_v41 = vpop.permute.xlu0 %1693 }
 0x38c   : > { %v6768_v59 = vsel %vm1136_vm11, %v1645_v13, %v1694_v41  ;;  %v1428_v34 = vpop.permute.xlu1 %1427  ;;  %v6779_v17 = vpop.permute.xlu2 %2464  ;;  %v3722_v13 = vpack.c.b16 %v3721_v8, %v3721_v8  ;;  %v3697_v41 = vunpack.c.l.b16 %v3649_v63  ;;  %v7601_v63 = vld [vmem:[#allocation9_spill] sm:$0xff] }
 0x38d   : > { %v1470_v49 = vsel %vm1136_vm11, %v1375_v29, %v1428_v34  ;;  %v3049_v29 = vpack.i.b16 %v2982_v60, %v2954_v23  ;;  %v7600_v34 = vld [vmem:[#allocation44_spill] sm:$0xff]  ;;  %v3294_v30 = vsel %vm473_vm0, %v7601_v63, %v3293_v53  ;;  %v3351_v63 = vshrl.u32 %v6761_v35, 16 }
 0x38e   : > { %v1472_v3 = vsel %vm1140_vm12, %v1470_v49, %v6679_v57  ;;  %v3322_v8 = vsel %vm473_vm0, %v7600_v34, %v3321_v19  ;;  %v3698_v33 = vpack.c.b16 %v3697_v41, %v3697_v41  ;;  %v3395_v57 = vunpack.c.l.b16 %v3349_v20  ;;  %v7602_v49 = vld [vmem:[#allocation28_spill] sm:$0xff] }
 0x38f   : > { %v1669_v54 = vpack.i.b16 %v7603_v45, %v7602_v49  ;;  %v6800_v2 = vperm.slane %v3322_v8, %v4084_v55  ;;  %v6803_v56 = vperm.slane %v3294_v30, %v4084_v55  ;;  %v3655_v41 = vpack.i.b16 %v6246_v37, %v6262_v7 }
 0x390   : > { %v2772_v34 = vunpack.c.l.b16 %v6487_v31  ;;  %v7604_v31 = vpack.i.b16 %v6227_v48, %v6209_v61 }
 0x391   : > { %3723 = vrot.lane.b32.xlu0 %v3722_v13, %s3999_s29  ;;  %3421 = vrot.lane.b32.xlu1 %v3420_v0, %s3998_s28  ;;  %v3093_v13 = vunpack.c.l.b16 %v3049_v29  ;;  %v3396_v0 = vpack.c.b16 %v3395_v57, %v3395_v57  ;;  %v3350_v29 = vshrl.u32 %v6771_v11, 16  ;;  %v3373_v37 = vpack.i.b16 %v6800_v2, %v6803_v56 }
 0x392   : > { %3699 = vrot.lane.b32.xlu2 %v3698_v33, %s4002_s7  ;;  %v2773_v7 = vpack.c.b16 %v2772_v34, %v2772_v34  ;;  %v3725_v49 = vunpack.c.l.b16 %v7604_v31  ;;  %v3375_v31 = vshrl.u32 %v6800_v2, 16 }
 0x393   : > { %v6793_v25 = vpop.permute.xlu0 %1423  ;;  %v3094_v8 = vpack.c.b16 %v3093_v13, %v3093_v13  ;;  %v3352_v45 = vpack.i.b16 %v3351_v63, %v3350_v29 }
 0x394   : > { %v1722_v19 = vpop.permute.xlu1 %1721  ;;  %v3708_v53 = vpop.permute.xlu2 %3707 }
 0x395   : > { %v1764_v20 = vsel %vm1136_vm11, %v1669_v54, %v1722_v19  ;;  %v6811_v33 = vsel %vm1136_vm11, %v3655_v41, %v3708_v53  ;;  %v3051_v54 = vshrl.u32 %v2982_v60, 16  ;;  %v3423_v41 = vunpack.c.l.b16 %v3373_v37  ;;  %v7605_v60 = vld [vmem:[#allocation8_spill] sm:$0xff] }
 0x396   : > { %v1766_v30 = vsel %vm1140_vm12, %v1764_v20, %v6699_v14  ;;  %v3050_v14 = vshrl.u32 %v2954_v23, 16  ;;  %v3726_v53 = vpack.c.b16 %v3725_v49, %v3725_v49  ;;  %v2971_v23 = vrot.slane %v7605_v60, 4 }
 0x398   : > { %v3052_v34 = vpack.i.b16 %v3051_v54, %v3050_v14  ;;  %v7608_v14 = vld [vmem:[#allocation54_spill] sm:$0xff] }
 0x399   : > { %3397 = vrot.lane.b32.xlu0 %v3396_v0, %s4001_s6  ;;  %3095 = vrot.lane.b32.xlu1 %v3094_v8, %s4004_s9  ;;  %v3399_v0 = vunpack.c.l.b16 %v3352_v45  ;;  %v7607_v45 = vld [vmem:[#allocation53_spill] sm:$0xff] }
 0x39a   : > { %2774 = vrot.lane.b32.xlu2 %v2773_v7, %s4003_s8  ;;  %v3097_v37 = vunpack.c.l.b16 %v3052_v34  ;;  %v3374_v7 = vshrl.u32 %v6803_v56, 16 }
 0x39b   : > { %v6819_v57 = vpop.permute.xlu0 %1717  ;;  %v3400_v29 = vpack.c.b16 %v3399_v0, %v3399_v0 }
 0x39c   : > { %v1404_v19 = vpop.permute.xlu1 %1403  ;;  %v6828_v20 = vpop.permute.xlu2 %2500 }
 0x39d   : > { %v1457_v13 = vsel %vm1140_vm12, %v6735_v51, %v1404_v19  ;;  %v3424_v51 = vpack.c.b16 %v3423_v41, %v3423_v41 }
 0x39e   : > { %v1459_v61 = vsel %vm1143_vm13, %v1457_v13, %v6719_v52  ;;  %v7606_v52 = vld [vmem:[#allocation3_spill] sm:$0xff]  ;;  %v2744_v13 = vunpack.c.l.b16 %v6586_v1 }
 0x39f   : > { %v1461_v48 = vsel %vm1146_vm14, %v1459_v61, %v6601_v44  ;;  %v2943_v49 = vrot.slane %v7606_v52, 4  ;;  %v2972_v44 = vsel %vm473_vm0, %v7607_v45, %v2971_v23  ;;  %v3729_v61 = vunpack.c.l.b16 %v6252_v36  ;;  %v7611_v45 = vld [vmem:[#allocation30_spill] sm:$0xff] }
 0x3a0   : > { %v6838_v63 = vsel %vm1149_vm15, %v1461_v48, %v6716_v18  ;;  %v6859_v0 = vperm.slane %v2972_v44, %v4084_v55  ;;  %v3376_v48 = vpack.i.b16 %v3375_v31, %v3374_v7  ;;  %v3305_v7 = vrot.slane %v6803_v56, 4 }
 0x3a1   : > { %3727 = vrot.lane.b32.xlu0 %v3726_v53, %s4002_s7  ;;  %3425 = vrot.lane.b32.xlu1 %v3424_v51, %s4001_s6  ;;  %v2944_v19 = vsel %vm473_vm0, %v7608_v14, %v2943_v49  ;;  %v3075_v53 = vshrl.u32 %v6723_v28, 16  ;;  %v3074_v51 = vshrl.u32 %v6729_v12, 16  ;;  %v2745_v28 = vpack.c.b16 %v2744_v13, %v2744_v13 }
 0x3a2   : > { %3401 = vrot.lane.b32.xlu2 %v3400_v29, %s3999_s29  ;;  %v6870_v1 = vperm.slane %v2944_v19, %v4084_v55  ;;  %v3427_v52 = vunpack.c.l.b16 %v3376_v48  ;;  %v3333_v12 = vrot.slane %v6800_v2, 4  ;;  %v3650_v13 = vshrl.u32 %v6758_v39, 16 }
 0x3a3   : > { %v1436_v8 = vpop.permute.xlu0 %1435  ;;  %v3076_v29 = vpack.i.b16 %v3075_v53, %v3074_v51  ;;  %v3306_v53 = vsel %vm473_vm0, 0, %v3305_v7 }
 0x3a4   : > { %v1474_v54 = vsel %vm1143_vm13, %v1472_v3, %v1436_v8  ;;  %v6854_v41 = vpop.permute.xlu1 %1451  ;;  %v2453_v34 = vpop.permute.xlu2 %2452  ;;  %v3098_v3 = vpack.c.b16 %v3097_v37, %v3097_v37  ;;  %v3730_v8 = vpack.c.b16 %v3729_v61, %v3729_v61  ;;  %v3055_v36 = vpack.i.b16 %v6859_v0, %v6870_v1 }
 0x3a5   : > { %v6850_v18 = vsel %vm1146_vm14, %v1474_v54, %v6674_v40  ;;  %v7609_v40 = vld [vmem:[#allocation24_spill] sm:$0xff]  ;;  %v3125_v49 = vunpack.c.l.b16 %v3076_v29  ;;  %v3651_v54 = vshrl.u32 %v6749_v32, 16  ;;  %v3428_v56 = vpack.c.b16 %v3427_v52, %v3427_v52  ;;  %v7613_v52 = vld [vmem:[#allocation10_spill] sm:$0xff] }
 0x3a6   : > { %v7610_v60 = vpack.i.b16 %v6332_v15, %v7609_v40  ;;  %v3101_v19 = vunpack.c.l.b16 %v3055_v36  ;;  %v7614_v36 = vld [vmem:[#allocation6_spill] sm:$0xff] }
 0x3a8   : > { %v6866_v23 = vsel %vm1136_vm11, %v7610_v60, %v2453_v34  ;;  %v3334_v34 = vsel %vm473_vm0, 0, %v3333_v12 }
 0x3a9   : > { %3099 = vrot.lane.b32.xlu0 %v3098_v3, %s3998_s28  ;;  %2746 = vrot.lane.b32.xlu1 %v2745_v28, %s4003_s8  ;;  %v3652_v3 = vpack.i.b16 %v3651_v54, %v3650_v13  ;;  %v3379_v48 = vpack.i.b16 %v3334_v34, %v3306_v53  ;;  %v7617_v54 = vld [vmem:[#allocation17_spill] sm:$0xff]  ;;  %v7620_v13 = vld [vmem:[#allocation50_spill] sm:$0xff] }
 0x3aa   : > { %3731 = vrot.lane.b32.xlu2 %v3730_v8, %s4000_s30 }
 0x3ab   : > { %v1730_v37 = vpop.permute.xlu0 %1729  ;;  %v3701_v60 = vunpack.c.l.b16 %v3652_v3  ;;  %v3431_v29 = vunpack.c.l.b16 %v3379_v48  ;;  %v3380_v48 = vshrl.u32 %v3306_v53, 16  ;;  %v7623_v53 = vld [vmem:[#allocation19_spill] sm:$0xff] }
 0x3ac   : > { %v1768_v15 = vsel %vm1143_vm13, %v1766_v30, %v1730_v37  ;;  %v1698_v31 = vpop.permute.xlu1 %1697  ;;  %v6887_v30 = vpop.permute.xlu2 %2476  ;;  %v3056_v37 = vshrl.u32 %v6870_v1, 16 }
 0x3ad   : > { %v1770_v55 = vsel %vm1146_vm14, %v1768_v15, %v6697_v42  ;;  %v1751_v14 = vsel %vm1140_vm12, %v6768_v59, %v1698_v31  ;;  %v3126_v59 = vpack.c.b16 %v3125_v49, %v3125_v49  ;;  %v7615_v15 = vpack.i.b16 %v7613_v52, %v7614_v36 }
 0x3ae   : > { %v1772_v44 = vsel %vm1149_vm15, %v1770_v55, %v7611_v45  ;;  %v1753_v42 = vsel %vm1143_vm13, %v1751_v14, %v6743_v16  ;;  %v7612_v16 = vpack.i.b16 %v6589_v62, %v6567_v6  ;;  %v3702_v6 = vpack.c.b16 %v3701_v60, %v3701_v60 }
 0x3af   : > { %v1774_v2 = vsel %vm1152_vm1, %v1772_v44, %v6706_v46  ;;  %v6898_v32 = vsel %vm1146_vm14, %v1753_v42, %v6650_v5  ;;  %v3102_v46 = vpack.c.b16 %v3101_v19, %v3101_v19  ;;  %v3057_v5 = vshrl.u32 %v6859_v0, 16  ;;  %v7616_v44 = vld [vmem:[#allocation27_spill] sm:$0xff]  ;;  %v7619_v42 = vld [vmem:[#allocation49_spill] sm:$0xff] }
 0x3b0   : > { %v2748_v39 = vunpack.c.l.b16 %v7612_v16  ;;  %v3129_v7 = vunpack.c.l.b16 %v7615_v15  ;;  %v3432_v12 = vpack.c.b16 %v3431_v29, %v3431_v29  ;;  %v3277_v31 = vrot.slane %v6761_v35, 4 }
 0x3b1   : > { %3429 = vrot.lane.b32.xlu0 %v3428_v56, %s3999_s29  ;;  %3127 = vrot.lane.b32.xlu1 %v3126_v59, %s3998_s28  ;;  %v3058_v62 = vpack.i.b16 %v3057_v5, %v3056_v37  ;;  %v3249_v49 = vrot.slane %v6771_v11, 4  ;;  %v7618_v14 = vpack.i.b16 %v7616_v44, %v7617_v54  ;;  %v7621_v59 = vpack.i.b16 %v7619_v42, %v7620_v13 }
 0x3b2   : > { %3103 = vrot.lane.b32.xlu2 %v3102_v46, %s4001_s6  ;;  %v2749_v8 = vpack.c.b16 %v2748_v39, %v2748_v39  ;;  %v3130_v19 = vpack.c.b16 %v3129_v7, %v3129_v7  ;;  %v3278_v46 = vsel %vm473_vm0, 0, %v3277_v31  ;;  %v3381_v16 = vshrl.u32 %v3334_v34, 16  ;;  %v7624_v34 = vld [vmem:[#allocation64_spill] sm:$0xff] }
 0x3b3   : > { %v6901_v61 = vpop.permute.xlu0 %2492  ;;  %v3105_v56 = vunpack.c.l.b16 %v3058_v62  ;;  %v7622_v11 = vpack.i.b16 %v5975_v10, %v5942_v50  ;;  %v7625_v62 = vpack.i.b16 %v7623_v53, %v7624_v34  ;;  %v2983_v10 = vrot.slane %v6859_v0, 4 }
 0x3b4   : > { %v1746_v40 = vpop.permute.xlu1 %1745  ;;  %v6912_v28 = vpop.permute.xlu2 %2488  ;;  %v3382_v37 = vpack.i.b16 %v3381_v16, %v3380_v48  ;;  %v2955_v15 = vrot.slane %v6870_v1, 4  ;;  %v3357_v42 = vshrl.u32 %v3278_v46, 16  ;;  %v7628_v34 = vpack.i.b16 %v7579_v27, %v7581_v38 }
 0x3b5   : > { %v6910_v51 = vsel %vm1155_vm2, %v1774_v2, %v1746_v40  ;;  %v2776_v2 = vunpack.c.l.b16 %v7618_v14  ;;  %v3250_v40 = vsel %vm473_vm0, 0, %v3249_v49  ;;  %v3106_v29 = vpack.c.b16 %v3105_v56, %v3105_v56  ;;  %v7626_v14 = vld [vmem:[#allocation57_spill] sm:$0xff] }
 0x3b6   : > { %v3355_v5 = vpack.i.b16 %v3278_v46, %v3250_v40  ;;  %v3356_v48 = vshrl.u32 %v3250_v40, 16  ;;  %v2788_v40 = vunpack.c.l.b16 %v6561_v43 }
 0x3b7   : > { %v2777_v60 = vpack.c.b16 %v2776_v2, %v2776_v2  ;;  %v3133_v2 = vunpack.c.l.b16 %v7626_v14 }
 0x3b8   : > { %v3403_v36 = vunpack.c.l.b16 %v3355_v5 }
 0x3b9   : > { %2750 = vrot.lane.b32.xlu0 %v2749_v8, %s4004_s9  ;;  %3703 = vrot.lane.b32.xlu1 %v3702_v6, %s4000_s30  ;;  %v2752_v6 = vunpack.c.l.b16 %v6662_v24  ;;  %v2984_v24 = vsel %vm473_vm0, 0, %v2983_v10  ;;  %v2789_v10 = vpack.c.b16 %v2788_v40, %v2788_v40 }
 0x3ba   : > { %3433 = vrot.lane.b32.xlu2 %v3432_v12, %s4002_s7  ;;  %v3435_v12 = vunpack.c.l.b16 %v3382_v37  ;;  %v3404_v49 = vpack.c.b16 %v3403_v36, %v3403_v36  ;;  %v3063_v27 = vshrl.u32 %v2984_v24, 16 }
 0x3bb   : > { %v6919_v55 = vpop.permute.xlu0 %2468  ;;  %v2753_v31 = vpack.c.b16 %v2752_v6, %v2752_v6 }
 0x3bc   : > { %v3680_v45 = vpop.permute.xlu1 %3679  ;;  %v3386_v35 = vpop.permute.xlu2 %3385  ;;  %v3436_v44 = vpack.c.b16 %v3435_v12, %v3435_v12 }
 0x3bd   : > { %v6932_v3 = vsel %vm1136_vm11, %v7621_v59, %v3680_v45  ;;  %v6939_v39 = vsel %vm1136_vm11, %v7622_v11, %v3386_v35  ;;  %v2956_v45 = vsel %vm473_vm0, 0, %v2955_v15  ;;  %v3134_v35 = vpack.c.b16 %v3133_v2, %v3133_v2  ;;  %v7629_v15 = vld [vmem:[#allocation60_spill] sm:$0xff] }
 0x3be   : > { %v3061_v0 = vpack.i.b16 %v2984_v24, %v2956_v45  ;;  %v3358_v11 = vpack.i.b16 %v3357_v42, %v3356_v48  ;;  %v7633_v24 = vpack.i.b16 %v6670_v26, %v6667_v4  ;;  %v7635_v26 = vld [vmem:[#allocation71_spill] sm:$0xff]  ;;  %v7637_v48 = vld [vmem:[#allocation46_spill] sm:$0xff]  ;;  %vm3779_vm0 = vcmask 1043456  }
 0x3c0   : > { %v3109_v59 = vunpack.c.l.b16 %v3061_v0  ;;  %v3407_v46 = vunpack.c.l.b16 %v3358_v11  ;;  %v2764_v14 = vunpack.c.l.b16 %v7633_v24  ;;  %v7638_v11 = vld [vmem:[#allocation38_spill] sm:$0xff] }
 0x3c1   : > { %3131 = vrot.lane.b32.xlu0 %v3130_v19, %s4001_s6  ;;  %2778 = vrot.lane.b32.xlu1 %v2777_v60, %s4004_s9  ;;  %v2780_v19 = vunpack.c.l.b16 %v6558_v21 }
 0x3c2   : > { %3107 = vrot.lane.b32.xlu2 %v3106_v29, %s3999_s29  ;;  %v3110_v60 = vpack.c.b16 %v3109_v59, %v3109_v59  ;;  %v7634_v59 = vld [vmem:[#allocation13_spill] sm:$0xff] }
 0x3c3   : > { %v2481_v8 = vpop.permute.xlu0 %2480  ;;  %v2781_v16 = vpack.c.b16 %v2780_v19, %v2780_v19  ;;  %v7636_v4 = vpack.i.b16 %v7634_v59, %v7635_v26  ;;  %v7653_v26 = vld [vmem:[#allocation66_spill] sm:$0xff] }
 0x3c4   : > { %v2523_v50 = vsel %vm1136_vm11, %v7625_v62, %v2481_v8  ;;  %v2497_v52 = vpop.permute.xlu1 %2496  ;;  %v6952_v7 = vpop.permute.xlu2 %3715  ;;  %v3408_v62 = vpack.c.b16 %v3407_v46, %v3407_v46 }
 0x3c9   : > { %2754 = vrot.lane.b32.xlu0 %v2753_v31, %s3998_s28  ;;  %3405 = vrot.lane.b32.xlu1 %v3404_v49, %s4002_s7 }
 0x3ca   : > { %3437 = vrot.lane.b32.xlu2 %v3436_v44, %s4000_s30 }
 0x3cb   : > { %v2457_v54 = vpop.permute.xlu0 %2456 }
 0x3cc   : > { %v2510_v1 = vsel %vm1140_vm12, %v6866_v23, %v2457_v54  ;;  %v6962_v56 = vpop.permute.xlu1 %2472  ;;  %v6965_v13 = vpop.permute.xlu2 %3691  ;;  %v7627_v23 = vpack.i.b16 %v6628_v47, %v6619_v22 }
 0x3ce   : > { %v2756_v29 = vunpack.c.l.b16 %v7627_v23  ;;  %v7639_v23 = vld [vmem:[#allocation70_spill] sm:$0xff] }
 0x3d0   : > { %v2757_v6 = vpack.c.b16 %v2756_v29, %v2756_v29  ;;  %v7640_v29 = vld [vmem:[#allocation62_spill] sm:$0xff] }
 0x3d1   : > { %3135 = vrot.lane.b32.xlu0 %v3134_v35, %s3999_s29  ;;  %2782 = vrot.lane.b32.xlu1 %v2781_v16, %s3998_s28 }
 0x3d2   : > { %3111 = vrot.lane.b32.xlu2 %v3110_v60, %s4002_s7  ;;  %v2796_v60 = vunpack.c.l.b16 %v7638_v11 }
 0x3d3   : > { %v2505_v5 = vpop.permute.xlu0 %2504 }
 0x3d4   : > { %v2485_v21 = vpop.permute.xlu1 %2484  ;;  %v3120_v37 = vpop.permute.xlu2 %3119 }
 0x3d5   : > { %v2525_v8 = vsel %vm1140_vm12, %v2523_v50, %v2485_v21  ;;  %v3162_v22 = vsel %vm1136_vm11, %v7628_v34, %v3120_v37  ;;  %v1151_v21 = vsel %vm1149_vm15, %v7640_v29, %v7639_v23  ;;  %v7641_v37 = vld [vmem:[#allocation31_spill] sm:$0xff]  ;;  %v2797_v34 = vpack.c.b16 %v2796_v60, %v2796_v60  ;;  %v7658_v23 = vld [vmem:[#allocation25_spill] sm:$0xff] }
 0x3d6   : > { %v2527_v53 = vsel %vm1143_vm13, %v2525_v8, %v6912_v28  ;;  %v7630_v28 = vld [vmem:[#allocation59_spill] sm:$0xff]  ;;  %v1154_v40 = vsel %vm1152_vm1, %v1151_v21, %v7641_v37 }
 0x3d7   : > { %v2529_v47 = vsel %vm1146_vm14, %v2527_v53, %v6901_v61  ;;  %v7631_v12 = vpack.i.b16 %v7629_v15, %v7630_v28  ;;  %v7646_v28 = vld [vmem:[#allocation15_spill] sm:$0xff] }
 0x3d8   : > { %v2531_v50 = vsel %vm1149_vm15, %v2529_v47, %v2497_v52  ;;  %v3062_v52 = vshrl.u32 %v2956_v45, 16 }
 0x3d9   : > { %2758 = vrot.lane.b32.xlu0 %v2757_v6, %s4001_s6  ;;  %v2533_v43 = vsel %vm1152_vm1, %v2531_v50, %v6828_v20  ;;  %v3137_v31 = vunpack.c.l.b16 %v7631_v12  ;;  %3409 = vrot.lane.b32.xlu1 %v3408_v62, %s4000_s30  ;;  %v7632_v20 = vpack.i.b16 %v6518_v9, %v6521_v58  ;;  %v2765_v58 = vpack.c.b16 %v2764_v14, %v2764_v14  ;;  %v7642_v6 = vld [vmem:[#allocation67_spill] sm:$0xff]  ;;  %v7643_v62 = vld [vmem:[#allocation21_spill] sm:$0xff]  ;;  %v7648_v14 = vld [vmem:[#allocation16_spill] sm:$0xff] }
 0x3da   : > { %v6992_v38 = vsel %vm1155_vm2, %v2533_v43, %v2505_v5  ;;  %2790 = vrot.lane.b32.xlu2 %v2789_v10, %s3999_s29  ;;  %v3064_v19 = vpack.i.b16 %v3063_v27, %v3062_v52  ;;  %v1465_v53 = vsel %vm1152_vm1, %v6838_v63, %v7642_v6  ;;  %v7644_v50 = vld [vmem:[#allocation37_spill] sm:$0xff]  ;;  %v1157_v63 = vsel %vm1155_vm2, %v1154_v40, %v7646_v28 }
 0x3db   : > { %v3684_v36 = vpop.permute.xlu0 %3683  ;;  %v2784_v44 = vunpack.c.l.b16 %v7632_v20  ;;  %v3138_v2 = vpack.c.b16 %v3137_v31, %v3137_v31  ;;  %v7645_v43 = vpack.i.b16 %v7643_v62, %v7644_v50  ;;  %v7647_v31 = vld [vmem:[#allocation61_spill] sm:$0xff]  ;;  %v7660_v62 = vld [vmem:[#allocation56_spill] sm:$0xff]  ;;  %v7661_v50 = vld [vmem:[#allocation58_spill] sm:$0xff] }
 0x3dc   : > { %v3737_v61 = vsel %vm1140_vm12, %v6932_v3, %v3684_v36  ;;  %v2461_v49 = vpop.permute.xlu1 %2460  ;;  %v3696_v0 = vpop.permute.xlu2 %3695  ;;  %v3141_v27 = vunpack.c.l.b16 %v7647_v31 }
 0x3dd   : > { %v2512_v54 = vsel %vm1143_vm13, %v2510_v1, %v2461_v49  ;;  %v2785_v9 = vpack.c.b16 %v2784_v44, %v2784_v44  ;;  %v3113_v1 = vunpack.c.l.b16 %v3064_v19  ;;  %v2792_v10 = vunpack.c.l.b16 %v7645_v43 }
 0x3de   : > { %v2514_v3 = vsel %vm1146_vm14, %v2512_v54, %v6779_v17  ;;  %v3142_v54 = vpack.c.b16 %v3141_v27, %v3141_v27 }
 0x3df   : > { %v7008_v45 = vsel %vm1149_vm15, %v2514_v3, %v6919_v55  ;;  %v2760_v55 = vunpack.c.l.b16 %v7637_v48  ;;  %v3114_v5 = vpack.c.b16 %v3113_v1, %v3113_v1  ;;  %v2793_v20 = vpack.c.b16 %v2792_v10, %v2792_v10  ;;  %v7650_v3 = vld [vmem:[#allocation68_spill] sm:$0xff]  ;;  %v7652_v1 = vld [vmem:[#allocation11_spill] sm:$0xff] }
 0x3e0   : > { %v7663_v10 = vld [vmem:[#allocation40_spill] sm:$0xff] }
 0x3e1   : > { %3139 = vrot.lane.b32.xlu0 %v3138_v2, %s4002_s7  ;;  %2786 = vrot.lane.b32.xlu1 %v2785_v9, %s4001_s6  ;;  %v2761_v8 = vpack.c.b16 %v2760_v55, %v2760_v55  ;;  %v7649_v2 = vld [vmem:[#allocation20_spill] sm:$0xff] }
 0x3e2   : > { %2766 = vrot.lane.b32.xlu2 %v2765_v58, %s4002_s7  ;;  %v2224_v19 = vsel %vm1152_vm1, %v7649_v2, %v7648_v14  ;;  %v7651_v58 = vld [vmem:[#allocation32_spill] sm:$0xff] }
 0x3e3   : > { %v3414_v42 = vpop.permute.xlu0 %3413  ;;  %v2226_v59 = vsel %vm1155_vm2, %v2224_v19, %v7652_v1 }
 0x3e4   : > { %v3456_v35 = vsel %vm1136_vm11, %v7636_v4, %v3414_v42  ;;  %v7017_v17 = vpop.permute.xlu1 %3711  ;;  %v3124_v16 = vpop.permute.xlu2 %3123  ;;  %v2768_v42 = vunpack.c.l.b16 %v7651_v58  ;;  %v7654_v4 = vld [vmem:[#allocation63_spill] sm:$0xff]  ;;  %v3769_v29 = vrot.slane %v2226_v59, 4 }
 0x3e5   : > { %v7025_v46 = vsel %vm1140_vm12, %v3162_v22, %v3124_v16  ;;  %v1467_v22 = vsel %vm1155_vm2, %v1465_v53, %v6793_v25  ;;  %v7655_v48 = vpack.i.b16 %v7653_v26, %v7654_v4  ;;  %v7656_v16 = vld [vmem:[#allocation35_spill] sm:$0xff]  ;;  %v7659_v53 = vld [vmem:[#allocation65_spill] sm:$0xff]  ;;  %v3752_v27 = vsel %vm1140_vm12, %v6811_v33, %v7017_v17 }
 0x3e6   : > { %v3765_v15 = vrot.slane %v1467_v22, 4  ;;  %v1757_v11 = vsel %vm1149_vm15, %v6898_v32, %v7656_v16 }
 0x3e8   : > { %v7046_v52 = vsel %vm3779_vm0, %v1157_v63, %v3765_v15 }
 0x3e9   : > { %3115 = vrot.lane.b32.xlu0 %v3114_v5, %s4000_s30  ;;  %2762 = vrot.lane.b32.xlu1 %v2761_v8, %s3999_s29  ;;  %v2769_v5 = vpack.c.b16 %v2768_v42, %v2768_v42 }
 0x3ea   : > { %2798 = vrot.lane.b32.xlu2 %v2797_v34, %s4000_s30 }
 0x3eb   : > { %v3390_v47 = vpop.permute.xlu0 %3389 }
 0x3ec   : > { %v3443_v36 = vsel %vm1140_vm12, %v6939_v39, %v3390_v47  ;;  %v3688_v12 = vpop.permute.xlu1 %3687  ;;  %v7049_v49 = vpop.permute.xlu2 %3699 }
 0x3ed   : > { %v3739_v25 = vsel %vm1143_vm13, %v3737_v61, %v3688_v12  ;;  %v1478_v61 = vsel %vm1149_vm15, %v6850_v18, %v7650_v3  ;;  %v7657_v18 = vld [vmem:[#allocation45_spill] sm:$0xff] }
 0x3ee   : > { %v3741_v39 = vsel %vm1146_vm14, %v3739_v25, %v6965_v13  ;;  %v1480_v60 = vsel %vm1152_vm1, %v1478_v61, %v7657_v18 }
 0x3ef   : > { %v3743_v44 = vsel %vm1149_vm15, %v3741_v39, %v3696_v0  ;;  %v1482_v21 = vsel %vm1155_vm2, %v1480_v60, %v6854_v41  ;;  %v7662_v41 = vpack.i.b16 %v7660_v62, %v7661_v50  ;;  %v3754_v39 = vsel %vm1143_vm13, %v3752_v27, %v6952_v7 }
 0x3f0   : > { %v3766_v40 = vrot.slane %v1482_v21, 4  ;;  %v3745_v16 = vsel %vm1152_vm1, %v3743_v44, %v7049_v49 }
 0x3f1   : > { %2794 = vrot.lane.b32.xlu0 %v2793_v20, %s4002_s7  ;;  %3143 = vrot.lane.b32.xlu1 %v3142_v54, %s4000_s30 }
 0x3f2   : > { %v7090_v34 = vsel %vm3779_vm0, %v7659_v53, %v3766_v40 }
 0x3f3   : > { %v3720_v24 = vpop.permute.xlu0 %3719 }
 0x3f4   : > { %v3418_v9 = vpop.permute.xlu1 %3417  ;;  %v2775_v0 = vpop.permute.xlu2 %2774 }
 0x3f5   : > { %v3458_v13 = vsel %vm1140_vm12, %v3456_v35, %v3418_v9  ;;  %v7070_v55 = vsel %vm1136_vm11, %v7655_v48, %v2775_v0  ;;  %v1759_v35 = vsel %vm1152_vm1, %v1757_v11, %v7658_v23 }
 0x3f6   : > { %v1761_v37 = vsel %vm1155_vm2, %v1759_v35, %v6819_v57  ;;  %v3770_v57 = vrot.slane %v7663_v10, 4 }
 0x3f7   : > { %v7086_v6 = vsel %vm3779_vm0, %v1761_v37, %v3769_v29 }
 0x3f8   : > { %v7099_v15 = vsel %vm3779_vm0, %v6910_v51, %v3770_v57  ;;  %v3756_v51 = vsel %vm1146_vm14, %v3754_v39, %v3720_v24  ;;  %v7664_v24 = vld [vmem:[#allocation23_spill] sm:$0xff] }
 0x3f9   : > { %2770 = vrot.lane.b32.xlu1 %v2769_v5, %s4000_s30 }
 0x3fb   : > { %v3394_v8 = vpop.permute.xlu0 %3393 }
 0x3fc   : > { %v3445_v32 = vsel %vm1143_vm13, %v3443_v36, %v3394_v8  ;;  %v3092_v47 = vpop.permute.xlu1 %3091  ;;  %v3402_v63 = vpop.permute.xlu2 %3401 }
 0x3fd   : > { %v3147_v43 = vsel %vm1136_vm11, %v7662_v41, %v3092_v47 }
 0x403   : > { %v3724_v22 = vpop.permute.xlu0 %3723 }
 0x404   : > { %v3422_v36 = vpop.permute.xlu1 %3421  ;;  %v3758_v54 = vsel %vm1149_vm15, %v3756_v51, %v3724_v22  ;;  %v3732_v2 = vpop.permute.xlu2 %3731 }
 0x405   : > { %v3460_v28 = vsel %vm1143_vm13, %v3458_v13, %v3422_v36  ;;  %v7665_v13 = vld [vmem:[#allocation22_spill] sm:$0xff] }
 0x406   : > { %v7666_v0 = vpack.i.b16 %v7664_v24, %v7665_v13 }
 0x40b   : > { %v3398_v12 = vpop.permute.xlu0 %3397 }
 0x40c   : > { %v3447_v31 = vsel %vm1146_vm14, %v3445_v32, %v3398_v12  ;;  %v3096_v25 = vpop.permute.xlu1 %3095  ;;  %v3104_v7 = vpop.permute.xlu2 %3103 }
 0x40d   : > { %v3149_v20 = vsel %vm1140_vm12, %v3147_v43, %v3096_v25  ;;  %v3449_v17 = vsel %vm1149_vm15, %v3447_v31, %v3402_v63 }
 0x413   : > { %v3728_v14 = vpop.permute.xlu0 %3727 }
 0x414   : > { %v3760_v19 = vsel %vm1152_vm1, %v3758_v54, %v3728_v14  ;;  %v3426_v61 = vpop.permute.xlu1 %3425  ;;  %v3434_v4 = vpop.permute.xlu2 %3433 }
 0x415   : > { %v3762_v3 = vsel %vm1155_vm2, %v3760_v19, %v3732_v2  ;;  %v3462_v33 = vsel %vm1146_vm14, %v3460_v28, %v3426_v61 }
 0x416   : > { %v3811_v9 = vsel %vm3779_vm0, %v3762_v3, 0 }
 0x417   : > { %3829 = vmatpush.bf16.msra.mxu1 %v3811_v9 }
 0x41b   : > { %v3100_v58 = vpop.permute.xlu0 %3099 }
 0x41c   : > { %v2747_v42 = vpop.permute.xlu1 %2746  ;;  %v3108_v5 = vpop.permute.xlu2 %3107  ;;  %v3151_v49 = vsel %vm1143_vm13, %v3149_v20, %v3100_v58 }
 0x41d   : > { %v2802_v1 = vsel %vm1136_vm11, %v7666_v0, %v2747_v42  ;;  %v3153_v41 = vsel %vm1146_vm14, %v3151_v49, %v3104_v7 }
 0x41e   : > { %v3155_v57 = vsel %vm1149_vm15, %v3153_v41, %v3108_v5 }
 0x423   : > { %v3430_v59 = vpop.permute.xlu0 %3429 }
 0x424   : > { %v3128_v26 = vpop.permute.xlu1 %3127  ;;  %v3438_v21 = vpop.permute.xlu2 %3437  ;;  %v3464_v31 = vsel %vm1149_vm15, %v3462_v33, %v3430_v59 }
 0x425   : > { %v3466_v51 = vsel %vm1152_vm1, %v3464_v31, %v3434_v4  ;;  %v3166_v14 = vsel %vm1143_vm13, %v7025_v46, %v3128_v26 }
 0x426   : > { %v3468_v2 = vsel %vm1155_vm2, %v3466_v51, %v3438_v21 }
 0x427   : > { %v3778_v58 = vrot.slane %v3468_v2, 4 }
 0x42b   : > { %v2751_v48 = vpop.permute.xlu0 %2750 }
 0x42c   : > { %v3704_v11 = vpop.permute.xlu1 %3703  ;;  %v3112_v40 = vpop.permute.xlu2 %3111  ;;  %v2804_v13 = vsel %vm1140_vm12, %v2802_v1, %v2751_v48  ;;  %v2518_v1 = vsel %vm1152_vm1, %v7008_v45, %v6962_v56 }
 0x42d   : > { %v3747_v18 = vsel %vm1155_vm2, %v3745_v16, %v3704_v11  ;;  %v3157_v36 = vsel %vm1152_vm1, %v3155_v57, %v3112_v40 }
 0x42e   : > { %v3809_v60 = vsel %vm3779_vm0, %v3747_v18, 0 }
 0x42f   : > { %3816 = vmatpush.bf16.msra.mxu0 %v3809_v60 }
 0x433   : > { %v3132_v23 = vpop.permute.xlu0 %3131 }
 0x434   : > { %v2779_v35 = vpop.permute.xlu1 %2778  ;;  %v2791_v62 = vpop.permute.xlu2 %2790  ;;  %v3168_v61 = vsel %vm1146_vm14, %v3166_v14, %v3132_v23  ;;  %v3804_v23 = vld [vmem:[%s7184_s3] sm:$0xf] }
 0x435   : > { %v2819_v25 = vsel %vm1140_vm12, %v7070_v55, %v2779_v35 }
 0x43b   : > { %v2755_v29 = vpop.permute.xlu0 %2754 }
 0x43c   : > { %v3406_v8 = vpop.permute.xlu1 %3405  ;;  %v2767_v22 = vpop.permute.xlu2 %2766  ;;  %v2806_v26 = vsel %vm1143_vm13, %v2804_v13, %v2755_v29 }
 0x43d   : > { %v3451_v43 = vsel %vm1152_vm1, %v3449_v17, %v3406_v8 }
 0x443   : > { %v3136_v37 = vpop.permute.xlu0 %3135 }
 0x444   : > { %v2783_v32 = vpop.permute.xlu1 %2782  ;;  %v2799_v9 = vpop.permute.xlu2 %2798  ;;  %v3170_v33 = vsel %vm1149_vm15, %v3168_v61, %v3136_v37 }
 0x445   : > { %v2821_v39 = vsel %vm1143_vm13, %v2819_v25, %v2783_v32 }
 0x44b   : > { %v2759_v53 = vpop.permute.xlu0 %2758 }
 0x44c   : > { %v3410_v47 = vpop.permute.xlu1 %3409  ;;  %v2808_v4 = vsel %vm1146_vm14, %v2806_v26, %v2759_v53 }
 0x44d   : > { %v3453_v10 = vsel %vm1155_vm2, %v3451_v43, %v3410_v47 }
 0x44e   : > { %v3777_v28 = vrot.slane %v3453_v10, 4 }
 0x453   : > { %v3140_v50 = vpop.permute.xlu0 %3139 }
 0x454   : > { %v2787_v44 = vpop.permute.xlu1 %2786  ;;  %v3172_v7 = vsel %vm1152_vm1, %v3170_v33, %v3140_v50 }
 0x455   : > { %v2823_v54 = vsel %vm1146_vm14, %v2821_v39, %v2787_v44 }
 0x456   : > { %v2825_v3 = vsel %vm1149_vm15, %v2823_v54, %v2791_v62 }
 0x45b   : > { %v3116_v63 = vpop.permute.xlu0 %3115 }
 0x45c   : > { %v3159_v12 = vsel %vm1155_vm2, %v3157_v36, %v3116_v63  ;;  %v2763_v20 = vpop.permute.xlu1 %2762 }
 0x45d   : > { %v3799_v27 = vsel %vm3779_vm0, %v3159_v12, %v3777_v28  ;;  %v2810_v16 = vsel %vm1149_vm15, %v2808_v4, %v2763_v20 }
 0x45e   : > { %3817 = vmatpush.bf16.msra.mxu0 %v3799_v27  ;;  %v2812_v11 = vsel %vm1152_vm1, %v2810_v16, %v2767_v22 }
 0x463   : > { %v2795_v19 = vpop.permute.xlu0 %2794 }
 0x464   : > { %v2827_v55 = vsel %vm1152_vm1, %v2825_v3, %v2795_v19  ;;  %v3144_v42 = vpop.permute.xlu1 %3143 }
 0x465   : > { %v2829_v17 = vsel %vm1155_vm2, %v2827_v55, %v2799_v9  ;;  %v3174_v46 = vsel %vm1155_vm2, %v3172_v7, %v3144_v42 }
 0x466   : > { %v3774_v24 = vrot.slane %v2829_v17, 4  ;;  %v3802_v0 = vsel %vm3779_vm0, %v3174_v46, %v3778_v58 }
 0x467   : > { %3830 = vmatpush.bf16.msra.mxu1 %v3802_v0 }
 0x468   : > { %v3796_v59 = vsel %vm3779_vm0, %v6992_v38, %v3774_v24  ;;  %v2520_v38 = vsel %vm1155_vm2, %v2518_v1, %v6887_v30 }
 0x46b   : > { %3831 = vmatpush.bf16.msra.mxu1 %v3796_v59 }
 0x46c   : > { %v2771_v18 = vpop.permute.xlu1 %2770 }
 0x46d   : > { %v2814_v48 = vsel %vm1155_vm2, %v2812_v11, %v2771_v18 }
 0x46e   : > { %v3773_v60 = vrot.slane %v2814_v48, 4 }
 0x46f   : > { %3832 = vmatpush.bf16.msra.mxu1 %v7099_v15 }
 0x470   : > { %v3793_v5 = vsel %vm3779_vm0, %v2520_v38, %v3773_v60 }
 0x471   : > { %3818 = vmatpush.bf16.msra.mxu0 %v3793_v5 }
 0x473   : > { %3833 = vmatpush.bf16.msra.mxu1 %v7090_v34 }
 0x475   : > { %3819 = vmatpush.bf16.msra.mxu0 %v7086_v6 }
 0x476   : > { %3962 = vmatmul.msk.bf16.vlgmr.msra.gmra.mxu1 %vm3805_vm3, %v3804_v23 }
 0x479   : > { %3820 = vmatpush.bf16.msra.mxu0 %v7046_v52 }
 0x47c   : > { %3961 = vmatmul.msk.bf16.vlgmr.msra.gmra.mxu0 %vm3805_vm3, %v3804_v23 }
 0x4f3   : > { %v3835_v30 = vpop.f32.mrf.mxu1 }
 0x4f4   : > { %v3845_v56 = vmul.f32 %v3835_v30, %v3835_v30 }
 0x4f9   : > { %v3822_v45 = vpop.f32.mrf.mxu0 }
 0x4fa   : > { %v3844_v34 = vmul.f32 %v3822_v45, %v3822_v45  ;;  %v3839_v15 = vpack.c.bf16 %v3835_v30, %v3822_v45  ;;  %v3841_v35 = vadd.f32 %v3835_v30, %v3822_v45 }
 0x4fb   : > { %v3837_v29 = vpop.f32.mrf.mxu1 }
 0x4fc   : > { %3840 = vst [vmem:[%s231_s17] sm:$0xff] %v3839_v15  ;;  %3842 = vadd.xlane.f32.xlu0 %v3841_v35  ;;  %v3846_v21 = vadd.f32 %v3845_v56, %v3844_v34 }
 0x4fe   : > { %3847 = vadd.xlane.f32.xlu1 %v3846_v21 }
 0x501   : > { %v3824_v6 = vpop.f32.mrf.mxu0 }
 0x56f   : > { %v3843_v52 = vpop.xlane.xlu0 %3842 }
 0x571   : > { %v3848_v8 = vpop.xlane.xlu1 %3847 }
 0x572   : > { %v3850_v37 = vsel %vm3849_vm4, %v3843_v52, %v3848_v8 }
 0x573   : > { %3852 = vst.msk [vmem:[%s235_s21] sm:$0xff] %vm3851_vm5, %v3850_v37 }
 0x574 PF: > { %s16_s18 = sadd.s32 1, %s3995_s18  }
 0x575   : > { %p13_p4 = scmp.ge.s32.totalorder %s16_s18, 4  }
 0x577   :  { %15 = sbr.rel (!%p13_p4) target bundleno = 1 (0x1), region = 78 }

</bundles_post_ra>
